<compile_context>
chip_gen: v5e
topology: v5e:2x2
jax: 0.10.0
libtpu: 0.0.40
codegen_flags: <defaults>
</compile_context>

<pallas_src>
import jax
import jax.numpy as jnp
from jax import lax
from jax.experimental import pallas as pl
from jax.experimental.pallas import tpu as pltpu

BN_EPS = 1e-5
LEAKY_SLOPE = 0.01  # nn.LeakyReLU() default


# --------------------------------------------------------------------------- #
# Kernels
# --------------------------------------------------------------------------- #
def _conv1x1_kernel(x_ref, w_ref, b_ref, o_ref):
    # x_ref: (rows, C_in) flattened (b, h, w) pixels; w_ref: (C_in, C_out);
    # b_ref: (1, C_out)
    p = jnp.dot(x_ref[...], w_ref[...], preferred_element_type=jnp.float32)
    o_ref[...] = (p + b_ref[...]).astype(o_ref.dtype)


def _upsample2x_kernel(x_ref, uyb_ref, uxt_ref, o_ref):
    # Bilinear 2x upsample (align_corners=True) per batch element:
    #   out[c] = Uy @ x[c] @ Ux^T
    # x_ref:   (1, C*H, W)   flattened NCHW image
    # uyb_ref: (C, 2H, H)    row-interp matrix (pre-broadcast over channels)
    # uxt_ref: (W, 2W)       col-interp matrix (transposed)
    # o_ref:   (1, C, 2H, 2W)
    c, _, h = uyb_ref.shape
    w2 = uxt_ref.shape[1]
    t = jnp.dot(x_ref[0, :, :], uxt_ref[...],
                preferred_element_type=jnp.float32)            # (C*H, 2W)
    t = t.reshape(c, h, w2)                                    # split major dims only
    o = lax.dot_general(uyb_ref[...], t,
                        dimension_numbers=(((2,), (1,)), ((0,), (0,))),
                        preferred_element_type=jnp.float32)    # (C, 2H, 2W)
    o_ref[0, :, :, :] = o.astype(o_ref.dtype)


def _make_conv3x3_bn_lrelu_kernel(n_inputs, h, w):
    """3x3 conv (padding=1, input pre-padded+flattened) + folded BN + LeakyReLU.

    With n_inputs == 2 the channel-concat of the two inputs is fused into the
    conv by splitting the weight along its input-channel axis.
    The padded image is flattened to rows of pitch (w+2); each conv tap is a
    contiguous row-slice + a 2D matmul, so the kernel is pure 2D.
    """
    row_pitch = w + 2
    n_out_rows = h * row_pitch  # computed rows (cols w..w+1 are discarded by wrapper)

    def kernel(*refs):
        x_refs = refs[:n_inputs]
        w_refs = refs[n_inputs:2 * n_inputs]
        scale_ref, shift_ref, o_ref = refs[2 * n_inputs:]
        c_out = o_ref.shape[-1]
        acc = jnp.zeros((n_out_rows, c_out), jnp.float32)
        for x_ref, w_ref in zip(x_refs, w_refs):
            for dy in range(3):
                for dx in range(3):
                    off = dy * row_pitch + dx
                    acc = acc + jnp.dot(x_ref[0, off:off + n_out_rows, :],
                                        w_ref[dy, dx, :, :],
                                        preferred_element_type=jnp.float32)
        y = acc * scale_ref[...] + shift_ref[...]          # folded BN (+ conv bias)
        y = jnp.where(y > 0, y, LEAKY_SLOPE * y)           # LeakyReLU
        o_ref[0, :, :] = y.astype(o_ref.dtype)

    return kernel


# --------------------------------------------------------------------------- #
# Pallas wrappers
# --------------------------------------------------------------------------- #
def _parallel(n_axes=1):
    return pltpu.CompilerParams(dimension_semantics=("parallel",) * n_axes)


def conv1x1(x_rows, w, bias, *, rows_per_block):
    n_rows, c_in = x_rows.shape
    c_out = w.shape[1]
    assert n_rows % rows_per_block == 0
    return pl.pallas_call(
        _conv1x1_kernel,
        out_shape=jax.ShapeDtypeStruct((n_rows, c_out), x_rows.dtype),
        grid=(n_rows // rows_per_block,),
        in_specs=[
            pl.BlockSpec((rows_per_block, c_in), lambda i: (i, 0)),
            pl.BlockSpec((c_in, c_out), lambda i: (0, 0)),
            pl.BlockSpec((1, c_out), lambda i: (0, 0)),
        ],
        out_specs=pl.BlockSpec((rows_per_block, c_out), lambda i: (i, 0)),
        compiler_params=_parallel(),
    )(x_rows, w, bias.reshape(1, c_out))


def upsample2x_bilinear_ac(x_nchw, uy, uxt):
    b, c, h, w = x_nchw.shape
    x_flat = x_nchw.reshape(b, c * h, w)                 # contiguous reshape (XLA)
    uyb = jnp.broadcast_to(uy[None], (c, 2 * h, h))      # resident across grid steps
    return pl.pallas_call(
        _upsample2x_kernel,
        out_shape=jax.ShapeDtypeStruct((b, c, 2 * h, 2 * w), x_nchw.dtype),
        grid=(b,),
        in_specs=[
            pl.BlockSpec((1, c * h, w), lambda i: (i, 0, 0)),
            pl.BlockSpec((c, 2 * h, h), lambda i: (0, 0, 0)),
            pl.BlockSpec((w, 2 * w), lambda i: (0, 0)),
        ],
        out_specs=pl.BlockSpec((1, c, 2 * h, 2 * w), lambda i: (i, 0, 0, 0)),
        compiler_params=_parallel(),
    )(x_flat, uyb, uxt)


def conv3x3_bn_lrelu(xs_nhwc, ws_hwio, scale, shift):
    """Fused 3x3 conv (pad=1) + BN(affine, folded) + LeakyReLU on NHWC inputs.

    xs_nhwc: list of NHWC inputs sharing (B, H, W); their implicit channel
    concat is fused via the per-input weight slices in ws_hwio.
    """
    n = len(xs_nhwc)
    b, h, w, _ = xs_nhwc[0].shape
    c_out = ws_hwio[0].shape[-1]
    n_pad_rows = (h + 2) * (w + 2) + 2
    n_out_rows = h * (w + 2)

    xs_flat = []
    for x in xs_nhwc:
        xp = jnp.pad(x, ((0, 0), (1, 1), (1, 1), (0, 0)))
        xf = xp.reshape(b, (h + 2) * (w + 2), x.shape[-1])
        xs_flat.append(jnp.pad(xf, ((0, 0), (0, 2), (0, 0))))

    in_specs = []
    for x in xs_flat:
        in_specs.append(pl.BlockSpec((1, n_pad_rows, x.shape[-1]),
                                     lambda i: (i, 0, 0)))
    for wt in ws_hwio:
        in_specs.append(pl.BlockSpec(wt.shape, lambda i: (0, 0, 0, 0)))
    in_specs.append(pl.BlockSpec((1, c_out), lambda i: (0, 0)))
    in_specs.append(pl.BlockSpec((1, c_out), lambda i: (0, 0)))

    out_flat = pl.pallas_call(
        _make_conv3x3_bn_lrelu_kernel(n, h, w),
        out_shape=jax.ShapeDtypeStruct((b, n_out_rows, c_out), xs_nhwc[0].dtype),
        grid=(b,),
        in_specs=in_specs,
        out_specs=pl.BlockSpec((1, n_out_rows, c_out), lambda i: (i, 0, 0)),
        compiler_params=_parallel(),
    )(*xs_flat, *ws_hwio, scale.reshape(1, c_out), shift.reshape(1, c_out))

    # drop the two junk columns produced by the padded row pitch
    return out_flat.reshape(b, h, w + 2, c_out)[:, :, :w, :]


# --------------------------------------------------------------------------- #
# UpBlock forward (glue in plain JAX, hot loops in Pallas)
# --------------------------------------------------------------------------- #
def bilinear_interp_matrix(n_in):
    """(2*n_in, n_in) matrix for bilinear 2x upsample, align_corners=True."""
    n_out = 2 * n_in
    s = jnp.arange(n_out, dtype=jnp.float32) * (n_in - 1) / (n_out - 1)
    i0 = jnp.floor(s).astype(jnp.int32)
    i1 = jnp.minimum(i0 + 1, n_in - 1)
    frac = s - i0.astype(jnp.float32)
    m = jnp.zeros((n_out, n_in), jnp.float32)
    m = m.at[jnp.arange(n_out), i0].add(1.0 - frac)
    m = m.at[jnp.arange(n_out), i1].add(frac)
    return m


def _fold_bn(conv_bias, bn):
    # Inference-mode BatchNorm folded (with the conv bias) into scale/shift.
    gamma, beta, mean, var = bn
    scale = gamma / jnp.sqrt(var + BN_EPS)
    shift = (conv_bias - mean) * scale + beta
    return scale.astype(jnp.float32), shift.astype(jnp.float32)


def up_block_forward(x1, x2, params):
    """UpBlock.forward (bilinear=True). NCHW in / NCHW out, like PyTorch."""
    b, c1, h, w = x1.shape
    c2 = params["w_1x1"].shape[0]
    h2, w2 = 2 * h, 2 * w
    assert x2.shape == (b, c2, h2, w2)

    # ---- conv1x1 on x1: per-pixel channel matmul (channels on lanes) --------
    x1_rows = jnp.transpose(x1, (0, 2, 3, 1)).reshape(b * h * w, c1)
    w1 = params["w_1x1"][:, :, 0, 0].T                              # (C1, C2)
    y_rows = conv1x1(x1_rows, w1, params["b_1x1"], rows_per_block=h * w)
    y_nchw = jnp.transpose(y_rows.reshape(b, h, w, c2), (0, 3, 1, 2))

    # ---- bilinear 2x upsample, align_corners=True ----------------------------
    uy = bilinear_interp_matrix(h)                                  # (2H, H)
    uxt = bilinear_interp_matrix(w).T                               # (W, 2W)
    y_up = upsample2x_bilinear_ac(y_nchw, uy, uxt)                  # (B, C2, 2H, 2W)

    # ---- ConvBlock: conv3x3+BN+LeakyReLU twice -------------------------------
    x2_nhwc = jnp.transpose(x2, (0, 2, 3, 1))
    y_up_nhwc = jnp.transpose(y_up, (0, 2, 3, 1))

    w_a = jnp.transpose(params["w_conv_a"], (2, 3, 1, 0))           # (3,3,2*C2,Cout)
    scale_a, shift_a = _fold_bn(params["b_conv_a"], params["bn_a"])
    # cat([x2, y_up], channel) fused into the conv via weight split
    z = conv3x3_bn_lrelu([x2_nhwc, y_up_nhwc],
                         [w_a[:, :, :c2, :], w_a[:, :, c2:, :]],
                         scale_a, shift_a)

    # TODO(synk): nn.Dropout between the convs is eval-mode identity here;
    # train-mode dropout would use pltpu.prng_seed/prng_random_bits in-kernel.

    w_b = jnp.transpose(params["w_conv_b"], (2, 3, 1, 0))           # (3,3,Cout,Cout)
    scale_b, shift_b = _fold_bn(params["b_conv_b"], params["bn_b"])
    z = conv3x3_bn_lrelu([z], [w_b], scale_b, shift_b)

    return jnp.transpose(z, (0, 3, 1, 2))                           # NCHW


# --------------------------------------------------------------------------- #
# Pure-JAX reference (independent code path) and test
# --------------------------------------------------------------------------- #
def _upsample2x_ref(x):  # NCHW, bilinear, align_corners=True
    b, c, h, w = x.shape
    ho, wo = 2 * h, 2 * w
    sy = jnp.arange(ho, dtype=jnp.float32) * (h - 1) / (ho - 1)
    sx = jnp.arange(wo, dtype=jnp.float32) * (w - 1) / (wo - 1)
    y0 = jnp.floor(sy).astype(jnp.int32)
    x0 = jnp.floor(sx).astype(jnp.int32)
    y1 = jnp.minimum(y0 + 1, h - 1)
    x1i = jnp.minimum(x0 + 1, w - 1)
    wy = (sy - y0.astype(jnp.float32))[None, None, :, None]
    wx = (sx - x0.astype(jnp.float32))[None, None, None, :]
    rows = x[:, :, y0, :] * (1 - wy) + x[:, :, y1, :] * wy
    return rows[:, :, :, x0] * (1 - wx) + rows[:, :, :, x1i] * wx


def up_block_ref(x1, x2, params):
    dn = ("NCHW", "OIHW", "NCHW")
    y = lax.conv_general_dilated(x1, params["w_1x1"], (1, 1), "VALID",
                                 dimension_numbers=dn)
    y = y + params["b_1x1"][None, :, None, None]
    y = _upsample2x_ref(y)
    x = jnp.concatenate([x2, y], axis=1)

    def block(xx, wt, bias, bn):
        gamma, beta, mean, var = bn
        z = lax.conv_general_dilated(xx, wt, (1, 1), ((1, 1), (1, 1)),
                                     dimension_numbers=dn)
        z = z + bias[None, :, None, None]
        z = (z - mean[None, :, None, None]) / jnp.sqrt(var[None, :, None, None] + BN_EPS)
        z = gamma[None, :, None, None] * z + beta[None, :, None, None]
        return jnp.where(z > 0, z, LEAKY_SLOPE * z)

    z = block(x, params["w_conv_a"], params["b_conv_a"], params["bn_a"])
    z = block(z, params["w_conv_b"], params["b_conv_b"], params["bn_b"])
    return z


if __name__ == "__main__":
    B, C1, C2, COUT = 2, 8, 4, 8
    H, W = 8, 8  # x1 spatial; x2 / output spatial is (16, 16)

    key = jax.random.PRNGKey(0)
    keys = jax.random.split(key, 10)

    x1 = jax.random.normal(keys[0], (B, C1, H, W), dtype=jnp.float32)
    x2 = jax.random.normal(keys[1], (B, C2, 2 * H, 2 * W), dtype=jnp.float32)

    def bn_params(k):
        kg, kb, km, kv = jax.random.split(k, 4)
        return (jax.random.normal(kg, (COUT,), jnp.float32) * 0.1 + 1.0,
                jax.random.normal(kb, (COUT,), jnp.float32) * 0.1,
                jax.random.normal(km, (COUT,), jnp.float32) * 0.1,
                jax.random.uniform(kv, (COUT,), jnp.float32, minval=0.5, maxval=1.5))

    params = {
        "w_1x1": jax.random.normal(keys[2], (C2, C1, 1, 1), jnp.float32) * 0.2,
        "b_1x1": jax.random.normal(keys[3], (C2,), jnp.float32) * 0.1,
        "w_conv_a": jax.random.normal(keys[4], (COUT, 2 * C2, 3, 3), jnp.float32) * 0.2,
        "b_conv_a": jax.random.normal(keys[5], (COUT,), jnp.float32) * 0.1,
        "bn_a": bn_params(keys[6]),
        "w_conv_b": jax.random.normal(keys[7], (COUT, COUT, 3, 3), jnp.float32) * 0.2,
        "b_conv_b": jax.random.normal(keys[8], (COUT,), jnp.float32) * 0.1,
        "bn_b": bn_params(keys[9]),
    }

    out = jax.jit(up_block_forward)(x1, x2, params)
    out = jax.block_until_ready(out)

    ref = up_block_ref(x1, x2, params)
    assert out.shape == (B, COUT, 2 * H, 2 * W) and out.dtype == x1.dtype
    max_err = float(jnp.max(jnp.abs(out - ref)))
    assert jnp.allclose(out, ref, atol=1e-3, rtol=1e-3), max_err

    print("KERNEL_OK")
</pallas_src>

<mosaic_0001>
module attributes {stable_mosaic.version = 11 : i64} {
  func.func @_conv1x1_kernel(%arg0: i32, %arg1: memref<64x8xf32, #tpu.memory_space<vmem>>, %arg2: memref<8x4xf32, #tpu.memory_space<vmem>>, %arg3: memref<1x4xf32, #tpu.memory_space<vmem>>, %arg4: memref<64x4xf32, #tpu.memory_space<vmem>>) attributes {dimension_semantics = [#tpu.dimension_semantics<parallel>], iteration_bounds = array<i64: 2>, scalar_prefetch = 0 : i64, scratch_operands = 0 : i64, tpu.core_type = #tpu.core_type<tc>, window_params = [{transform_indices = @transform_0, window_bounds = array<i64: 64, 8>}, {pipeline_mode = #tpu.pipeline_mode<synchronous>, transform_indices = @transform_1, window_bounds = array<i64: 8, 4>}, {pipeline_mode = #tpu.pipeline_mode<synchronous>, transform_indices = @transform_2, window_bounds = array<i64: 1, 4>}, {transform_indices = @transform_3, window_bounds = array<i64: 64, 4>}]} {
    %c0 = arith.constant 0 : index
    %c0_0 = arith.constant 0 : index
    %0 = vector.load %arg1[%c0, %c0_0] : memref<64x8xf32, #tpu.memory_space<vmem>>, vector<64x8xf32>
    %c0_1 = arith.constant 0 : index
    %c0_2 = arith.constant 0 : index
    %1 = vector.load %arg2[%c0_1, %c0_2] : memref<8x4xf32, #tpu.memory_space<vmem>>, vector<8x4xf32>
    %cst = arith.constant dense<0.000000e+00> : vector<64x4xf32>
    %2 = tpu.matmul %0, %1, %cst {dimension_numbers = #tpu.dot_dimension_numbers<[1], [0], [0], [1], [0, 0, 1, 1], [], []>} : vector<64x8xf32>, vector<8x4xf32>, vector<64x4xf32> -> vector<64x4xf32>
    %c0_3 = arith.constant 0 : index
    %c0_4 = arith.constant 0 : index
    %3 = vector.load %arg3[%c0_3, %c0_4] : memref<1x4xf32, #tpu.memory_space<vmem>>, vector<1x4xf32>
    %4 = vector.broadcast %3 : vector<1x4xf32> to vector<64x4xf32>
    %5 = arith.addf %2, %4 : vector<64x4xf32>
    %c0_5 = arith.constant 0 : index
    %c0_6 = arith.constant 0 : index
    %6 = vector.load %arg4[%c0_5, %c0_6] : memref<64x4xf32, #tpu.memory_space<vmem>>, vector<64x4xf32>
    tpu.vector_store %arg4[%c0_5, %c0_6], %5 {strides = array<i32>} : memref<64x4xf32, #tpu.memory_space<vmem>>, vector<64x4xf32>,
    return
  }
  func.func @transform_0(%arg0: i32) -> (i32, i32) {
    %c0_i32 = arith.constant 0 : i32
    %c0_i32_0 = arith.constant 0 : i32
    return %arg0, %c0_i32 : i32, i32
  }
  func.func @transform_1(%arg0: i32) -> (i32, i32) {
    %c0_i32 = arith.constant 0 : i32
    %c0_i32_0 = arith.constant 0 : i32
    %c0_i32_1 = arith.constant 0 : i32
    return %c0_i32, %c0_i32_0 : i32, i32
  }
  func.func @transform_2(%arg0: i32) -> (i32, i32) {
    %c0_i32 = arith.constant 0 : i32
    %c0_i32_0 = arith.constant 0 : i32
    %c0_i32_1 = arith.constant 0 : i32
    return %c0_i32, %c0_i32_0 : i32, i32
  }
  func.func @transform_3(%arg0: i32) -> (i32, i32) {
    %c0_i32 = arith.constant 0 : i32
    %c0_i32_0 = arith.constant 0 : i32
    return %arg0, %c0_i32 : i32, i32
  }
}

module attributes {stable_mosaic.version = 11 : i64} {
  func.func @_upsample2x_kernel(%arg0: i32, %arg1: memref<1x32x8xf32, #tpu.memory_space<vmem>>, %arg2: memref<4x16x8xf32, #tpu.memory_space<vmem>>, %arg3: memref<8x16xf32, #tpu.memory_space<vmem>>, %arg4: memref<1x4x16x16xf32, #tpu.memory_space<vmem>>) attributes {dimension_semantics = [#tpu.dimension_semantics<parallel>], iteration_bounds = array<i64: 2>, scalar_prefetch = 0 : i64, scratch_operands = 0 : i64, tpu.core_type = #tpu.core_type<tc>, window_params = [{transform_indices = @transform_0, window_bounds = array<i64: 1, 32, 8>}, {pipeline_mode = #tpu.pipeline_mode<synchronous>, transform_indices = @transform_1, window_bounds = array<i64: 4, 16, 8>}, {pipeline_mode = #tpu.pipeline_mode<synchronous>, transform_indices = @transform_2, window_bounds = array<i64: 8, 16>}, {transform_indices = @transform_3, window_bounds = array<i64: 1, 4, 16, 16>}]} {
    %c0 = arith.constant 0 : index
    %c0_0 = arith.constant 0 : index
    %c0_1 = arith.constant 0 : index
    %0 = vector.load %arg1[%c0, %c0_0, %c0_1] : memref<1x32x8xf32, #tpu.memory_space<vmem>>, vector<1x32x8xf32>
    %1 = vector.shape_cast %0 : vector<1x32x8xf32> to vector<32x8xf32>
    %c0_2 = arith.constant 0 : index
    %c0_3 = arith.constant 0 : index
    %2 = vector.load %arg3[%c0_2, %c0_3] : memref<8x16xf32, #tpu.memory_space<vmem>>, vector<8x16xf32>
    %cst = arith.constant dense<0.000000e+00> : vector<32x16xf32>
    %3 = tpu.matmul %1, %2, %cst {dimension_numbers = #tpu.dot_dimension_numbers<[1], [0], [0], [1], [0, 0, 1, 1], [], []>} : vector<32x8xf32>, vector<8x16xf32>, vector<32x16xf32> -> vector<32x16xf32>
    %4 = vector.shape_cast %3 : vector<32x16xf32> to vector<4x8x16xf32>
    %c0_4 = arith.constant 0 : index
    %c0_5 = arith.constant 0 : index
    %c0_6 = arith.constant 0 : index
    %5 = vector.load %arg2[%c0_4, %c0_5, %c0_6] : memref<4x16x8xf32, #tpu.memory_space<vmem>>, vector<4x16x8xf32>
    %cst_7 = arith.constant dense<0.000000e+00> : vector<4x16x16xf32>
    %6 = tpu.matmul %5, %4, %cst_7 {dimension_numbers = #tpu.dot_dimension_numbers<[2], [1], [1], [2], [0, 0, 0, 1, 1, 2], [0], [0]>} : vector<4x16x8xf32>, vector<4x8x16xf32>, vector<4x16x16xf32> -> vector<4x16x16xf32>
    %c0_8 = arith.constant 0 : index
    %c0_9 = arith.constant 0 : index
    %c0_10 = arith.constant 0 : index
    %c0_11 = arith.constant 0 : index
    %7 = vector.load %arg4[%c0_8, %c0_9, %c0_10, %c0_11] : memref<1x4x16x16xf32, #tpu.memory_space<vmem>>, vector<1x4x16x16xf32>
    %8 = vector.shape_cast %7 : vector<1x4x16x16xf32> to vector<4x16x16xf32>
    %9 = vector.shape_cast %6 : vector<4x16x16xf32> to vector<1x4x16x16xf32>
    tpu.vector_store %arg4[%c0_8, %c0_9, %c0_10, %c0_11], %9 {strides = array<i32>} : memref<1x4x16x16xf32, #tpu.memory_space<vmem>>, vector<1x4x16x16xf32>,
    return
  }
  func.func @transform_0(%arg0: i32) -> (i32, i32, i32) {
    %c0_i32 = arith.constant 0 : i32
    %c0_i32_0 = arith.constant 0 : i32
    %c0_i32_1 = arith.constant 0 : i32
    return %arg0, %c0_i32, %c0_i32_0 : i32, i32, i32
  }
  func.func @transform_1(%arg0: i32) -> (i32, i32, i32) {
    %c0_i32 = arith.constant 0 : i32
    %c0_i32_0 = arith.constant 0 : i32
    %c0_i32_1 = arith.constant 0 : i32
    %c0_i32_2 = arith.constant 0 : i32
    return %c0_i32, %c0_i32_0, %c0_i32_1 : i32, i32, i32
  }
  func.func @transform_2(%arg0: i32) -> (i32, i32) {
    %c0_i32 = arith.constant 0 : i32
    %c0_i32_0 = arith.constant 0 : i32
    %c0_i32_1 = arith.constant 0 : i32
    return %c0_i32, %c0_i32_0 : i32, i32
  }
  func.func @transform_3(%arg0: i32) -> (i32, i32, i32, i32) {
    %c0_i32 = arith.constant 0 : i32
    %c0_i32_0 = arith.constant 0 : i32
    %c0_i32_1 = arith.constant 0 : i32
    %c0_i32_2 = arith.constant 0 : i32
    return %arg0, %c0_i32, %c0_i32_0, %c0_i32_1 : i32, i32, i32, i32
  }
}

module attributes {stable_mosaic.version = 11 : i64} {
  func.func @kernel(%arg0: i32, %arg1: memref<1x326x4xf32, #tpu.memory_space<vmem>>, %arg2: memref<1x326x4xf32, #tpu.memory_space<vmem>>, %arg3: memref<3x3x4x8xf32, #tpu.memory_space<vmem>>, %arg4: memref<3x3x4x8xf32, #tpu.memory_space<vmem>>, %arg5: memref<1x8xf32, #tpu.memory_space<vmem>>, %arg6: memref<1x8xf32, #tpu.memory_space<vmem>>, %arg7: memref<1x288x8xf32, #tpu.memory_space<vmem>>) attributes {dimension_semantics = [#tpu.dimension_semantics<parallel>], iteration_bounds = array<i64: 2>, scalar_prefetch = 0 : i64, scratch_operands = 0 : i64, tpu.core_type = #tpu.core_type<tc>, window_params = [{transform_indices = @transform_0, window_bounds = array<i64: 1, 326, 4>}, {transform_indices = @transform_1, window_bounds = array<i64: 1, 326, 4>}, {pipeline_mode = #tpu.pipeline_mode<synchronous>, transform_indices = @transform_2, window_bounds = array<i64: 3, 3, 4, 8>}, {pipeline_mode = #tpu.pipeline_mode<synchronous>, transform_indices = @transform_3, window_bounds = array<i64: 3, 3, 4, 8>}, {pipeline_mode = #tpu.pipeline_mode<synchronous>, transform_indices = @transform_4, window_bounds = array<i64: 1, 8>}, {pipeline_mode = #tpu.pipeline_mode<synchronous>, transform_indices = @transform_5, window_bounds = array<i64: 1, 8>}, {transform_indices = @transform_6, window_bounds = array<i64: 1, 288, 8>}]} {
    %cst = arith.constant 0.000000e+00 : f32
    %0 = vector.broadcast %cst : f32 to vector<288x8xf32>
    %c0 = arith.constant 0 : index
    %c0_0 = arith.constant 0 : index
    %c0_1 = arith.constant 0 : index
    %1 = vector.load %arg1[%c0, %c0_0, %c0_1] : memref<1x326x4xf32, #tpu.memory_space<vmem>>, vector<1x288x4xf32>
    %2 = vector.shape_cast %1 : vector<1x288x4xf32> to vector<288x4xf32>
    %c0_2 = arith.constant 0 : index
    %c0_3 = arith.constant 0 : index
    %c0_4 = arith.constant 0 : index
    %c0_5 = arith.constant 0 : index
    %3 = vector.load %arg3[%c0_2, %c0_3, %c0_4, %c0_5] : memref<3x3x4x8xf32, #tpu.memory_space<vmem>>, vector<1x1x4x8xf32>
    %4 = vector.shape_cast %3 : vector<1x1x4x8xf32> to vector<4x8xf32>
    %cst_6 = arith.constant dense<0.000000e+00> : vector<288x8xf32>
    %5 = tpu.matmul %2, %4, %cst_6 {dimension_numbers = #tpu.dot_dimension_numbers<[1], [0], [0], [1], [0, 0, 1, 1], [], []>} : vector<288x4xf32>, vector<4x8xf32>, vector<288x8xf32> -> vector<288x8xf32>
    %6 = arith.addf %0, %5 : vector<288x8xf32>
    %c0_7 = arith.constant 0 : index
    %c1 = arith.constant 1 : index
    %c0_8 = arith.constant 0 : index
    %7 = vector.load %arg1[%c0_7, %c1, %c0_8] : memref<1x326x4xf32, #tpu.memory_space<vmem>>, vector<1x288x4xf32>
    %8 = vector.shape_cast %7 : vector<1x288x4xf32> to vector<288x4xf32>
    %c0_9 = arith.constant 0 : index
    %c1_10 = arith.constant 1 : index
    %c0_11 = arith.constant 0 : index
    %c0_12 = arith.constant 0 : index
    %9 = vector.load %arg3[%c0_9, %c1_10, %c0_11, %c0_12] : memref<3x3x4x8xf32, #tpu.memory_space<vmem>>, vector<1x1x4x8xf32>
    %10 = vector.shape_cast %9 : vector<1x1x4x8xf32> to vector<4x8xf32>
    %cst_13 = arith.constant dense<0.000000e+00> : vector<288x8xf32>
    %11 = tpu.matmul %8, %10, %cst_13 {dimension_numbers = #tpu.dot_dimension_numbers<[1], [0], [0], [1], [0, 0, 1, 1], [], []>} : vector<288x4xf32>, vector<4x8xf32>, vector<288x8xf32> -> vector<288x8xf32>
    %12 = arith.addf %6, %11 : vector<288x8xf32>
    %c0_14 = arith.constant 0 : index
    %c2 = arith.constant 2 : index
    %c0_15 = arith.constant 0 : index
    %13 = vector.load %arg1[%c0_14, %c2, %c0_15] : memref<1x326x4xf32, #tpu.memory_space<vmem>>, vector<1x288x4xf32>
    %14 = vector.shape_cast %13 : vector<1x288x4xf32> to vector<288x4xf32>
    %c0_16 = arith.constant 0 : index
    %c2_17 = arith.constant 2 : index
    %c0_18 = arith.constant 0 : index
    %c0_19 = arith.constant 0 : index
    %15 = vector.load %arg3[%c0_16, %c2_17, %c0_18, %c0_19] : memref<3x3x4x8xf32, #tpu.memory_space<vmem>>, vector<1x1x4x8xf32>
    %16 = vector.shape_cast %15 : vector<1x1x4x8xf32> to vector<4x8xf32>
    %cst_20 = arith.constant dense<0.000000e+00> : vector<288x8xf32>
    %17 = tpu.matmul %14, %16, %cst_20 {dimension_numbers = #tpu.dot_dimension_numbers<[1], [0], [0], [1], [0, 0, 1, 1], [], []>} : vector<288x4xf32>, vector<4x8xf32>, vector<288x8xf32> -> vector<288x8xf32>
    %18 = arith.addf %12, %17 : vector<288x8xf32>
    %c0_21 = arith.constant 0 : index
    %c18 = arith.constant 18 : index
    %c0_22 = arith.constant 0 : index
    %19 = vector.load %arg1[%c0_21, %c18, %c0_22] : memref<1x326x4xf32, #tpu.memory_space<vmem>>, vector<1x288x4xf32>
    %20 = vector.shape_cast %19 : vector<1x288x4xf32> to vector<288x4xf32>
    %c1_23 = arith.constant 1 : index
    %c0_24 = arith.constant 0 : index
    %c0_25 = arith.constant 0 : index
    %c0_26 = arith.constant 0 : index
    %21 = vector.load %arg3[%c1_23, %c0_24, %c0_25, %c0_26] : memref<3x3x4x8xf32, #tpu.memory_space<vmem>>, vector<1x1x4x8xf32>
    %22 = vector.shape_cast %21 : vector<1x1x4x8xf32> to vector<4x8xf32>
    %cst_27 = arith.constant dense<0.000000e+00> : vector<288x8xf32>
    %23 = tpu.matmul %20, %22, %cst_27 {dimension_numbers = #tpu.dot_dimension_numbers<[1], [0], [0], [1], [0, 0, 1, 1], [], []>} : vector<288x4xf32>, vector<4x8xf32>, vector<288x8xf32> -> vector<288x8xf32>
    %24 = arith.addf %18, %23 : vector<288x8xf32>
    %c0_28 = arith.constant 0 : index
    %c19 = arith.constant 19 : index
    %c0_29 = arith.constant 0 : index
    %25 = vector.load %arg1[%c0_28, %c19, %c0_29] : memref<1x326x4xf32, #tpu.memory_space<vmem>>, vector<1x288x4xf32>
    %26 = vector.shape_cast %25 : vector<1x288x4xf32> to vector<288x4xf32>
    %c1_30 = arith.constant 1 : index
    %c1_31 = arith.constant 1 : index
    %c0_32 = arith.constant 0 : index
    %c0_33 = arith.constant 0 : index
    %27 = vector.load %arg3[%c1_30, %c1_31, %c0_32, %c0_33] : memref<3x3x4x8xf32, #tpu.memory_space<vmem>>, vector<1x1x4x8xf32>
    %28 = vector.shape_cast %27 : vector<1x1x4x8xf32> to vector<4x8xf32>
    %cst_34 = arith.constant dense<0.000000e+00> : vector<288x8xf32>
    %29 = tpu.matmul %26, %28, %cst_34 {dimension_numbers = #tpu.dot_dimension_numbers<[1], [0], [0], [1], [0, 0, 1, 1], [], []>} : vector<288x4xf32>, vector<4x8xf32>, vector<288x8xf32> -> vector<288x8xf32>
    %30 = arith.addf %24, %29 : vector<288x8xf32>
    %c0_35 = arith.constant 0 : index
    %c20 = arith.constant 20 : index
    %c0_36 = arith.constant 0 : index
    %31 = vector.load %arg1[%c0_35, %c20, %c0_36] : memref<1x326x4xf32, #tpu.memory_space<vmem>>, vector<1x288x4xf32>
    %32 = vector.shape_cast %31 : vector<1x288x4xf32> to vector<288x4xf32>
    %c1_37 = arith.constant 1 : index
    %c2_38 = arith.constant 2 : index
    %c0_39 = arith.constant 0 : index
    %c0_40 = arith.constant 0 : index
    %33 = vector.load %arg3[%c1_37, %c2_38, %c0_39, %c0_40] : memref<3x3x4x8xf32, #tpu.memory_space<vmem>>, vector<1x1x4x8xf32>
    %34 = vector.shape_cast %33 : vector<1x1x4x8xf32> to vector<4x8xf32>
    %cst_41 = arith.constant dense<0.000000e+00> : vector<288x8xf32>
    %35 = tpu.matmul %32, %34, %cst_41 {dimension_numbers = #tpu.dot_dimension_numbers<[1], [0], [0], [1], [0, 0, 1, 1], [], []>} : vector<288x4xf32>, vector<4x8xf32>, vector<288x8xf32> -> vector<288x8xf32>
    %36 = arith.addf %30, %35 : vector<288x8xf32>
    %c0_42 = arith.constant 0 : index
    %c36 = arith.constant 36 : index
    %c0_43 = arith.constant 0 : index
    %37 = vector.load %arg1[%c0_42, %c36, %c0_43] : memref<1x326x4xf32, #tpu.memory_space<vmem>>, vector<1x288x4xf32>
    %38 = vector.shape_cast %37 : vector<1x288x4xf32> to vector<288x4xf32>
    %c2_44 = arith.constant 2 : index
    %c0_45 = arith.constant 0 : index
    %c0_46 = arith.constant 0 : index
    %c0_47 = arith.constant 0 : index
    %39 = vector.load %arg3[%c2_44, %c0_45, %c0_46, %c0_47] : memref<3x3x4x8xf32, #tpu.memory_space<vmem>>, vector<1x1x4x8xf32>
    %40 = vector.shape_cast %39 : vector<1x1x4x8xf32> to vector<4x8xf32>
    %cst_48 = arith.constant dense<0.000000e+00> : vector<288x8xf32>
    %41 = tpu.matmul %38, %40, %cst_48 {dimension_numbers = #tpu.dot_dimension_numbers<[1], [0], [0], [1], [0, 0, 1, 1], [], []>} : vector<288x4xf32>, vector<4x8xf32>, vector<288x8xf32> -> vector<288x8xf32>
    %42 = arith.addf %36, %41 : vector<288x8xf32>
    %c0_49 = arith.constant 0 : index
    %c37 = arith.constant 37 : index
    %c0_50 = arith.constant 0 : index
    %43 = vector.load %arg1[%c0_49, %c37, %c0_50] : memref<1x326x4xf32, #tpu.memory_space<vmem>>, vector<1x288x4xf32>
    %44 = vector.shape_cast %43 : vector<1x288x4xf32> to vector<288x4xf32>
    %c2_51 = arith.constant 2 : index
    %c1_52 = arith.constant 1 : index
    %c0_53 = arith.constant 0 : index
    %c0_54 = arith.constant 0 : index
    %45 = vector.load %arg3[%c2_51, %c1_52, %c0_53, %c0_54] : memref<3x3x4x8xf32, #tpu.memory_space<vmem>>, vector<1x1x4x8xf32>
    %46 = vector.shape_cast %45 : vector<1x1x4x8xf32> to vector<4x8xf32>
    %cst_55 = arith.constant dense<0.000000e+00> : vector<288x8xf32>
    %47 = tpu.matmul %44, %46, %cst_55 {dimension_numbers = #tpu.dot_dimension_numbers<[1], [0], [0], [1], [0, 0, 1, 1], [], []>} : vector<288x4xf32>, vector<4x8xf32>, vector<288x8xf32> -> vector<288x8xf32>
    %48 = arith.addf %42, %47 : vector<288x8xf32>
    %c0_56 = arith.constant 0 : index
    %c38 = arith.constant 38 : index
    %c0_57 = arith.constant 0 : index
    %49 = vector.load %arg1[%c0_56, %c38, %c0_57] : memref<1x326x4xf32, #tpu.memory_space<vmem>>, vector<1x288x4xf32>
    %50 = vector.shape_cast %49 : vector<1x288x4xf32> to vector<288x4xf32>
    %c2_58 = arith.constant 2 : index
    %c2_59 = arith.constant 2 : index
    %c0_60 = arith.constant 0 : index
    %c0_61 = arith.constant 0 : index
    %51 = vector.load %arg3[%c2_58, %c2_59, %c0_60, %c0_61] : memref<3x3x4x8xf32, #tpu.memory_space<vmem>>, vector<1x1x4x8xf32>
    %52 = vector.shape_cast %51 : vector<1x1x4x8xf32> to vector<4x8xf32>
    %cst_62 = arith.constant dense<0.000000e+00> : vector<288x8xf32>
    %53 = tpu.matmul %50, %52, %cst_62 {dimension_numbers = #tpu.dot_dimension_numbers<[1], [0], [0], [1], [0, 0, 1, 1], [], []>} : vector<288x4xf32>, vector<4x8xf32>, vector<288x8xf32> -> vector<288x8xf32>
    %54 = arith.addf %48, %53 : vector<288x8xf32>
    %c0_63 = arith.constant 0 : index
    %c0_64 = arith.constant 0 : index
    %c0_65 = arith.constant 0 : index
    %55 = vector.load %arg2[%c0_63, %c0_64, %c0_65] : memref<1x326x4xf32, #tpu.memory_space<vmem>>, vector<1x288x4xf32>
    %56 = vector.shape_cast %55 : vector<1x288x4xf32> to vector<288x4xf32>
    %c0_66 = arith.constant 0 : index
    %c0_67 = arith.constant 0 : index
    %c0_68 = arith.constant 0 : index
    %c0_69 = arith.constant 0 : index
    %57 = vector.load %arg4[%c0_66, %c0_67, %c0_68, %c0_69] : memref<3x3x4x8xf32, #tpu.memory_space<vmem>>, vector<1x1x4x8xf32>
    %58 = vector.shape_cast %57 : vector<1x1x4x8xf32> to vector<4x8xf32>
    %cst_70 = arith.constant dense<0.000000e+00> : vector<288x8xf32>
    %59 = tpu.matmul %56, %58, %cst_70 {dimension_numbers = #tpu.dot_dimension_numbers<[1], [0], [0], [1], [0, 0, 1, 1], [], []>} : vector<288x4xf32>, vector<4x8xf32>, vector<288x8xf32> -> vector<288x8xf32>
    %60 = arith.addf %54, %59 : vector<288x8xf32>
    %c0_71 = arith.constant 0 : index
    %c1_72 = arith.constant 1 : index
    %c0_73 = arith.constant 0 : index
    %61 = vector.load %arg2[%c0_71, %c1_72, %c0_73] : memref<1x326x4xf32, #tpu.memory_space<vmem>>, vector<1x288x4xf32>
    %62 = vector.shape_cast %61 : vector<1x288x4xf32> to vector<288x4xf32>
    %c0_74 = arith.constant 0 : index
    %c1_75 = arith.constant 1 : index
    %c0_76 = arith.constant 0 : index
    %c0_77 = arith.constant 0 : index
    %63 = vector.load %arg4[%c0_74, %c1_75, %c0_76, %c0_77] : memref<3x3x4x8xf32, #tpu.memory_space<vmem>>, vector<1x1x4x8xf32>
    %64 = vector.shape_cast %63 : vector<1x1x4x8xf32> to vector<4x8xf32>
    %cst_78 = arith.constant dense<0.000000e+00> : vector<288x8xf32>
    %65 = tpu.matmul %62, %64, %cst_78 {dimension_numbers = #tpu.dot_dimension_numbers<[1], [0], [0], [1], [0, 0, 1, 1], [], []>} : vector<288x4xf32>, vector<4x8xf32>, vector<288x8xf32> -> vector<288x8xf32>
    %66 = arith.addf %60, %65 : vector<288x8xf32>
    %c0_79 = arith.constant 0 : index
    %c2_80 = arith.constant 2 : index
    %c0_81 = arith.constant 0 : index
    %67 = vector.load %arg2[%c0_79, %c2_80, %c0_81] : memref<1x326x4xf32, #tpu.memory_space<vmem>>, vector<1x288x4xf32>
    %68 = vector.shape_cast %67 : vector<1x288x4xf32> to vector<288x4xf32>
    %c0_82 = arith.constant 0 : index
    %c2_83 = arith.constant 2 : index
    %c0_84 = arith.constant 0 : index
    %c0_85 = arith.constant 0 : index
    %69 = vector.load %arg4[%c0_82, %c2_83, %c0_84, %c0_85] : memref<3x3x4x8xf32, #tpu.memory_space<vmem>>, vector<1x1x4x8xf32>
    %70 = vector.shape_cast %69 : vector<1x1x4x8xf32> to vector<4x8xf32>
    %cst_86 = arith.constant dense<0.000000e+00> : vector<288x8xf32>
    %71 = tpu.matmul %68, %70, %cst_86 {dimension_numbers = #tpu.dot_dimension_numbers<[1], [0], [0], [1], [0, 0, 1, 1], [], []>} : vector<288x4xf32>, vector<4x8xf32>, vector<288x8xf32> -> vector<288x8xf32>
    %72 = arith.addf %66, %71 : vector<288x8xf32>
    %c0_87 = arith.constant 0 : index
    %c18_88 = arith.constant 18 : index
    %c0_89 = arith.constant 0 : index
    %73 = vector.load %arg2[%c0_87, %c18_88, %c0_89] : memref<1x326x4xf32, #tpu.memory_space<vmem>>, vector<1x288x4xf32>
    %74 = vector.shape_cast %73 : vector<1x288x4xf32> to vector<288x4xf32>
    %c1_90 = arith.constant 1 : index
    %c0_91 = arith.constant 0 : index
    %c0_92 = arith.constant 0 : index
    %c0_93 = arith.constant 0 : index
    %75 = vector.load %arg4[%c1_90, %c0_91, %c0_92, %c0_93] : memref<3x3x4x8xf32, #tpu.memory_space<vmem>>, vector<1x1x4x8xf32>
    %76 = vector.shape_cast %75 : vector<1x1x4x8xf32> to vector<4x8xf32>
    %cst_94 = arith.constant dense<0.000000e+00> : vector<288x8xf32>
    %77 = tpu.matmul %74, %76, %cst_94 {dimension_numbers = #tpu.dot_dimension_numbers<[1], [0], [0], [1], [0, 0, 1, 1], [], []>} : vector<288x4xf32>, vector<4x8xf32>, vector<288x8xf32> -> vector<288x8xf32>
    %78 = arith.addf %72, %77 : vector<288x8xf32>
    %c0_95 = arith.constant 0 : index
    %c19_96 = arith.constant 19 : index
    %c0_97 = arith.constant 0 : index
    %79 = vector.load %arg2[%c0_95, %c19_96, %c0_97] : memref<1x326x4xf32, #tpu.memory_space<vmem>>, vector<1x288x4xf32>
    %80 = vector.shape_cast %79 : vector<1x288x4xf32> to vector<288x4xf32>
    %c1_98 = arith.constant 1 : index
    %c1_99 = arith.constant 1 : index
    %c0_100 = arith.constant 0 : index
    %c0_101 = arith.constant 0 : index
    %81 = vector.load %arg4[%c1_98, %c1_99, %c0_100, %c0_101] : memref<3x3x4x8xf32, #tpu.memory_space<vmem>>, vector<1x1x4x8xf32>
    %82 = vector.shape_cast %81 : vector<1x1x4x8xf32> to vector<4x8xf32>
    %cst_102 = arith.constant dense<0.000000e+00> : vector<288x8xf32>
    %83 = tpu.matmul %80, %82, %cst_102 {dimension_numbers = #tpu.dot_dimension_numbers<[1], [0], [0], [1], [0, 0, 1, 1], [], []>} : vector<288x4xf32>, vector<4x8xf32>, vector<288x8xf32> -> vector<288x8xf32>
    %84 = arith.addf %78, %83 : vector<288x8xf32>
    %c0_103 = arith.constant 0 : index
    %c20_104 = arith.constant 20 : index
    %c0_105 = arith.constant 0 : index
    %85 = vector.load %arg2[%c0_103, %c20_104, %c0_105] : memref<1x326x4xf32, #tpu.memory_space<vmem>>, vector<1x288x4xf32>
    %86 = vector.shape_cast %85 : vector<1x288x4xf32> to vector<288x4xf32>
    %c1_106 = arith.constant 1 : index
    %c2_107 = arith.constant 2 : index
    %c0_108 = arith.constant 0 : index
    %c0_109 = arith.constant 0 : index
    %87 = vector.load %arg4[%c1_106, %c2_107, %c0_108, %c0_109] : memref<3x3x4x8xf32, #tpu.memory_space<vmem>>, vector<1x1x4x8xf32>
    %88 = vector.shape_cast %87 : vector<1x1x4x8xf32> to vector<4x8xf32>
    %cst_110 = arith.constant dense<0.000000e+00> : vector<288x8xf32>
    %89 = tpu.matmul %86, %88, %cst_110 {dimension_numbers = #tpu.dot_dimension_numbers<[1], [0], [0], [1], [0, 0, 1, 1], [], []>} : vector<288x4xf32>, vector<4x8xf32>, vector<288x8xf32> -> vector<288x8xf32>
    %90 = arith.addf %84, %89 : vector<288x8xf32>
    %c0_111 = arith.constant 0 : index
    %c36_112 = arith.constant 36 : index
    %c0_113 = arith.constant 0 : index
    %91 = vector.load %arg2[%c0_111, %c36_112, %c0_113] : memref<1x326x4xf32, #tpu.memory_space<vmem>>, vector<1x288x4xf32>
    %92 = vector.shape_cast %91 : vector<1x288x4xf32> to vector<288x4xf32>
    %c2_114 = arith.constant 2 : index
    %c0_115 = arith.constant 0 : index
    %c0_116 = arith.constant 0 : index
    %c0_117 = arith.constant 0 : index
    %93 = vector.load %arg4[%c2_114, %c0_115, %c0_116, %c0_117] : memref<3x3x4x8xf32, #tpu.memory_space<vmem>>, vector<1x1x4x8xf32>
    %94 = vector.shape_cast %93 : vector<1x1x4x8xf32> to vector<4x8xf32>
    %cst_118 = arith.constant dense<0.000000e+00> : vector<288x8xf32>
    %95 = tpu.matmul %92, %94, %cst_118 {dimension_numbers = #tpu.dot_dimension_numbers<[1], [0], [0], [1], [0, 0, 1, 1], [], []>} : vector<288x4xf32>, vector<4x8xf32>, vector<288x8xf32> -> vector<288x8xf32>
    %96 = arith.addf %90, %95 : vector<288x8xf32>
    %c0_119 = arith.constant 0 : index
    %c37_120 = arith.constant 37 : index
    %c0_121 = arith.constant 0 : index
    %97 = vector.load %arg2[%c0_119, %c37_120, %c0_121] : memref<1x326x4xf32, #tpu.memory_space<vmem>>, vector<1x288x4xf32>
    %98 = vector.shape_cast %97 : vector<1x288x4xf32> to vector<288x4xf32>
    %c2_122 = arith.constant 2 : index
    %c1_123 = arith.constant 1 : index
    %c0_124 = arith.constant 0 : index
    %c0_125 = arith.constant 0 : index
    %99 = vector.load %arg4[%c2_122, %c1_123, %c0_124, %c0_125] : memref<3x3x4x8xf32, #tpu.memory_space<vmem>>, vector<1x1x4x8xf32>
    %100 = vector.shape_cast %99 : vector<1x1x4x8xf32> to vector<4x8xf32>
    %cst_126 = arith.constant dense<0.000000e+00> : vector<288x8xf32>
    %101 = tpu.matmul %98, %100, %cst_126 {dimension_numbers = #tpu.dot_dimension_numbers<[1], [0], [0], [1], [0, 0, 1, 1], [], []>} : vector<288x4xf32>, vector<4x8xf32>, vector<288x8xf32> -> vector<288x8xf32>
    %102 = arith.addf %96, %101 : vector<288x8xf32>
    %c0_127 = arith.constant 0 : index
    %c38_128 = arith.constant 38 : index
    %c0_129 = arith.constant 0 : index
    %103 = vector.load %arg2[%c0_127, %c38_128, %c0_129] : memref<1x326x4xf32, #tpu.memory_space<vmem>>, vector<1x288x4xf32>
    %104 = vector.shape_cast %103 : vector<1x288x4xf32> to vector<288x4xf32>
    %c2_130 = arith.constant 2 : index
    %c2_131 = arith.constant 2 : index
    %c0_132 = arith.constant 0 : index
    %c0_133 = arith.constant 0 : index
    %105 = vector.load %arg4[%c2_130, %c2_131, %c0_132, %c0_133] : memref<3x3x4x8xf32, #tpu.memory_space<vmem>>, vector<1x1x4x8xf32>
    %106 = vector.shape_cast %105 : vector<1x1x4x8xf32> to vector<4x8xf32>
    %cst_134 = arith.constant dense<0.000000e+00> : vector<288x8xf32>
    %107 = tpu.matmul %104, %106, %cst_134 {dimension_numbers = #tpu.dot_dimension_numbers<[1], [0], [0], [1], [0, 0, 1, 1], [], []>} : vector<288x4xf32>, vector<4x8xf32>, vector<288x8xf32> -> vector<288x8xf32>
    %108 = arith.addf %102, %107 : vector<288x8xf32>
    %c0_135 = arith.constant 0 : index
    %c0_136 = arith.constant 0 : index
    %109 = vector.load %arg5[%c0_135, %c0_136] : memref<1x8xf32, #tpu.memory_space<vmem>>, vector<1x8xf32>
    %110 = vector.broadcast %109 : vector<1x8xf32> to vector<288x8xf32>
    %111 = arith.mulf %108, %110 : vector<288x8xf32>
    %c0_137 = arith.constant 0 : index
    %c0_138 = arith.constant 0 : index
    %112 = vector.load %arg6[%c0_137, %c0_138] : memref<1x8xf32, #tpu.memory_space<vmem>>, vector<1x8xf32>
    %113 = vector.broadcast %112 : vector<1x8xf32> to vector<288x8xf32>
    %114 = arith.addf %111, %113 : vector<288x8xf32>
    %cst_139 = arith.constant 0.000000e+00 : f32
    %115 = vector.broadcast %cst_139 : f32 to vector<288x8xf32>
    %116 = arith.cmpf ogt, %114, %115 : vector<288x8xf32>
    %cst_140 = arith.constant 0.00999999977 : f32
    %117 = vector.broadcast %cst_140 : f32 to vector<288x8xf32>
    %118 = arith.mulf %117, %114 : vector<288x8xf32>
    %119 = arith.select %116, %114, %118 : vector<288x8xi1>, vector<288x8xf32>
    %c0_141 = arith.constant 0 : index
    %c0_142 = arith.constant 0 : index
    %c0_143 = arith.constant 0 : index
    %120 = vector.load %arg7[%c0_141, %c0_142, %c0_143] : memref<1x288x8xf32, #tpu.memory_space<vmem>>, vector<1x288x8xf32>
    %121 = vector.shape_cast %120 : vector<1x288x8xf32> to vector<288x8xf32>
    %122 = vector.shape_cast %119 : vector<288x8xf32> to vector<1x288x8xf32>
    tpu.vector_store %arg7[%c0_141, %c0_142, %c0_143], %122 {strides = array<i32>} : memref<1x288x8xf32, #tpu.memory_space<vmem>>, vector<1x288x8xf32>,
    return
  }
  func.func @transform_0(%arg0: i32) -> (i32, i32, i32) {
    %c0_i32 = arith.constant 0 : i32
    %c0_i32_0 = arith.constant 0 : i32
    %c0_i32_1 = arith.constant 0 : i32
    return %arg0, %c0_i32, %c0_i32_0 : i32, i32, i32
  }
  func.func @transform_1(%arg0: i32) -> (i32, i32, i32) {
    %c0_i32 = arith.constant 0 : i32
    %c0_i32_0 = arith.constant 0 : i32
    %c0_i32_1 = arith.constant 0 : i32
    return %arg0, %c0_i32, %c0_i32_0 : i32, i32, i32
  }
  func.func @transform_2(%arg0: i32) -> (i32, i32, i32, i32) {
    %c0_i32 = arith.constant 0 : i32
    %c0_i32_0 = arith.constant 0 : i32
    %c0_i32_1 = arith.constant 0 : i32
    %c0_i32_2 = arith.constant 0 : i32
    %c0_i32_3 = arith.constant 0 : i32
    return %c0_i32, %c0_i32_0, %c0_i32_1, %c0_i32_2 : i32, i32, i32, i32
  }
  func.func @transform_3(%arg0: i32) -> (i32, i32, i32, i32) {
    %c0_i32 = arith.constant 0 : i32
    %c0_i32_0 = arith.constant 0 : i32
    %c0_i32_1 = arith.constant 0 : i32
    %c0_i32_2 = arith.constant 0 : i32
    %c0_i32_3 = arith.constant 0 : i32
    return %c0_i32, %c0_i32_0, %c0_i32_1, %c0_i32_2 : i32, i32, i32, i32
  }
  func.func @transform_4(%arg0: i32) -> (i32, i32) {
    %c0_i32 = arith.constant 0 : i32
    %c0_i32_0 = arith.constant 0 : i32
    %c0_i32_1 = arith.constant 0 : i32
    return %c0_i32, %c0_i32_0 : i32, i32
  }
  func.func @transform_5(%arg0: i32) -> (i32, i32) {
    %c0_i32 = arith.constant 0 : i32
    %c0_i32_0 = arith.constant 0 : i32
    %c0_i32_1 = arith.constant 0 : i32
    return %c0_i32, %c0_i32_0 : i32, i32
  }
  func.func @transform_6(%arg0: i32) -> (i32, i32, i32) {
    %c0_i32 = arith.constant 0 : i32
    %c0_i32_0 = arith.constant 0 : i32
    %c0_i32_1 = arith.constant 0 : i32
    return %arg0, %c0_i32, %c0_i32_0 : i32, i32, i32
  }
}

module attributes {stable_mosaic.version = 11 : i64} {
  func.func @kernel(%arg0: i32, %arg1: memref<1x326x8xf32, #tpu.memory_space<vmem>>, %arg2: memref<3x3x8x8xf32, #tpu.memory_space<vmem>>, %arg3: memref<1x8xf32, #tpu.memory_space<vmem>>, %arg4: memref<1x8xf32, #tpu.memory_space<vmem>>, %arg5: memref<1x288x8xf32, #tpu.memory_space<vmem>>) attributes {dimension_semantics = [#tpu.dimension_semantics<parallel>], iteration_bounds = array<i64: 2>, scalar_prefetch = 0 : i64, scratch_operands = 0 : i64, tpu.core_type = #tpu.core_type<tc>, window_params = [{transform_indices = @transform_0, window_bounds = array<i64: 1, 326, 8>}, {pipeline_mode = #tpu.pipeline_mode<synchronous>, transform_indices = @transform_1, window_bounds = array<i64: 3, 3, 8, 8>}, {pipeline_mode = #tpu.pipeline_mode<synchronous>, transform_indices = @transform_2, window_bounds = array<i64: 1, 8>}, {pipeline_mode = #tpu.pipeline_mode<synchronous>, transform_indices = @transform_3, window_bounds = array<i64: 1, 8>}, {transform_indices = @transform_4, window_bounds = array<i64: 1, 288, 8>}]} {
    %cst = arith.constant 0.000000e+00 : f32
    %0 = vector.broadcast %cst : f32 to vector<288x8xf32>
    %c0 = arith.constant 0 : index
    %c0_0 = arith.constant 0 : index
    %c0_1 = arith.constant 0 : index
    %1 = vector.load %arg1[%c0, %c0_0, %c0_1] : memref<1x326x8xf32, #tpu.memory_space<vmem>>, vector<1x288x8xf32>
    %2 = vector.shape_cast %1 : vector<1x288x8xf32> to vector<288x8xf32>
    %c0_2 = arith.constant 0 : index
    %c0_3 = arith.constant 0 : index
    %c0_4 = arith.constant 0 : index
    %c0_5 = arith.constant 0 : index
    %3 = vector.load %arg2[%c0_2, %c0_3, %c0_4, %c0_5] : memref<3x3x8x8xf32, #tpu.memory_space<vmem>>, vector<1x1x8x8xf32>
    %4 = vector.shape_cast %3 : vector<1x1x8x8xf32> to vector<8x8xf32>
    %cst_6 = arith.constant dense<0.000000e+00> : vector<288x8xf32>
    %5 = tpu.matmul %2, %4, %cst_6 {dimension_numbers = #tpu.dot_dimension_numbers<[1], [0], [0], [1], [0, 0, 1, 1], [], []>} : vector<288x8xf32>, vector<8x8xf32>, vector<288x8xf32> -> vector<288x8xf32>
    %6 = arith.addf %0, %5 : vector<288x8xf32>
    %c0_7 = arith.constant 0 : index
    %c1 = arith.constant 1 : index
    %c0_8 = arith.constant 0 : index
    %7 = vector.load %arg1[%c0_7, %c1, %c0_8] : memref<1x326x8xf32, #tpu.memory_space<vmem>>, vector<1x288x8xf32>
    %8 = vector.shape_cast %7 : vector<1x288x8xf32> to vector<288x8xf32>
    %c0_9 = arith.constant 0 : index
    %c1_10 = arith.constant 1 : index
    %c0_11 = arith.constant 0 : index
    %c0_12 = arith.constant 0 : index
    %9 = vector.load %arg2[%c0_9, %c1_10, %c0_11, %c0_12] : memref<3x3x8x8xf32, #tpu.memory_space<vmem>>, vector<1x1x8x8xf32>
    %10 = vector.shape_cast %9 : vector<1x1x8x8xf32> to vector<8x8xf32>
    %cst_13 = arith.constant dense<0.000000e+00> : vector<288x8xf32>
    %11 = tpu.matmul %8, %10, %cst_13 {dimension_numbers = #tpu.dot_dimension_numbers<[1], [0], [0], [1], [0, 0, 1, 1], [], []>} : vector<288x8xf32>, vector<8x8xf32>, vector<288x8xf32> -> vector<288x8xf32>
    %12 = arith.addf %6, %11 : vector<288x8xf32>
    %c0_14 = arith.constant 0 : index
    %c2 = arith.constant 2 : index
    %c0_15 = arith.constant 0 : index
    %13 = vector.load %arg1[%c0_14, %c2, %c0_15] : memref<1x326x8xf32, #tpu.memory_space<vmem>>, vector<1x288x8xf32>
    %14 = vector.shape_cast %13 : vector<1x288x8xf32> to vector<288x8xf32>
    %c0_16 = arith.constant 0 : index
    %c2_17 = arith.constant 2 : index
    %c0_18 = arith.constant 0 : index
    %c0_19 = arith.constant 0 : index
    %15 = vector.load %arg2[%c0_16, %c2_17, %c0_18, %c0_19] : memref<3x3x8x8xf32, #tpu.memory_space<vmem>>, vector<1x1x8x8xf32>
    %16 = vector.shape_cast %15 : vector<1x1x8x8xf32> to vector<8x8xf32>
    %cst_20 = arith.constant dense<0.000000e+00> : vector<288x8xf32>
    %17 = tpu.matmul %14, %16, %cst_20 {dimension_numbers = #tpu.dot_dimension_numbers<[1], [0], [0], [1], [0, 0, 1, 1], [], []>} : vector<288x8xf32>, vector<8x8xf32>, vector<288x8xf32> -> vector<288x8xf32>
    %18 = arith.addf %12, %17 : vector<288x8xf32>
    %c0_21 = arith.constant 0 : index
    %c18 = arith.constant 18 : index
    %c0_22 = arith.constant 0 : index
    %19 = vector.load %arg1[%c0_21, %c18, %c0_22] : memref<1x326x8xf32, #tpu.memory_space<vmem>>, vector<1x288x8xf32>
    %20 = vector.shape_cast %19 : vector<1x288x8xf32> to vector<288x8xf32>
    %c1_23 = arith.constant 1 : index
    %c0_24 = arith.constant 0 : index
    %c0_25 = arith.constant 0 : index
    %c0_26 = arith.constant 0 : index
    %21 = vector.load %arg2[%c1_23, %c0_24, %c0_25, %c0_26] : memref<3x3x8x8xf32, #tpu.memory_space<vmem>>, vector<1x1x8x8xf32>
    %22 = vector.shape_cast %21 : vector<1x1x8x8xf32> to vector<8x8xf32>
    %cst_27 = arith.constant dense<0.000000e+00> : vector<288x8xf32>
    %23 = tpu.matmul %20, %22, %cst_27 {dimension_numbers = #tpu.dot_dimension_numbers<[1], [0], [0], [1], [0, 0, 1, 1], [], []>} : vector<288x8xf32>, vector<8x8xf32>, vector<288x8xf32> -> vector<288x8xf32>
    %24 = arith.addf %18, %23 : vector<288x8xf32>
    %c0_28 = arith.constant 0 : index
    %c19 = arith.constant 19 : index
    %c0_29 = arith.constant 0 : index
    %25 = vector.load %arg1[%c0_28, %c19, %c0_29] : memref<1x326x8xf32, #tpu.memory_space<vmem>>, vector<1x288x8xf32>
    %26 = vector.shape_cast %25 : vector<1x288x8xf32> to vector<288x8xf32>
    %c1_30 = arith.constant 1 : index
    %c1_31 = arith.constant 1 : index
    %c0_32 = arith.constant 0 : index
    %c0_33 = arith.constant 0 : index
    %27 = vector.load %arg2[%c1_30, %c1_31, %c0_32, %c0_33] : memref<3x3x8x8xf32, #tpu.memory_space<vmem>>, vector<1x1x8x8xf32>
    %28 = vector.shape_cast %27 : vector<1x1x8x8xf32> to vector<8x8xf32>
    %cst_34 = arith.constant dense<0.000000e+00> : vector<288x8xf32>
    %29 = tpu.matmul %26, %28, %cst_34 {dimension_numbers = #tpu.dot_dimension_numbers<[1], [0], [0], [1], [0, 0, 1, 1], [], []>} : vector<288x8xf32>, vector<8x8xf32>, vector<288x8xf32> -> vector<288x8xf32>
    %30 = arith.addf %24, %29 : vector<288x8xf32>
    %c0_35 = arith.constant 0 : index
    %c20 = arith.constant 20 : index
    %c0_36 = arith.constant 0 : index
    %31 = vector.load %arg1[%c0_35, %c20, %c0_36] : memref<1x326x8xf32, #tpu.memory_space<vmem>>, vector<1x288x8xf32>
    %32 = vector.shape_cast %31 : vector<1x288x8xf32> to vector<288x8xf32>
    %c1_37 = arith.constant 1 : index
    %c2_38 = arith.constant 2 : index
    %c0_39 = arith.constant 0 : index
    %c0_40 = arith.constant 0 : index
    %33 = vector.load %arg2[%c1_37, %c2_38, %c0_39, %c0_40] : memref<3x3x8x8xf32, #tpu.memory_space<vmem>>, vector<1x1x8x8xf32>
    %34 = vector.shape_cast %33 : vector<1x1x8x8xf32> to vector<8x8xf32>
    %cst_41 = arith.constant dense<0.000000e+00> : vector<288x8xf32>
    %35 = tpu.matmul %32, %34, %cst_41 {dimension_numbers = #tpu.dot_dimension_numbers<[1], [0], [0], [1], [0, 0, 1, 1], [], []>} : vector<288x8xf32>, vector<8x8xf32>, vector<288x8xf32> -> vector<288x8xf32>
    %36 = arith.addf %30, %35 : vector<288x8xf32>
    %c0_42 = arith.constant 0 : index
    %c36 = arith.constant 36 : index
    %c0_43 = arith.constant 0 : index
    %37 = vector.load %arg1[%c0_42, %c36, %c0_43] : memref<1x326x8xf32, #tpu.memory_space<vmem>>, vector<1x288x8xf32>
    %38 = vector.shape_cast %37 : vector<1x288x8xf32> to vector<288x8xf32>
    %c2_44 = arith.constant 2 : index
    %c0_45 = arith.constant 0 : index
    %c0_46 = arith.constant 0 : index
    %c0_47 = arith.constant 0 : index
    %39 = vector.load %arg2[%c2_44, %c0_45, %c0_46, %c0_47] : memref<3x3x8x8xf32, #tpu.memory_space<vmem>>, vector<1x1x8x8xf32>
    %40 = vector.shape_cast %39 : vector<1x1x8x8xf32> to vector<8x8xf32>
    %cst_48 = arith.constant dense<0.000000e+00> : vector<288x8xf32>
    %41 = tpu.matmul %38, %40, %cst_48 {dimension_numbers = #tpu.dot_dimension_numbers<[1], [0], [0], [1], [0, 0, 1, 1], [], []>} : vector<288x8xf32>, vector<8x8xf32>, vector<288x8xf32> -> vector<288x8xf32>
    %42 = arith.addf %36, %41 : vector<288x8xf32>
    %c0_49 = arith.constant 0 : index
    %c37 = arith.constant 37 : index
    %c0_50 = arith.constant 0 : index
    %43 = vector.load %arg1[%c0_49, %c37, %c0_50] : memref<1x326x8xf32, #tpu.memory_space<vmem>>, vector<1x288x8xf32>
    %44 = vector.shape_cast %43 : vector<1x288x8xf32> to vector<288x8xf32>
    %c2_51 = arith.constant 2 : index
    %c1_52 = arith.constant 1 : index
    %c0_53 = arith.constant 0 : index
    %c0_54 = arith.constant 0 : index
    %45 = vector.load %arg2[%c2_51, %c1_52, %c0_53, %c0_54] : memref<3x3x8x8xf32, #tpu.memory_space<vmem>>, vector<1x1x8x8xf32>
    %46 = vector.shape_cast %45 : vector<1x1x8x8xf32> to vector<8x8xf32>
    %cst_55 = arith.constant dense<0.000000e+00> : vector<288x8xf32>
    %47 = tpu.matmul %44, %46, %cst_55 {dimension_numbers = #tpu.dot_dimension_numbers<[1], [0], [0], [1], [0, 0, 1, 1], [], []>} : vector<288x8xf32>, vector<8x8xf32>, vector<288x8xf32> -> vector<288x8xf32>
    %48 = arith.addf %42, %47 : vector<288x8xf32>
    %c0_56 = arith.constant 0 : index
    %c38 = arith.constant 38 : index
    %c0_57 = arith.constant 0 : index
    %49 = vector.load %arg1[%c0_56, %c38, %c0_57] : memref<1x326x8xf32, #tpu.memory_space<vmem>>, vector<1x288x8xf32>
    %50 = vector.shape_cast %49 : vector<1x288x8xf32> to vector<288x8xf32>
    %c2_58 = arith.constant 2 : index
    %c2_59 = arith.constant 2 : index
    %c0_60 = arith.constant 0 : index
    %c0_61 = arith.constant 0 : index
    %51 = vector.load %arg2[%c2_58, %c2_59, %c0_60, %c0_61] : memref<3x3x8x8xf32, #tpu.memory_space<vmem>>, vector<1x1x8x8xf32>
    %52 = vector.shape_cast %51 : vector<1x1x8x8xf32> to vector<8x8xf32>
    %cst_62 = arith.constant dense<0.000000e+00> : vector<288x8xf32>
    %53 = tpu.matmul %50, %52, %cst_62 {dimension_numbers = #tpu.dot_dimension_numbers<[1], [0], [0], [1], [0, 0, 1, 1], [], []>} : vector<288x8xf32>, vector<8x8xf32>, vector<288x8xf32> -> vector<288x8xf32>
    %54 = arith.addf %48, %53 : vector<288x8xf32>
    %c0_63 = arith.constant 0 : index
    %c0_64 = arith.constant 0 : index
    %55 = vector.load %arg3[%c0_63, %c0_64] : memref<1x8xf32, #tpu.memory_space<vmem>>, vector<1x8xf32>
    %56 = vector.broadcast %55 : vector<1x8xf32> to vector<288x8xf32>
    %57 = arith.mulf %54, %56 : vector<288x8xf32>
    %c0_65 = arith.constant 0 : index
    %c0_66 = arith.constant 0 : index
    %58 = vector.load %arg4[%c0_65, %c0_66] : memref<1x8xf32, #tpu.memory_space<vmem>>, vector<1x8xf32>
    %59 = vector.broadcast %58 : vector<1x8xf32> to vector<288x8xf32>
    %60 = arith.addf %57, %59 : vector<288x8xf32>
    %cst_67 = arith.constant 0.000000e+00 : f32
    %61 = vector.broadcast %cst_67 : f32 to vector<288x8xf32>
    %62 = arith.cmpf ogt, %60, %61 : vector<288x8xf32>
    %cst_68 = arith.constant 0.00999999977 : f32
    %63 = vector.broadcast %cst_68 : f32 to vector<288x8xf32>
    %64 = arith.mulf %63, %60 : vector<288x8xf32>
    %65 = arith.select %62, %60, %64 : vector<288x8xi1>, vector<288x8xf32>
    %c0_69 = arith.constant 0 : index
    %c0_70 = arith.constant 0 : index
    %c0_71 = arith.constant 0 : index
    %66 = vector.load %arg5[%c0_69, %c0_70, %c0_71] : memref<1x288x8xf32, #tpu.memory_space<vmem>>, vector<1x288x8xf32>
    %67 = vector.shape_cast %66 : vector<1x288x8xf32> to vector<288x8xf32>
    %68 = vector.shape_cast %65 : vector<288x8xf32> to vector<1x288x8xf32>
    tpu.vector_store %arg5[%c0_69, %c0_70, %c0_71], %68 {strides = array<i32>} : memref<1x288x8xf32, #tpu.memory_space<vmem>>, vector<1x288x8xf32>,
    return
  }
  func.func @transform_0(%arg0: i32) -> (i32, i32, i32) {
    %c0_i32 = arith.constant 0 : i32
    %c0_i32_0 = arith.constant 0 : i32
    %c0_i32_1 = arith.constant 0 : i32
    return %arg0, %c0_i32, %c0_i32_0 : i32, i32, i32
  }
  func.func @transform_1(%arg0: i32) -> (i32, i32, i32, i32) {
    %c0_i32 = arith.constant 0 : i32
    %c0_i32_0 = arith.constant 0 : i32
    %c0_i32_1 = arith.constant 0 : i32
    %c0_i32_2 = arith.constant 0 : i32
    %c0_i32_3 = arith.constant 0 : i32
    return %c0_i32, %c0_i32_0, %c0_i32_1, %c0_i32_2 : i32, i32, i32, i32
  }
  func.func @transform_2(%arg0: i32) -> (i32, i32) {
    %c0_i32 = arith.constant 0 : i32
    %c0_i32_0 = arith.constant 0 : i32
    %c0_i32_1 = arith.constant 0 : i32
    return %c0_i32, %c0_i32_0 : i32, i32
  }
  func.func @transform_3(%arg0: i32) -> (i32, i32) {
    %c0_i32 = arith.constant 0 : i32
    %c0_i32_0 = arith.constant 0 : i32
    %c0_i32_1 = arith.constant 0 : i32
    return %c0_i32, %c0_i32_0 : i32, i32
  }
  func.func @transform_4(%arg0: i32) -> (i32, i32, i32) {
    %c0_i32 = arith.constant 0 : i32
    %c0_i32_0 = arith.constant 0 : i32
    %c0_i32_1 = arith.constant 0 : i32
    return %arg0, %c0_i32, %c0_i32_0 : i32, i32, i32
  }
}

</mosaic_0001>

<bundles_post_ra>
// kernel: up_block_forward.4
= control target key start
LH: loop header
LB: loop body
LE: loop exit
PB: predicated region body
PF: predicated region fallthrough
CT: control target
= control target key end

     0   :  { %s377_s12 = smov 0   ;;  %s416_s0 = inlined_call_operand.vmem [shape: f32[128,8], index: 0, kind: input, shape index: {}]   ;;  %s417_s1 = inlined_call_operand.vmem [shape: f32[8,4], index: 1, kind: input, shape index: {}]   ;;  %s418_s2 = inlined_call_operand.vmem [shape: f32[1,4], index: 2, kind: input, shape index: {}]   ;;  %s419_s3 = inlined_call_operand.vmem [shape: f32[128,4], index: 3, kind: output, shape index: {}]  }
   0x1 LB: > { %s318_s13 = sadd.s32 4294967295, %s355_s12   ;;  %p322_p0 = scmp.ge.s32.totalorder %s355_s12, 1  ;;  %s355_s12 = sphi %s377_s12, %s13_s12  }
   0x2   : > { %p138_p1 = scmp.lt.s32.totalorder %s355_s12, 3 }
   0x4   : > { %p139_p2 = pnand %p322_p0, %p138_p1 }
   0x5   : > { %s323_s16 = sshll.u32 (!%p139_p2), %s318_s13, 3 }
   0x6   : > { %142 = sbr.rel (%p139_p2) target bundleno = 159 (0x9f), region = 32  ;;  %p163_p3 = scmp.lt.s32.totalorder (!%p139_p2), %s323_s16, 15 }
   0xb   : > { %v182_v0 = vld [vmem:[%s417_s1] sm:$0xff]  ;;  %s421_s16 = smov (!%p163_p3, %s323_s16), 15  ;;  %vm187_vm0 = vcmask 64512   ;;  %vm253_vm1 = vcmask 31744  }
   0xc   : > { %338 = vmatpush.msra.mxu2 %v182_v0  ;;  %339 = vmatpush.msra.mxu3 %v182_v0  ;;  %s324_s17 = sshll.u32 %s421_s16, 3  ;;  %v348_v9 = vld [vmem:[%s418_s2] ss:$0 sm:$0xff] }
   0xd   : > { %227 = vmatpush.msra.mxu0 %v182_v0  ;;  %337 = vmatpush.msra.mxu1 %v182_v0  ;;  %s166_s20 = scalar_lea.vmem %s416_s0, %s324_s17  ;;  %s172_s25 = scalar_lea.vmem %s419_s3, %s324_s17 }
   0xe   : > { %v178_v1 = vld [vmem:[%s166_s20 + $0x20] sm:$0xff]  ;;  %v180_v2 = vld [vmem:[%s166_s20 + $0x30] sm:$0xff]  ;;  %v179_v5 = vld [vmem:[%s166_s20 + $0x28] sm:$0xff] }
   0xf   : > { %v174_v3 = vld [vmem:[%s166_s20] sm:$0xff]  ;;  %331 = vmatmul.msk.f32.vlgmr.msra.gmra.mxu2 %vm187_vm0, %v178_v1  ;;  %333 = vmatmul.msk.f32.vlgmr.msra.gmra.mxu3 %vm187_vm0, %v180_v2  ;;  %v176_v4 = vld [vmem:[%s166_s20 + $0x10] sm:$0xff]  ;;  %v181_v6 = vld [vmem:[%s166_s20 + $0x38] sm:$0xff] }
  0x10   : > { %327 = vmatmul.msk.f32.vlgmr.msra.gmra.mxu0 %vm187_vm0, %v174_v3  ;;  %329 = vmatmul.msk.f32.vlgmr.msra.gmra.mxu1 %vm187_vm0, %v176_v4  ;;  %v175_v7 = vld [vmem:[%s166_s20 + $0x8] sm:$0xff]  ;;  %v177_v8 = vld [vmem:[%s166_s20 + $0x18] sm:$0xff] }
  0x17   : > { %332 = vmatmul.msk.f32.gmra.mxu2 %vm187_vm0, %v179_v5  ;;  %334 = vmatmul.msk.f32.gmra.mxu3 %vm187_vm0, %v181_v6 }
  0x18   : > { %328 = vmatmul.msk.f32.gmra.mxu0 %vm187_vm0, %v175_v7  ;;  %330 = vmatmul.msk.f32.gmra.mxu1 %vm187_vm0, %v177_v8 }
  0x8d   : > { %v229_v10 = vpop.f32.mrf.mxu0  ;;  %v235_v11 = vpop.f32.mrf.mxu1 }
  0x8e   : > { %v230_v12 = vadd.f32 %v348_v9, %v229_v10  ;;  %v236_v13 = vadd.f32 %v348_v9, %v235_v11 }
  0x90   : > { %254 = vst.msk [vmem:[%s172_s25] sm:$0xff] %vm253_vm1, %v230_v12 }
  0x91   : > { %256 = vst.msk [vmem:[%s172_s25 + $0x10] sm:$0xff] %vm253_vm1, %v236_v13 }
  0x92   : > { %v241_v14 = vpop.f32.mrf.mxu2  ;;  %v247_v15 = vpop.f32.mrf.mxu3 }
  0x93   : > { %v242_v16 = vadd.f32 %v348_v9, %v241_v14  ;;  %v248_v17 = vadd.f32 %v348_v9, %v247_v15 }
  0x95   : > { %258 = vst.msk [vmem:[%s172_s25 + $0x20] sm:$0xff] %vm253_vm1, %v242_v16  ;;  %v232_v18 = vpop.f32.mrf.mxu0  ;;  %v238_v19 = vpop.f32.mrf.mxu1 }
  0x96   : > { %260 = vst.msk [vmem:[%s172_s25 + $0x30] sm:$0xff] %vm253_vm1, %v248_v17  ;;  %v233_v20 = vadd.f32 %v348_v9, %v232_v18  ;;  %v239_v21 = vadd.f32 %v348_v9, %v238_v19 }
  0x98   : > { %255 = vst.msk [vmem:[%s172_s25 + $0x8] sm:$0xff] %vm253_vm1, %v233_v20 }
  0x99   : > { %257 = vst.msk [vmem:[%s172_s25 + $0x18] sm:$0xff] %vm253_vm1, %v239_v21 }
  0x9a   : > { %v244_v22 = vpop.f32.mrf.mxu2  ;;  %v250_v23 = vpop.f32.mrf.mxu3 }
  0x9b   : > { %v245_v24 = vadd.f32 %v348_v9, %v244_v22  ;;  %v251_v25 = vadd.f32 %v348_v9, %v250_v23 }
  0x9d   : > { %259 = vst.msk [vmem:[%s172_s25 + $0x28] sm:$0xff] %vm253_vm1, %v245_v24 }
  0x9e   : > { %261 = vst.msk [vmem:[%s172_s25 + $0x38] sm:$0xff] %vm253_vm1, %v251_v25 }
  0x9f PF: > { %s13_s12 = sadd.s32 1, %s355_s12  }
  0xa0   : > { %p10_p4 = scmp.ge.s32.totalorder %s13_s12, 4  }
  0xa2   :  { %12 = sbr.rel (!%p10_p4) target bundleno = 1 (0x1), region = 62 }

// kernel: up_block_forward.5
= control target key start
LH: loop header
LB: loop body
LE: loop exit
PB: predicated region body
PF: predicated region fallthrough
CT: control target
= control target key end

     0   :  { %s469_s12 = smov 0   ;;  %s537_s0 = inlined_call_operand.vmem [shape: f32[2,32,8], index: 0, kind: input, shape index: {}]   ;;  %s538_s1 = inlined_call_operand.vmem [shape: f32[4,16,8], index: 1, kind: input, shape index: {}]   ;;  %s539_s2 = inlined_call_operand.vmem [shape: f32[8,16], index: 2, kind: input, shape index: {}]   ;;  %s540_s3 = inlined_call_operand.vmem [shape: f32[2,4,16,16], index: 3, kind: output, shape index: {}]  }
   0x1 LB: > { %s406_s13 = sadd.s32 4294967295, %s447_s12   ;;  %p410_p0 = scmp.ge.s32.totalorder %s447_s12, 1  ;;  %s447_s12 = sphi %s469_s12, %s13_s12  }
   0x2   : > { %p137_p1 = scmp.lt.s32.totalorder %s447_s12, 3 }
   0x4   : > { %p138_p2 = pnand %p410_p0, %p137_p1 }
   0x5   : > { %p161_p3 = scmp.lt.s32.totalorder (!%p138_p2), %s406_s13, 1 }
   0x6   : > { %141 = sbr.rel (%p138_p2) target bundleno = 299 (0x12b), region = 32 }
   0xb   : > { %v175_v0 = vld [vmem:[%s539_s2] sm:$0xff]  ;;  %s542_s13 = smov (!%p161_p3, %s406_s13), 1  ;;  %vm176_vm0 = vcmask 64512   ;;  %v219_v5 = vld [vmem:[%s538_s1 + $0x8] sm:$0xff]  ;;  %v220_v9 = vld [vmem:[%s538_s1 + $0x10] sm:$0xff]  ;;  %vm342_vm1 = vcmask 130048  }
   0xc   : > { %204 = vmatpush.msra.mxu0 %v175_v0  ;;  %431 = vmatpush.msra.mxu2 %v175_v0  ;;  %s429_s16 = sshll.u32 %s542_s13, 5  ;;  %v218_v6 = vld [vmem:[%s538_s1] sm:$0xff]  ;;  %v224_v10 = vld [vmem:[%s538_s1 + $0x30] sm:$0xff]  ;;  %v221_v13 = vld [vmem:[%s538_s1 + $0x18] sm:$0xff]  ;;  %s430_s9 = sshll.u32 %s542_s13, 6 }
   0xd   : > { %s165_s19 = scalar_lea.vmem %s537_s0, %s429_s16  ;;  %v222_v12 = vld [vmem:[%s538_s1 + $0x20] sm:$0xff]  ;;  %v225_v15 = vld [vmem:[%s538_s1 + $0x38] sm:$0xff]  ;;  %v223_v16 = vld [vmem:[%s538_s1 + $0x28] sm:$0xff]  ;;  %s170_s14 = scalar_lea.vmem %s540_s3, %s430_s9 }
   0xe   : > { %v171_v1 = vld [vmem:[%s165_s19] sm:$0xff]  ;;  %v174_v2 = vld [vmem:[%s165_s19 + $0x18] sm:$0xff]  ;;  %v172_v3 = vld [vmem:[%s165_s19 + $0x8] sm:$0xff] }
   0xf   : > { %415 = vmatmul.msk.f32.vlgmr.msra.gmra.mxu0 %vm176_vm0, %v171_v1  ;;  %418 = vmatmul.msk.f32.vlgmr.msra.gmra.mxu2 %vm176_vm0, %v174_v2  ;;  %v173_v4 = vld [vmem:[%s165_s19 + $0x10] sm:$0xff] }
  0x17   : > { %416 = vmatmul.msk.f32.gmra.mxu0 %vm176_vm0, %v172_v3 }
  0x1f   : > { %417 = vmatmul.msk.f32.gmra.mxu0 %vm176_vm0, %v173_v4 }
  0x8c   : > { %v206_v7 = vpop.f32.mrf.mxu0 }
  0x8d   : > { %247 = vmatpush.msra.mxu1 %v206_v7  ;;  %432 = vmatpush.msra.mxu3 %v206_v7 }
  0x8e   : > { %420 = vmatmul.msk.f32.vlgmr.msra.gmra.mxu3 %vm176_vm0, %v219_v5  ;;  %419 = vmatmul.msk.f32.vlgmr.msra.gmra.mxu1 %vm176_vm0, %v218_v6 }
  0x92   : > { %v215_v8 = vpop.f32.mrf.mxu2 }
  0x93   : > { %334 = vmatpush.msrb.mxu1 %v215_v8 }
  0x94   : > { %v209_v11 = vpop.f32.mrf.mxu0 }
  0x95   : > { %276 = vmatpush.msrb.mxu2 %v209_v11 }
  0x96   : > { %421 = vmatmul.msk.f32.vlgmr.msrb.gmra.mxu2 %vm176_vm0, %v220_v9  ;;  %425 = vmatmul.msk.f32.vlgmr.msrb.gmra.mxu1 %vm176_vm0, %v224_v10 }
  0x9c   : > { %v212_v14 = vpop.f32.mrf.mxu0 }
  0x9d   : > { %305 = vmatpush.msrb.mxu3 %v212_v14 }
  0x9e   : > { %423 = vmatmul.msk.f32.vlgmr.msrb.gmra.mxu3 %vm176_vm0, %v222_v12  ;;  %422 = vmatmul.msk.f32.gmra.mxu2 %vm176_vm0, %v221_v13 }
  0x9f   : > { %426 = vmatmul.msk.f32.gmra.mxu1 %vm176_vm0, %v225_v15 }
  0xa6   : > { %424 = vmatmul.msk.f32.gmra.mxu3 %vm176_vm0, %v223_v16 }
 0x10b   : > { %v249_v17 = vpop.f32.mrf.mxu1 }
 0x10c   : > { %343 = vst.msk [vmem:[%s170_s14] sm:$0xff] %vm342_vm1, %v249_v17 }
 0x111   : > { %v252_v18 = vpop.f32.mrf.mxu3 }
 0x112   : > { %344 = vst.msk [vmem:[%s170_s14 + $0x8] sm:$0xff] %vm342_vm1, %v252_v18 }
 0x113   : > { %v336_v19 = vpop.f32.mrf.mxu1 }
 0x114   : > { %349 = vst.msk [vmem:[%s170_s14 + $0x30] sm:$0xff] %vm342_vm1, %v336_v19 }
 0x119   : > { %v278_v20 = vpop.f32.mrf.mxu2 }
 0x11a   : > { %345 = vst.msk [vmem:[%s170_s14 + $0x10] sm:$0xff] %vm342_vm1, %v278_v20 }
 0x11c   : > { %v339_v21 = vpop.f32.mrf.mxu1 }
 0x11d   : > { %350 = vst.msk [vmem:[%s170_s14 + $0x38] sm:$0xff] %vm342_vm1, %v339_v21 }
 0x121   : > { %v307_v22 = vpop.f32.mrf.mxu3  ;;  %v281_v23 = vpop.f32.mrf.mxu2 }
 0x122   : > { %347 = vst.msk [vmem:[%s170_s14 + $0x20] sm:$0xff] %vm342_vm1, %v307_v22 }
 0x123   : > { %346 = vst.msk [vmem:[%s170_s14 + $0x18] sm:$0xff] %vm342_vm1, %v281_v23 }
 0x129   : > { %v310_v24 = vpop.f32.mrf.mxu3 }
 0x12a   : > { %348 = vst.msk [vmem:[%s170_s14 + $0x28] sm:$0xff] %vm342_vm1, %v310_v24 }
 0x12b PF: > { %s13_s12 = sadd.s32 1, %s447_s12  }
 0x12c   : > { %p10_p4 = scmp.ge.s32.totalorder %s13_s12, 4  }
 0x12e   :  { %12 = sbr.rel (!%p10_p4) target bundleno = 1 (0x1), region = 62 }

// kernel: up_block_forward.7
= control target key start
LH: loop header
LB: loop body
LE: loop exit
PB: predicated region body
PF: predicated region fallthrough
CT: control target
= control target key end

     0   :  { %s3559_s15 = smov 0   ;;  %s4571_s0 = inlined_call_operand.vmem [shape: f32[2,326,8], index: 0, kind: input, shape index: {}]   ;;  %s4572_s1 = inlined_call_operand.vmem [shape: f32[3,3,8,8], index: 1, kind: input, shape index: {}]   ;;  %s4573_s2 = inlined_call_operand.vmem [shape: f32[1,8], index: 2, kind: input, shape index: {}]   ;;  %s4574_s3 = inlined_call_operand.vmem [shape: f32[1,8], index: 3, kind: input, shape index: {}]   ;;  %s4575_s4 = inlined_call_operand.vmem [shape: f32[2,288,8], index: 4, kind: output, shape index: {}]  }
   0x1 LB: > { %s3168_s16 = sadd.s32 4294967295, %s3532_s15   ;;  %p3172_p0 = scmp.ge.s32.totalorder %s3532_s15, 1  ;;  %s3532_s15 = sphi %s3559_s15, %s14_s15  }
   0x2   : > { %p162_p1 = scmp.lt.s32.totalorder %s3532_s15, 3 }
   0x4   : > { %p163_p2 = pnand %p3172_p0, %p162_p1 }
   0x5   : > { %p188_p3 = scmp.lt.s32.totalorder (!%p163_p2), %s3168_s16, 1 }
   0x6   : > { %166 = sbr.rel (%p163_p2) target bundleno = 802 (0x322), region = 36 }
   0xb   : > { %v3175_v0 = vld [vmem:[%s4572_s1 + $0x8] sm:$0xff]  ;;  %v3248_v1 = vld [vmem:[%s4572_s1 + $0x10] sm:$0xff]  ;;  %v3285_v2 = vld [vmem:[%s4572_s1 + $0x18] sm:$0xff]  ;;  %s4577_s16 = smov (!%p188_p3, %s3168_s16), 1  ;;  %vm273_vm0 = vcmask 64512  }
   0xc   : > { %3509 = vmatpush.msra.mxu1 %v3175_v0  ;;  %3510 = vmatpush.msra.mxu2 %v3175_v0  ;;  %v234_v3 = vld [vmem:[%s4572_s1] sm:$0xff]  ;;  %s3512_s27 = smul.u32 328, %s4577_s16  ;;  %v3396_v29 = vld [vmem:[%s4572_s1 + $0x30] sm:$0xff]  ;;  %v3433_v30 = vld [vmem:[%s4572_s1 + $0x38] sm:$0xff] }
   0xd   : > { %3511 = vmatpush.msra.mxu3 %v3175_v0  ;;  %v3322_v4 = vld [vmem:[%s4572_s1 + $0x20] sm:$0xff]  ;;  %397 = vmatpush.msra.mxu0 %v3175_v0  ;;  %v3359_v31 = vld [vmem:[%s4572_s1 + $0x28] sm:$0xff]  ;;  %s3513_s19 = smul.u32 288, %s4577_s16 }
   0xe   : > { %901 = vmatpush.msrb.mxu2 %v3248_v1  ;;  %630 = vmatpush.msrb.mxu1 %v234_v3  ;;  %s3588_s30 = scalar_lea.vmem %s4571_s0, %s3512_s27  ;;  %v3470_v36 = vld [vmem:[%s4572_s1 + $0x40] sm:$0xff] }
   0xf   : > { %1208 = vmatpush.msrb.mxu3 %v3285_v2  ;;  %1515 = vmatpush.msrb.mxu0 %v3322_v4  ;;  %v244_v5 = vld [vmem:[%s3588_s30 + $0x49] sm:$0xff]  ;;  %v253_v6 = vld [vmem:[%s3588_s30 + $0x91] sm:$0xff]  ;;  %v262_v7 = vld [vmem:[%s3588_s30 + $0xd9] sm:$0xff]  ;;  %s4255_s22 = scalar_lea.vmem %s4575_s4, %s3513_s19 }
  0x10   : > { %3185 = vmatmul.msk.f32.vlgmr.msra.gmra.mxu1 %vm273_vm0, %v244_v5  ;;  %3194 = vmatmul.msk.f32.vlgmr.msra.gmra.mxu2 %vm273_vm0, %v253_v6  ;;  %v235_v8 = vld [vmem:[%s3588_s30 + $0x1] sm:$0xff]  ;;  %v245_v9 = vld [vmem:[%s3588_s30 + $0x51] sm:$0xff]  ;;  %v254_v10 = vld [vmem:[%s3588_s30 + $0x99] sm:$0xff] }
  0x11   : > { %3203 = vmatmul.msk.f32.vlgmr.msra.gmra.mxu3 %vm273_vm0, %v262_v7  ;;  %3176 = vmatmul.msk.f32.vlgmr.msra.gmra.mxu0 %vm273_vm0, %v235_v8  ;;  %v263_v11 = vld [vmem:[%s3588_s30 + $0xe1] sm:$0xff]  ;;  %v236_v12 = vld [vmem:[%s3588_s30 + $0x9] sm:$0xff]  ;;  %v246_v13 = vld [vmem:[%s3588_s30 + $0x59] sm:$0xff] }
  0x12   : > { %v255_v14 = vld [vmem:[%s3588_s30 + $0xa1] sm:$0xff]  ;;  %v264_v15 = vld [vmem:[%s3588_s30 + $0xe9] sm:$0xff]  ;;  %v237_v16 = vld [vmem:[%s3588_s30 + $0x11] sm:$0xff]  ;;  %2129 = vmatpush.msra.mxu2 %v3396_v29  ;;  %2436 = vmatpush.msra.mxu3 %v3433_v30 }
  0x13   : > { %v247_v17 = vld [vmem:[%s3588_s30 + $0x61] sm:$0xff]  ;;  %v256_v18 = vld [vmem:[%s3588_s30 + $0xa9] sm:$0xff]  ;;  %v265_v19 = vld [vmem:[%s3588_s30 + $0xf1] sm:$0xff]  ;;  %1822 = vmatpush.msra.mxu1 %v3359_v31  ;;  %2743 = vmatpush.msra.mxu0 %v3470_v36 }
  0x14   : > { %v238_v20 = vld [vmem:[%s3588_s30 + $0x19] sm:$0xff]  ;;  %v248_v21 = vld [vmem:[%s3588_s30 + $0x69] sm:$0xff]  ;;  %v257_v22 = vld [vmem:[%s3588_s30 + $0xb1] sm:$0xff] }
  0x15   : > { %v266_v23 = vld [vmem:[%s3588_s30 + $0xf9] sm:$0xff]  ;;  %v239_v24 = vld [vmem:[%s3588_s30 + $0x21] sm:$0xff]  ;;  %v249_v25 = vld [vmem:[%s3588_s30 + $0x71] sm:$0xff] }
  0x16   : > { %v258_v26 = vld [vmem:[%s3588_s30 + $0xb9] sm:$0xff]  ;;  %v267_v27 = vld [vmem:[%s3588_s30 + $0x101] sm:$0xff]  ;;  %v240_v28 = vld [vmem:[%s3588_s30 + $0x29] sm:$0xff] }
  0x17   : > { %v250_v32 = vld [vmem:[%s3588_s30 + $0x79] sm:$0xff]  ;;  %v259_v33 = vld [vmem:[%s3588_s30 + $0xc1] sm:$0xff]  ;;  %v268_v34 = vld [vmem:[%s3588_s30 + $0x109] sm:$0xff] }
  0x18   : > { %3186 = vmatmul.msk.f32.gmra.mxu1 %vm273_vm0, %v245_v9  ;;  %3195 = vmatmul.msk.f32.gmra.mxu2 %vm273_vm0, %v254_v10  ;;  %v241_v35 = vld [vmem:[%s3588_s30 + $0x31] sm:$0xff]  ;;  %v251_v37 = vld [vmem:[%s3588_s30 + $0x81] sm:$0xff]  ;;  %v260_v38 = vld [vmem:[%s3588_s30 + $0xc9] sm:$0xff] }
  0x19   : > { %3204 = vmatmul.msk.f32.gmra.mxu3 %vm273_vm0, %v263_v11  ;;  %3177 = vmatmul.msk.f32.gmra.mxu0 %vm273_vm0, %v236_v12  ;;  %v269_v39 = vld [vmem:[%s3588_s30 + $0x111] sm:$0xff]  ;;  %v242_v40 = vld [vmem:[%s3588_s30 + $0x39] sm:$0xff]  ;;  %v252_v41 = vld [vmem:[%s3588_s30 + $0x89] sm:$0xff] }
  0x1a   : > { %v261_v42 = vld [vmem:[%s3588_s30 + $0xd1] sm:$0xff]  ;;  %v270_v43 = vld [vmem:[%s3588_s30 + $0x119] sm:$0xff]  ;;  %v243_v44 = vld [vmem:[%s3588_s30 + $0x41] sm:$0xff] }
  0x1b   : > { %v198_v45 = vld [vmem:[%s3588_s30] sm:$0xff]  ;;  %v1047_v47 = vld [vmem:[%s3588_s30 + $0x12] sm:$0xff]  ;;  %v199_v49 = vld [vmem:[%s3588_s30 + $0x8] sm:$0xff] }
  0x1c   : > { %v740_v46 = vld [vmem:[%s3588_s30 + $0x2] sm:$0xff]  ;;  %v1354_v48 = vld [vmem:[%s3588_s30 + $0x13] sm:$0xff]  ;;  %v741_v50 = vld [vmem:[%s3588_s30 + $0xa] sm:$0xff] }
  0x1d   : > { %v1048_v51 = vld [vmem:[%s3588_s30 + $0x1a] sm:$0xff]  ;;  %v200_v53 = vld [vmem:[%s3588_s30 + $0x10] sm:$0xff]  ;;  %v1049_v54 = vld [vmem:[%s3588_s30 + $0x22] sm:$0xff] }
  0x1e   : > { %v1355_v52 = vld [vmem:[%s3588_s30 + $0x1b] sm:$0xff]  ;;  %v1356_v55 = vld [vmem:[%s3588_s30 + $0x23] sm:$0xff]  ;;  %v1357_v58 = vld [vmem:[%s3588_s30 + $0x2b] sm:$0xff] }
  0x1f   : > { %v201_v56 = vld [vmem:[%s3588_s30 + $0x18] sm:$0xff]  ;;  %v1050_v57 = vld [vmem:[%s3588_s30 + $0x2a] sm:$0xff]  ;;  %v202_v59 = vld [vmem:[%s3588_s30 + $0x20] sm:$0xff] }
  0x20   : > { %3187 = vmatmul.msk.f32.gmra.mxu1 %vm273_vm0, %v246_v13  ;;  %3196 = vmatmul.msk.f32.gmra.mxu2 %vm273_vm0, %v255_v14  ;;  %v1051_v60 = vld [vmem:[%s3588_s30 + $0x32] sm:$0xff]  ;;  %v203_v62 = vld [vmem:[%s3588_s30 + $0x28] sm:$0xff]  ;;  %v1052_v63 = vld [vmem:[%s3588_s30 + $0x3a] sm:$0xff] }
  0x21   : > { %3205 = vmatmul.msk.f32.gmra.mxu3 %vm273_vm0, %v264_v15  ;;  %3178 = vmatmul.msk.f32.gmra.mxu0 %vm273_vm0, %v237_v16  ;;  %v1358_v61 = vld [vmem:[%s3588_s30 + $0x33] sm:$0xff]  ;;  %v1359_v0 = vld [vmem:[%s3588_s30 + $0x3b] sm:$0xff]  ;;  %v1360_v3 = vld [vmem:[%s3588_s30 + $0x43] sm:$0xff] }
  0x22   : > { %v204_v1 = vld [vmem:[%s3588_s30 + $0x30] sm:$0xff]  ;;  %v1053_v2 = vld [vmem:[%s3588_s30 + $0x42] sm:$0xff]  ;;  %v205_v5 = vld [vmem:[%s3588_s30 + $0x38] sm:$0xff] }
  0x23   : > { %v1054_v6 = vld [vmem:[%s3588_s30 + $0x4a] sm:$0xff]  ;;  %v206_v12 = vld [vmem:[%s3588_s30 + $0x40] sm:$0xff]  ;;  %v1055_v13 = vld [vmem:[%s3588_s30 + $0x52] sm:$0xff] }
  0x24   : > { %v1361_v8 = vld [vmem:[%s3588_s30 + $0x4b] sm:$0xff]  ;;  %v1362_v15 = vld [vmem:[%s3588_s30 + $0x53] sm:$0xff]  ;;  %v1364_v29 = vld [vmem:[%s3588_s30 + $0x63] sm:$0xff] }
  0x25   : > { %v1365_v36 = vld [vmem:[%s3588_s30 + $0x6b] sm:$0xff] }
  0x28   : > { %3188 = vmatmul.msk.f32.gmra.mxu1 %vm273_vm0, %v247_v17  ;;  %3197 = vmatmul.msk.f32.gmra.mxu2 %vm273_vm0, %v256_v18 }
  0x29   : > { %3206 = vmatmul.msk.f32.gmra.mxu3 %vm273_vm0, %v265_v19  ;;  %3179 = vmatmul.msk.f32.gmra.mxu0 %vm273_vm0, %v238_v20  ;;  %v207_v19 = vld [vmem:[%s3588_s30 + $0x48] sm:$0xff]  ;;  %v1056_v20 = vld [vmem:[%s3588_s30 + $0x5a] sm:$0xff] }
  0x30   : > { %3189 = vmatmul.msk.f32.gmra.mxu1 %vm273_vm0, %v248_v21  ;;  %3198 = vmatmul.msk.f32.gmra.mxu2 %vm273_vm0, %v257_v22  ;;  %v1363_v22 = vld [vmem:[%s3588_s30 + $0x5b] sm:$0xff] }
  0x31   : > { %3207 = vmatmul.msk.f32.gmra.mxu3 %vm273_vm0, %v266_v23  ;;  %3180 = vmatmul.msk.f32.gmra.mxu0 %vm273_vm0, %v239_v24 }
  0x38   : > { %3190 = vmatmul.msk.f32.gmra.mxu1 %vm273_vm0, %v249_v25  ;;  %3199 = vmatmul.msk.f32.gmra.mxu2 %vm273_vm0, %v258_v26  ;;  %v208_v26 = vld [vmem:[%s3588_s30 + $0x50] sm:$0xff] }
  0x39   : > { %3208 = vmatmul.msk.f32.gmra.mxu3 %vm273_vm0, %v267_v27  ;;  %3181 = vmatmul.msk.f32.gmra.mxu0 %vm273_vm0, %v240_v28  ;;  %v1057_v27 = vld [vmem:[%s3588_s30 + $0x62] sm:$0xff] }
  0x40   : > { %3191 = vmatmul.msk.f32.gmra.mxu1 %vm273_vm0, %v250_v32  ;;  %3200 = vmatmul.msk.f32.gmra.mxu2 %vm273_vm0, %v259_v33  ;;  %v209_v33 = vld [vmem:[%s3588_s30 + $0x58] sm:$0xff] }
  0x41   : > { %3209 = vmatmul.msk.f32.gmra.mxu3 %vm273_vm0, %v268_v34  ;;  %3182 = vmatmul.msk.f32.gmra.mxu0 %vm273_vm0, %v241_v35  ;;  %v1058_v34 = vld [vmem:[%s3588_s30 + $0x6a] sm:$0xff] }
  0x48   : > { %3192 = vmatmul.msk.f32.gmra.mxu1 %vm273_vm0, %v251_v37  ;;  %3201 = vmatmul.msk.f32.gmra.mxu2 %vm273_vm0, %v260_v38 }
  0x49   : > { %3210 = vmatmul.msk.f32.gmra.mxu3 %vm273_vm0, %v269_v39  ;;  %3183 = vmatmul.msk.f32.gmra.mxu0 %vm273_vm0, %v242_v40  ;;  %v210_v40 = vld [vmem:[%s3588_s30 + $0x60] sm:$0xff] }
  0x50   : > { %3193 = vmatmul.msk.f32.gmra.mxu1 %vm273_vm0, %v252_v41  ;;  %3202 = vmatmul.msk.f32.gmra.mxu2 %vm273_vm0, %v261_v42  ;;  %v1059_v41 = vld [vmem:[%s3588_s30 + $0x72] sm:$0xff] }
  0x51   : > { %3211 = vmatmul.msk.f32.gmra.mxu3 %vm273_vm0, %v270_v43  ;;  %3184 = vmatmul.msk.f32.gmra.mxu0 %vm273_vm0, %v243_v44  ;;  %v1366_v43 = vld [vmem:[%s3588_s30 + $0x73] sm:$0xff] }
  0x58   : > { %3212 = vmatmul.msk.f32.vlgmr.msrb.gmra.mxu1 %vm273_vm0, %v198_v45  ;;  %3249 = vmatmul.msk.f32.vlgmr.msrb.gmra.mxu2 %vm273_vm0, %v740_v46 }
  0x59   : > { %3286 = vmatmul.msk.f32.vlgmr.msrb.gmra.mxu3 %vm273_vm0, %v1047_v47  ;;  %3323 = vmatmul.msk.f32.vlgmr.msrb.gmra.mxu0 %vm273_vm0, %v1354_v48  ;;  %v1060_v48 = vld [vmem:[%s3588_s30 + $0x7a] sm:$0xff] }
  0x60   : > { %3213 = vmatmul.msk.f32.gmra.mxu1 %vm273_vm0, %v199_v49  ;;  %3250 = vmatmul.msk.f32.gmra.mxu2 %vm273_vm0, %v741_v50  ;;  %v1367_v50 = vld [vmem:[%s3588_s30 + $0x7b] sm:$0xff] }
  0x61   : > { %3287 = vmatmul.msk.f32.gmra.mxu3 %vm273_vm0, %v1048_v51  ;;  %3324 = vmatmul.msk.f32.gmra.mxu0 %vm273_vm0, %v1355_v52 }
  0x68   : > { %3214 = vmatmul.msk.f32.gmra.mxu1 %vm273_vm0, %v200_v53  ;;  %3251 = vmatmul.msk.f32.gmra.mxu2 %vm273_vm0, %v1047_v47  ;;  %v211_v47 = vld [vmem:[%s3588_s30 + $0x68] sm:$0xff] }
  0x69   : > { %3288 = vmatmul.msk.f32.gmra.mxu3 %vm273_vm0, %v1049_v54  ;;  %3325 = vmatmul.msk.f32.gmra.mxu0 %vm273_vm0, %v1356_v55  ;;  %v1061_v55 = vld [vmem:[%s3588_s30 + $0x82] sm:$0xff] }
  0x70   : > { %3215 = vmatmul.msk.f32.gmra.mxu1 %vm273_vm0, %v201_v56  ;;  %3252 = vmatmul.msk.f32.gmra.mxu2 %vm273_vm0, %v1048_v51 }
  0x71   : > { %3289 = vmatmul.msk.f32.gmra.mxu3 %vm273_vm0, %v1050_v57  ;;  %3326 = vmatmul.msk.f32.gmra.mxu0 %vm273_vm0, %v1357_v58 }
  0x78   : > { %3216 = vmatmul.msk.f32.gmra.mxu1 %vm273_vm0, %v202_v59  ;;  %3253 = vmatmul.msk.f32.gmra.mxu2 %vm273_vm0, %v1049_v54  ;;  %v212_v54 = vld [vmem:[%s3588_s30 + $0x70] sm:$0xff] }
  0x79   : > { %3290 = vmatmul.msk.f32.gmra.mxu3 %vm273_vm0, %v1051_v60  ;;  %3327 = vmatmul.msk.f32.gmra.mxu0 %vm273_vm0, %v1358_v61  ;;  %v213_v61 = vld [vmem:[%s3588_s30 + $0x78] sm:$0xff] }
  0x80   : > { %3217 = vmatmul.msk.f32.gmra.mxu1 %vm273_vm0, %v203_v62  ;;  %3254 = vmatmul.msk.f32.gmra.mxu2 %vm273_vm0, %v1050_v57  ;;  %v1368_v57 = vld [vmem:[%s3588_s30 + $0x83] sm:$0xff] }
  0x81   : > { %3291 = vmatmul.msk.f32.gmra.mxu3 %vm273_vm0, %v1052_v63  ;;  %3328 = vmatmul.msk.f32.gmra.mxu0 %vm273_vm0, %v1359_v0  ;;  %v1062_v62 = vld [vmem:[%s3588_s30 + $0x8a] sm:$0xff] }
  0x82   : > { %v1369_v0 = vld [vmem:[%s3588_s30 + $0x8b] sm:$0xff] }
  0x88   : > { %3218 = vmatmul.msk.f32.gmra.mxu1 %vm273_vm0, %v204_v1  ;;  %3255 = vmatmul.msk.f32.gmra.mxu2 %vm273_vm0, %v1051_v60 }
  0x89   : > { %3292 = vmatmul.msk.f32.gmra.mxu3 %vm273_vm0, %v1053_v2  ;;  %3329 = vmatmul.msk.f32.gmra.mxu0 %vm273_vm0, %v1360_v3 }
  0x8d   : > { %v3725_v4 = vpop.f32.mrf.mxu1 }
  0x8e   : > { %v3729_v7 = vpop.f32.mrf.mxu0 }
  0x90   : > { %3219 = vmatmul.msk.f32.gmra.mxu1 %vm273_vm0, %v205_v5  ;;  %3256 = vmatmul.msk.f32.gmra.mxu2 %vm273_vm0, %v1052_v63  ;;  %v214_v5 = vld [vmem:[%s3588_s30 + $0x80] sm:$0xff] }
  0x91   : > { %3293 = vmatmul.msk.f32.gmra.mxu3 %vm273_vm0, %v1054_v6  ;;  %3330 = vmatmul.msk.f32.gmra.mxu0 %vm273_vm0, %v1361_v8 }
  0x93   : > { %v3736_v9 = vpop.f32.mrf.mxu2 }
  0x94   : > { %v3738_v10 = vpop.f32.mrf.mxu3 }
  0x95   : > { %v3740_v11 = vpop.f32.mrf.mxu1 }
  0x96   : > { %v3744_v14 = vpop.f32.mrf.mxu0 }
  0x98   : > { %3220 = vmatmul.msk.f32.gmra.mxu1 %vm273_vm0, %v206_v12  ;;  %3257 = vmatmul.msk.f32.gmra.mxu2 %vm273_vm0, %v1053_v2  ;;  %v1370_v12 = vld [vmem:[%s3588_s30 + $0x93] sm:$0xff] }
  0x99   : > { %3294 = vmatmul.msk.f32.gmra.mxu3 %vm273_vm0, %v1055_v13  ;;  %3331 = vmatmul.msk.f32.gmra.mxu0 %vm273_vm0, %v1362_v15 }
  0x9b   : > { %v3751_v16 = vpop.f32.mrf.mxu2 }
  0x9c   : > { %v3753_v17 = vpop.f32.mrf.mxu3 }
  0x9d   : > { %v3755_v18 = vpop.f32.mrf.mxu1 }
  0x9e   : > { %v3759_v21 = vpop.f32.mrf.mxu0 }
  0xa0   : > { %3221 = vmatmul.msk.f32.gmra.mxu1 %vm273_vm0, %v207_v19  ;;  %3258 = vmatmul.msk.f32.gmra.mxu2 %vm273_vm0, %v1054_v6  ;;  %v1063_v6 = vld [vmem:[%s3588_s30 + $0x92] sm:$0xff] }
  0xa1   : > { %3295 = vmatmul.msk.f32.gmra.mxu3 %vm273_vm0, %v1056_v20  ;;  %3332 = vmatmul.msk.f32.gmra.mxu0 %vm273_vm0, %v1363_v22 }
  0xa3   : > { %v3766_v23 = vpop.f32.mrf.mxu2 }
  0xa4   : > { %v3768_v24 = vpop.f32.mrf.mxu3 }
  0xa5   : > { %v3770_v25 = vpop.f32.mrf.mxu1 }
  0xa6   : > { %v3774_v28 = vpop.f32.mrf.mxu0 }
  0xa8   : > { %3222 = vmatmul.msk.f32.gmra.mxu1 %vm273_vm0, %v208_v26  ;;  %3259 = vmatmul.msk.f32.gmra.mxu2 %vm273_vm0, %v1055_v13  ;;  %v215_v26 = vld [vmem:[%s3588_s30 + $0x88] sm:$0xff] }
  0xa9   : > { %3296 = vmatmul.msk.f32.gmra.mxu3 %vm273_vm0, %v1057_v27  ;;  %3333 = vmatmul.msk.f32.gmra.mxu0 %vm273_vm0, %v1364_v29  ;;  %v1064_v29 = vld [vmem:[%s3588_s30 + $0x9a] sm:$0xff] }
  0xab   : > { %v3781_v30 = vpop.f32.mrf.mxu2 }
  0xac   : > { %v3783_v31 = vpop.f32.mrf.mxu3 }
  0xad   : > { %v3785_v32 = vpop.f32.mrf.mxu1 }
  0xae   : > { %v3789_v35 = vpop.f32.mrf.mxu0 }
  0xb0   : > { %3223 = vmatmul.msk.f32.gmra.mxu1 %vm273_vm0, %v209_v33  ;;  %3260 = vmatmul.msk.f32.gmra.mxu2 %vm273_vm0, %v1056_v20 }
  0xb1   : > { %3297 = vmatmul.msk.f32.gmra.mxu3 %vm273_vm0, %v1058_v34  ;;  %3334 = vmatmul.msk.f32.gmra.mxu0 %vm273_vm0, %v1365_v36 }
  0xb3   : > { %v3796_v37 = vpop.f32.mrf.mxu2 }
  0xb4   : > { %v3798_v38 = vpop.f32.mrf.mxu3 }
  0xb5   : > { %v3800_v39 = vpop.f32.mrf.mxu1 }
  0xb6   : > { %v3804_v42 = vpop.f32.mrf.mxu0 }
  0xb8   : > { %3224 = vmatmul.msk.f32.gmra.mxu1 %vm273_vm0, %v210_v40  ;;  %3261 = vmatmul.msk.f32.gmra.mxu2 %vm273_vm0, %v1057_v27 }
  0xb9   : > { %3298 = vmatmul.msk.f32.gmra.mxu3 %vm273_vm0, %v1059_v41  ;;  %3335 = vmatmul.msk.f32.gmra.mxu0 %vm273_vm0, %v1366_v43 }
  0xbb   : > { %v3811_v44 = vpop.f32.mrf.mxu2 }
  0xbc   : > { %v3813_v45 = vpop.f32.mrf.mxu3 }
  0xbd   : > { %v3815_v46 = vpop.f32.mrf.mxu1 }
  0xbe   : > { %v3819_v49 = vpop.f32.mrf.mxu0 }
  0xc0   : > { %3225 = vmatmul.msk.f32.gmra.mxu1 %vm273_vm0, %v211_v47  ;;  %3262 = vmatmul.msk.f32.gmra.mxu2 %vm273_vm0, %v1058_v34  ;;  %v1371_v34 = vld [vmem:[%s3588_s30 + $0x9b] sm:$0xff] }
  0xc1   : > { %3299 = vmatmul.msk.f32.gmra.mxu3 %vm273_vm0, %v1060_v48  ;;  %3336 = vmatmul.msk.f32.gmra.mxu0 %vm273_vm0, %v1367_v50 }
  0xc3   : > { %v3826_v51 = vpop.f32.mrf.mxu2 }
  0xc4   : > { %v3828_v52 = vpop.f32.mrf.mxu3 }
  0xc5   : > { %v3830_v53 = vpop.f32.mrf.mxu1 }
  0xc6   : > { %v3834_v56 = vpop.f32.mrf.mxu0 }
  0xc8   : > { %3226 = vmatmul.msk.f32.gmra.mxu1 %vm273_vm0, %v212_v54  ;;  %3263 = vmatmul.msk.f32.gmra.mxu2 %vm273_vm0, %v1059_v41  ;;  %v1065_v54 = vld [vmem:[%s3588_s30 + $0xa2] sm:$0xff] }
  0xc9   : > { %3300 = vmatmul.msk.f32.gmra.mxu3 %vm273_vm0, %v1061_v55  ;;  %3337 = vmatmul.msk.f32.gmra.mxu0 %vm273_vm0, %v1368_v57  ;;  %v1372_v57 = vld [vmem:[%s3588_s30 + $0xa3] sm:$0xff] }
  0xcb   : > { %v3841_v58 = vpop.f32.mrf.mxu2 }
  0xcc   : > { %v3843_v59 = vpop.f32.mrf.mxu3 }
  0xcd   : > { %v3845_v60 = vpop.f32.mrf.mxu1 }
  0xce   : > { %v3849_v63 = vpop.f32.mrf.mxu0 }
  0xd0   : > { %3227 = vmatmul.msk.f32.gmra.mxu1 %vm273_vm0, %v213_v61  ;;  %3264 = vmatmul.msk.f32.gmra.mxu2 %vm273_vm0, %v1060_v48  ;;  %v216_v48 = vld [vmem:[%s3588_s30 + $0x90] sm:$0xff] }
  0xd1   : > { %3301 = vmatmul.msk.f32.gmra.mxu3 %vm273_vm0, %v1062_v62  ;;  %3338 = vmatmul.msk.f32.gmra.mxu0 %vm273_vm0, %v1369_v0 }
  0xd3   : > { %v3856_v1 = vpop.f32.mrf.mxu2 }
  0xd4   : > { %v3858_v2 = vpop.f32.mrf.mxu3 }
  0xd5   : > { %v632_v3 = vpop.f32.mrf.mxu1 }
  0xd6   : > { %v1517_v8 = vpop.f32.mrf.mxu0  ;;  %v633_v13 = vadd.f32 %v632_v3, %v3729_v7 }
  0xd8   : > { %3228 = vmatmul.msk.f32.gmra.mxu1 %vm273_vm0, %v214_v5  ;;  %3265 = vmatmul.msk.f32.gmra.mxu2 %vm273_vm0, %v1061_v55 }
  0xd9   : > { %3302 = vmatmul.msk.f32.gmra.mxu3 %vm273_vm0, %v1063_v6  ;;  %3339 = vmatmul.msk.f32.gmra.mxu0 %vm273_vm0, %v1370_v12 }
  0xdb   : > { %v903_v15 = vpop.f32.mrf.mxu2 }
  0xdc   : > { %v1011_v19 = vadd.f32 %v903_v15, %v633_v13  ;;  %v1210_v20 = vpop.f32.mrf.mxu3  ;;  %v1066_v13 = vld [vmem:[%s3588_s30 + $0xaa] sm:$0xff] }
  0xdd   : > { %v635_v22 = vpop.f32.mrf.mxu1 }
  0xde   : > { %v1318_v27 = vadd.f32 %v1210_v20, %v1011_v19  ;;  %v1520_v33 = vpop.f32.mrf.mxu0  ;;  %v636_v7 = vadd.f32 %v635_v22, %v3744_v14  ;;  %v1373_v19 = vld [vmem:[%s3588_s30 + $0xab] sm:$0xff] }
  0xe0   : > { %v3871_v36 = vadd.f32 %v1517_v8, %v1318_v27  ;;  %3229 = vmatmul.msk.f32.gmra.mxu1 %vm273_vm0, %v215_v26  ;;  %3266 = vmatmul.msk.f32.gmra.mxu2 %vm273_vm0, %v1062_v62  ;;  %v217_v8 = vld [vmem:[%s3588_s30 + $0x98] sm:$0xff] }
  0xe1   : > { %3303 = vmatmul.msk.f32.gmra.mxu3 %vm273_vm0, %v1064_v29  ;;  %3340 = vmatmul.msk.f32.gmra.mxu0 %vm273_vm0, %v1371_v34 }
  0xe3   : > { %v906_v40 = vpop.f32.mrf.mxu2 }
  0xe4   : > { %v1012_v41 = vadd.f32 %v906_v40, %v636_v7  ;;  %v1213_v43 = vpop.f32.mrf.mxu3  ;;  %v1067_v7 = vld [vmem:[%s3588_s30 + $0xb2] sm:$0xff] }
  0xe5   : > { %v638_v47 = vpop.f32.mrf.mxu1 }
  0xe6   : > { %v1319_v50 = vadd.f32 %v1213_v43, %v1012_v41  ;;  %v1523_v55 = vpop.f32.mrf.mxu0  ;;  %v639_v14 = vadd.f32 %v638_v47, %v3759_v21  ;;  %v1374_v41 = vld [vmem:[%s3588_s30 + $0xb3] sm:$0xff] }
  0xe8   : > { %v3881_v61 = vadd.f32 %v1520_v33, %v1319_v50  ;;  %3230 = vmatmul.msk.f32.gmra.mxu1 %vm273_vm0, %v216_v48  ;;  %3267 = vmatmul.msk.f32.gmra.mxu2 %vm273_vm0, %v1063_v6  ;;  %v218_v33 = vld [vmem:[%s3588_s30 + $0xa0] sm:$0xff] }
  0xe9   : > { %3304 = vmatmul.msk.f32.gmra.mxu3 %vm273_vm0, %v1065_v54  ;;  %3341 = vmatmul.msk.f32.gmra.mxu0 %vm273_vm0, %v1372_v57 }
  0xeb   : > { %v909_v62 = vpop.f32.mrf.mxu2 }
  0xec   : > { %v1013_v0 = vadd.f32 %v909_v62, %v639_v14  ;;  %v1216_v3 = vpop.f32.mrf.mxu3  ;;  %v1068_v14 = vld [vmem:[%s3588_s30 + $0xba] sm:$0xff] }
  0xed   : > { %v641_v5 = vpop.f32.mrf.mxu1 }
  0xee   : > { %v1320_v12 = vadd.f32 %v1216_v3, %v1013_v0  ;;  %v1526_v15 = vpop.f32.mrf.mxu0  ;;  %v642_v21 = vadd.f32 %v641_v5, %v3774_v28  ;;  %v1375_v0 = vld [vmem:[%s3588_s30 + $0xbb] sm:$0xff] }
  0xf0   : > { %v3891_v20 = vadd.f32 %v1523_v55, %v1320_v12  ;;  %3231 = vmatmul.msk.f32.gmra.mxu1 %vm273_vm0, %v217_v8  ;;  %3268 = vmatmul.msk.f32.gmra.mxu2 %vm273_vm0, %v1064_v29  ;;  %v219_v55 = vld [vmem:[%s3588_s30 + $0xa8] sm:$0xff] }
  0xf1   : > { %3305 = vmatmul.msk.f32.gmra.mxu3 %vm273_vm0, %v1066_v13  ;;  %3342 = vmatmul.msk.f32.gmra.mxu0 %vm273_vm0, %v1373_v19 }
  0xf3   : > { %v912_v6 = vpop.f32.mrf.mxu2 }
  0xf4   : > { %v1014_v22 = vadd.f32 %v912_v6, %v642_v21  ;;  %v1219_v26 = vpop.f32.mrf.mxu3  ;;  %v1069_v21 = vld [vmem:[%s3588_s30 + $0xc2] sm:$0xff] }
  0xf5   : > { %v644_v27 = vpop.f32.mrf.mxu1 }
  0xf6   : > { %v1321_v34 = vadd.f32 %v1219_v26, %v1014_v22  ;;  %v1529_v40 = vpop.f32.mrf.mxu0  ;;  %v645_v28 = vadd.f32 %v644_v27, %v3789_v35  ;;  %v1376_v22 = vld [vmem:[%s3588_s30 + $0xc3] sm:$0xff] }
  0xf8   : > { %v3901_v43 = vadd.f32 %v1526_v15, %v1321_v34  ;;  %3232 = vmatmul.msk.f32.gmra.mxu1 %vm273_vm0, %v218_v33  ;;  %3269 = vmatmul.msk.f32.gmra.mxu2 %vm273_vm0, %v1065_v54  ;;  %v220_v15 = vld [vmem:[%s3588_s30 + $0xb0] sm:$0xff] }
  0xf9   : > { %3306 = vmatmul.msk.f32.gmra.mxu3 %vm273_vm0, %v1067_v7  ;;  %3343 = vmatmul.msk.f32.gmra.mxu0 %vm273_vm0, %v1374_v41 }
  0xfb   : > { %v915_v29 = vpop.f32.mrf.mxu2 }
  0xfc   : > { %v1015_v47 = vadd.f32 %v915_v29, %v645_v28  ;;  %v1222_v48 = vpop.f32.mrf.mxu3  ;;  %v1070_v28 = vld [vmem:[%s3588_s30 + $0xca] sm:$0xff] }
  0xfd   : > { %v647_v50 = vpop.f32.mrf.mxu1 }
  0xfe   : > { %v1322_v57 = vadd.f32 %v1222_v48, %v1015_v47  ;;  %v1532_v62 = vpop.f32.mrf.mxu0  ;;  %v648_v35 = vadd.f32 %v647_v50, %v3804_v42  ;;  %v1377_v47 = vld [vmem:[%s3588_s30 + $0xcb] sm:$0xff] }
 0x100   : > { %v3911_v3 = vadd.f32 %v1529_v40, %v1322_v57  ;;  %3233 = vmatmul.msk.f32.gmra.mxu1 %vm273_vm0, %v219_v55  ;;  %3270 = vmatmul.msk.f32.gmra.mxu2 %vm273_vm0, %v1066_v13  ;;  %v221_v40 = vld [vmem:[%s3588_s30 + $0xb8] sm:$0xff] }
 0x101   : > { %3307 = vmatmul.msk.f32.gmra.mxu3 %vm273_vm0, %v1068_v14  ;;  %3344 = vmatmul.msk.f32.gmra.mxu0 %vm273_vm0, %v1375_v0 }
 0x103   : > { %v918_v54 = vpop.f32.mrf.mxu2 }
 0x104   : > { %v1016_v5 = vadd.f32 %v918_v54, %v648_v35  ;;  %v1225_v8 = vpop.f32.mrf.mxu3  ;;  %v1071_v35 = vld [vmem:[%s3588_s30 + $0xd2] sm:$0xff] }
 0x105   : > { %v650_v12 = vpop.f32.mrf.mxu1 }
 0x106   : > { %v1323_v19 = vadd.f32 %v1225_v8, %v1016_v5  ;;  %v1535_v6 = vpop.f32.mrf.mxu0  ;;  %v651_v42 = vadd.f32 %v650_v12, %v3819_v49  ;;  %v1378_v5 = vld [vmem:[%s3588_s30 + $0xd3] sm:$0xff] }
 0x108   : > { %v3921_v26 = vadd.f32 %v1532_v62, %v1323_v19  ;;  %3234 = vmatmul.msk.f32.gmra.mxu1 %vm273_vm0, %v220_v15  ;;  %3271 = vmatmul.msk.f32.gmra.mxu2 %vm273_vm0, %v1067_v7  ;;  %v222_v62 = vld [vmem:[%s3588_s30 + $0xc0] sm:$0xff] }
 0x109   : > { %3308 = vmatmul.msk.f32.gmra.mxu3 %vm273_vm0, %v1069_v21  ;;  %3345 = vmatmul.msk.f32.gmra.mxu0 %vm273_vm0, %v1376_v22 }
 0x10b   : > { %v921_v13 = vpop.f32.mrf.mxu2 }
 0x10c   : > { %v1017_v27 = vadd.f32 %v921_v13, %v651_v42  ;;  %v1228_v33 = vpop.f32.mrf.mxu3  ;;  %v1072_v42 = vld [vmem:[%s3588_s30 + $0xda] sm:$0xff] }
 0x10d   : > { %v653_v34 = vpop.f32.mrf.mxu1 }
 0x10e   : > { %v1324_v41 = vadd.f32 %v1228_v33, %v1017_v27  ;;  %v1538_v29 = vpop.f32.mrf.mxu0  ;;  %v654_v49 = vadd.f32 %v653_v34, %v3834_v56  ;;  %v1379_v27 = vld [vmem:[%s3588_s30 + $0xdb] sm:$0xff] }
 0x110   : > { %v3931_v48 = vadd.f32 %v1535_v6, %v1324_v41  ;;  %3235 = vmatmul.msk.f32.gmra.mxu1 %vm273_vm0, %v221_v40  ;;  %3272 = vmatmul.msk.f32.gmra.mxu2 %vm273_vm0, %v1068_v14  ;;  %v223_v6 = vld [vmem:[%s3588_s30 + $0xc8] sm:$0xff] }
 0x111   : > { %3309 = vmatmul.msk.f32.gmra.mxu3 %vm273_vm0, %v1070_v28  ;;  %3346 = vmatmul.msk.f32.gmra.mxu0 %vm273_vm0, %v1377_v47 }
 0x113   : > { %v924_v7 = vpop.f32.mrf.mxu2 }
 0x114   : > { %v1018_v50 = vadd.f32 %v924_v7, %v654_v49  ;;  %v1231_v55 = vpop.f32.mrf.mxu3  ;;  %v1073_v49 = vld [vmem:[%s3588_s30 + $0xe2] sm:$0xff] }
 0x115   : > { %v656_v57 = vpop.f32.mrf.mxu1 }
 0x116   : > { %v1325_v0 = vadd.f32 %v1231_v55, %v1018_v50  ;;  %v1541_v54 = vpop.f32.mrf.mxu0  ;;  %v657_v56 = vadd.f32 %v656_v57, %v3849_v63  ;;  %v1380_v50 = vld [vmem:[%s3588_s30 + $0xe3] sm:$0xff] }
 0x118   : > { %v3941_v8 = vadd.f32 %v1538_v29, %v1325_v0  ;;  %3236 = vmatmul.msk.f32.gmra.mxu1 %vm273_vm0, %v222_v62  ;;  %3273 = vmatmul.msk.f32.gmra.mxu2 %vm273_vm0, %v1069_v21  ;;  %v224_v29 = vld [vmem:[%s3588_s30 + $0xd0] sm:$0xff] }
 0x119   : > { %3310 = vmatmul.msk.f32.gmra.mxu3 %vm273_vm0, %v1071_v35  ;;  %3347 = vmatmul.msk.f32.gmra.mxu0 %vm273_vm0, %v1378_v5 }
 0x11b   : > { %v927_v14 = vpop.f32.mrf.mxu2 }
 0x11c   : > { %v1019_v12 = vadd.f32 %v927_v14, %v657_v56  ;;  %v1234_v15 = vpop.f32.mrf.mxu3  ;;  %v1074_v56 = vld [vmem:[%s3588_s30 + $0xea] sm:$0xff] }
 0x11d   : > { %v659_v19 = vpop.f32.mrf.mxu1 }
 0x11e   : > { %v1326_v22 = vadd.f32 %v1234_v15, %v1019_v12  ;;  %v1544_v13 = vpop.f32.mrf.mxu0  ;;  %v660_v63 = vadd.f32 %v659_v19, %v3725_v4  ;;  %v1381_v12 = vld [vmem:[%s3588_s30 + $0xeb] sm:$0xff] }
 0x120   : > { %v3951_v33 = vadd.f32 %v1541_v54, %v1326_v22  ;;  %3237 = vmatmul.msk.f32.gmra.mxu1 %vm273_vm0, %v223_v6  ;;  %3274 = vmatmul.msk.f32.gmra.mxu2 %vm273_vm0, %v1070_v28  ;;  %v225_v54 = vld [vmem:[%s3588_s30 + $0xd8] sm:$0xff] }
 0x121   : > { %3311 = vmatmul.msk.f32.gmra.mxu3 %vm273_vm0, %v1072_v42  ;;  %3348 = vmatmul.msk.f32.gmra.mxu0 %vm273_vm0, %v1379_v27 }
 0x123   : > { %v930_v21 = vpop.f32.mrf.mxu2 }
 0x124   : > { %v1020_v34 = vadd.f32 %v930_v21, %v660_v63  ;;  %v1237_v40 = vpop.f32.mrf.mxu3  ;;  %v1075_v63 = vld [vmem:[%s3588_s30 + $0xf2] sm:$0xff] }
 0x125   : > { %v662_v41 = vpop.f32.mrf.mxu1 }
 0x126   : > { %v1327_v47 = vadd.f32 %v1237_v40, %v1020_v34  ;;  %v1547_v7 = vpop.f32.mrf.mxu0  ;;  %v663_v4 = vadd.f32 %v662_v41, %v3740_v11  ;;  %v1382_v34 = vld [vmem:[%s3588_s30 + $0xf3] sm:$0xff] }
 0x128   : > { %v3961_v55 = vadd.f32 %v1544_v13, %v1327_v47  ;;  %3238 = vmatmul.msk.f32.gmra.mxu1 %vm273_vm0, %v224_v29  ;;  %3275 = vmatmul.msk.f32.gmra.mxu2 %vm273_vm0, %v1071_v35  ;;  %v226_v13 = vld [vmem:[%s3588_s30 + $0xe0] sm:$0xff] }
 0x129   : > { %3312 = vmatmul.msk.f32.gmra.mxu3 %vm273_vm0, %v1073_v49  ;;  %3349 = vmatmul.msk.f32.gmra.mxu0 %vm273_vm0, %v1380_v50 }
 0x12b   : > { %v933_v28 = vpop.f32.mrf.mxu2 }
 0x12c   : > { %v1021_v57 = vadd.f32 %v933_v28, %v663_v4  ;;  %v1240_v62 = vpop.f32.mrf.mxu3  ;;  %v1076_v4 = vld [vmem:[%s3588_s30 + $0xfa] sm:$0xff] }
 0x12d   : > { %v665_v0 = vpop.f32.mrf.mxu1 }
 0x12e   : > { %v1328_v5 = vadd.f32 %v1240_v62, %v1021_v57  ;;  %v1550_v14 = vpop.f32.mrf.mxu0  ;;  %v666_v11 = vadd.f32 %v665_v0, %v3755_v18  ;;  %v1383_v57 = vld [vmem:[%s3588_s30 + $0xfb] sm:$0xff] }
 0x130   : > { %v3971_v15 = vadd.f32 %v1547_v7, %v1328_v5  ;;  %3239 = vmatmul.msk.f32.gmra.mxu1 %vm273_vm0, %v225_v54  ;;  %3276 = vmatmul.msk.f32.gmra.mxu2 %vm273_vm0, %v1072_v42  ;;  %v227_v7 = vld [vmem:[%s3588_s30 + $0xe8] sm:$0xff] }
 0x131   : > { %3313 = vmatmul.msk.f32.gmra.mxu3 %vm273_vm0, %v1074_v56  ;;  %3350 = vmatmul.msk.f32.gmra.mxu0 %vm273_vm0, %v1381_v12 }
 0x133   : > { %v936_v35 = vpop.f32.mrf.mxu2 }
 0x134   : > { %v1022_v19 = vadd.f32 %v936_v35, %v666_v11  ;;  %v1243_v6 = vpop.f32.mrf.mxu3  ;;  %v1077_v11 = vld [vmem:[%s3588_s30 + $0x102] sm:$0xff] }
 0x135   : > { %v668_v22 = vpop.f32.mrf.mxu1 }
 0x136   : > { %v1329_v27 = vadd.f32 %v1243_v6, %v1022_v19  ;;  %v1553_v21 = vpop.f32.mrf.mxu0  ;;  %v669_v18 = vadd.f32 %v668_v22, %v3770_v25  ;;  %v1384_v19 = vld [vmem:[%s3588_s30 + $0x103] sm:$0xff] }
 0x138   : > { %v3981_v40 = vadd.f32 %v1550_v14, %v1329_v27  ;;  %3240 = vmatmul.msk.f32.gmra.mxu1 %vm273_vm0, %v226_v13  ;;  %3277 = vmatmul.msk.f32.gmra.mxu2 %vm273_vm0, %v1073_v49  ;;  %v228_v14 = vld [vmem:[%s3588_s30 + $0xf0] sm:$0xff] }
 0x139   : > { %3314 = vmatmul.msk.f32.gmra.mxu3 %vm273_vm0, %v1075_v63  ;;  %3351 = vmatmul.msk.f32.gmra.mxu0 %vm273_vm0, %v1382_v34 }
 0x13b   : > { %v939_v42 = vpop.f32.mrf.mxu2 }
 0x13c   : > { %v1023_v41 = vadd.f32 %v939_v42, %v669_v18  ;;  %v1246_v29 = vpop.f32.mrf.mxu3  ;;  %v1078_v18 = vld [vmem:[%s3588_s30 + $0x10a] sm:$0xff] }
 0x13d   : > { %v671_v47 = vpop.f32.mrf.mxu1 }
 0x13e   : > { %v1330_v50 = vadd.f32 %v1246_v29, %v1023_v41  ;;  %v1556_v28 = vpop.f32.mrf.mxu0  ;;  %v672_v25 = vadd.f32 %v671_v47, %v3785_v32  ;;  %v1385_v41 = vld [vmem:[%s3588_s30 + $0x10b] sm:$0xff] }
 0x140   : > { %v3991_v62 = vadd.f32 %v1553_v21, %v1330_v50  ;;  %3241 = vmatmul.msk.f32.gmra.mxu1 %vm273_vm0, %v227_v7  ;;  %3278 = vmatmul.msk.f32.gmra.mxu2 %vm273_vm0, %v1074_v56  ;;  %v229_v21 = vld [vmem:[%s3588_s30 + $0xf8] sm:$0xff] }
 0x141   : > { %3315 = vmatmul.msk.f32.gmra.mxu3 %vm273_vm0, %v1076_v4  ;;  %3352 = vmatmul.msk.f32.gmra.mxu0 %vm273_vm0, %v1383_v57 }
 0x143   : > { %v942_v49 = vpop.f32.mrf.mxu2 }
 0x144   : > { %v1024_v0 = vadd.f32 %v942_v49, %v672_v25  ;;  %v1249_v54 = vpop.f32.mrf.mxu3  ;;  %v1079_v25 = vld [vmem:[%s3588_s30 + $0x112] sm:$0xff] }
 0x145   : > { %v674_v5 = vpop.f32.mrf.mxu1 }
 0x146   : > { %v1331_v12 = vadd.f32 %v1249_v54, %v1024_v0  ;;  %v1559_v35 = vpop.f32.mrf.mxu0  ;;  %v675_v32 = vadd.f32 %v674_v5, %v3800_v39  ;;  %v1386_v0 = vld [vmem:[%s3588_s30 + $0x113] sm:$0xff] }
 0x148   : > { %v4001_v6 = vadd.f32 %v1556_v28, %v1331_v12  ;;  %3242 = vmatmul.msk.f32.gmra.mxu1 %vm273_vm0, %v228_v14  ;;  %3279 = vmatmul.msk.f32.gmra.mxu2 %vm273_vm0, %v1075_v63  ;;  %v230_v28 = vld [vmem:[%s3588_s30 + $0x100] sm:$0xff] }
 0x149   : > { %3316 = vmatmul.msk.f32.gmra.mxu3 %vm273_vm0, %v1077_v11  ;;  %3353 = vmatmul.msk.f32.gmra.mxu0 %vm273_vm0, %v1384_v19 }
 0x14b   : > { %v945_v56 = vpop.f32.mrf.mxu2 }
 0x14c   : > { %v1025_v22 = vadd.f32 %v945_v56, %v675_v32  ;;  %v1252_v13 = vpop.f32.mrf.mxu3  ;;  %v1080_v32 = vld [vmem:[%s3588_s30 + $0x11a] sm:$0xff] }
 0x14d   : > { %v677_v27 = vpop.f32.mrf.mxu1 }
 0x14e   : > { %v1332_v34 = vadd.f32 %v1252_v13, %v1025_v22  ;;  %v1562_v42 = vpop.f32.mrf.mxu0  ;;  %v678_v39 = vadd.f32 %v677_v27, %v3815_v46  ;;  %v1387_v22 = vld [vmem:[%s3588_s30 + $0x11b] sm:$0xff] }
 0x150   : > { %v4011_v29 = vadd.f32 %v1559_v35, %v1332_v34  ;;  %3243 = vmatmul.msk.f32.gmra.mxu1 %vm273_vm0, %v229_v21  ;;  %3280 = vmatmul.msk.f32.gmra.mxu2 %vm273_vm0, %v1076_v4  ;;  %v231_v35 = vld [vmem:[%s3588_s30 + $0x108] sm:$0xff] }
 0x151   : > { %3317 = vmatmul.msk.f32.gmra.mxu3 %vm273_vm0, %v1078_v18  ;;  %3354 = vmatmul.msk.f32.gmra.mxu0 %vm273_vm0, %v1385_v41 }
 0x153   : > { %v948_v63 = vpop.f32.mrf.mxu2 }
 0x154   : > { %v1026_v47 = vadd.f32 %v948_v63, %v678_v39  ;;  %v1255_v7 = vpop.f32.mrf.mxu3  ;;  %v1081_v39 = vld [vmem:[%s3588_s30 + $0x122] sm:$0xff] }
 0x155   : > { %v680_v50 = vpop.f32.mrf.mxu1 }
 0x156   : > { %v1333_v57 = vadd.f32 %v1255_v7, %v1026_v47  ;;  %v1565_v49 = vpop.f32.mrf.mxu0  ;;  %v681_v46 = vadd.f32 %v680_v50, %v3830_v53  ;;  %v1388_v47 = vld [vmem:[%s3588_s30 + $0x123] sm:$0xff] }
 0x158   : > { %v4021_v54 = vadd.f32 %v1562_v42, %v1333_v57  ;;  %3244 = vmatmul.msk.f32.gmra.mxu1 %vm273_vm0, %v230_v28  ;;  %3281 = vmatmul.msk.f32.gmra.mxu2 %vm273_vm0, %v1077_v11  ;;  %v232_v42 = vld [vmem:[%s3588_s30 + $0x110] sm:$0xff] }
 0x159   : > { %3318 = vmatmul.msk.f32.gmra.mxu3 %vm273_vm0, %v1079_v25  ;;  %3355 = vmatmul.msk.f32.gmra.mxu0 %vm273_vm0, %v1386_v0 }
 0x15b   : > { %v951_v4 = vpop.f32.mrf.mxu2 }
 0x15c   : > { %v1027_v5 = vadd.f32 %v951_v4, %v681_v46  ;;  %v1258_v14 = vpop.f32.mrf.mxu3  ;;  %v1082_v46 = vld [vmem:[%s3588_s30 + $0x12a] sm:$0xff] }
 0x15d   : > { %v683_v12 = vpop.f32.mrf.mxu1 }
 0x15e   : > { %v1334_v19 = vadd.f32 %v1258_v14, %v1027_v5  ;;  %v1568_v56 = vpop.f32.mrf.mxu0  ;;  %v684_v53 = vadd.f32 %v683_v12, %v3845_v60  ;;  %v1389_v5 = vld [vmem:[%s3588_s30 + $0x12b] sm:$0xff] }
 0x160   : > { %v4031_v13 = vadd.f32 %v1565_v49, %v1334_v19  ;;  %3245 = vmatmul.msk.f32.gmra.mxu1 %vm273_vm0, %v231_v35  ;;  %3282 = vmatmul.msk.f32.gmra.mxu2 %vm273_vm0, %v1078_v18  ;;  %v233_v49 = vld [vmem:[%s3588_s30 + $0x118] sm:$0xff] }
 0x161   : > { %3319 = vmatmul.msk.f32.gmra.mxu3 %vm273_vm0, %v1080_v32  ;;  %3356 = vmatmul.msk.f32.gmra.mxu0 %vm273_vm0, %v1387_v22  ;;  %v1968_v22 = vld [vmem:[%s3588_s30 + $0x24] sm:$0xff] }
 0x163   : > { %v954_v11 = vpop.f32.mrf.mxu2 }
 0x164   : > { %v1028_v27 = vadd.f32 %v954_v11, %v684_v53  ;;  %v1261_v21 = vpop.f32.mrf.mxu3  ;;  %v2275_v11 = vld [vmem:[%s3588_s30 + $0x25] sm:$0xff] }
 0x165   : > { %v686_v34 = vpop.f32.mrf.mxu1 }
 0x166   : > { %v1335_v41 = vadd.f32 %v1261_v21, %v1028_v27  ;;  %v1571_v63 = vpop.f32.mrf.mxu0  ;;  %v687_v60 = vadd.f32 %v686_v34, %v3736_v9  ;;  %v2582_v21 = vld [vmem:[%s3588_s30 + $0x26] sm:$0xff] }
 0x168   : > { %v4041_v7 = vadd.f32 %v1568_v56, %v1335_v41  ;;  %3246 = vmatmul.msk.f32.gmra.mxu1 %vm273_vm0, %v232_v42  ;;  %3283 = vmatmul.msk.f32.gmra.mxu2 %vm273_vm0, %v1079_v25  ;;  %v1661_v56 = vld [vmem:[%s3588_s30 + $0x14] sm:$0xff] }
 0x169   : > { %3320 = vmatmul.msk.f32.gmra.mxu3 %vm273_vm0, %v1081_v39  ;;  %3357 = vmatmul.msk.f32.gmra.mxu0 %vm273_vm0, %v1388_v47  ;;  %v1969_v47 = vld [vmem:[%s3588_s30 + $0x2c] sm:$0xff] }
 0x16b   : > { %v957_v18 = vpop.f32.mrf.mxu2 }
 0x16c   : > { %v1029_v50 = vadd.f32 %v957_v18, %v687_v60  ;;  %v1264_v28 = vpop.f32.mrf.mxu3  ;;  %v2276_v18 = vld [vmem:[%s3588_s30 + $0x2d] sm:$0xff] }
 0x16d   : > { %v689_v57 = vpop.f32.mrf.mxu1 }
 0x16e   : > { %v1336_v0 = vadd.f32 %v1264_v28, %v1029_v50  ;;  %v1574_v4 = vpop.f32.mrf.mxu0  ;;  %v690_v9 = vadd.f32 %v689_v57, %v3751_v16  ;;  %v2583_v28 = vld [vmem:[%s3588_s30 + $0x2e] sm:$0xff] }
 0x170   : > { %v4051_v25 = vadd.f32 %v1571_v63, %v1336_v0  ;;  %3247 = vmatmul.msk.f32.gmra.mxu1 %vm273_vm0, %v233_v49  ;;  %3284 = vmatmul.msk.f32.gmra.mxu2 %vm273_vm0, %v1080_v32  ;;  %v1662_v63 = vld [vmem:[%s3588_s30 + $0x1c] sm:$0xff] }
 0x171   : > { %3321 = vmatmul.msk.f32.gmra.mxu3 %vm273_vm0, %v1082_v46  ;;  %3358 = vmatmul.msk.f32.gmra.mxu0 %vm273_vm0, %v1389_v5  ;;  %v1970_v5 = vld [vmem:[%s3588_s30 + $0x34] sm:$0xff] }
 0x173   : > { %v960_v14 = vpop.f32.mrf.mxu2 }
 0x174   : > { %v1030_v12 = vadd.f32 %v960_v14, %v690_v9  ;;  %v1267_v35 = vpop.f32.mrf.mxu3  ;;  %v2277_v14 = vld [vmem:[%s3588_s30 + $0x35] sm:$0xff] }
 0x175   : > { %v692_v19 = vpop.f32.mrf.mxu1 }
 0x176   : > { %v1337_v53 = vadd.f32 %v1267_v35, %v1030_v12  ;;  %v1577_v27 = vpop.f32.mrf.mxu0  ;;  %v693_v16 = vadd.f32 %v692_v19, %v3766_v23  ;;  %v2584_v35 = vld [vmem:[%s3588_s30 + $0x36] sm:$0xff] }
 0x178   : > { %v4062_v32 = vadd.f32 %v1574_v4, %v1337_v53  ;;  %3360 = vmatmul.msk.f32.vlgmr.msra.gmra.mxu1 %vm273_vm0, %v1661_v56  ;;  %3397 = vmatmul.msk.f32.vlgmr.msra.gmra.mxu2 %vm273_vm0, %v1968_v22 }
 0x179   : > { %3434 = vmatmul.msk.f32.vlgmr.msra.gmra.mxu3 %vm273_vm0, %v2275_v11  ;;  %3471 = vmatmul.msk.f32.vlgmr.msra.gmra.mxu0 %vm273_vm0, %v2582_v21  ;;  %v1971_v21 = vld [vmem:[%s3588_s30 + $0x3c] sm:$0xff] }
 0x17b   : > { %v963_v34 = vpop.f32.mrf.mxu2 }
 0x17c   : > { %v1031_v42 = vadd.f32 %v963_v34, %v693_v16  ;;  %v1270_v41 = vpop.f32.mrf.mxu3  ;;  %v2278_v34 = vld [vmem:[%s3588_s30 + $0x3d] sm:$0xff] }
 0x17d   : > { %v695_v39 = vpop.f32.mrf.mxu1 }
 0x17e   : > { %v1338_v60 = vadd.f32 %v1270_v41, %v1031_v42  ;;  %v1580_v50 = vpop.f32.mrf.mxu0  ;;  %v696_v23 = vadd.f32 %v695_v39, %v3781_v30 }
 0x180   : > { %v4073_v57 = vadd.f32 %v1577_v27, %v1338_v60  ;;  %3361 = vmatmul.msk.f32.gmra.mxu1 %vm273_vm0, %v1662_v63  ;;  %3398 = vmatmul.msk.f32.gmra.mxu2 %vm273_vm0, %v1969_v47 }
 0x181   : > { %3435 = vmatmul.msk.f32.gmra.mxu3 %vm273_vm0, %v2276_v18  ;;  %3472 = vmatmul.msk.f32.gmra.mxu0 %vm273_vm0, %v2583_v28 }
 0x183   : > { %v966_v49 = vpop.f32.mrf.mxu2 }
 0x184   : > { %v1032_v0 = vadd.f32 %v966_v49, %v696_v23  ;;  %v1273_v46 = vpop.f32.mrf.mxu3  ;;  %v2279_v23 = vld [vmem:[%s3588_s30 + $0x45] sm:$0xff] }
 0x185   : > { %v698_v4 = vpop.f32.mrf.mxu1 }
 0x186   : > { %v1339_v9 = vadd.f32 %v1273_v46, %v1032_v0  ;;  %v1583_v12 = vpop.f32.mrf.mxu0  ;;  %v699_v30 = vadd.f32 %v698_v4, %v3796_v37 }
 0x188   : > { %v4083_v19 = vadd.f32 %v1580_v50, %v1339_v9  ;;  %3362 = vmatmul.msk.f32.gmra.mxu1 %vm273_vm0, %v1968_v22  ;;  %3399 = vmatmul.msk.f32.gmra.mxu2 %vm273_vm0, %v1970_v5  ;;  %v2585_v22 = vld [vmem:[%s3588_s30 + $0x3e] sm:$0xff] }
 0x189   : > { %3436 = vmatmul.msk.f32.gmra.mxu3 %vm273_vm0, %v2277_v14  ;;  %3473 = vmatmul.msk.f32.gmra.mxu0 %vm273_vm0, %v2584_v35  ;;  %v1972_v50 = vld [vmem:[%s3588_s30 + $0x44] sm:$0xff] }
 0x18b   : > { %v969_v56 = vpop.f32.mrf.mxu2 }
 0x18c   : > { %v1033_v53 = vadd.f32 %v969_v56, %v699_v30  ;;  %v1276_v11 = vpop.f32.mrf.mxu3  ;;  %v2280_v30 = vld [vmem:[%s3588_s30 + $0x4d] sm:$0xff] }
 0x18d   : > { %v701_v27 = vpop.f32.mrf.mxu1 }
 0x18e   : > { %v1340_v16 = vadd.f32 %v1276_v11, %v1033_v53  ;;  %v1586_v42 = vpop.f32.mrf.mxu0  ;;  %v702_v37 = vadd.f32 %v701_v27, %v3811_v44 }
 0x190   : > { %v4093_v41 = vadd.f32 %v1583_v12, %v1340_v16  ;;  %3363 = vmatmul.msk.f32.gmra.mxu1 %vm273_vm0, %v1969_v47  ;;  %3400 = vmatmul.msk.f32.gmra.mxu2 %vm273_vm0, %v1971_v21  ;;  %v2586_v47 = vld [vmem:[%s3588_s30 + $0x46] sm:$0xff] }
 0x191   : > { %3437 = vmatmul.msk.f32.gmra.mxu3 %vm273_vm0, %v2278_v34  ;;  %3474 = vmatmul.msk.f32.gmra.mxu0 %vm273_vm0, %v2585_v22  ;;  %v1973_v12 = vld [vmem:[%s3588_s30 + $0x4c] sm:$0xff] }
 0x193   : > { %v972_v39 = vpop.f32.mrf.mxu2 }
 0x194   : > { %v1034_v63 = vadd.f32 %v972_v39, %v702_v37  ;;  %v1279_v60 = vpop.f32.mrf.mxu3  ;;  %v2281_v37 = vld [vmem:[%s3588_s30 + $0x55] sm:$0xff] }
 0x195   : > { %v704_v18 = vpop.f32.mrf.mxu1 }
 0x196   : > { %v1341_v28 = vadd.f32 %v1279_v60, %v1034_v63  ;;  %v1589_v49 = vpop.f32.mrf.mxu0  ;;  %v705_v44 = vadd.f32 %v704_v18, %v3826_v51 }
 0x198   : > { %v4103_v0 = vadd.f32 %v1586_v42, %v1341_v28  ;;  %3364 = vmatmul.msk.f32.gmra.mxu1 %vm273_vm0, %v1970_v5  ;;  %3401 = vmatmul.msk.f32.gmra.mxu2 %vm273_vm0, %v1972_v50  ;;  %v2587_v5 = vld [vmem:[%s3588_s30 + $0x4e] sm:$0xff] }
 0x199   : > { %3438 = vmatmul.msk.f32.gmra.mxu3 %vm273_vm0, %v2279_v23  ;;  %3475 = vmatmul.msk.f32.gmra.mxu0 %vm273_vm0, %v2586_v47  ;;  %v1974_v42 = vld [vmem:[%s3588_s30 + $0x54] sm:$0xff] }
 0x19b   : > { %v975_v46 = vpop.f32.mrf.mxu2 }
 0x19c   : > { %v1035_v4 = vadd.f32 %v975_v46, %v705_v44  ;;  %v1282_v9 = vpop.f32.mrf.mxu3  ;;  %v2282_v44 = vld [vmem:[%s3588_s30 + $0x5d] sm:$0xff] }
 0x19d   : > { %v707_v14 = vpop.f32.mrf.mxu1 }
 0x19e   : > { %v1342_v35 = vadd.f32 %v1282_v9, %v1035_v4  ;;  %v1592_v56 = vpop.f32.mrf.mxu0  ;;  %v708_v51 = vadd.f32 %v707_v14, %v3841_v58 }
 0x1a0   : > { %v4113_v53 = vadd.f32 %v1589_v49, %v1342_v35  ;;  %3365 = vmatmul.msk.f32.gmra.mxu1 %vm273_vm0, %v1971_v21  ;;  %3402 = vmatmul.msk.f32.gmra.mxu2 %vm273_vm0, %v1973_v12  ;;  %v2588_v21 = vld [vmem:[%s3588_s30 + $0x56] sm:$0xff] }
 0x1a1   : > { %3439 = vmatmul.msk.f32.gmra.mxu3 %vm273_vm0, %v2280_v30  ;;  %3476 = vmatmul.msk.f32.gmra.mxu0 %vm273_vm0, %v2587_v5  ;;  %v1975_v49 = vld [vmem:[%s3588_s30 + $0x5c] sm:$0xff] }
 0x1a3   : > { %v978_v11 = vpop.f32.mrf.mxu2 }
 0x1a4   : > { %v1036_v27 = vadd.f32 %v978_v11, %v708_v51  ;;  %v1285_v16 = vpop.f32.mrf.mxu3  ;;  %v2283_v51 = vld [vmem:[%s3588_s30 + $0x65] sm:$0xff] }
 0x1a5   : > { %v710_v34 = vpop.f32.mrf.mxu1 }
 0x1a6   : > { %v1343_v22 = vadd.f32 %v1285_v16, %v1036_v27  ;;  %v1595_v39 = vpop.f32.mrf.mxu0  ;;  %v711_v58 = vadd.f32 %v710_v34, %v3856_v1 }
 0x1a8   : > { %v4123_v63 = vadd.f32 %v1592_v56, %v1343_v22  ;;  %3366 = vmatmul.msk.f32.gmra.mxu1 %vm273_vm0, %v1972_v50  ;;  %3403 = vmatmul.msk.f32.gmra.mxu2 %vm273_vm0, %v1974_v42  ;;  %v2589_v50 = vld [vmem:[%s3588_s30 + $0x5e] sm:$0xff] }
 0x1a9   : > { %3440 = vmatmul.msk.f32.gmra.mxu3 %vm273_vm0, %v2281_v37  ;;  %3477 = vmatmul.msk.f32.gmra.mxu0 %vm273_vm0, %v2588_v21  ;;  %v1976_v56 = vld [vmem:[%s3588_s30 + $0x64] sm:$0xff] }
 0x1ab   : > { %v981_v60 = vpop.f32.mrf.mxu2 }
 0x1ac   : > { %v1037_v18 = vadd.f32 %v981_v60, %v711_v58  ;;  %v1288_v28 = vpop.f32.mrf.mxu3  ;;  %v2284_v58 = vld [vmem:[%s3588_s30 + $0x6d] sm:$0xff] }
 0x1ad   : > { %v713_v23 = vpop.f32.mrf.mxu1 }
 0x1ae   : > { %v1344_v47 = vadd.f32 %v1288_v28, %v1037_v18  ;;  %v1598_v46 = vpop.f32.mrf.mxu0  ;;  %v714_v1 = vadd.f32 %v713_v23, %v3738_v10 }
 0x1b0   : > { %v4133_v4 = vadd.f32 %v1595_v39, %v1344_v47  ;;  %3367 = vmatmul.msk.f32.gmra.mxu1 %vm273_vm0, %v1973_v12  ;;  %3404 = vmatmul.msk.f32.gmra.mxu2 %vm273_vm0, %v1975_v49  ;;  %v2590_v12 = vld [vmem:[%s3588_s30 + $0x66] sm:$0xff] }
 0x1b1   : > { %3441 = vmatmul.msk.f32.gmra.mxu3 %vm273_vm0, %v2282_v44  ;;  %3478 = vmatmul.msk.f32.gmra.mxu0 %vm273_vm0, %v2589_v50  ;;  %v1977_v39 = vld [vmem:[%s3588_s30 + $0x6c] sm:$0xff] }
 0x1b3   : > { %v984_v9 = vpop.f32.mrf.mxu2 }
 0x1b4   : > { %v1038_v14 = vadd.f32 %v984_v9, %v714_v1  ;;  %v1291_v35 = vpop.f32.mrf.mxu3  ;;  %v2285_v1 = vld [vmem:[%s3588_s30 + $0x75] sm:$0xff] }
 0x1b5   : > { %v716_v30 = vpop.f32.mrf.mxu1 }
 0x1b6   : > { %v1345_v5 = vadd.f32 %v1291_v35, %v1038_v14  ;;  %v1601_v11 = vpop.f32.mrf.mxu0  ;;  %v717_v10 = vadd.f32 %v716_v30, %v3753_v17 }
 0x1b8   : > { %v4143_v27 = vadd.f32 %v1598_v46, %v1345_v5  ;;  %3368 = vmatmul.msk.f32.gmra.mxu1 %vm273_vm0, %v1974_v42  ;;  %3405 = vmatmul.msk.f32.gmra.mxu2 %vm273_vm0, %v1976_v56  ;;  %v2591_v42 = vld [vmem:[%s3588_s30 + $0x6e] sm:$0xff] }
 0x1b9   : > { %3442 = vmatmul.msk.f32.gmra.mxu3 %vm273_vm0, %v2283_v51  ;;  %3479 = vmatmul.msk.f32.gmra.mxu0 %vm273_vm0, %v2590_v12  ;;  %v1978_v46 = vld [vmem:[%s3588_s30 + $0x74] sm:$0xff] }
 0x1bb   : > { %v987_v16 = vpop.f32.mrf.mxu2 }
 0x1bc   : > { %v1039_v34 = vadd.f32 %v987_v16, %v717_v10  ;;  %v1294_v22 = vpop.f32.mrf.mxu3  ;;  %v2286_v10 = vld [vmem:[%s3588_s30 + $0x7d] sm:$0xff] }
 0x1bd   : > { %v719_v37 = vpop.f32.mrf.mxu1 }
 0x1be   : > { %v1346_v21 = vadd.f32 %v1294_v22, %v1039_v34  ;;  %v1604_v60 = vpop.f32.mrf.mxu0  ;;  %v720_v17 = vadd.f32 %v719_v37, %v3768_v24 }
 0x1c0   : > { %v4153_v18 = vadd.f32 %v1601_v11, %v1346_v21  ;;  %3369 = vmatmul.msk.f32.gmra.mxu1 %vm273_vm0, %v1975_v49  ;;  %3406 = vmatmul.msk.f32.gmra.mxu2 %vm273_vm0, %v1977_v39  ;;  %v2592_v49 = vld [vmem:[%s3588_s30 + $0x76] sm:$0xff] }
 0x1c1   : > { %3443 = vmatmul.msk.f32.gmra.mxu3 %vm273_vm0, %v2284_v58  ;;  %3480 = vmatmul.msk.f32.gmra.mxu0 %vm273_vm0, %v2591_v42  ;;  %v1979_v11 = vld [vmem:[%s3588_s30 + $0x7c] sm:$0xff] }
 0x1c3   : > { %v990_v28 = vpop.f32.mrf.mxu2 }
 0x1c4   : > { %v1040_v23 = vadd.f32 %v990_v28, %v720_v17  ;;  %v1297_v47 = vpop.f32.mrf.mxu3  ;;  %v2287_v17 = vld [vmem:[%s3588_s30 + $0x85] sm:$0xff] }
 0x1c5   : > { %v722_v44 = vpop.f32.mrf.mxu1 }
 0x1c6   : > { %v1347_v50 = vadd.f32 %v1297_v47, %v1040_v23  ;;  %v1607_v9 = vpop.f32.mrf.mxu0  ;;  %v723_v24 = vadd.f32 %v722_v44, %v3783_v31 }
 0x1c8   : > { %v4163_v14 = vadd.f32 %v1604_v60, %v1347_v50  ;;  %3370 = vmatmul.msk.f32.gmra.mxu1 %vm273_vm0, %v1976_v56  ;;  %3407 = vmatmul.msk.f32.gmra.mxu2 %vm273_vm0, %v1978_v46  ;;  %v2593_v56 = vld [vmem:[%s3588_s30 + $0x7e] sm:$0xff] }
 0x1c9   : > { %3444 = vmatmul.msk.f32.gmra.mxu3 %vm273_vm0, %v2285_v1  ;;  %3481 = vmatmul.msk.f32.gmra.mxu0 %vm273_vm0, %v2592_v49  ;;  %v1980_v60 = vld [vmem:[%s3588_s30 + $0x84] sm:$0xff] }
 0x1cb   : > { %v993_v35 = vpop.f32.mrf.mxu2 }
 0x1cc   : > { %v1041_v30 = vadd.f32 %v993_v35, %v723_v24  ;;  %v1300_v5 = vpop.f32.mrf.mxu3  ;;  %v2288_v24 = vld [vmem:[%s3588_s30 + $0x8d] sm:$0xff] }
 0x1cd   : > { %v725_v51 = vpop.f32.mrf.mxu1 }
 0x1ce   : > { %v1348_v12 = vadd.f32 %v1300_v5, %v1041_v30  ;;  %v1610_v16 = vpop.f32.mrf.mxu0  ;;  %v726_v31 = vadd.f32 %v725_v51, %v3798_v38 }
 0x1d0   : > { %v4173_v34 = vadd.f32 %v1607_v9, %v1348_v12  ;;  %3371 = vmatmul.msk.f32.gmra.mxu1 %vm273_vm0, %v1977_v39  ;;  %3408 = vmatmul.msk.f32.gmra.mxu2 %vm273_vm0, %v1979_v11  ;;  %v2594_v39 = vld [vmem:[%s3588_s30 + $0x86] sm:$0xff] }
 0x1d1   : > { %3445 = vmatmul.msk.f32.gmra.mxu3 %vm273_vm0, %v2286_v10  ;;  %3482 = vmatmul.msk.f32.gmra.mxu0 %vm273_vm0, %v2593_v56  ;;  %v1981_v9 = vld [vmem:[%s3588_s30 + $0x8c] sm:$0xff] }
 0x1d3   : > { %v996_v22 = vpop.f32.mrf.mxu2 }
 0x1d4   : > { %v1042_v37 = vadd.f32 %v996_v22, %v726_v31  ;;  %v1303_v21 = vpop.f32.mrf.mxu3  ;;  %v2289_v31 = vld [vmem:[%s3588_s30 + $0x95] sm:$0xff] }
 0x1d5   : > { %v728_v58 = vpop.f32.mrf.mxu1 }
 0x1d6   : > { %v1349_v42 = vadd.f32 %v1303_v21, %v1042_v37  ;;  %v1613_v28 = vpop.f32.mrf.mxu0  ;;  %v729_v38 = vadd.f32 %v728_v58, %v3813_v45 }
 0x1d8   : > { %v4183_v23 = vadd.f32 %v1610_v16, %v1349_v42  ;;  %3372 = vmatmul.msk.f32.gmra.mxu1 %vm273_vm0, %v1978_v46  ;;  %3409 = vmatmul.msk.f32.gmra.mxu2 %vm273_vm0, %v1980_v60  ;;  %v2595_v46 = vld [vmem:[%s3588_s30 + $0x8e] sm:$0xff] }
 0x1d9   : > { %3446 = vmatmul.msk.f32.gmra.mxu3 %vm273_vm0, %v2287_v17  ;;  %3483 = vmatmul.msk.f32.gmra.mxu0 %vm273_vm0, %v2594_v39  ;;  %v1982_v16 = vld [vmem:[%s3588_s30 + $0x94] sm:$0xff] }
 0x1db   : > { %v999_v47 = vpop.f32.mrf.mxu2 }
 0x1dc   : > { %v1043_v44 = vadd.f32 %v999_v47, %v729_v38  ;;  %v1306_v50 = vpop.f32.mrf.mxu3  ;;  %v2290_v38 = vld [vmem:[%s3588_s30 + $0x9d] sm:$0xff] }
 0x1dd   : > { %v731_v1 = vpop.f32.mrf.mxu1 }
 0x1de   : > { %v1350_v49 = vadd.f32 %v1306_v50, %v1043_v44  ;;  %v1616_v35 = vpop.f32.mrf.mxu0  ;;  %v732_v45 = vadd.f32 %v731_v1, %v3828_v52 }
 0x1e0   : > { %v4193_v30 = vadd.f32 %v1613_v28, %v1350_v49  ;;  %3373 = vmatmul.msk.f32.gmra.mxu1 %vm273_vm0, %v1979_v11  ;;  %3410 = vmatmul.msk.f32.gmra.mxu2 %vm273_vm0, %v1981_v9  ;;  %v2596_v11 = vld [vmem:[%s3588_s30 + $0x96] sm:$0xff] }
 0x1e1   : > { %3447 = vmatmul.msk.f32.gmra.mxu3 %vm273_vm0, %v2288_v24  ;;  %3484 = vmatmul.msk.f32.gmra.mxu0 %vm273_vm0, %v2595_v46  ;;  %v1983_v28 = vld [vmem:[%s3588_s30 + $0x9c] sm:$0xff] }
 0x1e3   : > { %v1002_v5 = vpop.f32.mrf.mxu2 }
 0x1e4   : > { %v1044_v51 = vadd.f32 %v1002_v5, %v732_v45  ;;  %v1309_v12 = vpop.f32.mrf.mxu3  ;;  %v2291_v45 = vld [vmem:[%s3588_s30 + $0xa5] sm:$0xff] }
 0x1e5   : > { %v734_v10 = vpop.f32.mrf.mxu1 }
 0x1e6   : > { %v1351_v56 = vadd.f32 %v1309_v12, %v1044_v51  ;;  %v1619_v22 = vpop.f32.mrf.mxu0  ;;  %v735_v52 = vadd.f32 %v734_v10, %v3843_v59  ;;  %v2598_v51 = vld [vmem:[%s3588_s30 + $0xa6] sm:$0xff] }
 0x1e8   : > { %v4203_v37 = vadd.f32 %v1616_v35, %v1351_v56  ;;  %3374 = vmatmul.msk.f32.gmra.mxu1 %vm273_vm0, %v1980_v60  ;;  %3411 = vmatmul.msk.f32.gmra.mxu2 %vm273_vm0, %v1982_v16  ;;  %v2597_v60 = vld [vmem:[%s3588_s30 + $0x9e] sm:$0xff] }
 0x1e9   : > { %3448 = vmatmul.msk.f32.gmra.mxu3 %vm273_vm0, %v2289_v31  ;;  %3485 = vmatmul.msk.f32.gmra.mxu0 %vm273_vm0, %v2596_v11  ;;  %v1984_v35 = vld [vmem:[%s3588_s30 + $0xa4] sm:$0xff] }
 0x1eb   : > { %v1005_v21 = vpop.f32.mrf.mxu2 }
 0x1ec   : > { %v1045_v58 = vadd.f32 %v1005_v21, %v735_v52  ;;  %v1312_v42 = vpop.f32.mrf.mxu3  ;;  %v4234_v52 = vld [vmem:[%s4573_s2] ss:$0 sm:$0xff] }
 0x1ed   : > { %v737_v17 = vpop.f32.mrf.mxu1 }
 0x1ee   : > { %v1352_v39 = vadd.f32 %v1312_v42, %v1045_v58  ;;  %v1622_v47 = vpop.f32.mrf.mxu0  ;;  %v738_v59 = vadd.f32 %v737_v17, %v3858_v2  ;;  %v2599_v58 = vld [vmem:[%s3588_s30 + $0xae] sm:$0xff] }
 0x1f0   : > { %v4213_v44 = vadd.f32 %v1619_v22, %v1352_v39  ;;  %3375 = vmatmul.msk.f32.gmra.mxu1 %vm273_vm0, %v1981_v9  ;;  %3412 = vmatmul.msk.f32.gmra.mxu2 %vm273_vm0, %v1983_v28  ;;  %v1985_v22 = vld [vmem:[%s3588_s30 + $0xac] sm:$0xff] }
 0x1f1   : > { %3449 = vmatmul.msk.f32.gmra.mxu3 %vm273_vm0, %v2290_v38  ;;  %3486 = vmatmul.msk.f32.gmra.mxu0 %vm273_vm0, %v2597_v60 }
 0x1f3   : > { %v1008_v50 = vpop.f32.mrf.mxu2 }
 0x1f4   : > { %v1046_v1 = vadd.f32 %v1008_v50, %v738_v59  ;;  %v1315_v49 = vpop.f32.mrf.mxu3 }
 0x1f5   : > { %v1824_v24 = vpop.f32.mrf.mxu1 }
 0x1f6   : > { %v1353_v46 = vadd.f32 %v1315_v49, %v1046_v1  ;;  %v2745_v5 = vpop.f32.mrf.mxu0  ;;  %v1932_v2 = vadd.f32 %v1824_v24, %v3871_v36  ;;  %v4241_v36 = vld [vmem:[%s4574_s3] ss:$0 sm:$0xff] }
 0x1f8   : > { %v4223_v9 = vadd.f32 %v1622_v47, %v1353_v46  ;;  %3376 = vmatmul.msk.f32.gmra.mxu1 %vm273_vm0, %v1982_v16  ;;  %3413 = vmatmul.msk.f32.gmra.mxu2 %vm273_vm0, %v1984_v35  ;;  %v2292_v16 = vld [vmem:[%s3588_s30 + $0xad] sm:$0xff]  ;;  %v2600_v46 = vld [vmem:[%s3588_s30 + $0xb6] sm:$0xff] }
 0x1f9   : > { %3450 = vmatmul.msk.f32.gmra.mxu3 %vm273_vm0, %v2291_v45  ;;  %3487 = vmatmul.msk.f32.gmra.mxu0 %vm273_vm0, %v2598_v51 }
 0x1fb   : > { %v2131_v12 = vpop.f32.mrf.mxu2 }
 0x1fc   : > { %v2239_v10 = vadd.f32 %v2131_v12, %v1932_v2  ;;  %v2438_v56 = vpop.f32.mrf.mxu3 }
 0x1fd   : > { %v1827_v31 = vpop.f32.mrf.mxu1 }
 0x1fe   : > { %v2546_v11 = vadd.f32 %v2438_v56, %v2239_v10  ;;  %v2748_v21 = vpop.f32.mrf.mxu0  ;;  %v1933_v17 = vadd.f32 %v1827_v31, %v3881_v61  ;;  %v2293_v61 = vld [vmem:[%s3588_s30 + $0xb5] sm:$0xff] }
 0x200   : > { %v2853_v42 = vadd.f32 %v2745_v5, %v2546_v11  ;;  %3377 = vmatmul.msk.f32.gmra.mxu1 %vm273_vm0, %v1983_v28  ;;  %3414 = vmatmul.msk.f32.gmra.mxu2 %vm273_vm0, %v1985_v22  ;;  %v1986_v28 = vld [vmem:[%s3588_s30 + $0xb4] sm:$0xff]  ;;  %v1987_v11 = vld [vmem:[%s3588_s30 + $0xbc] sm:$0xff] }
 0x201   : > { %3451 = vmatmul.msk.f32.gmra.mxu3 %vm273_vm0, %v2292_v16  ;;  %3488 = vmatmul.msk.f32.gmra.mxu0 %vm273_vm0, %v2599_v58  ;;  %v2294_v58 = vld [vmem:[%s3588_s30 + $0xbd] sm:$0xff] }
 0x202   : > { %v2893_v39 = vmul.f32 %v4234_v52, %v2853_v42 }
 0x203   : > { %v2134_v38 = vpop.f32.mrf.mxu2 }
 0x204   : > { %v2933_v47 = vadd.f32 %v4241_v36, %v2893_v39  ;;  %v2240_v60 = vadd.f32 %v2134_v38, %v1933_v17  ;;  %v2441_v59 = vpop.f32.mrf.mxu3  ;;  %v2601_v17 = vld [vmem:[%s3588_s30 + $0xbe] sm:$0xff] }
 0x205   : > { %v1830_v50 = vpop.f32.mrf.mxu1 }
 0x206   : > { %vm2969_vm1 = vcmp.gt.f32.partialorder %v2933_v47, 0.0  ;;  %v3005_v1 = vmul.f32 0.01, %v2933_v47  ;;  %v2547_v49 = vadd.f32 %v2441_v59, %v2240_v60  ;;  %v2751_v24 = vpop.f32.mrf.mxu0  ;;  %v1934_v51 = vadd.f32 %v1830_v50, %v3891_v20 }
 0x208   : > { %v3041_v45 = vsel %vm2969_vm1, %v2933_v47, %v3005_v1  ;;  %v2854_v5 = vadd.f32 %v2748_v21, %v2547_v49  ;;  %3378 = vmatmul.msk.f32.gmra.mxu1 %vm273_vm0, %v1984_v35  ;;  %3415 = vmatmul.msk.f32.gmra.mxu2 %vm273_vm0, %v1986_v28  ;;  %v1988_v49 = vld [vmem:[%s3588_s30 + $0xc4] sm:$0xff] }
 0x209   : > { %3077 = vst.msk [vmem:[%s4255_s22] sm:$0xff] %vm273_vm0, %v3041_v45  ;;  %3452 = vmatmul.msk.f32.gmra.mxu3 %vm273_vm0, %v2293_v61  ;;  %3489 = vmatmul.msk.f32.gmra.mxu0 %vm273_vm0, %v2600_v46  ;;  %v2295_v46 = vld [vmem:[%s3588_s30 + $0xc5] sm:$0xff] }
 0x20a   : > { %v2894_v2 = vmul.f32 %v4234_v52, %v2854_v5  ;;  %v2602_v5 = vld [vmem:[%s3588_s30 + $0xc6] sm:$0xff] }
 0x20b   : > { %v2137_v12 = vpop.f32.mrf.mxu2 }
 0x20c   : > { %v2934_v10 = vadd.f32 %v4241_v36, %v2894_v2  ;;  %v2241_v56 = vadd.f32 %v2137_v12, %v1934_v51  ;;  %v2444_v35 = vpop.f32.mrf.mxu3 }
 0x20d   : > { %v1833_v31 = vpop.f32.mrf.mxu1 }
 0x20e   : > { %vm2970_vm2 = vcmp.gt.f32.partialorder %v2934_v10, 0.0  ;;  %v3006_v16 = vmul.f32 0.01, %v2934_v10  ;;  %v2548_v21 = vadd.f32 %v2444_v35, %v2241_v56  ;;  %v2754_v42 = vpop.f32.mrf.mxu0  ;;  %v1935_v20 = vadd.f32 %v1833_v31, %v3901_v43 }
 0x210   : > { %v3042_v39 = vsel %vm2970_vm2, %v2934_v10, %v3006_v16  ;;  %v2855_v38 = vadd.f32 %v2751_v24, %v2548_v21  ;;  %3379 = vmatmul.msk.f32.gmra.mxu1 %vm273_vm0, %v1985_v22  ;;  %3416 = vmatmul.msk.f32.gmra.mxu2 %vm273_vm0, %v1987_v11  ;;  %v1989_v16 = vld [vmem:[%s3588_s30 + $0xcc] sm:$0xff] }
 0x211   : > { %3078 = vst.msk [vmem:[%s4255_s22 + $0x8] sm:$0xff] %vm273_vm0, %v3042_v39  ;;  %3453 = vmatmul.msk.f32.gmra.mxu3 %vm273_vm0, %v2294_v58  ;;  %3490 = vmatmul.msk.f32.gmra.mxu0 %vm273_vm0, %v2601_v17  ;;  %v2603_v39 = vld [vmem:[%s3588_s30 + $0xce] sm:$0xff] }
 0x212   : > { %v2895_v47 = vmul.f32 %v4234_v52, %v2855_v38 }
 0x213   : > { %v2140_v60 = vpop.f32.mrf.mxu2 }
 0x214   : > { %v2935_v59 = vadd.f32 %v4241_v36, %v2895_v47  ;;  %v2242_v50 = vadd.f32 %v2140_v60, %v1935_v20  ;;  %v2447_v22 = vpop.f32.mrf.mxu3 }
 0x215   : > { %v1836_v1 = vpop.f32.mrf.mxu1 }
 0x216   : > { %vm2971_vm3 = vcmp.gt.f32.partialorder %v2935_v59, 0.0  ;;  %v3007_v61 = vmul.f32 0.01, %v2935_v59  ;;  %v2549_v24 = vadd.f32 %v2447_v22, %v2242_v50  ;;  %v2757_v45 = vpop.f32.mrf.mxu0  ;;  %v1936_v43 = vadd.f32 %v1836_v1, %v3911_v3  ;;  %v1990_v1 = vld [vmem:[%s3588_s30 + $0xd4] sm:$0xff] }
 0x218   : > { %v3043_v51 = vsel %vm2971_vm3, %v2935_v59, %v3007_v61  ;;  %v2856_v2 = vadd.f32 %v2754_v42, %v2549_v24  ;;  %3380 = vmatmul.msk.f32.gmra.mxu1 %vm273_vm0, %v1986_v28  ;;  %3417 = vmatmul.msk.f32.gmra.mxu2 %vm273_vm0, %v1988_v49  ;;  %v2296_v42 = vld [vmem:[%s3588_s30 + $0xcd] sm:$0xff] }
 0x219   : > { %3079 = vst.msk [vmem:[%s4255_s22 + $0x10] sm:$0xff] %vm273_vm0, %v3043_v51  ;;  %3454 = vmatmul.msk.f32.gmra.mxu3 %vm273_vm0, %v2295_v46  ;;  %3491 = vmatmul.msk.f32.gmra.mxu0 %vm273_vm0, %v2602_v5  ;;  %v2297_v46 = vld [vmem:[%s3588_s30 + $0xd5] sm:$0xff] }
 0x21a   : > { %v2896_v12 = vmul.f32 %v4234_v52, %v2856_v2  ;;  %v2604_v5 = vld [vmem:[%s3588_s30 + $0xd6] sm:$0xff] }
 0x21b   : > { %v2143_v10 = vpop.f32.mrf.mxu2 }
 0x21c   : > { %v2936_v56 = vadd.f32 %v4241_v36, %v2896_v12  ;;  %v2243_v35 = vadd.f32 %v2143_v10, %v1936_v43  ;;  %v2450_v28 = vpop.f32.mrf.mxu3 }
 0x21d   : > { %v1839_v31 = vpop.f32.mrf.mxu1 }
 0x21e   : > { %vm2972_vm4 = vcmp.gt.f32.partialorder %v2936_v56, 0.0  ;;  %v3008_v21 = vmul.f32 0.01, %v2936_v56  ;;  %v2550_v58 = vadd.f32 %v2450_v28, %v2243_v35  ;;  %v2760_v17 = vpop.f32.mrf.mxu0  ;;  %v1937_v3 = vadd.f32 %v1839_v31, %v3921_v26  ;;  %v1991_v28 = vld [vmem:[%s3588_s30 + $0xdc] sm:$0xff] }
 0x220   : > { %v3044_v38 = vsel %vm2972_vm4, %v2936_v56, %v3008_v21  ;;  %v2857_v20 = vadd.f32 %v2757_v45, %v2550_v58  ;;  %3381 = vmatmul.msk.f32.gmra.mxu1 %vm273_vm0, %v1987_v11  ;;  %3418 = vmatmul.msk.f32.gmra.mxu2 %vm273_vm0, %v1989_v16  ;;  %v2298_v58 = vld [vmem:[%s3588_s30 + $0xdd] sm:$0xff] }
 0x221   : > { %3080 = vst.msk [vmem:[%s4255_s22 + $0x18] sm:$0xff] %vm273_vm0, %v3044_v38  ;;  %3455 = vmatmul.msk.f32.gmra.mxu3 %vm273_vm0, %v2296_v42  ;;  %3492 = vmatmul.msk.f32.gmra.mxu0 %vm273_vm0, %v2603_v39 }
 0x222   : > { %v2897_v47 = vmul.f32 %v4234_v52, %v2857_v20 }
 0x223   : > { %v2146_v60 = vpop.f32.mrf.mxu2 }
 0x224   : > { %v2937_v59 = vadd.f32 %v4241_v36, %v2897_v47  ;;  %v2244_v50 = vadd.f32 %v2146_v60, %v1937_v3  ;;  %v2453_v11 = vpop.f32.mrf.mxu3 }
 0x225   : > { %v1842_v22 = vpop.f32.mrf.mxu1 }
 0x226   : > { %vm2973_vm5 = vcmp.gt.f32.partialorder %v2937_v59, 0.0  ;;  %v3009_v61 = vmul.f32 0.01, %v2937_v59  ;;  %v2551_v24 = vadd.f32 %v2453_v11, %v2244_v50  ;;  %v2763_v45 = vpop.f32.mrf.mxu0  ;;  %v1938_v26 = vadd.f32 %v1842_v22, %v3931_v48  ;;  %v1992_v50 = vld [vmem:[%s3588_s30 + $0xe4] sm:$0xff] }
 0x228   : > { %v3045_v51 = vsel %vm2973_vm5, %v2937_v59, %v3009_v61  ;;  %v2858_v2 = vadd.f32 %v2760_v17, %v2551_v24  ;;  %3382 = vmatmul.msk.f32.gmra.mxu1 %vm273_vm0, %v1988_v49  ;;  %3419 = vmatmul.msk.f32.gmra.mxu2 %vm273_vm0, %v1990_v1  ;;  %v2605_v17 = vld [vmem:[%s3588_s30 + $0xde] sm:$0xff] }
 0x229   : > { %3081 = vst.msk [vmem:[%s4255_s22 + $0x20] sm:$0xff] %vm273_vm0, %v3045_v51  ;;  %3456 = vmatmul.msk.f32.gmra.mxu3 %vm273_vm0, %v2297_v46  ;;  %3493 = vmatmul.msk.f32.gmra.mxu0 %vm273_vm0, %v2604_v5  ;;  %v2299_v61 = vld [vmem:[%s3588_s30 + $0xe5] sm:$0xff] }
 0x22a   : > { %v2898_v43 = vmul.f32 %v4234_v52, %v2858_v2  ;;  %v2606_v46 = vld [vmem:[%s3588_s30 + $0xe6] sm:$0xff] }
 0x22b   : > { %v2149_v12 = vpop.f32.mrf.mxu2 }
 0x22c   : > { %v2938_v10 = vadd.f32 %v4241_v36, %v2898_v43  ;;  %v2245_v56 = vadd.f32 %v2149_v12, %v1938_v26  ;;  %v2456_v49 = vpop.f32.mrf.mxu3 }
 0x22d   : > { %v1845_v35 = vpop.f32.mrf.mxu1 }
 0x22e   : > { %vm2974_vm6 = vcmp.gt.f32.partialorder %v2938_v10, 0.0  ;;  %v3010_v31 = vmul.f32 0.01, %v2938_v10  ;;  %v2552_v21 = vadd.f32 %v2456_v49, %v2245_v56  ;;  %v2766_v42 = vpop.f32.mrf.mxu0  ;;  %v1939_v48 = vadd.f32 %v1845_v35, %v3941_v8  ;;  %v2300_v35 = vld [vmem:[%s3588_s30 + $0xed] sm:$0xff] }
 0x230   : > { %v3046_v39 = vsel %vm2974_vm6, %v2938_v10, %v3010_v31  ;;  %v2859_v38 = vadd.f32 %v2763_v45, %v2552_v21  ;;  %3383 = vmatmul.msk.f32.gmra.mxu1 %vm273_vm0, %v1989_v16  ;;  %3420 = vmatmul.msk.f32.gmra.mxu2 %vm273_vm0, %v1991_v28  ;;  %v1993_v10 = vld [vmem:[%s3588_s30 + $0xec] sm:$0xff] }
 0x231   : > { %3082 = vst.msk [vmem:[%s4255_s22 + $0x28] sm:$0xff] %vm273_vm0, %v3046_v39  ;;  %3457 = vmatmul.msk.f32.gmra.mxu3 %vm273_vm0, %v2298_v58  ;;  %3494 = vmatmul.msk.f32.gmra.mxu0 %vm273_vm0, %v2605_v17  ;;  %v2607_v21 = vld [vmem:[%s3588_s30 + $0xee] sm:$0xff] }
 0x232   : > { %v2899_v20 = vmul.f32 %v4234_v52, %v2859_v38 }
 0x233   : > { %v2152_v3 = vpop.f32.mrf.mxu2 }
 0x234   : > { %v2939_v47 = vadd.f32 %v4241_v36, %v2899_v20  ;;  %v2246_v60 = vadd.f32 %v2152_v3, %v1939_v48  ;;  %v2459_v16 = vpop.f32.mrf.mxu3  ;;  %v1994_v3 = vld [vmem:[%s3588_s30 + $0xf4] sm:$0xff] }
 0x235   : > { %v1848_v59 = vpop.f32.mrf.mxu1 }
 0x236   : > { %vm2975_vm7 = vcmp.gt.f32.partialorder %v2939_v47, 0.0  ;;  %v3011_v11 = vmul.f32 0.01, %v2939_v47  ;;  %v2553_v22 = vadd.f32 %v2459_v16, %v2246_v60  ;;  %v2769_v24 = vpop.f32.mrf.mxu0  ;;  %v1940_v8 = vadd.f32 %v1848_v59, %v3951_v33  ;;  %v2301_v16 = vld [vmem:[%s3588_s30 + $0xf5] sm:$0xff] }
 0x238   : > { %v3047_v45 = vsel %vm2975_vm7, %v2939_v47, %v3011_v11  ;;  %v2860_v5 = vadd.f32 %v2766_v42, %v2553_v22  ;;  %3384 = vmatmul.msk.f32.gmra.mxu1 %vm273_vm0, %v1990_v1  ;;  %3421 = vmatmul.msk.f32.gmra.mxu2 %vm273_vm0, %v1992_v50  ;;  %v2608_v11 = vld [vmem:[%s3588_s30 + $0xf6] sm:$0xff] }
 0x239   : > { %3083 = vst.msk [vmem:[%s4255_s22 + $0x30] sm:$0xff] %vm273_vm0, %v3047_v45  ;;  %3458 = vmatmul.msk.f32.gmra.mxu3 %vm273_vm0, %v2299_v61  ;;  %3495 = vmatmul.msk.f32.gmra.mxu0 %vm273_vm0, %v2606_v46 }
 0x23a   : > { %v2900_v51 = vmul.f32 %v4234_v52, %v2860_v5 }
 0x23b   : > { %v2155_v2 = vpop.f32.mrf.mxu2 }
 0x23c   : > { %v2940_v26 = vadd.f32 %v4241_v36, %v2900_v51  ;;  %v2247_v43 = vadd.f32 %v2155_v2, %v1940_v8  ;;  %v2462_v1 = vpop.f32.mrf.mxu3  ;;  %v1995_v51 = vld [vmem:[%s3588_s30 + $0xfc] sm:$0xff] }
 0x23d   : > { %v1851_v12 = vpop.f32.mrf.mxu1 }
 0x23e   : > { %vm2976_vm8 = vcmp.gt.f32.partialorder %v2940_v26, 0.0  ;;  %v3012_v56 = vmul.f32 0.01, %v2940_v26  ;;  %v2554_v49 = vadd.f32 %v2462_v1, %v2247_v43  ;;  %v2772_v31 = vpop.f32.mrf.mxu0  ;;  %v1941_v33 = vadd.f32 %v1851_v12, %v3961_v55  ;;  %v2302_v43 = vld [vmem:[%s3588_s30 + $0xfd] sm:$0xff] }
 0x23f   : > { %v2609_v12 = vld [vmem:[%s3588_s30 + $0xfe] sm:$0xff] }
 0x240   : > { %v3048_v58 = vsel %vm2976_vm8, %v2940_v26, %v3012_v56  ;;  %v2861_v42 = vadd.f32 %v2769_v24, %v2554_v49  ;;  %3385 = vmatmul.msk.f32.gmra.mxu1 %vm273_vm0, %v1991_v28  ;;  %3422 = vmatmul.msk.f32.gmra.mxu2 %vm273_vm0, %v1993_v10 }
 0x241   : > { %3084 = vst.msk [vmem:[%s4255_s22 + $0x38] sm:$0xff] %vm273_vm0, %v3048_v58  ;;  %3459 = vmatmul.msk.f32.gmra.mxu3 %vm273_vm0, %v2300_v35  ;;  %3496 = vmatmul.msk.f32.gmra.mxu0 %vm273_vm0, %v2607_v21 }
 0x242   : > { %v2901_v17 = vmul.f32 %v4234_v52, %v2861_v42 }
 0x243   : > { %v2158_v39 = vpop.f32.mrf.mxu2 }
 0x244   : > { %v2941_v38 = vadd.f32 %v4241_v36, %v2901_v17  ;;  %v2248_v48 = vadd.f32 %v2158_v39, %v1941_v33  ;;  %v2465_v28 = vpop.f32.mrf.mxu3  ;;  %v1996_v33 = vld [vmem:[%s3588_s30 + $0x104] sm:$0xff] }
 0x245   : > { %v1854_v20 = vpop.f32.mrf.mxu1 }
 0x246   : > { %vm2977_vm9 = vcmp.gt.f32.partialorder %v2941_v38, 0.0  ;;  %v3013_v47 = vmul.f32 0.01, %v2941_v38  ;;  %v2555_v60 = vadd.f32 %v2465_v28, %v2248_v48  ;;  %v2775_v59 = vpop.f32.mrf.mxu0  ;;  %v1942_v55 = vadd.f32 %v1854_v20, %v3971_v15  ;;  %v2610_v28 = vld [vmem:[%s3588_s30 + $0x106] sm:$0xff] }
 0x248   : > { %v3049_v22 = vsel %vm2977_vm9, %v2941_v38, %v3013_v47  ;;  %v2862_v61 = vadd.f32 %v2772_v31, %v2555_v60  ;;  %3386 = vmatmul.msk.f32.gmra.mxu1 %vm273_vm0, %v1992_v50  ;;  %3423 = vmatmul.msk.f32.gmra.mxu2 %vm273_vm0, %v1994_v3  ;;  %v2303_v38 = vld [vmem:[%s3588_s30 + $0x105] sm:$0xff] }
 0x249   : > { %3085 = vst.msk [vmem:[%s4255_s22 + $0x40] sm:$0xff] %vm273_vm0, %v3049_v22  ;;  %3460 = vmatmul.msk.f32.gmra.mxu3 %vm273_vm0, %v2301_v16  ;;  %3497 = vmatmul.msk.f32.gmra.mxu0 %vm273_vm0, %v2608_v11 }
 0x24a   : > { %v2902_v24 = vmul.f32 %v4234_v52, %v2862_v61  ;;  %v1997_v61 = vld [vmem:[%s3588_s30 + $0x10c] sm:$0xff] }
 0x24b   : > { %v2161_v46 = vpop.f32.mrf.mxu2 }
 0x24c   : > { %v2942_v45 = vadd.f32 %v4241_v36, %v2902_v24  ;;  %v2249_v5 = vadd.f32 %v2161_v46, %v1942_v55  ;;  %v2468_v50 = vpop.f32.mrf.mxu3  ;;  %v2304_v46 = vld [vmem:[%s3588_s30 + $0x10d] sm:$0xff] }
 0x24d   : > { %v1857_v8 = vpop.f32.mrf.mxu1 }
 0x24e   : > { %vm2978_vm10 = vcmp.gt.f32.partialorder %v2942_v45, 0.0  ;;  %v3014_v2 = vmul.f32 0.01, %v2942_v45  ;;  %v2556_v26 = vadd.f32 %v2468_v50, %v2249_v5  ;;  %v2778_v1 = vpop.f32.mrf.mxu0  ;;  %v1943_v15 = vadd.f32 %v1857_v8, %v3981_v40  ;;  %v2611_v5 = vld [vmem:[%s3588_s30 + $0x10e] sm:$0xff] }
 0x250   : > { %v3050_v56 = vsel %vm2978_vm10, %v2942_v45, %v3014_v2  ;;  %v2863_v49 = vadd.f32 %v2775_v59, %v2556_v26  ;;  %3387 = vmatmul.msk.f32.gmra.mxu1 %vm273_vm0, %v1993_v10  ;;  %3424 = vmatmul.msk.f32.gmra.mxu2 %vm273_vm0, %v1995_v51 }
 0x251   : > { %3086 = vst.msk [vmem:[%s4255_s22 + $0x48] sm:$0xff] %vm273_vm0, %v3050_v56  ;;  %3461 = vmatmul.msk.f32.gmra.mxu3 %vm273_vm0, %v2302_v43  ;;  %3498 = vmatmul.msk.f32.gmra.mxu0 %vm273_vm0, %v2609_v12  ;;  %v1998_v56 = vld [vmem:[%s3588_s30 + $0x114] sm:$0xff] }
 0x252   : > { %v2903_v35 = vmul.f32 %v4234_v52, %v2863_v49 }
 0x253   : > { %v2164_v31 = vpop.f32.mrf.mxu2 }
 0x254   : > { %v2943_v21 = vadd.f32 %v4241_v36, %v2903_v35  ;;  %v2250_v58 = vadd.f32 %v2164_v31, %v1943_v15  ;;  %v2471_v10 = vpop.f32.mrf.mxu3  ;;  %v2305_v35 = vld [vmem:[%s3588_s30 + $0x115] sm:$0xff] }
 0x255   : > { %v1860_v42 = vpop.f32.mrf.mxu1 }
 0x256   : > { %vm2979_vm11 = vcmp.gt.f32.partialorder %v2943_v21, 0.0  ;;  %v3015_v17 = vmul.f32 0.01, %v2943_v21  ;;  %v2557_v39 = vadd.f32 %v2471_v10, %v2250_v58  ;;  %v2781_v48 = vpop.f32.mrf.mxu0  ;;  %v1944_v40 = vadd.f32 %v1860_v42, %v3991_v62 }
 0x258   : > { %v3051_v20 = vsel %vm2979_vm11, %v2943_v21, %v3015_v17  ;;  %v2864_v47 = vadd.f32 %v2778_v1, %v2557_v39  ;;  %3388 = vmatmul.msk.f32.gmra.mxu1 %vm273_vm0, %v1994_v3  ;;  %3425 = vmatmul.msk.f32.gmra.mxu2 %vm273_vm0, %v1996_v33  ;;  %v2612_v21 = vld [vmem:[%s3588_s30 + $0x116] sm:$0xff] }
 0x259   : > { %3087 = vst.msk [vmem:[%s4255_s22 + $0x50] sm:$0xff] %vm273_vm0, %v3051_v20  ;;  %3462 = vmatmul.msk.f32.gmra.mxu3 %vm273_vm0, %v2303_v38  ;;  %3499 = vmatmul.msk.f32.gmra.mxu0 %vm273_vm0, %v2610_v28  ;;  %v1999_v28 = vld [vmem:[%s3588_s30 + $0x11c] sm:$0xff] }
 0x25a   : > { %v2904_v60 = vmul.f32 %v4234_v52, %v2864_v47 }
 0x25b   : > { %v2167_v16 = vpop.f32.mrf.mxu2 }
 0x25c   : > { %v2944_v59 = vadd.f32 %v4241_v36, %v2904_v60  ;;  %v2251_v11 = vadd.f32 %v2167_v16, %v1944_v40  ;;  %v2474_v3 = vpop.f32.mrf.mxu3  ;;  %v2306_v40 = vld [vmem:[%s3588_s30 + $0x11d] sm:$0xff] }
 0x25d   : > { %v1863_v22 = vpop.f32.mrf.mxu1  ;;  %v2613_v16 = vld [vmem:[%s3588_s30 + $0x11e] sm:$0xff] }
 0x25e   : > { %vm2980_vm12 = vcmp.gt.f32.partialorder %v2944_v59, 0.0  ;;  %v3016_v55 = vmul.f32 0.01, %v2944_v59  ;;  %v2558_v24 = vadd.f32 %v2474_v3, %v2251_v11  ;;  %v2784_v45 = vpop.f32.mrf.mxu0  ;;  %v1945_v62 = vadd.f32 %v1863_v22, %v4001_v6 }
 0x260   : > { %v3052_v50 = vsel %vm2980_vm12, %v2944_v59, %v3016_v55  ;;  %v2865_v8 = vadd.f32 %v2781_v48, %v2558_v24  ;;  %3389 = vmatmul.msk.f32.gmra.mxu1 %vm273_vm0, %v1995_v51  ;;  %3426 = vmatmul.msk.f32.gmra.mxu2 %vm273_vm0, %v1997_v61 }
 0x261   : > { %3088 = vst.msk [vmem:[%s4255_s22 + $0x58] sm:$0xff] %vm273_vm0, %v3052_v50  ;;  %3463 = vmatmul.msk.f32.gmra.mxu3 %vm273_vm0, %v2304_v46  ;;  %3500 = vmatmul.msk.f32.gmra.mxu0 %vm273_vm0, %v2611_v5 }
 0x262   : > { %v2905_v2 = vmul.f32 %v4234_v52, %v2865_v8  ;;  %v2307_v8 = vld [vmem:[%s3588_s30 + $0x125] sm:$0xff] }
 0x263   : > { %v2170_v26 = vpop.f32.mrf.mxu2 }
 0x264   : > { %v2945_v43 = vadd.f32 %v4241_v36, %v2905_v2  ;;  %v2252_v1 = vadd.f32 %v2170_v26, %v1945_v62  ;;  %v2477_v51 = vpop.f32.mrf.mxu3  ;;  %v2614_v2 = vld [vmem:[%s3588_s30 + $0x126] sm:$0xff] }
 0x265   : > { %v1866_v12 = vpop.f32.mrf.mxu1 }
 0x266   : > { %vm2981_vm13 = vcmp.gt.f32.partialorder %v2945_v43, 0.0  ;;  %v3017_v49 = vmul.f32 0.01, %v2945_v43  ;;  %v2559_v15 = vadd.f32 %v2477_v51, %v2252_v1  ;;  %v2787_v31 = vpop.f32.mrf.mxu0  ;;  %v1946_v6 = vadd.f32 %v1866_v12, %v4011_v29 }
 0x268   : > { %v3053_v58 = vsel %vm2981_vm13, %v2945_v43, %v3017_v49  ;;  %v2866_v10 = vadd.f32 %v2784_v45, %v2559_v15  ;;  %3390 = vmatmul.msk.f32.gmra.mxu1 %vm273_vm0, %v1996_v33  ;;  %3427 = vmatmul.msk.f32.gmra.mxu2 %vm273_vm0, %v1998_v56  ;;  %v2000_v45 = vld [vmem:[%s3588_s30 + $0x124] sm:$0xff] }
 0x269   : > { %3089 = vst.msk [vmem:[%s4255_s22 + $0x60] sm:$0xff] %vm273_vm0, %v3053_v58  ;;  %3464 = vmatmul.msk.f32.gmra.mxu3 %vm273_vm0, %v2305_v35  ;;  %3501 = vmatmul.msk.f32.gmra.mxu0 %vm273_vm0, %v2612_v21  ;;  %v2001_v35 = vld [vmem:[%s3588_s30 + $0x12c] sm:$0xff] }
 0x26a   : > { %v2906_v42 = vmul.f32 %v4234_v52, %v2866_v10  ;;  %v2308_v58 = vld [vmem:[%s3588_s30 + $0x12d] sm:$0xff] }
 0x26b   : > { %v2173_v17 = vpop.f32.mrf.mxu2 }
 0x26c   : > { %v2946_v39 = vadd.f32 %v4241_v36, %v2906_v42  ;;  %v2253_v38 = vadd.f32 %v2173_v17, %v1946_v6  ;;  %v2480_v33 = vpop.f32.mrf.mxu3  ;;  %v2615_v6 = vld [vmem:[%s3588_s30 + $0x12e] sm:$0xff] }
 0x26d   : > { %v1869_v48 = vpop.f32.mrf.mxu1 }
 0x26e   : > { %vm2982_vm14 = vcmp.gt.f32.partialorder %v2946_v39, 0.0  ;;  %v3018_v20 = vmul.f32 0.01, %v2946_v39  ;;  %v2560_v47 = vadd.f32 %v2480_v33, %v2253_v38  ;;  %v2790_v60 = vpop.f32.mrf.mxu0  ;;  %v1947_v29 = vadd.f32 %v1869_v48, %v4021_v54 }
 0x270   : > { %v3054_v59 = vsel %vm2982_vm14, %v2946_v39, %v3018_v20  ;;  %v2867_v11 = vadd.f32 %v2787_v31, %v2560_v47  ;;  %3391 = vmatmul.msk.f32.gmra.mxu1 %vm273_vm0, %v1997_v61  ;;  %3428 = vmatmul.msk.f32.gmra.mxu2 %vm273_vm0, %v1999_v28  ;;  %v2002_v47 = vld [vmem:[%s3588_s30 + $0x134] sm:$0xff] }
 0x271   : > { %3090 = vst.msk [vmem:[%s4255_s22 + $0x68] sm:$0xff] %vm273_vm0, %v3054_v59  ;;  %3465 = vmatmul.msk.f32.gmra.mxu3 %vm273_vm0, %v2306_v40  ;;  %3502 = vmatmul.msk.f32.gmra.mxu0 %vm273_vm0, %v2613_v16  ;;  %v2309_v16 = vld [vmem:[%s3588_s30 + $0x135] sm:$0xff] }
 0x272   : > { %v2907_v3 = vmul.f32 %v4234_v52, %v2867_v11  ;;  %v2616_v11 = vld [vmem:[%s3588_s30 + $0x136] sm:$0xff] }
 0x273   : > { %v2176_v22 = vpop.f32.mrf.mxu2 }
 0x274   : > { %v2947_v55 = vadd.f32 %v4241_v36, %v2907_v3  ;;  %v2254_v24 = vadd.f32 %v2176_v22, %v1947_v29  ;;  %v2483_v61 = vpop.f32.mrf.mxu3 }
 0x275   : > { %v1872_v46 = vpop.f32.mrf.mxu1 }
 0x276   : > { %vm2983_vm15 = vcmp.gt.f32.partialorder %v2947_v55, 0.0  ;;  %v3019_v5 = vmul.f32 0.01, %v2947_v55  ;;  %v2561_v50 = vadd.f32 %v2483_v61, %v2254_v24  ;;  %v2793_v62 = vpop.f32.mrf.mxu0  ;;  %v1948_v54 = vadd.f32 %v1872_v46, %v4031_v13 }
 0x278   : > { %v3055_v26 = vsel %vm2983_vm15, %v2947_v55, %v3019_v5  ;;  %v2868_v43 = vadd.f32 %v2790_v60, %v2561_v50  ;;  %3392 = vmatmul.msk.f32.gmra.mxu1 %vm273_vm0, %v1998_v56  ;;  %3429 = vmatmul.msk.f32.gmra.mxu2 %vm273_vm0, %v2000_v45  ;;  %v2003_v5 = vld [vmem:[%s3588_s30 + $0x13c] sm:$0xff] }
 0x279   : > { %3091 = vst.msk [vmem:[%s4255_s22 + $0x70] sm:$0xff] %vm273_vm0, %v3055_v26  ;;  %3466 = vmatmul.msk.f32.gmra.mxu3 %vm273_vm0, %v2307_v8  ;;  %3503 = vmatmul.msk.f32.gmra.mxu0 %vm273_vm0, %v2614_v2  ;;  %v2617_v26 = vld [vmem:[%s3588_s30 + $0x13e] sm:$0xff] }
 0x27a   : > { %v2908_v1 = vmul.f32 %v4234_v52, %v2868_v43 }
 0x27b   : > { %v2179_v51 = vpop.f32.mrf.mxu2 }
 0x27c   : > { %v2948_v12 = vadd.f32 %v4241_v36, %v2908_v1  ;;  %v2255_v49 = vadd.f32 %v2179_v51, %v1948_v54  ;;  %v2486_v56 = vpop.f32.mrf.mxu3 }
 0x27d   : > { %v1875_v15 = vpop.f32.mrf.mxu1 }
 0x27e   : > { %vm2984_vm1 = vcmp.gt.f32.partialorder %v2948_v12, 0.0  ;;  %v3020_v31 = vmul.f32 0.01, %v2948_v12  ;;  %v2562_v21 = vadd.f32 %v2486_v56, %v2255_v49  ;;  %v2796_v10 = vpop.f32.mrf.mxu0  ;;  %v1949_v13 = vadd.f32 %v1875_v15, %v4041_v7 }
 0x280   : > { %v3056_v42 = vsel %vm2984_vm1, %v2948_v12, %v3020_v31  ;;  %v2869_v17 = vadd.f32 %v2793_v62, %v2562_v21  ;;  %3393 = vmatmul.msk.f32.gmra.mxu1 %vm273_vm0, %v1999_v28  ;;  %3430 = vmatmul.msk.f32.gmra.mxu2 %vm273_vm0, %v2001_v35  ;;  %v2310_v62 = vld [vmem:[%s3588_s30 + $0x13d] sm:$0xff] }
 0x281   : > { %3092 = vst.msk [vmem:[%s4255_s22 + $0x78] sm:$0xff] %vm273_vm0, %v3056_v42  ;;  %3467 = vmatmul.msk.f32.gmra.mxu3 %vm273_vm0, %v2308_v58  ;;  %3504 = vmatmul.msk.f32.gmra.mxu0 %vm273_vm0, %v2615_v6 }
 0x282   : > { %v2909_v39 = vmul.f32 %v4234_v52, %v2869_v17 }
 0x283   : > { %v2182_v38 = vpop.f32.mrf.mxu2 }
 0x284   : > { %v2949_v33 = vadd.f32 %v4241_v36, %v2909_v39  ;;  %v2256_v48 = vadd.f32 %v2182_v38, %v1949_v13  ;;  %v2489_v28 = vpop.f32.mrf.mxu3 }
 0x285   : > { %v1878_v20 = vpop.f32.mrf.mxu1 }
 0x286   : > { %vm2985_vm2 = vcmp.gt.f32.partialorder %v2949_v33, 0.0  ;;  %v3021_v40 = vmul.f32 0.01, %v2949_v33  ;;  %v2563_v60 = vadd.f32 %v2489_v28, %v2256_v48  ;;  %v2799_v59 = vpop.f32.mrf.mxu0  ;;  %v1950_v7 = vadd.f32 %v1878_v20, %v4051_v25 }
 0x288   : > { %v3057_v29 = vsel %vm2985_vm2, %v2949_v33, %v3021_v40  ;;  %v2870_v3 = vadd.f32 %v2796_v10, %v2563_v60  ;;  %3394 = vmatmul.msk.f32.gmra.mxu1 %vm273_vm0, %v2000_v45  ;;  %3431 = vmatmul.msk.f32.gmra.mxu2 %vm273_vm0, %v2002_v47 }
 0x289   : > { %3093 = vst.msk [vmem:[%s4255_s22 + $0x80] sm:$0xff] %vm273_vm0, %v3057_v29  ;;  %3468 = vmatmul.msk.f32.gmra.mxu3 %vm273_vm0, %v2309_v16  ;;  %3505 = vmatmul.msk.f32.gmra.mxu0 %vm273_vm0, %v2616_v11 }
 0x28a   : > { %v2910_v22 = vmul.f32 %v4234_v52, %v2870_v3 }
 0x28b   : > { %v2185_v55 = vpop.f32.mrf.mxu2 }
 0x28c   : > { %v2950_v24 = vadd.f32 %v4241_v36, %v2910_v22  ;;  %v2257_v61 = vadd.f32 %v2185_v55, %v1950_v7  ;;  %v2492_v46 = vpop.f32.mrf.mxu3 }
 0x28d   : > { %v1881_v45 = vpop.f32.mrf.mxu1 }
 0x28e   : > { %vm2986_vm3 = vcmp.gt.f32.partialorder %v2950_v24, 0.0  ;;  %v3022_v50 = vmul.f32 0.01, %v2950_v24  ;;  %v2564_v8 = vadd.f32 %v2492_v46, %v2257_v61  ;;  %v2802_v2 = vpop.f32.mrf.mxu0  ;;  %v1951_v25 = vadd.f32 %v1881_v45, %v4062_v32 }
 0x290   : > { %v3058_v43 = vsel %vm2986_vm3, %v2950_v24, %v3022_v50  ;;  %v2871_v54 = vadd.f32 %v2799_v59, %v2564_v8  ;;  %3395 = vmatmul.msk.f32.gmra.mxu1 %vm273_vm0, %v2001_v35  ;;  %3432 = vmatmul.msk.f32.gmra.mxu2 %vm273_vm0, %v2003_v5 }
 0x291   : > { %3094 = vst.msk [vmem:[%s4255_s22 + $0x88] sm:$0xff] %vm273_vm0, %v3058_v43  ;;  %3469 = vmatmul.msk.f32.gmra.mxu3 %vm273_vm0, %v2310_v62  ;;  %3506 = vmatmul.msk.f32.gmra.mxu0 %vm273_vm0, %v2617_v26 }
 0x292   : > { %v2911_v1 = vmul.f32 %v4234_v52, %v2871_v54 }
 0x293   : > { %v2188_v51 = vpop.f32.mrf.mxu2 }
 0x294   : > { %v2951_v12 = vadd.f32 %v4241_v36, %v2911_v1  ;;  %v2258_v49 = vadd.f32 %v2188_v51, %v1951_v25  ;;  %v2495_v56 = vpop.f32.mrf.mxu3 }
 0x295   : > { %v1884_v15 = vpop.f32.mrf.mxu1 }
 0x296   : > { %vm2987_vm4 = vcmp.gt.f32.partialorder %v2951_v12, 0.0  ;;  %v3023_v35 = vmul.f32 0.01, %v2951_v12  ;;  %v2565_v31 = vadd.f32 %v2495_v56, %v2258_v49  ;;  %v2805_v21 = vpop.f32.mrf.mxu0  ;;  %v1952_v6 = vadd.f32 %v1884_v15, %v4073_v57 }
 0x298   : > { %v3059_v58 = vsel %vm2987_vm4, %v2951_v12, %v3023_v35  ;;  %v2872_v10 = vadd.f32 %v2802_v2, %v2565_v31 }
 0x299   : > { %3095 = vst.msk [vmem:[%s4255_s22 + $0x90] sm:$0xff] %vm273_vm0, %v3059_v58 }
 0x29a   : > { %v2912_v32 = vmul.f32 %v4234_v52, %v2872_v10 }
 0x29b   : > { %v2191_v42 = vpop.f32.mrf.mxu2 }
 0x29c   : > { %v2952_v17 = vadd.f32 %v4241_v36, %v2912_v32  ;;  %v2259_v13 = vadd.f32 %v2191_v42, %v1952_v6  ;;  %v2498_v39 = vpop.f32.mrf.mxu3 }
 0x29d   : > { %v1887_v38 = vpop.f32.mrf.mxu1 }
 0x29e   : > { %vm2988_vm5 = vcmp.gt.f32.partialorder %v2952_v17, 0.0  ;;  %v3024_v33 = vmul.f32 0.01, %v2952_v17  ;;  %v2566_v48 = vadd.f32 %v2498_v39, %v2259_v13  ;;  %v2808_v28 = vpop.f32.mrf.mxu0  ;;  %v1953_v40 = vadd.f32 %v1887_v38, %v4083_v19 }
 0x2a0   : > { %v3060_v20 = vsel %vm2988_vm5, %v2952_v17, %v3024_v33  ;;  %v2873_v47 = vadd.f32 %v2805_v21, %v2566_v48 }
 0x2a1   : > { %3096 = vst.msk [vmem:[%s4255_s22 + $0x98] sm:$0xff] %vm273_vm0, %v3060_v20 }
 0x2a2   : > { %v2913_v57 = vmul.f32 %v4234_v52, %v2873_v47 }
 0x2a3   : > { %v2194_v60 = vpop.f32.mrf.mxu2 }
 0x2a4   : > { %v2953_v16 = vadd.f32 %v4241_v36, %v2913_v57  ;;  %v2260_v59 = vadd.f32 %v2194_v60, %v1953_v40  ;;  %v2501_v11 = vpop.f32.mrf.mxu3 }
 0x2a5   : > { %v1890_v29 = vpop.f32.mrf.mxu1 }
 0x2a6   : > { %vm2989_vm6 = vcmp.gt.f32.partialorder %v2953_v16, 0.0  ;;  %v3025_v3 = vmul.f32 0.01, %v2953_v16  ;;  %v2567_v7 = vadd.f32 %v2501_v11, %v2260_v59  ;;  %v2811_v22 = vpop.f32.mrf.mxu0  ;;  %v1954_v61 = vadd.f32 %v1890_v29, %v4093_v41 }
 0x2a8   : > { %v3061_v55 = vsel %vm2989_vm6, %v2953_v16, %v3025_v3  ;;  %v2874_v24 = vadd.f32 %v2808_v28, %v2567_v7 }
 0x2a9   : > { %3097 = vst.msk [vmem:[%s4255_s22 + $0xa0] sm:$0xff] %vm273_vm0, %v3061_v55 }
 0x2aa   : > { %v2914_v19 = vmul.f32 %v4234_v52, %v2874_v24 }
 0x2ab   : > { %v2197_v46 = vpop.f32.mrf.mxu2 }
 0x2ac   : > { %v2954_v45 = vadd.f32 %v4241_v36, %v2914_v19  ;;  %v2261_v5 = vadd.f32 %v2197_v46, %v1954_v61  ;;  %v2504_v50 = vpop.f32.mrf.mxu3 }
 0x2ad   : > { %v1893_v8 = vpop.f32.mrf.mxu1 }
 0x2ae   : > { %vm2990_vm7 = vcmp.gt.f32.partialorder %v2954_v45, 0.0  ;;  %v3026_v62 = vmul.f32 0.01, %v2954_v45  ;;  %v2568_v2 = vadd.f32 %v2504_v50, %v2261_v5  ;;  %v2814_v26 = vpop.f32.mrf.mxu0  ;;  %v1955_v25 = vadd.f32 %v1893_v8, %v4103_v0 }
 0x2b0   : > { %v3062_v43 = vsel %vm2990_vm7, %v2954_v45, %v3026_v62  ;;  %v2875_v54 = vadd.f32 %v2811_v22, %v2568_v2 }
 0x2b1   : > { %3098 = vst.msk [vmem:[%s4255_s22 + $0xa8] sm:$0xff] %vm273_vm0, %v3062_v43 }
 0x2b2   : > { %v2915_v41 = vmul.f32 %v4234_v52, %v2875_v54 }
 0x2b3   : > { %v2200_v1 = vpop.f32.mrf.mxu2 }
 0x2b4   : > { %v2955_v51 = vadd.f32 %v4241_v36, %v2915_v41  ;;  %v2262_v12 = vadd.f32 %v2200_v1, %v1955_v25  ;;  %v2507_v49 = vpop.f32.mrf.mxu3 }
 0x2b5   : > { %v1896_v56 = vpop.f32.mrf.mxu1 }
 0x2b6   : > { %vm2991_vm8 = vcmp.gt.f32.partialorder %v2955_v51, 0.0  ;;  %v3027_v15 = vmul.f32 0.01, %v2955_v51  ;;  %v2569_v35 = vadd.f32 %v2507_v49, %v2262_v12  ;;  %v2817_v31 = vpop.f32.mrf.mxu0  ;;  %v1956_v10 = vadd.f32 %v1896_v56, %v4113_v53 }
 0x2b8   : > { %v3063_v21 = vsel %vm2991_vm8, %v2955_v51, %v3027_v15  ;;  %v2876_v58 = vadd.f32 %v2814_v26, %v2569_v35  ;;  %v4524_v35 = vld [vmem:[%s4574_s3] ss:$0 sm:$0xff] }
 0x2b9   : > { %3099 = vst.msk [vmem:[%s4255_s22 + $0xb0] sm:$0xff] %vm273_vm0, %v3063_v21 }
 0x2ba   : > { %v2916_v0 = vmul.f32 %v4234_v52, %v2876_v58 }
 0x2bb   : > { %v2203_v6 = vpop.f32.mrf.mxu2 }
 0x2bc   : > { %v2956_v32 = vadd.f32 %v4241_v36, %v2916_v0  ;;  %v2263_v42 = vadd.f32 %v2203_v6, %v1956_v10  ;;  %v2510_v17 = vpop.f32.mrf.mxu3 }
 0x2bd   : > { %v1899_v13 = vpop.f32.mrf.mxu1 }
 0x2be   : > { %vm2992_vm9 = vcmp.gt.f32.partialorder %v2956_v32, 0.0  ;;  %v3028_v39 = vmul.f32 0.01, %v2956_v32  ;;  %v2570_v38 = vadd.f32 %v2510_v17, %v2263_v42  ;;  %v2820_v33 = vpop.f32.mrf.mxu0  ;;  %v1957_v20 = vadd.f32 %v1899_v13, %v4123_v63 }
 0x2c0   : > { %v3064_v48 = vsel %vm2992_vm9, %v2956_v32, %v3028_v39  ;;  %v2877_v28 = vadd.f32 %v2817_v31, %v2570_v38 }
 0x2c1   : > { %3100 = vst.msk [vmem:[%s4255_s22 + $0xb8] sm:$0xff] %vm273_vm0, %v3064_v48 }
 0x2c2   : > { %v2917_v53 = vmul.f32 %v4234_v52, %v2877_v28 }
 0x2c3   : > { %v2206_v47 = vpop.f32.mrf.mxu2 }
 0x2c4   : > { %v2957_v40 = vadd.f32 %v4241_v36, %v2917_v53  ;;  %v2264_v57 = vadd.f32 %v2206_v47, %v1957_v20  ;;  %v2513_v60 = vpop.f32.mrf.mxu3 }
 0x2c5   : > { %v1902_v16 = vpop.f32.mrf.mxu1 }
 0x2c6   : > { %vm2993_vm10 = vcmp.gt.f32.partialorder %v2957_v40, 0.0  ;;  %v3029_v59 = vmul.f32 0.01, %v2957_v40  ;;  %v2571_v11 = vadd.f32 %v2513_v60, %v2264_v57  ;;  %v2823_v29 = vpop.f32.mrf.mxu0  ;;  %v1958_v22 = vadd.f32 %v1902_v16, %v4133_v4 }
 0x2c8   : > { %v3065_v3 = vsel %vm2993_vm10, %v2957_v40, %v3029_v59  ;;  %v2878_v7 = vadd.f32 %v2820_v33, %v2571_v11 }
 0x2c9   : > { %3101 = vst.msk [vmem:[%s4255_s22 + $0xc0] sm:$0xff] %vm273_vm0, %v3065_v3 }
 0x2ca   : > { %v2918_v63 = vmul.f32 %v4234_v52, %v2878_v7 }
 0x2cb   : > { %v2209_v55 = vpop.f32.mrf.mxu2 }
 0x2cc   : > { %v2958_v24 = vadd.f32 %v4241_v36, %v2918_v63  ;;  %v2265_v61 = vadd.f32 %v2209_v55, %v1958_v22  ;;  %v2516_v19 = vpop.f32.mrf.mxu3 }
 0x2cd   : > { %v1905_v46 = vpop.f32.mrf.mxu1 }
 0x2ce   : > { %vm2994_vm11 = vcmp.gt.f32.partialorder %v2958_v24, 0.0  ;;  %v3030_v45 = vmul.f32 0.01, %v2958_v24  ;;  %v2572_v5 = vadd.f32 %v2516_v19, %v2265_v61  ;;  %v2826_v50 = vpop.f32.mrf.mxu0  ;;  %v1959_v2 = vadd.f32 %v1905_v46, %v4143_v27  ;;  %v4518_v27 = vld [vmem:[%s4573_s2] ss:$0 sm:$0xff] }
 0x2d0   : > { %v3066_v8 = vsel %vm2994_vm11, %v2958_v24, %v3030_v45  ;;  %v2879_v62 = vadd.f32 %v2823_v29, %v2572_v5 }
 0x2d1   : > { %3102 = vst.msk [vmem:[%s4255_s22 + $0xc8] sm:$0xff] %vm273_vm0, %v3066_v8 }
 0x2d2   : > { %v2919_v4 = vmul.f32 %v4234_v52, %v2879_v62 }
 0x2d3   : > { %v2212_v26 = vpop.f32.mrf.mxu2 }
 0x2d4   : > { %v2959_v43 = vadd.f32 %v4241_v36, %v2919_v4  ;;  %v2266_v54 = vadd.f32 %v2212_v26, %v1959_v2  ;;  %v2519_v25 = vpop.f32.mrf.mxu3 }
 0x2d5   : > { %v1908_v41 = vpop.f32.mrf.mxu1 }
 0x2d6   : > { %vm2995_vm12 = vcmp.gt.f32.partialorder %v2959_v43, 0.0  ;;  %v3031_v1 = vmul.f32 0.01, %v2959_v43  ;;  %v2573_v51 = vadd.f32 %v2519_v25, %v2266_v54  ;;  %v2829_v12 = vpop.f32.mrf.mxu0  ;;  %v1960_v15 = vadd.f32 %v1908_v41, %v4153_v18 }
 0x2d8   : > { %v3067_v49 = vsel %vm2995_vm12, %v2959_v43, %v3031_v1  ;;  %v2880_v56 = vadd.f32 %v2826_v50, %v2573_v51 }
 0x2d9   : > { %3103 = vst.msk [vmem:[%s4255_s22 + $0xd0] sm:$0xff] %vm273_vm0, %v3067_v49 }
 0x2da   : > { %v2920_v52 = vmul.f32 %v4518_v27, %v2880_v56 }
 0x2db   : > { %v2215_v36 = vpop.f32.mrf.mxu2 }
 0x2dc   : > { %v2960_v31 = vadd.f32 %v4524_v35, %v2920_v52  ;;  %v2267_v21 = vadd.f32 %v2215_v36, %v1960_v15  ;;  %v2522_v58 = vpop.f32.mrf.mxu3 }
 0x2dd   : > { %v1911_v10 = vpop.f32.mrf.mxu1 }
 0x2de   : > { %vm2996_vm13 = vcmp.gt.f32.partialorder %v2960_v31, 0.0  ;;  %v3032_v18 = vmul.f32 0.01, %v2960_v31  ;;  %v2574_v0 = vadd.f32 %v2522_v58, %v2267_v21  ;;  %v2832_v6 = vpop.f32.mrf.mxu0  ;;  %v1961_v17 = vadd.f32 %v1911_v10, %v4163_v14 }
 0x2e0   : > { %v3068_v32 = vsel %vm2996_vm13, %v2960_v31, %v3032_v18  ;;  %v2881_v42 = vadd.f32 %v2829_v12, %v2574_v0 }
 0x2e1   : > { %3104 = vst.msk [vmem:[%s4255_s22 + $0xd8] sm:$0xff] %vm273_vm0, %v3068_v32 }
 0x2e2   : > { %v2921_v13 = vmul.f32 %v4518_v27, %v2881_v42 }
 0x2e3   : > { %v2218_v39 = vpop.f32.mrf.mxu2 }
 0x2e4   : > { %v2961_v38 = vadd.f32 %v4524_v35, %v2921_v13  ;;  %v2268_v33 = vadd.f32 %v2218_v39, %v1961_v17  ;;  %v2525_v48 = vpop.f32.mrf.mxu3 }
 0x2e5   : > { %v1914_v28 = vpop.f32.mrf.mxu1 }
 0x2e6   : > { %vm2997_vm14 = vcmp.gt.f32.partialorder %v2961_v38, 0.0  ;;  %v3033_v20 = vmul.f32 0.01, %v2961_v38  ;;  %v2575_v53 = vadd.f32 %v2525_v48, %v2268_v33  ;;  %v2835_v47 = vpop.f32.mrf.mxu0  ;;  %v1962_v60 = vadd.f32 %v1914_v28, %v4173_v34 }
 0x2e8   : > { %v3069_v40 = vsel %vm2997_vm14, %v2961_v38, %v3033_v20  ;;  %v2882_v57 = vadd.f32 %v2832_v6, %v2575_v53 }
 0x2e9   : > { %3105 = vst.msk [vmem:[%s4255_s22 + $0xe0] sm:$0xff] %vm273_vm0, %v3069_v40 }
 0x2ea   : > { %v2922_v14 = vmul.f32 %v4518_v27, %v2882_v57 }
 0x2eb   : > { %v2221_v16 = vpop.f32.mrf.mxu2 }
 0x2ec   : > { %v2962_v59 = vadd.f32 %v4524_v35, %v2922_v14  ;;  %v2269_v11 = vadd.f32 %v2221_v16, %v1962_v60  ;;  %v2528_v29 = vpop.f32.mrf.mxu3 }
 0x2ed   : > { %v1917_v3 = vpop.f32.mrf.mxu1 }
 0x2ee   : > { %vm2998_vm15 = vcmp.gt.f32.partialorder %v2962_v59, 0.0  ;;  %v3034_v7 = vmul.f32 0.01, %v2962_v59  ;;  %v2576_v22 = vadd.f32 %v2528_v29, %v2269_v11  ;;  %v2838_v63 = vpop.f32.mrf.mxu0  ;;  %v1963_v61 = vadd.f32 %v1917_v3, %v4183_v23 }
 0x2f0   : > { %v3070_v55 = vsel %vm2998_vm15, %v2962_v59, %v3034_v7  ;;  %v2883_v24 = vadd.f32 %v2835_v47, %v2576_v22 }
 0x2f1   : > { %3106 = vst.msk [vmem:[%s4255_s22 + $0xe8] sm:$0xff] %vm273_vm0, %v3070_v55 }
 0x2f2   : > { %v2923_v34 = vmul.f32 %v4518_v27, %v2883_v24 }
 0x2f3   : > { %v2224_v19 = vpop.f32.mrf.mxu2 }
 0x2f4   : > { %v2963_v46 = vadd.f32 %v4524_v35, %v2923_v34  ;;  %v2270_v45 = vadd.f32 %v2224_v19, %v1963_v61  ;;  %v2531_v5 = vpop.f32.mrf.mxu3 }
 0x2f5   : > { %v1920_v50 = vpop.f32.mrf.mxu1 }
 0x2f6   : > { %vm2999_vm1 = vcmp.gt.f32.partialorder %v2963_v46, 0.0  ;;  %v3035_v8 = vmul.f32 0.01, %v2963_v46  ;;  %v2577_v62 = vadd.f32 %v2531_v5, %v2270_v45  ;;  %v2841_v2 = vpop.f32.mrf.mxu0  ;;  %v1964_v43 = vadd.f32 %v1920_v50, %v4193_v30 }
 0x2f8   : > { %v3071_v4 = vsel %vm2999_vm1, %v2963_v46, %v3035_v8  ;;  %v2884_v26 = vadd.f32 %v2838_v63, %v2577_v62 }
 0x2f9   : > { %3107 = vst.msk [vmem:[%s4255_s22 + $0xf0] sm:$0xff] %vm273_vm0, %v3071_v4 }
 0x2fa   : > { %v2924_v23 = vmul.f32 %v4518_v27, %v2884_v26 }
 0x2fb   : > { %v2227_v54 = vpop.f32.mrf.mxu2 }
 0x2fc   : > { %v2964_v25 = vadd.f32 %v4524_v35, %v2924_v23  ;;  %v2271_v41 = vadd.f32 %v2227_v54, %v1964_v43  ;;  %v2534_v1 = vpop.f32.mrf.mxu3 }
 0x2fd   : > { %v1923_v51 = vpop.f32.mrf.mxu1 }
 0x2fe   : > { %vm3000_vm2 = vcmp.gt.f32.partialorder %v2964_v25, 0.0  ;;  %v3036_v12 = vmul.f32 0.01, %v2964_v25  ;;  %v2578_v49 = vadd.f32 %v2534_v1, %v2271_v41  ;;  %v2844_v52 = vpop.f32.mrf.mxu0  ;;  %v1965_v36 = vadd.f32 %v1923_v51, %v4203_v37 }
 0x300   : > { %v3072_v56 = vsel %vm3000_vm2, %v2964_v25, %v3036_v12  ;;  %v2885_v15 = vadd.f32 %v2841_v2, %v2578_v49 }
 0x301   : > { %3108 = vst.msk [vmem:[%s4255_s22 + $0xf8] sm:$0xff] %vm273_vm0, %v3072_v56 }
 0x302   : > { %v2925_v30 = vmul.f32 %v4518_v27, %v2885_v15 }
 0x303   : > { %v2230_v31 = vpop.f32.mrf.mxu2 }
 0x304   : > { %v2965_v21 = vadd.f32 %v4524_v35, %v2925_v30  ;;  %v2272_v58 = vadd.f32 %v2230_v31, %v1965_v36  ;;  %v2537_v10 = vpop.f32.mrf.mxu3 }
 0x305   : > { %v1926_v18 = vpop.f32.mrf.mxu1 }
 0x306   : > { %vm3001_vm3 = vcmp.gt.f32.partialorder %v2965_v21, 0.0  ;;  %v3037_v0 = vmul.f32 0.01, %v2965_v21  ;;  %v2579_v6 = vadd.f32 %v2537_v10, %v2272_v58  ;;  %v1966_v17 = vadd.f32 %v1926_v18, %v4213_v44  ;;  %v2847_v39 = vpop.f32.mrf.mxu0 }
 0x308   : > { %v3073_v32 = vsel %vm3001_vm3, %v2965_v21, %v3037_v0  ;;  %v2886_v42 = vadd.f32 %v2844_v52, %v2579_v6 }
 0x309   : > { %3109 = vst.msk [vmem:[%s4255_s22 + $0x100] sm:$0xff] %vm273_vm0, %v3073_v32 }
 0x30a   : > { %v2926_v37 = vmul.f32 %v4518_v27, %v2886_v42 }
 0x30b   : > { %v2233_v13 = vpop.f32.mrf.mxu2 }
 0x30c   : > { %v2966_v38 = vadd.f32 %v4524_v35, %v2926_v37  ;;  %v2273_v33 = vadd.f32 %v2233_v13, %v1966_v17  ;;  %v2540_v48 = vpop.f32.mrf.mxu3 }
 0x30d   : > { %v1929_v53 = vpop.f32.mrf.mxu1 }
 0x30e   : > { %vm3002_vm4 = vcmp.gt.f32.partialorder %v2966_v38, 0.0  ;;  %v3038_v28 = vmul.f32 0.01, %v2966_v38  ;;  %v2580_v20 = vadd.f32 %v2540_v48, %v2273_v33  ;;  %v1967_v57 = vadd.f32 %v1929_v53, %v4223_v9  ;;  %v2850_v11 = vpop.f32.mrf.mxu0 }
 0x310   : > { %v3074_v47 = vsel %vm3002_vm4, %v2966_v38, %v3038_v28  ;;  %v2887_v40 = vadd.f32 %v2847_v39, %v2580_v20 }
 0x311   : > { %3110 = vst.msk [vmem:[%s4255_s22 + $0x108] sm:$0xff] %vm273_vm0, %v3074_v47 }
 0x312   : > { %v2927_v44 = vmul.f32 %v4518_v27, %v2887_v40 }
 0x313   : > { %v2236_v60 = vpop.f32.mrf.mxu2 }
 0x314   : > { %v2967_v14 = vadd.f32 %v4524_v35, %v2927_v44  ;;  %v2274_v16 = vadd.f32 %v2236_v60, %v1967_v57  ;;  %v2543_v59 = vpop.f32.mrf.mxu3 }
 0x316   : > { %vm3003_vm5 = vcmp.gt.f32.partialorder %v2967_v14, 0.0  ;;  %v3039_v29 = vmul.f32 0.01, %v2967_v14  ;;  %v2581_v3 = vadd.f32 %v2543_v59, %v2274_v16 }
 0x318   : > { %v3075_v7 = vsel %vm3003_vm5, %v2967_v14, %v3039_v29  ;;  %v2888_v22 = vadd.f32 %v2850_v11, %v2581_v3 }
 0x319   : > { %3111 = vst.msk [vmem:[%s4255_s22 + $0x110] sm:$0xff] %vm273_vm0, %v3075_v7 }
 0x31a   : > { %v2928_v63 = vmul.f32 %v4518_v27, %v2888_v22 }
 0x31c   : > { %v2968_v9 = vadd.f32 %v4524_v35, %v2928_v63 }
 0x31e   : > { %vm3004_vm6 = vcmp.gt.f32.partialorder %v2968_v9, 0.0  ;;  %v3040_v55 = vmul.f32 0.01, %v2968_v9 }
 0x320   : > { %v3076_v24 = vsel %vm3004_vm6, %v2968_v9, %v3040_v55 }
 0x321   : > { %3112 = vst.msk [vmem:[%s4255_s22 + $0x118] sm:$0xff] %vm273_vm0, %v3076_v24 }
 0x322 PF: > { %s14_s15 = sadd.s32 1, %s3532_s15  }
 0x323   : > { %p11_p4 = scmp.ge.s32.totalorder %s14_s15, 4  }
 0x325   :  { %13 = sbr.rel (!%p11_p4) target bundleno = 1 (0x1), region = 74 }

// kernel: up_block_forward.6
= control target key start
LH: loop header
LB: loop body
LE: loop exit
PB: predicated region body
PF: predicated region fallthrough
CT: control target
= control target key end

     0   :  { %s6824_s21 = smov 0   ;;  %s8794_s0 = inlined_call_operand.vmem [shape: f32[2,326,4], index: 0, kind: input, shape index: {}]   ;;  %s8795_s1 = inlined_call_operand.vmem [shape: f32[2,326,4], index: 1, kind: input, shape index: {}]   ;;  %s8796_s2 = inlined_call_operand.vmem [shape: f32[3,3,4,8], index: 2, kind: input, shape index: {}]   ;;  %s8797_s3 = inlined_call_operand.vmem [shape: f32[3,3,4,8], index: 3, kind: input, shape index: {}]   ;;  %s8798_s4 = inlined_call_operand.vmem [shape: f32[1,8], index: 4, kind: input, shape index: {}]   ;;  %s8799_s5 = inlined_call_operand.vmem [shape: f32[1,8], index: 5, kind: input, shape index: {}]   ;;  %s8800_s6 = inlined_call_operand.vmem [shape: f32[2,288,8], index: 6, kind: output, shape index: {}]  }
   0x1 LB: > { %s6072_s22 = sadd.s32 4294967295, %s6787_s21   ;;  %p6076_p0 = scmp.ge.s32.totalorder %s6787_s21, 1  ;;  %s6787_s21 = sphi %s6824_s21, %s16_s21  }
   0x2   : > { %p222_p1 = scmp.lt.s32.totalorder %s6787_s21, 3 }
   0x4   : > { %p223_p2 = pnand %p6076_p0, %p222_p1 }
   0x6   : > { %226 = sbr.rel (%p223_p2) target bundleno = 1454 (0x5ae), region = 44 }
   0xb   : > { %v6080_v0 = vld [vmem:[%s8796_s2 + $0x4] sm:$0xf]  ;;  %vm456_vm0 = vcmask 1043456   ;;  %v308_v1 = vld [vmem:[%s8796_s2] sm:$0xf]  ;;  %p257_p3 = scmp.lt.s32.totalorder %s6072_s22, 1 }
   0xc   : > { %6764 = vmatpush.msk.msra.mxu2 %vm456_vm0, %v6080_v0  ;;  %6765 = vmatpush.msk.msra.mxu3 %vm456_vm0, %v308_v1  ;;  %v6155_v2 = vld [vmem:[%s8796_s2 + $0x8] sm:$0xf]  ;;  %v6193_v3 = vld [vmem:[%s8796_s2 + $0xc] sm:$0xf]  ;;  %v6231_v4 = vld [vmem:[%s8796_s2 + $0x10] sm:$0xf] }
   0xd   : > { %s8829_s22 = smov (!%p257_p3, %s6072_s22), 1  ;;  %v6269_v5 = vld [vmem:[%s8796_s2 + $0x14] sm:$0xf]  ;;  %6081 = vmatpush.msk.msra.mxu0 %vm456_vm0, %v6080_v0  ;;  %6118 = vmatpush.msk.msra.mxu1 %vm456_vm0, %v308_v1  ;;  %vm347_vm1 = vcmask 31744   ;;  %vm5968_vm3 = vcmask 64512  }
   0xe   : > { %6156 = vmatpush.msk.msrb.mxu2 %vm456_vm0, %v6155_v2  ;;  %6194 = vmatpush.msk.msrb.mxu3 %vm456_vm0, %v6193_v3  ;;  %s6766_s11 = smul.u32 328, %s8829_s22  ;;  %v6307_v2 = vld [vmem:[%s8796_s2 + $0x18] sm:$0xf]  ;;  %v6345_v3 = vld [vmem:[%s8796_s2 + $0x1c] sm:$0xf] }
   0xf   : > { %6232 = vmatpush.msk.msrb.mxu0 %vm456_vm0, %v6231_v4  ;;  %6270 = vmatpush.msk.msrb.mxu1 %vm456_vm0, %v6269_v5  ;;  %s6767_s26 = smul.u32 288, %s8829_s22 }
  0x10   : > { %s6866_s14 = scalar_lea.vmem %s8794_s0, %s6766_s11  ;;  %s7504_s12 = scalar_lea.vmem %s8795_s1, %s6766_s11 }
  0x11   : > { %v327_v6 = vld [vmem:[%s6866_s14 + $0x91] sm:$0xff]  ;;  %v309_v8 = vld [vmem:[%s6866_s14 + $0x1] sm:$0xff]  ;;  %v328_v10 = vld [vmem:[%s6866_s14 + $0x99] sm:$0xff]  ;;  %s8480_s29 = scalar_lea.vmem %s8800_s6, %s6767_s26 }
  0x12   : > { %v290_v7 = vld [vmem:[%s6866_s14 + $0x90] sm:$0xff]  ;;  %6100 = vmatmul.msk.f32.vlgmr.msra.gmra.mxu2 %vm347_vm1, %v327_v6  ;;  %v272_v9 = vld [vmem:[%s6866_s14] sm:$0xff]  ;;  %6082 = vmatmul.msk.f32.vlgmr.msra.gmra.mxu0 %vm347_vm1, %v309_v8  ;;  %v291_v11 = vld [vmem:[%s6866_s14 + $0x98] sm:$0xff] }
  0x13   : > { %6137 = vmatmul.msk.f32.vlgmr.msra.gmra.mxu3 %vm347_vm1, %v290_v7  ;;  %6119 = vmatmul.msk.f32.vlgmr.msra.gmra.mxu1 %vm347_vm1, %v272_v9  ;;  %v310_v12 = vld [vmem:[%s6866_s14 + $0x9] sm:$0xff]  ;;  %v329_v14 = vld [vmem:[%s6866_s14 + $0xa1] sm:$0xff]  ;;  %v311_v16 = vld [vmem:[%s6866_s14 + $0x11] sm:$0xff] }
  0x14   : > { %v273_v13 = vld [vmem:[%s6866_s14 + $0x8] sm:$0xff]  ;;  %v292_v15 = vld [vmem:[%s6866_s14 + $0xa0] sm:$0xff]  ;;  %v274_v17 = vld [vmem:[%s6866_s14 + $0x10] sm:$0xff]  ;;  %6308 = vmatpush.msk.msra.mxu2 %vm456_vm0, %v6307_v2  ;;  %6346 = vmatpush.msk.msra.mxu3 %vm456_vm0, %v6345_v3 }
  0x15   : > { %v330_v18 = vld [vmem:[%s6866_s14 + $0xa9] sm:$0xff]  ;;  %v312_v20 = vld [vmem:[%s6866_s14 + $0x19] sm:$0xff]  ;;  %v331_v22 = vld [vmem:[%s6866_s14 + $0xb1] sm:$0xff] }
  0x16   : > { %v293_v19 = vld [vmem:[%s6866_s14 + $0xa8] sm:$0xff]  ;;  %v275_v21 = vld [vmem:[%s6866_s14 + $0x18] sm:$0xff]  ;;  %v294_v23 = vld [vmem:[%s6866_s14 + $0xb0] sm:$0xff] }
  0x17   : > { %v313_v24 = vld [vmem:[%s6866_s14 + $0x21] sm:$0xff]  ;;  %v332_v26 = vld [vmem:[%s6866_s14 + $0xb9] sm:$0xff]  ;;  %v314_v28 = vld [vmem:[%s6866_s14 + $0x29] sm:$0xff] }
  0x18   : > { %v276_v25 = vld [vmem:[%s6866_s14 + $0x20] sm:$0xff]  ;;  %v295_v27 = vld [vmem:[%s6866_s14 + $0xb8] sm:$0xff]  ;;  %v277_v29 = vld [vmem:[%s6866_s14 + $0x28] sm:$0xff] }
  0x19   : > { %v333_v30 = vld [vmem:[%s6866_s14 + $0xc1] sm:$0xff]  ;;  %v315_v32 = vld [vmem:[%s6866_s14 + $0x31] sm:$0xff]  ;;  %v334_v34 = vld [vmem:[%s6866_s14 + $0xc9] sm:$0xff] }
  0x1a   : > { %6101 = vmatmul.msk.f32.gmra.mxu2 %vm347_vm1, %v328_v10  ;;  %6083 = vmatmul.msk.f32.gmra.mxu0 %vm347_vm1, %v310_v12  ;;  %v296_v31 = vld [vmem:[%s6866_s14 + $0xc0] sm:$0xff]  ;;  %v278_v33 = vld [vmem:[%s6866_s14 + $0x30] sm:$0xff]  ;;  %v297_v35 = vld [vmem:[%s6866_s14 + $0xc8] sm:$0xff] }
  0x1b   : > { %6138 = vmatmul.msk.f32.gmra.mxu3 %vm347_vm1, %v291_v11  ;;  %6120 = vmatmul.msk.f32.gmra.mxu1 %vm347_vm1, %v273_v13  ;;  %v316_v36 = vld [vmem:[%s6866_s14 + $0x39] sm:$0xff]  ;;  %v335_v38 = vld [vmem:[%s6866_s14 + $0xd1] sm:$0xff]  ;;  %v317_v40 = vld [vmem:[%s6866_s14 + $0x41] sm:$0xff] }
  0x1c   : > { %v279_v37 = vld [vmem:[%s6866_s14 + $0x38] sm:$0xff]  ;;  %v298_v39 = vld [vmem:[%s6866_s14 + $0xd0] sm:$0xff]  ;;  %v280_v41 = vld [vmem:[%s6866_s14 + $0x40] sm:$0xff] }
  0x1d   : > { %v336_v42 = vld [vmem:[%s6866_s14 + $0xd9] sm:$0xff]  ;;  %v318_v44 = vld [vmem:[%s6866_s14 + $0x49] sm:$0xff]  ;;  %v337_v46 = vld [vmem:[%s6866_s14 + $0xe1] sm:$0xff] }
  0x1e   : > { %v299_v43 = vld [vmem:[%s6866_s14 + $0xd8] sm:$0xff]  ;;  %v281_v45 = vld [vmem:[%s6866_s14 + $0x48] sm:$0xff]  ;;  %v300_v47 = vld [vmem:[%s6866_s14 + $0xe0] sm:$0xff] }
  0x1f   : > { %v319_v48 = vld [vmem:[%s6866_s14 + $0x51] sm:$0xff]  ;;  %v338_v50 = vld [vmem:[%s6866_s14 + $0xe9] sm:$0xff]  ;;  %v320_v52 = vld [vmem:[%s6866_s14 + $0x59] sm:$0xff] }
  0x20   : > { %v282_v49 = vld [vmem:[%s6866_s14 + $0x50] sm:$0xff]  ;;  %v301_v51 = vld [vmem:[%s6866_s14 + $0xe8] sm:$0xff]  ;;  %v283_v53 = vld [vmem:[%s6866_s14 + $0x58] sm:$0xff] }
  0x21   : > { %v339_v54 = vld [vmem:[%s6866_s14 + $0xf1] sm:$0xff]  ;;  %v321_v56 = vld [vmem:[%s6866_s14 + $0x61] sm:$0xff]  ;;  %v340_v58 = vld [vmem:[%s6866_s14 + $0xf9] sm:$0xff] }
  0x22   : > { %6102 = vmatmul.msk.f32.gmra.mxu2 %vm347_vm1, %v329_v14  ;;  %6084 = vmatmul.msk.f32.gmra.mxu0 %vm347_vm1, %v311_v16  ;;  %v302_v55 = vld [vmem:[%s6866_s14 + $0xf0] sm:$0xff]  ;;  %v284_v57 = vld [vmem:[%s6866_s14 + $0x60] sm:$0xff]  ;;  %v303_v59 = vld [vmem:[%s6866_s14 + $0xf8] sm:$0xff] }
  0x23   : > { %6139 = vmatmul.msk.f32.gmra.mxu3 %vm347_vm1, %v292_v15  ;;  %6121 = vmatmul.msk.f32.gmra.mxu1 %vm347_vm1, %v274_v17  ;;  %v322_v60 = vld [vmem:[%s6866_s14 + $0x69] sm:$0xff]  ;;  %v341_v62 = vld [vmem:[%s6866_s14 + $0x101] sm:$0xff]  ;;  %v323_v0 = vld [vmem:[%s6866_s14 + $0x71] sm:$0xff] }
  0x24   : > { %v285_v61 = vld [vmem:[%s6866_s14 + $0x68] sm:$0xff]  ;;  %v304_v63 = vld [vmem:[%s6866_s14 + $0x100] sm:$0xff]  ;;  %v286_v1 = vld [vmem:[%s6866_s14 + $0x70] sm:$0xff] }
  0x25   : > { %v342_v4 = vld [vmem:[%s6866_s14 + $0x109] sm:$0xff]  ;;  %v324_v6 = vld [vmem:[%s6866_s14 + $0x79] sm:$0xff]  ;;  %v343_v10 = vld [vmem:[%s6866_s14 + $0x111] sm:$0xff] }
  0x26   : > { %v305_v5 = vld [vmem:[%s6866_s14 + $0x108] sm:$0xff]  ;;  %v287_v7 = vld [vmem:[%s6866_s14 + $0x78] sm:$0xff]  ;;  %v6383_v8 = vld [vmem:[%s8796_s2 + $0x20] sm:$0xf] }
  0x27   : > { %6384 = vmatpush.msk.msra.mxu0 %vm456_vm0, %v6383_v8  ;;  %v3027_v9 = vld [vmem:[%s8797_s3] sm:$0xf]  ;;  %v306_v11 = vld [vmem:[%s6866_s14 + $0x110] sm:$0xff] }
  0x28   : > { %6421 = vmatpush.msk.msra.mxu1 %vm456_vm0, %v3027_v9  ;;  %v325_v14 = vld [vmem:[%s6866_s14 + $0x81] sm:$0xff]  ;;  %v7107_v2 = vld [vmem:[%s6866_s14 + $0x34] sm:$0xff] }
  0x29   : > { %v288_v15 = vld [vmem:[%s6866_s14 + $0x80] sm:$0xff] }
  0x2a   : > { %6103 = vmatmul.msk.f32.gmra.mxu2 %vm347_vm1, %v330_v18  ;;  %6085 = vmatmul.msk.f32.gmra.mxu0 %vm347_vm1, %v312_v20  ;;  %v307_v20 = vld [vmem:[%s6866_s14 + $0x118] sm:$0xff] }
  0x2b   : > { %6140 = vmatmul.msk.f32.gmra.mxu3 %vm347_vm1, %v293_v19  ;;  %6122 = vmatmul.msk.f32.gmra.mxu1 %vm347_vm1, %v275_v21  ;;  %v344_v19 = vld [vmem:[%s6866_s14 + $0x119] sm:$0xff] }
  0x2c   : > { %v1446_v9 = vld [vmem:[%s6866_s14 + $0x3b] sm:$0xff] }
  0x32   : > { %6104 = vmatmul.msk.f32.gmra.mxu2 %vm347_vm1, %v331_v22  ;;  %6086 = vmatmul.msk.f32.gmra.mxu0 %vm347_vm1, %v313_v24  ;;  %v289_v24 = vld [vmem:[%s6866_s14 + $0x88] sm:$0xff] }
  0x33   : > { %6141 = vmatmul.msk.f32.gmra.mxu3 %vm347_vm1, %v294_v23  ;;  %6123 = vmatmul.msk.f32.gmra.mxu1 %vm347_vm1, %v276_v25  ;;  %v326_v23 = vld [vmem:[%s6866_s14 + $0x89] sm:$0xff] }
  0x3a   : > { %6105 = vmatmul.msk.f32.gmra.mxu2 %vm347_vm1, %v332_v26  ;;  %6087 = vmatmul.msk.f32.gmra.mxu0 %vm347_vm1, %v314_v28  ;;  %v821_v28 = vld [vmem:[%s6866_s14 + $0x2] sm:$0xff] }
  0x3b   : > { %6142 = vmatmul.msk.f32.gmra.mxu3 %vm347_vm1, %v295_v27  ;;  %6124 = vmatmul.msk.f32.gmra.mxu1 %vm347_vm1, %v277_v29  ;;  %v1131_v29 = vld [vmem:[%s6866_s14 + $0x12] sm:$0xff] }
  0x42   : > { %6106 = vmatmul.msk.f32.gmra.mxu2 %vm347_vm1, %v333_v30  ;;  %6088 = vmatmul.msk.f32.gmra.mxu0 %vm347_vm1, %v315_v32  ;;  %v1441_v32 = vld [vmem:[%s6866_s14 + $0x13] sm:$0xff] }
  0x43   : > { %6143 = vmatmul.msk.f32.gmra.mxu3 %vm347_vm1, %v296_v31  ;;  %6125 = vmatmul.msk.f32.gmra.mxu1 %vm347_vm1, %v278_v33  ;;  %v1751_v33 = vld [vmem:[%s6866_s14 + $0x14] sm:$0xff] }
  0x4a   : > { %6107 = vmatmul.msk.f32.gmra.mxu2 %vm347_vm1, %v334_v34  ;;  %6089 = vmatmul.msk.f32.gmra.mxu0 %vm347_vm1, %v316_v36 }
  0x4b   : > { %6144 = vmatmul.msk.f32.gmra.mxu3 %vm347_vm1, %v297_v35  ;;  %6126 = vmatmul.msk.f32.gmra.mxu1 %vm347_vm1, %v279_v37  ;;  %v822_v37 = vld [vmem:[%s6866_s14 + $0xa] sm:$0xff] }
  0x52   : > { %6108 = vmatmul.msk.f32.gmra.mxu2 %vm347_vm1, %v335_v38  ;;  %6090 = vmatmul.msk.f32.gmra.mxu0 %vm347_vm1, %v317_v40  ;;  %v1132_v38 = vld [vmem:[%s6866_s14 + $0x1a] sm:$0xff] }
  0x53   : > { %6145 = vmatmul.msk.f32.gmra.mxu3 %vm347_vm1, %v298_v39  ;;  %6127 = vmatmul.msk.f32.gmra.mxu1 %vm347_vm1, %v280_v41  ;;  %v1442_v41 = vld [vmem:[%s6866_s14 + $0x1b] sm:$0xff] }
  0x5a   : > { %6109 = vmatmul.msk.f32.gmra.mxu2 %vm347_vm1, %v336_v42  ;;  %6091 = vmatmul.msk.f32.gmra.mxu0 %vm347_vm1, %v318_v44  ;;  %v1752_v42 = vld [vmem:[%s6866_s14 + $0x1c] sm:$0xff] }
  0x5b   : > { %6146 = vmatmul.msk.f32.gmra.mxu3 %vm347_vm1, %v299_v43  ;;  %6128 = vmatmul.msk.f32.gmra.mxu1 %vm347_vm1, %v281_v45 }
  0x62   : > { %6110 = vmatmul.msk.f32.gmra.mxu2 %vm347_vm1, %v337_v46  ;;  %6092 = vmatmul.msk.f32.gmra.mxu0 %vm347_vm1, %v319_v48  ;;  %v1133_v46 = vld [vmem:[%s6866_s14 + $0x22] sm:$0xff] }
  0x63   : > { %6147 = vmatmul.msk.f32.gmra.mxu3 %vm347_vm1, %v300_v47  ;;  %6129 = vmatmul.msk.f32.gmra.mxu1 %vm347_vm1, %v282_v49  ;;  %v1443_v49 = vld [vmem:[%s6866_s14 + $0x23] sm:$0xff] }
  0x6a   : > { %6111 = vmatmul.msk.f32.gmra.mxu2 %vm347_vm1, %v338_v50  ;;  %6093 = vmatmul.msk.f32.gmra.mxu0 %vm347_vm1, %v320_v52  ;;  %v7075_v50 = vld [vmem:[%s6866_s14 + $0x24] sm:$0xff] }
  0x6b   : > { %6148 = vmatmul.msk.f32.gmra.mxu3 %vm347_vm1, %v301_v51  ;;  %6130 = vmatmul.msk.f32.gmra.mxu1 %vm347_vm1, %v283_v53 }
  0x72   : > { %6112 = vmatmul.msk.f32.gmra.mxu2 %vm347_vm1, %v339_v54  ;;  %6094 = vmatmul.msk.f32.gmra.mxu0 %vm347_vm1, %v321_v56  ;;  %v1134_v54 = vld [vmem:[%s6866_s14 + $0x2a] sm:$0xff] }
  0x73   : > { %6149 = vmatmul.msk.f32.gmra.mxu3 %vm347_vm1, %v302_v55  ;;  %6131 = vmatmul.msk.f32.gmra.mxu1 %vm347_vm1, %v284_v57  ;;  %v1444_v57 = vld [vmem:[%s6866_s14 + $0x2b] sm:$0xff] }
  0x7a   : > { %6113 = vmatmul.msk.f32.gmra.mxu2 %vm347_vm1, %v340_v58  ;;  %6095 = vmatmul.msk.f32.gmra.mxu0 %vm347_vm1, %v322_v60  ;;  %v7091_v58 = vld [vmem:[%s6866_s14 + $0x2c] sm:$0xff] }
  0x7b   : > { %6150 = vmatmul.msk.f32.gmra.mxu3 %vm347_vm1, %v303_v59  ;;  %6132 = vmatmul.msk.f32.gmra.mxu1 %vm347_vm1, %v285_v61 }
  0x82   : > { %6114 = vmatmul.msk.f32.gmra.mxu2 %vm347_vm1, %v341_v62  ;;  %6096 = vmatmul.msk.f32.gmra.mxu0 %vm347_vm1, %v323_v0  ;;  %v1135_v62 = vld [vmem:[%s6866_s14 + $0x32] sm:$0xff] }
  0x83   : > { %6151 = vmatmul.msk.f32.gmra.mxu3 %vm347_vm1, %v304_v63  ;;  %6133 = vmatmul.msk.f32.gmra.mxu1 %vm347_vm1, %v286_v1  ;;  %v1445_v1 = vld [vmem:[%s6866_s14 + $0x33] sm:$0xff] }
  0x8a   : > { %6115 = vmatmul.msk.f32.gmra.mxu2 %vm347_vm1, %v342_v4  ;;  %6097 = vmatmul.msk.f32.gmra.mxu0 %vm347_vm1, %v324_v6  ;;  %v1136_v6 = vld [vmem:[%s6866_s14 + $0x3a] sm:$0xff] }
  0x8b   : > { %6152 = vmatmul.msk.f32.gmra.mxu3 %vm347_vm1, %v305_v5  ;;  %6134 = vmatmul.msk.f32.gmra.mxu1 %vm347_vm1, %v287_v7 }
  0x8f   : > { %v7014_v12 = vpop.f32.mrf.mxu0 }
  0x90   : > { %v7016_v13 = vpop.f32.mrf.mxu1 }
  0x92   : > { %6116 = vmatmul.msk.f32.gmra.mxu2 %vm347_vm1, %v343_v10  ;;  %6098 = vmatmul.msk.f32.gmra.mxu0 %vm347_vm1, %v325_v14  ;;  %v7123_v10 = vld [vmem:[%s6866_s14 + $0x3c] sm:$0xff] }
  0x93   : > { %6153 = vmatmul.msk.f32.gmra.mxu3 %vm347_vm1, %v306_v11  ;;  %6135 = vmatmul.msk.f32.gmra.mxu1 %vm347_vm1, %v288_v15 }
  0x95   : > { %v531_v16 = vpop.f32.mrf.mxu2 }
  0x96   : > { %v767_v17 = vpop.f32.mrf.mxu3 }
  0x97   : > { %v7024_v18 = vadd.f32 %v767_v17, %v531_v16  ;;  %v7028_v21 = vpop.f32.mrf.mxu0  ;;  %v1137_v16 = vld [vmem:[%s6866_s14 + $0x42] sm:$0xff] }
  0x98   : > { %v7030_v22 = vpop.f32.mrf.mxu1 }
  0x9a   : > { %6117 = vmatmul.msk.f32.gmra.mxu2 %vm347_vm1, %v344_v19  ;;  %6099 = vmatmul.msk.f32.gmra.mxu0 %vm347_vm1, %v326_v23  ;;  %v7139_v23 = vld [vmem:[%s6866_s14 + $0x44] sm:$0xff] }
  0x9b   : > { %6154 = vmatmul.msk.f32.gmra.mxu3 %vm347_vm1, %v307_v20  ;;  %6136 = vmatmul.msk.f32.gmra.mxu1 %vm347_vm1, %v289_v24  ;;  %v1447_v20 = vld [vmem:[%s6866_s14 + $0x43] sm:$0xff] }
  0x9d   : > { %v534_v25 = vpop.f32.mrf.mxu2 }
  0x9e   : > { %v770_v26 = vpop.f32.mrf.mxu3 }
  0x9f   : > { %v7038_v27 = vadd.f32 %v770_v26, %v534_v25  ;;  %v7042_v30 = vpop.f32.mrf.mxu0 }
  0xa0   : > { %v7044_v31 = vpop.f32.mrf.mxu1 }
  0xa2   : > { %6157 = vmatmul.msk.f32.vlgmr.msrb.gmra.mxu2 %vm347_vm1, %v821_v28  ;;  %6233 = vmatmul.msk.f32.vlgmr.msrb.gmra.mxu0 %vm347_vm1, %v1441_v32  ;;  %v1138_v28 = vld [vmem:[%s6866_s14 + $0x4a] sm:$0xff] }
  0xa3   : > { %6195 = vmatmul.msk.f32.vlgmr.msrb.gmra.mxu3 %vm347_vm1, %v1131_v29  ;;  %6271 = vmatmul.msk.f32.vlgmr.msrb.gmra.mxu1 %vm347_vm1, %v1751_v33  ;;  %v1448_v33 = vld [vmem:[%s6866_s14 + $0x4b] sm:$0xff] }
  0xa5   : > { %v537_v34 = vpop.f32.mrf.mxu2 }
  0xa6   : > { %v773_v35 = vpop.f32.mrf.mxu3 }
  0xa7   : > { %v7052_v36 = vadd.f32 %v773_v35, %v537_v34  ;;  %v7056_v39 = vpop.f32.mrf.mxu0  ;;  %v7155_v34 = vld [vmem:[%s6866_s14 + $0x4c] sm:$0xff] }
  0xa8   : > { %v7058_v40 = vpop.f32.mrf.mxu1  ;;  %8805 = vst [vmem:[#allocation5_spill] sm:$0xff] %v7155_v34 }
  0xaa   : > { %6158 = vmatmul.msk.f32.gmra.mxu2 %vm347_vm1, %v822_v37  ;;  %6234 = vmatmul.msk.f32.gmra.mxu0 %vm347_vm1, %v1442_v41  ;;  %v1139_v41 = vld [vmem:[%s6866_s14 + $0x52] sm:$0xff] }
  0xab   : > { %6196 = vmatmul.msk.f32.gmra.mxu3 %vm347_vm1, %v1132_v38  ;;  %6272 = vmatmul.msk.f32.gmra.mxu1 %vm347_vm1, %v1752_v42 }
  0xad   : > { %v540_v43 = vpop.f32.mrf.mxu2 }
  0xae   : > { %v776_v44 = vpop.f32.mrf.mxu3 }
  0xaf   : > { %v7066_v45 = vadd.f32 %v776_v44, %v540_v43  ;;  %v7069_v47 = vpop.f32.mrf.mxu0  ;;  %v1449_v44 = vld [vmem:[%s6866_s14 + $0x53] sm:$0xff] }
  0xb0   : > { %v7071_v48 = vpop.f32.mrf.mxu1 }
  0xb2   : > { %6159 = vmatmul.msk.f32.gmra.mxu2 %vm347_vm1, %v1131_v29  ;;  %6235 = vmatmul.msk.f32.gmra.mxu0 %vm347_vm1, %v1443_v49 }
  0xb3   : > { %6197 = vmatmul.msk.f32.gmra.mxu3 %vm347_vm1, %v1133_v46  ;;  %6273 = vmatmul.msk.f32.gmra.mxu1 %vm347_vm1, %v7075_v50 }
  0xb5   : > { %v543_v51 = vpop.f32.mrf.mxu2 }
  0xb6   : > { %v779_v52 = vpop.f32.mrf.mxu3 }
  0xb7   : > { %v7082_v53 = vadd.f32 %v779_v52, %v543_v51  ;;  %v7085_v55 = vpop.f32.mrf.mxu0 }
  0xb8   : > { %v7087_v56 = vpop.f32.mrf.mxu1 }
  0xba   : > { %6160 = vmatmul.msk.f32.gmra.mxu2 %vm347_vm1, %v1132_v38  ;;  %6236 = vmatmul.msk.f32.gmra.mxu0 %vm347_vm1, %v1444_v57 }
  0xbb   : > { %6198 = vmatmul.msk.f32.gmra.mxu3 %vm347_vm1, %v1134_v54  ;;  %6274 = vmatmul.msk.f32.gmra.mxu1 %vm347_vm1, %v7091_v58 }
  0xbd   : > { %v546_v59 = vpop.f32.mrf.mxu2 }
  0xbe   : > { %v782_v60 = vpop.f32.mrf.mxu3 }
  0xbf   : > { %v7098_v61 = vadd.f32 %v782_v60, %v546_v59  ;;  %v7101_v63 = vpop.f32.mrf.mxu0  ;;  %v1450_v60 = vld [vmem:[%s6866_s14 + $0x5b] sm:$0xff] }
  0xc0   : > { %v7103_v0 = vpop.f32.mrf.mxu1 }
  0xc2   : > { %6161 = vmatmul.msk.f32.gmra.mxu2 %vm347_vm1, %v1133_v46  ;;  %6237 = vmatmul.msk.f32.gmra.mxu0 %vm347_vm1, %v1445_v1  ;;  %v1759_v46 = vld [vmem:[%s6866_s14 + $0x54] sm:$0xff] }
  0xc3   : > { %6199 = vmatmul.msk.f32.gmra.mxu3 %vm347_vm1, %v1135_v62  ;;  %6275 = vmatmul.msk.f32.gmra.mxu1 %vm347_vm1, %v7107_v2 }
  0xc5   : > { %v549_v3 = vpop.f32.mrf.mxu2 }
  0xc6   : > { %v785_v4 = vpop.f32.mrf.mxu3 }
  0xc7   : > { %v7114_v5 = vadd.f32 %v785_v4, %v549_v3  ;;  %v7117_v7 = vpop.f32.mrf.mxu0 }
  0xc8   : > { %v7119_v8 = vpop.f32.mrf.mxu1 }
  0xc9   : > { %8802 = vst [vmem:[#allocation2_spill] sm:$0xff] %v7114_v5 }
  0xca   : > { %6162 = vmatmul.msk.f32.gmra.mxu2 %vm347_vm1, %v1134_v54  ;;  %6238 = vmatmul.msk.f32.gmra.mxu0 %vm347_vm1, %v1446_v9  ;;  %v1140_v54 = vld [vmem:[%s6866_s14 + $0x5a] sm:$0xff] }
  0xcb   : > { %6200 = vmatmul.msk.f32.gmra.mxu3 %vm347_vm1, %v1136_v6  ;;  %6276 = vmatmul.msk.f32.gmra.mxu1 %vm347_vm1, %v7123_v10 }
  0xcd   : > { %v552_v11 = vpop.f32.mrf.mxu2 }
  0xce   : > { %v788_v14 = vpop.f32.mrf.mxu3 }
  0xcf   : > { %v7130_v15 = vadd.f32 %v788_v14, %v552_v11  ;;  %v7133_v17 = vpop.f32.mrf.mxu0  ;;  %v1451_v14 = vld [vmem:[%s6866_s14 + $0x63] sm:$0xff] }
  0xd0   : > { %v7135_v19 = vpop.f32.mrf.mxu1 }
  0xd1   : > { %8803 = vst [vmem:[#allocation3_spill] sm:$0xff] %v7130_v15 }
  0xd2   : > { %6163 = vmatmul.msk.f32.gmra.mxu2 %vm347_vm1, %v1135_v62  ;;  %6239 = vmatmul.msk.f32.gmra.mxu0 %vm347_vm1, %v1447_v20  ;;  %v1760_v62 = vld [vmem:[%s6866_s14 + $0x5c] sm:$0xff] }
  0xd3   : > { %6201 = vmatmul.msk.f32.gmra.mxu3 %vm347_vm1, %v1137_v16  ;;  %6277 = vmatmul.msk.f32.gmra.mxu1 %vm347_vm1, %v7139_v23 }
  0xd5   : > { %v555_v24 = vpop.f32.mrf.mxu2 }
  0xd6   : > { %v791_v25 = vpop.f32.mrf.mxu3 }
  0xd7   : > { %v7146_v26 = vadd.f32 %v791_v25, %v555_v24  ;;  %v7149_v29 = vpop.f32.mrf.mxu0 }
  0xd8   : > { %v7151_v32 = vpop.f32.mrf.mxu1 }
  0xd9   : > { %8804 = vst [vmem:[#allocation4_spill] sm:$0xff] %v7146_v26 }
  0xda   : > { %6164 = vmatmul.msk.f32.gmra.mxu2 %vm347_vm1, %v1136_v6  ;;  %6240 = vmatmul.msk.f32.gmra.mxu0 %vm347_vm1, %v1448_v33  ;;  %v1141_v6 = vld [vmem:[%s6866_s14 + $0x62] sm:$0xff] }
  0xdb   : > { %6202 = vmatmul.msk.f32.gmra.mxu3 %vm347_vm1, %v1138_v28  ;;  %6278 = vmatmul.msk.f32.gmra.mxu1 %vm347_vm1, %v7155_v34  ;;  %v1458_v34 = vld [vmem:[%s6866_s14 + $0x9b] sm:$0xff] }
  0xdd   : > { %v558_v35 = vpop.f32.mrf.mxu2 }
  0xde   : > { %v794_v37 = vpop.f32.mrf.mxu3 }
  0xdf   : > { %v7162_v38 = vadd.f32 %v794_v37, %v558_v35  ;;  %v7165_v42 = vpop.f32.mrf.mxu0  ;;  %v1452_v37 = vld [vmem:[%s6866_s14 + $0x6b] sm:$0xff] }
  0xe0   : > { %v7167_v43 = vpop.f32.mrf.mxu1 }
  0xe1   : > { %8806 = vst [vmem:[#allocation6_spill] sm:$0xff] %v7162_v38  ;;  %v1767_v38 = vld [vmem:[%s6866_s14 + $0x94] sm:$0xff] }
  0xe2   : > { %6165 = vmatmul.msk.f32.gmra.mxu2 %vm347_vm1, %v1137_v16  ;;  %6241 = vmatmul.msk.f32.gmra.mxu0 %vm347_vm1, %v1449_v44  ;;  %v1761_v16 = vld [vmem:[%s6866_s14 + $0x64] sm:$0xff] }
  0xe3   : > { %6203 = vmatmul.msk.f32.gmra.mxu3 %vm347_vm1, %v1139_v41  ;;  %6279 = vmatmul.msk.f32.gmra.mxu1 %vm347_vm1, %v1759_v46 }
  0xe5   : > { %v561_v49 = vpop.f32.mrf.mxu2 }
  0xe6   : > { %v797_v51 = vpop.f32.mrf.mxu3 }
  0xe7   : > { %v7175_v52 = vadd.f32 %v797_v51, %v561_v49  ;;  %v7178_v57 = vpop.f32.mrf.mxu0  ;;  %v1143_v51 = vld [vmem:[%s6866_s14 + $0x72] sm:$0xff] }
  0xe8   : > { %v7180_v59 = vpop.f32.mrf.mxu1 }
  0xe9   : > { %8807 = vst [vmem:[#allocation7_spill] sm:$0xff] %v7175_v52  ;;  %v1457_v52 = vld [vmem:[%s6866_s14 + $0x93] sm:$0xff] }
  0xea   : > { %6166 = vmatmul.msk.f32.gmra.mxu2 %vm347_vm1, %v1138_v28  ;;  %6242 = vmatmul.msk.f32.gmra.mxu0 %vm347_vm1, %v1450_v60  ;;  %v1142_v28 = vld [vmem:[%s6866_s14 + $0x6a] sm:$0xff] }
  0xeb   : > { %6204 = vmatmul.msk.f32.gmra.mxu3 %vm347_vm1, %v1140_v54  ;;  %6280 = vmatmul.msk.f32.gmra.mxu1 %vm347_vm1, %v1760_v62 }
  0xed   : > { %v564_v1 = vpop.f32.mrf.mxu2 }
  0xee   : > { %v800_v3 = vpop.f32.mrf.mxu3 }
  0xef   : > { %v7188_v4 = vadd.f32 %v800_v3, %v564_v1  ;;  %v7191_v9 = vpop.f32.mrf.mxu0  ;;  %v1453_v1 = vld [vmem:[%s6866_s14 + $0x73] sm:$0xff] }
  0xf0   : > { %v7193_v11 = vpop.f32.mrf.mxu1 }
  0xf1   : > { %8808 = vst [vmem:[#allocation8_spill] sm:$0xff] %v7188_v4 }
  0xf2   : > { %6167 = vmatmul.msk.f32.gmra.mxu2 %vm347_vm1, %v1139_v41  ;;  %6243 = vmatmul.msk.f32.gmra.mxu0 %vm347_vm1, %v1451_v14  ;;  %v1762_v41 = vld [vmem:[%s6866_s14 + $0x6c] sm:$0xff] }
  0xf3   : > { %6205 = vmatmul.msk.f32.gmra.mxu3 %vm347_vm1, %v1141_v6  ;;  %6281 = vmatmul.msk.f32.gmra.mxu1 %vm347_vm1, %v1761_v16 }
  0xf5   : > { %v567_v20 = vpop.f32.mrf.mxu2 }
  0xf6   : > { %v803_v24 = vpop.f32.mrf.mxu3 }
  0xf7   : > { %v7201_v25 = vadd.f32 %v803_v24, %v567_v20  ;;  %v7204_v33 = vpop.f32.mrf.mxu0  ;;  %v1144_v20 = vld [vmem:[%s6866_s14 + $0x7a] sm:$0xff] }
  0xf8   : > { %v7206_v35 = vpop.f32.mrf.mxu1 }
  0xf9   : > { %8809 = vst [vmem:[#allocation9_spill] sm:$0xff] %v7201_v25  ;;  %v1456_v25 = vld [vmem:[%s6866_s14 + $0x8b] sm:$0xff] }
  0xfa   : > { %6168 = vmatmul.msk.f32.gmra.mxu2 %vm347_vm1, %v1140_v54  ;;  %6244 = vmatmul.msk.f32.gmra.mxu0 %vm347_vm1, %v1452_v37  ;;  %v1763_v54 = vld [vmem:[%s6866_s14 + $0x74] sm:$0xff] }
  0xfb   : > { %6206 = vmatmul.msk.f32.gmra.mxu3 %vm347_vm1, %v1142_v28  ;;  %6282 = vmatmul.msk.f32.gmra.mxu1 %vm347_vm1, %v1762_v41  ;;  %v1454_v41 = vld [vmem:[%s6866_s14 + $0x7b] sm:$0xff] }
  0xfd   : > { %v570_v44 = vpop.f32.mrf.mxu2 }
  0xfe   : > { %v806_v46 = vpop.f32.mrf.mxu3 }
  0xff   : > { %v7214_v49 = vadd.f32 %v806_v46, %v570_v44  ;;  %v7217_v60 = vpop.f32.mrf.mxu0 }
 0x100   : > { %v7219_v62 = vpop.f32.mrf.mxu1 }
 0x101   : > { %8810 = vst [vmem:[#allocation10_spill] sm:$0xff] %v7214_v49 }
 0x102   : > { %6169 = vmatmul.msk.f32.gmra.mxu2 %vm347_vm1, %v1141_v6  ;;  %6245 = vmatmul.msk.f32.gmra.mxu0 %vm347_vm1, %v1453_v1  ;;  %v1764_v6 = vld [vmem:[%s6866_s14 + $0x7c] sm:$0xff] }
 0x103   : > { %6207 = vmatmul.msk.f32.gmra.mxu3 %vm347_vm1, %v1143_v51  ;;  %6283 = vmatmul.msk.f32.gmra.mxu1 %vm347_vm1, %v1763_v54  ;;  %v1145_v54 = vld [vmem:[%s6866_s14 + $0x82] sm:$0xff] }
 0x105   : > { %v573_v3 = vpop.f32.mrf.mxu2 }
 0x106   : > { %v809_v14 = vpop.f32.mrf.mxu3 }
 0x107   : > { %v7227_v16 = vadd.f32 %v809_v14, %v573_v3  ;;  %v7230_v24 = vpop.f32.mrf.mxu0 }
 0x108   : > { %v7232_v37 = vpop.f32.mrf.mxu1 }
 0x109   : > { %8811 = vst [vmem:[#allocation11_spill] sm:$0xff] %v7227_v16  ;;  %v1455_v16 = vld [vmem:[%s6866_s14 + $0x83] sm:$0xff] }
 0x10a   : > { %6170 = vmatmul.msk.f32.gmra.mxu2 %vm347_vm1, %v1142_v28  ;;  %6246 = vmatmul.msk.f32.gmra.mxu0 %vm347_vm1, %v1454_v41  ;;  %v1765_v28 = vld [vmem:[%s6866_s14 + $0x84] sm:$0xff] }
 0x10b   : > { %6208 = vmatmul.msk.f32.gmra.mxu3 %vm347_vm1, %v1144_v20  ;;  %6284 = vmatmul.msk.f32.gmra.mxu1 %vm347_vm1, %v1764_v6 }
 0x10d   : > { %v576_v44 = vpop.f32.mrf.mxu2 }
 0x10e   : > { %v812_v46 = vpop.f32.mrf.mxu3 }
 0x10f   : > { %v7240_v1 = vadd.f32 %v812_v46, %v576_v44  ;;  %v7243_v3 = vpop.f32.mrf.mxu0  ;;  %v1146_v46 = vld [vmem:[%s6866_s14 + $0x8a] sm:$0xff] }
 0x110   : > { %v7245_v14 = vpop.f32.mrf.mxu1 }
 0x111   : > { %8812 = vst [vmem:[#allocation12_spill] sm:$0xff] %v7240_v1 }
 0x112   : > { %6171 = vmatmul.msk.f32.gmra.mxu2 %vm347_vm1, %v1143_v51  ;;  %6247 = vmatmul.msk.f32.gmra.mxu0 %vm347_vm1, %v1455_v16  ;;  %v1766_v51 = vld [vmem:[%s6866_s14 + $0x8c] sm:$0xff] }
 0x113   : > { %6209 = vmatmul.msk.f32.gmra.mxu3 %vm347_vm1, %v1145_v54  ;;  %6285 = vmatmul.msk.f32.gmra.mxu1 %vm347_vm1, %v1765_v28 }
 0x115   : > { %v579_v41 = vpop.f32.mrf.mxu2 }
 0x116   : > { %v815_v6 = vpop.f32.mrf.mxu3 }
 0x117   : > { %v7253_v44 = vadd.f32 %v815_v6, %v579_v41  ;;  %v7256_v1 = vpop.f32.mrf.mxu0  ;;  %v1147_v6 = vld [vmem:[%s6866_s14 + $0x92] sm:$0xff] }
 0x118   : > { %v7258_v49 = vpop.f32.mrf.mxu1 }
 0x119   : > { %8813 = vst [vmem:[#allocation13_spill] sm:$0xff] %v7253_v44 }
 0x11a   : > { %6172 = vmatmul.msk.f32.gmra.mxu2 %vm347_vm1, %v1144_v20  ;;  %6248 = vmatmul.msk.f32.gmra.mxu0 %vm347_vm1, %v1456_v25  ;;  %v714_v25 = vadd.f32 %v7016_v13, %v7014_v12  ;;  %v717_v12 = vadd.f32 %v7030_v22, %v7028_v21  ;;  %v720_v21 = vadd.f32 %v7044_v31, %v7042_v30 }
 0x11b   : > { %6210 = vmatmul.msk.f32.gmra.mxu3 %vm347_vm1, %v1146_v46  ;;  %6286 = vmatmul.msk.f32.gmra.mxu1 %vm347_vm1, %v1766_v51  ;;  %v723_v30 = vadd.f32 %v7058_v40, %v7056_v39  ;;  %v726_v39 = vadd.f32 %v7071_v48, %v7069_v47  ;;  %v729_v47 = vadd.f32 %v7087_v56, %v7085_v55 }
 0x11c   : > { %v732_v55 = vadd.f32 %v7103_v0, %v7101_v63  ;;  %v735_v63 = vadd.f32 %v7119_v8, %v7117_v7  ;;  %v738_v7 = vadd.f32 %v7135_v19, %v7133_v17  ;;  %v741_v17 = vadd.f32 %v7151_v32, %v7149_v29 }
 0x11d   : > { %v582_v16 = vpop.f32.mrf.mxu2  ;;  %v744_v29 = vadd.f32 %v7167_v43, %v7165_v42  ;;  %v747_v42 = vadd.f32 %v7180_v59, %v7178_v57  ;;  %v750_v57 = vadd.f32 %v7193_v11, %v7191_v9  ;;  %v753_v9 = vadd.f32 %v7206_v35, %v7204_v33 }
 0x11e   : > { %v818_v28 = vpop.f32.mrf.mxu3  ;;  %v756_v33 = vadd.f32 %v7219_v62, %v7217_v60  ;;  %v759_v60 = vadd.f32 %v7232_v37, %v7230_v24  ;;  %v6458_v24 = vld [vmem:[%s8797_s3 + $0x4] sm:$0xf]  ;;  %v762_v37 = vadd.f32 %v7245_v14, %v7243_v3  ;;  %v1784_v3 = vld [vmem:[%s6866_s14 + $0x11c] sm:$0xff] }
 0x11f   : > { %v7266_v41 = vadd.f32 %v818_v28, %v582_v16  ;;  %v1607_v44 = vpop.f32.mrf.mxu0  ;;  %v1148_v28 = vld [vmem:[%s6866_s14 + $0x9a] sm:$0xff]  ;;  %6459 = vmatpush.msk.msrb.mxu2 %vm456_vm0, %v6458_v24 }
 0x120   : > { %v1917_v4 = vpop.f32.mrf.mxu1 }
 0x121   : > { %8814 = vst [vmem:[#allocation14_spill] sm:$0xff] %v7266_v41 }
 0x122   : > { %6173 = vmatmul.msk.f32.gmra.mxu2 %vm347_vm1, %v1145_v54  ;;  %6249 = vmatmul.msk.f32.gmra.mxu0 %vm347_vm1, %v1457_v52  ;;  %v1768_v54 = vld [vmem:[%s6866_s14 + $0x9c] sm:$0xff] }
 0x123   : > { %6211 = vmatmul.msk.f32.gmra.mxu3 %vm347_vm1, %v1147_v6  ;;  %6287 = vmatmul.msk.f32.gmra.mxu1 %vm347_vm1, %v1767_v38 }
 0x125   : > { %v987_v20 = vpop.f32.mrf.mxu2 }
 0x126   : > { %v1297_v51 = vpop.f32.mrf.mxu3  ;;  %v1095_v16 = vadd.f32 %v987_v20, %v714_v25  ;;  %v1149_v20 = vld [vmem:[%s6866_s14 + $0xa2] sm:$0xff] }
 0x127   : > { %v1610_v26 = vpop.f32.mrf.mxu0 }
 0x128   : > { %v1405_v41 = vadd.f32 %v1297_v51, %v1095_v16  ;;  %v1920_v15 = vpop.f32.mrf.mxu1  ;;  %v1769_v16 = vld [vmem:[%s6866_s14 + $0xa4] sm:$0xff] }
 0x12a   : > { %v1715_v5 = vadd.f32 %v1607_v44, %v1405_v41  ;;  %6174 = vmatmul.msk.f32.gmra.mxu2 %vm347_vm1, %v1146_v46  ;;  %6250 = vmatmul.msk.f32.gmra.mxu0 %vm347_vm1, %v1458_v34  ;;  %v1459_v46 = vld [vmem:[%s6866_s14 + $0xa3] sm:$0xff] }
 0x12b   : > { %6212 = vmatmul.msk.f32.gmra.mxu3 %vm347_vm1, %v1148_v28  ;;  %6288 = vmatmul.msk.f32.gmra.mxu1 %vm347_vm1, %v1768_v54 }
 0x12c   : > { %v7286_v13 = vadd.f32 %v1917_v4, %v1715_v5 }
 0x12d   : > { %v990_v38 = vpop.f32.mrf.mxu2 }
 0x12e   : > { %v1300_v52 = vpop.f32.mrf.mxu3  ;;  %v1096_v25 = vadd.f32 %v990_v38, %v717_v12  ;;  %v1150_v12 = vld [vmem:[%s6866_s14 + $0xaa] sm:$0xff] }
 0x12f   : > { %v1613_v44 = vpop.f32.mrf.mxu0 }
 0x130   : > { %v1406_v51 = vadd.f32 %v1300_v52, %v1096_v25  ;;  %v1923_v41 = vpop.f32.mrf.mxu1  ;;  %v1770_v25 = vld [vmem:[%s6866_s14 + $0xac] sm:$0xff] }
 0x132   : > { %v1716_v34 = vadd.f32 %v1610_v26, %v1406_v51  ;;  %6175 = vmatmul.msk.f32.gmra.mxu2 %vm347_vm1, %v1147_v6  ;;  %6251 = vmatmul.msk.f32.gmra.mxu0 %vm347_vm1, %v1459_v46  ;;  %v1460_v6 = vld [vmem:[%s6866_s14 + $0xab] sm:$0xff] }
 0x133   : > { %6213 = vmatmul.msk.f32.gmra.mxu3 %vm347_vm1, %v1149_v20  ;;  %6289 = vmatmul.msk.f32.gmra.mxu1 %vm347_vm1, %v1769_v16 }
 0x134   : > { %v7297_v22 = vadd.f32 %v1920_v15, %v1716_v34  ;;  %v1151_v34 = vld [vmem:[%s6866_s14 + $0xb2] sm:$0xff] }
 0x135   : > { %v993_v5 = vpop.f32.mrf.mxu2 }
 0x136   : > { %v1303_v4 = vpop.f32.mrf.mxu3  ;;  %v1097_v54 = vadd.f32 %v993_v5, %v720_v21 }
 0x137   : > { %v1616_v26 = vpop.f32.mrf.mxu0 }
 0x138   : > { %v1407_v38 = vadd.f32 %v1303_v4, %v1097_v54  ;;  %v1926_v52 = vpop.f32.mrf.mxu1  ;;  %v1771_v4 = vld [vmem:[%s6866_s14 + $0xb4] sm:$0xff] }
 0x13a   : > { %v1717_v51 = vadd.f32 %v1613_v44, %v1407_v38  ;;  %6176 = vmatmul.msk.f32.gmra.mxu2 %vm347_vm1, %v1148_v28  ;;  %6252 = vmatmul.msk.f32.gmra.mxu0 %vm347_vm1, %v1460_v6  ;;  %v1461_v28 = vld [vmem:[%s6866_s14 + $0xb3] sm:$0xff] }
 0x13b   : > { %6214 = vmatmul.msk.f32.gmra.mxu3 %vm347_vm1, %v1150_v12  ;;  %6290 = vmatmul.msk.f32.gmra.mxu1 %vm347_vm1, %v1770_v25  ;;  %v1152_v25 = vld [vmem:[%s6866_s14 + $0xba] sm:$0xff] }
 0x13c   : > { %v7308_v31 = vadd.f32 %v1923_v41, %v1717_v51 }
 0x13d   : > { %v996_v15 = vpop.f32.mrf.mxu2 }
 0x13e   : > { %v1306_v46 = vpop.f32.mrf.mxu3  ;;  %v1098_v16 = vadd.f32 %v996_v15, %v723_v30  ;;  %v1772_v15 = vld [vmem:[%s6866_s14 + $0xbc] sm:$0xff] }
 0x13f   : > { %v1619_v44 = vpop.f32.mrf.mxu0 }
 0x140   : > { %v1408_v21 = vadd.f32 %v1306_v46, %v1098_v16  ;;  %v1929_v5 = vpop.f32.mrf.mxu1 }
 0x142   : > { %v1718_v54 = vadd.f32 %v1616_v26, %v1408_v21  ;;  %6177 = vmatmul.msk.f32.gmra.mxu2 %vm347_vm1, %v1149_v20  ;;  %6253 = vmatmul.msk.f32.gmra.mxu0 %vm347_vm1, %v1461_v28  ;;  %v1462_v20 = vld [vmem:[%s6866_s14 + $0xbb] sm:$0xff] }
 0x143   : > { %6215 = vmatmul.msk.f32.gmra.mxu3 %vm347_vm1, %v1151_v34  ;;  %6291 = vmatmul.msk.f32.gmra.mxu1 %vm347_vm1, %v1771_v4  ;;  %v1153_v28 = vld [vmem:[%s6866_s14 + $0xc2] sm:$0xff] }
 0x144   : > { %v7319_v40 = vadd.f32 %v1926_v52, %v1718_v54 }
 0x145   : > { %v999_v41 = vpop.f32.mrf.mxu2 }
 0x146   : > { %v1309_v38 = vpop.f32.mrf.mxu3  ;;  %v1099_v6 = vadd.f32 %v999_v41, %v726_v39  ;;  %v1773_v39 = vld [vmem:[%s6866_s14 + $0xc4] sm:$0xff] }
 0x147   : > { %v1622_v26 = vpop.f32.mrf.mxu0 }
 0x148   : > { %v1409_v51 = vadd.f32 %v1309_v38, %v1099_v6  ;;  %v1932_v30 = vpop.f32.mrf.mxu1 }
 0x14a   : > { %v1719_v46 = vadd.f32 %v1619_v44, %v1409_v51  ;;  %6178 = vmatmul.msk.f32.gmra.mxu2 %vm347_vm1, %v1150_v12  ;;  %6254 = vmatmul.msk.f32.gmra.mxu0 %vm347_vm1, %v1462_v20  ;;  %v1463_v12 = vld [vmem:[%s6866_s14 + $0xc3] sm:$0xff] }
 0x14b   : > { %6216 = vmatmul.msk.f32.gmra.mxu3 %vm347_vm1, %v1152_v25  ;;  %6292 = vmatmul.msk.f32.gmra.mxu1 %vm347_vm1, %v1772_v15  ;;  %v1154_v51 = vld [vmem:[%s6866_s14 + $0xca] sm:$0xff] }
 0x14c   : > { %v7330_v48 = vadd.f32 %v1929_v5, %v1719_v46  ;;  %v1774_v46 = vld [vmem:[%s6866_s14 + $0xcc] sm:$0xff] }
 0x14d   : > { %v1002_v52 = vpop.f32.mrf.mxu2 }
 0x14e   : > { %v1312_v16 = vpop.f32.mrf.mxu3  ;;  %v1100_v21 = vadd.f32 %v1002_v52, %v729_v47 }
 0x14f   : > { %v1625_v44 = vpop.f32.mrf.mxu0 }
 0x150   : > { %v1410_v4 = vadd.f32 %v1312_v16, %v1100_v21  ;;  %v1935_v54 = vpop.f32.mrf.mxu1  ;;  %v1155_v21 = vld [vmem:[%s6866_s14 + $0xd2] sm:$0xff] }
 0x152   : > { %v1720_v41 = vadd.f32 %v1622_v26, %v1410_v4  ;;  %6179 = vmatmul.msk.f32.gmra.mxu2 %vm347_vm1, %v1151_v34  ;;  %6255 = vmatmul.msk.f32.gmra.mxu0 %vm347_vm1, %v1463_v12  ;;  %v1464_v34 = vld [vmem:[%s6866_s14 + $0xcb] sm:$0xff] }
 0x153   : > { %6217 = vmatmul.msk.f32.gmra.mxu3 %vm347_vm1, %v1153_v28  ;;  %6293 = vmatmul.msk.f32.gmra.mxu1 %vm347_vm1, %v1773_v39  ;;  %v1775_v39 = vld [vmem:[%s6866_s14 + $0xd4] sm:$0xff] }
 0x154   : > { %v7341_v56 = vadd.f32 %v1932_v30, %v1720_v41 }
 0x155   : > { %v1005_v5 = vpop.f32.mrf.mxu2 }
 0x156   : > { %v1315_v38 = vpop.f32.mrf.mxu3  ;;  %v1101_v6 = vadd.f32 %v1005_v5, %v732_v55 }
 0x157   : > { %v1628_v26 = vpop.f32.mrf.mxu0 }
 0x158   : > { %v1411_v20 = vadd.f32 %v1315_v38, %v1101_v6  ;;  %v1938_v15 = vpop.f32.mrf.mxu1  ;;  %v1156_v38 = vld [vmem:[%s6866_s14 + $0xda] sm:$0xff] }
 0x15a   : > { %v1721_v47 = vadd.f32 %v1625_v44, %v1411_v20  ;;  %6180 = vmatmul.msk.f32.gmra.mxu2 %vm347_vm1, %v1152_v25  ;;  %6256 = vmatmul.msk.f32.gmra.mxu0 %vm347_vm1, %v1464_v34  ;;  %v1465_v25 = vld [vmem:[%s6866_s14 + $0xd3] sm:$0xff]  ;;  %v1776_v34 = vld [vmem:[%s6866_s14 + $0xdc] sm:$0xff] }
 0x15b   : > { %6218 = vmatmul.msk.f32.gmra.mxu3 %vm347_vm1, %v1154_v51  ;;  %6294 = vmatmul.msk.f32.gmra.mxu1 %vm347_vm1, %v1774_v46 }
 0x15c   : > { %v7352_v0 = vadd.f32 %v1935_v54, %v1721_v47 }
 0x15d   : > { %v1008_v30 = vpop.f32.mrf.mxu2 }
 0x15e   : > { %v1318_v52 = vpop.f32.mrf.mxu3  ;;  %v1102_v16 = vadd.f32 %v1008_v30, %v735_v63  ;;  %v1157_v30 = vld [vmem:[%s6866_s14 + $0xe2] sm:$0xff] }
 0x15f   : > { %v1631_v44 = vpop.f32.mrf.mxu0 }
 0x160   : > { %v1412_v4 = vadd.f32 %v1318_v52, %v1102_v16  ;;  %v1941_v12 = vpop.f32.mrf.mxu1 }
 0x162   : > { %v1722_v41 = vadd.f32 %v1628_v26, %v1412_v4  ;;  %6181 = vmatmul.msk.f32.gmra.mxu2 %vm347_vm1, %v1153_v28  ;;  %6257 = vmatmul.msk.f32.gmra.mxu0 %vm347_vm1, %v1465_v25  ;;  %v1466_v28 = vld [vmem:[%s6866_s14 + $0xdb] sm:$0xff] }
 0x163   : > { %6219 = vmatmul.msk.f32.gmra.mxu3 %vm347_vm1, %v1155_v21  ;;  %6295 = vmatmul.msk.f32.gmra.mxu1 %vm347_vm1, %v1775_v39 }
 0x164   : > { %v7363_v8 = vadd.f32 %v1938_v15, %v1722_v41 }
 0x165   : > { %v1011_v54 = vpop.f32.mrf.mxu2 }
 0x166   : > { %v1321_v55 = vpop.f32.mrf.mxu3  ;;  %v1103_v5 = vadd.f32 %v1011_v54, %v738_v7  ;;  %v1158_v7 = vld [vmem:[%s6866_s14 + $0xea] sm:$0xff] }
 0x167   : > { %v1634_v20 = vpop.f32.mrf.mxu0 }
 0x168   : > { %v1413_v6 = vadd.f32 %v1321_v55, %v1103_v5  ;;  %v1944_v26 = vpop.f32.mrf.mxu1 }
 0x16a   : > { %v1723_v46 = vadd.f32 %v1631_v44, %v1413_v6  ;;  %6182 = vmatmul.msk.f32.gmra.mxu2 %vm347_vm1, %v1154_v51  ;;  %6258 = vmatmul.msk.f32.gmra.mxu0 %vm347_vm1, %v1466_v28  ;;  %v1467_v51 = vld [vmem:[%s6866_s14 + $0xe3] sm:$0xff]  ;;  %v1778_v6 = vld [vmem:[%s6866_s14 + $0xec] sm:$0xff] }
 0x16b   : > { %6220 = vmatmul.msk.f32.gmra.mxu3 %vm347_vm1, %v1156_v38  ;;  %6296 = vmatmul.msk.f32.gmra.mxu1 %vm347_vm1, %v1776_v34  ;;  %v1777_v44 = vld [vmem:[%s6866_s14 + $0xe4] sm:$0xff] }
 0x16c   : > { %v7374_v19 = vadd.f32 %v1941_v12, %v1723_v46  ;;  %v1159_v46 = vld [vmem:[%s6866_s14 + $0xf2] sm:$0xff] }
 0x16d   : > { %v1014_v15 = vpop.f32.mrf.mxu2 }
 0x16e   : > { %v1324_v47 = vpop.f32.mrf.mxu3  ;;  %v1104_v63 = vadd.f32 %v1014_v15, %v741_v17 }
 0x16f   : > { %v1637_v16 = vpop.f32.mrf.mxu0 }
 0x170   : > { %v1414_v52 = vadd.f32 %v1324_v47, %v1104_v63  ;;  %v1947_v4 = vpop.f32.mrf.mxu1  ;;  %v1779_v63 = vld [vmem:[%s6866_s14 + $0xf4] sm:$0xff] }
 0x172   : > { %v1724_v25 = vadd.f32 %v1634_v20, %v1414_v52  ;;  %6183 = vmatmul.msk.f32.gmra.mxu2 %vm347_vm1, %v1155_v21  ;;  %6259 = vmatmul.msk.f32.gmra.mxu0 %vm347_vm1, %v1467_v51  ;;  %v1468_v21 = vld [vmem:[%s6866_s14 + $0xeb] sm:$0xff] }
 0x173   : > { %6221 = vmatmul.msk.f32.gmra.mxu3 %vm347_vm1, %v1157_v30  ;;  %6297 = vmatmul.msk.f32.gmra.mxu1 %vm347_vm1, %v1777_v44  ;;  %v1160_v44 = vld [vmem:[%s6866_s14 + $0xfa] sm:$0xff] }
 0x174   : > { %v7385_v32 = vadd.f32 %v1944_v26, %v1724_v25 }
 0x175   : > { %v1017_v12 = vpop.f32.mrf.mxu2 }
 0x176   : > { %v1327_v39 = vpop.f32.mrf.mxu3  ;;  %v1105_v41 = vadd.f32 %v1017_v12, %v744_v29 }
 0x177   : > { %v1640_v55 = vpop.f32.mrf.mxu0 }
 0x178   : > { %v1415_v54 = vadd.f32 %v1327_v39, %v1105_v41  ;;  %v1950_v5 = vpop.f32.mrf.mxu1  ;;  %v1780_v39 = vld [vmem:[%s6866_s14 + $0xfc] sm:$0xff] }
 0x17a   : > { %v1725_v20 = vadd.f32 %v1637_v16, %v1415_v54  ;;  %6184 = vmatmul.msk.f32.gmra.mxu2 %vm347_vm1, %v1156_v38  ;;  %6260 = vmatmul.msk.f32.gmra.mxu0 %vm347_vm1, %v1468_v21  ;;  %v1469_v38 = vld [vmem:[%s6866_s14 + $0xf3] sm:$0xff]  ;;  %v1161_v21 = vld [vmem:[%s6866_s14 + $0x102] sm:$0xff] }
 0x17b   : > { %6222 = vmatmul.msk.f32.gmra.mxu3 %vm347_vm1, %v1158_v7  ;;  %6298 = vmatmul.msk.f32.gmra.mxu1 %vm347_vm1, %v1778_v6 }
 0x17c   : > { %v7396_v43 = vadd.f32 %v1947_v4, %v1725_v20 }
 0x17d   : > { %v1020_v26 = vpop.f32.mrf.mxu2 }
 0x17e   : > { %v1330_v28 = vpop.f32.mrf.mxu3  ;;  %v1106_v34 = vadd.f32 %v1020_v26, %v747_v42  ;;  %v1781_v26 = vld [vmem:[%s6866_s14 + $0x104] sm:$0xff] }
 0x17f   : > { %v1643_v15 = vpop.f32.mrf.mxu0 }
 0x180   : > { %v1416_v17 = vadd.f32 %v1330_v28, %v1106_v34  ;;  %v1953_v47 = vpop.f32.mrf.mxu1 }
 0x182   : > { %v1726_v52 = vadd.f32 %v1640_v55, %v1416_v17  ;;  %6185 = vmatmul.msk.f32.gmra.mxu2 %vm347_vm1, %v1157_v30  ;;  %6261 = vmatmul.msk.f32.gmra.mxu0 %vm347_vm1, %v1469_v38  ;;  %v1470_v30 = vld [vmem:[%s6866_s14 + $0xfb] sm:$0xff] }
 0x183   : > { %6223 = vmatmul.msk.f32.gmra.mxu3 %vm347_vm1, %v1159_v46  ;;  %6299 = vmatmul.msk.f32.gmra.mxu1 %vm347_vm1, %v1779_v63 }
 0x184   : > { %v7407_v59 = vadd.f32 %v1950_v5, %v1726_v52 }
 0x185   : > { %v1023_v16 = vpop.f32.mrf.mxu2 }
 0x186   : > { %v1333_v4 = vpop.f32.mrf.mxu3  ;;  %v1107_v51 = vadd.f32 %v1023_v16, %v750_v57  ;;  %v1782_v57 = vld [vmem:[%s6866_s14 + $0x10c] sm:$0xff] }
 0x187   : > { %v1646_v29 = vpop.f32.mrf.mxu0 }
 0x188   : > { %v1417_v25 = vadd.f32 %v1333_v4, %v1107_v51  ;;  %v1956_v12 = vpop.f32.mrf.mxu1 }
 0x18a   : > { %v1727_v41 = vadd.f32 %v1643_v15, %v1417_v25  ;;  %6186 = vmatmul.msk.f32.gmra.mxu2 %vm347_vm1, %v1158_v7  ;;  %6262 = vmatmul.msk.f32.gmra.mxu0 %vm347_vm1, %v1470_v30  ;;  %v1471_v7 = vld [vmem:[%s6866_s14 + $0x103] sm:$0xff] }
 0x18b   : > { %6224 = vmatmul.msk.f32.gmra.mxu3 %vm347_vm1, %v1160_v44  ;;  %6300 = vmatmul.msk.f32.gmra.mxu1 %vm347_vm1, %v1780_v39 }
 0x18c   : > { %v7418_v11 = vadd.f32 %v1953_v47, %v1727_v41  ;;  %v1162_v47 = vld [vmem:[%s6866_s14 + $0x10a] sm:$0xff]  ;;  %v1473_v41 = vld [vmem:[%s6866_s14 + $0x113] sm:$0xff] }
 0x18d   : > { %v1026_v54 = vpop.f32.mrf.mxu2 }
 0x18e   : > { %v1336_v55 = vpop.f32.mrf.mxu3  ;;  %v1108_v5 = vadd.f32 %v1026_v54, %v753_v9 }
 0x18f   : > { %v1649_v20 = vpop.f32.mrf.mxu0 }
 0x190   : > { %v1418_v6 = vadd.f32 %v1336_v55, %v1108_v5  ;;  %v1959_v42 = vpop.f32.mrf.mxu1  ;;  %v6496_v55 = vld [vmem:[%s8797_s3 + $0x8] sm:$0xf] }
 0x191   : > { %6497 = vmatpush.msk.msrb.mxu3 %vm456_vm0, %v6496_v55 }
 0x192   : > { %v1728_v28 = vadd.f32 %v1646_v29, %v1418_v6  ;;  %6187 = vmatmul.msk.f32.gmra.mxu2 %vm347_vm1, %v1159_v46  ;;  %6263 = vmatmul.msk.f32.gmra.mxu0 %vm347_vm1, %v1471_v7  ;;  %v1472_v46 = vld [vmem:[%s6866_s14 + $0x10b] sm:$0xff] }
 0x193   : > { %6225 = vmatmul.msk.f32.gmra.mxu3 %vm347_vm1, %v1161_v21  ;;  %6301 = vmatmul.msk.f32.gmra.mxu1 %vm347_vm1, %v1781_v26  ;;  %v1163_v29 = vld [vmem:[%s6866_s14 + $0x112] sm:$0xff] }
 0x194   : > { %v7429_v35 = vadd.f32 %v1956_v12, %v1728_v28  ;;  %v1474_v28 = vld [vmem:[%s6866_s14 + $0x11b] sm:$0xff] }
 0x195   : > { %v1029_v34 = vpop.f32.mrf.mxu2 }
 0x196   : > { %v1339_v17 = vpop.f32.mrf.mxu3  ;;  %v1109_v15 = vadd.f32 %v1029_v34, %v756_v33  ;;  %v765_v33 = vadd.f32 %v7258_v49, %v7256_v1 }
 0x197   : > { %v1652_v63 = vpop.f32.mrf.mxu0 }
 0x198   : > { %v1419_v38 = vadd.f32 %v1339_v17, %v1109_v15  ;;  %v1962_v52 = vpop.f32.mrf.mxu1  ;;  %v6534_v17 = vld [vmem:[%s8797_s3 + $0xc] sm:$0xf] }
 0x199   : > { %6535 = vmatpush.msk.msrb.mxu0 %vm456_vm0, %v6534_v17  ;;  %v2372_v17 = vld [vmem:[%s6866_s14 + $0x2d] sm:$0xff] }
 0x19a   : > { %v1729_v16 = vadd.f32 %v1649_v20, %v1419_v38  ;;  %6188 = vmatmul.msk.f32.gmra.mxu2 %vm347_vm1, %v1160_v44  ;;  %6264 = vmatmul.msk.f32.gmra.mxu0 %vm347_vm1, %v1472_v46  ;;  %v1783_v44 = vld [vmem:[%s6866_s14 + $0x114] sm:$0xff] }
 0x19b   : > { %6226 = vmatmul.msk.f32.gmra.mxu3 %vm347_vm1, %v1162_v47  ;;  %6302 = vmatmul.msk.f32.gmra.mxu1 %vm347_vm1, %v1782_v57  ;;  %v1164_v20 = vld [vmem:[%s6866_s14 + $0x11a] sm:$0xff]  ;;  %v1475_v57 = vld [vmem:[%s6866_s14 + $0x123] sm:$0xff] }
 0x19c   : > { %v7440_v62 = vadd.f32 %v1959_v42, %v1729_v16  ;;  %v1785_v16 = vld [vmem:[%s6866_s14 + $0x124] sm:$0xff] }
 0x19d   : > { %v1032_v4 = vpop.f32.mrf.mxu2 }
 0x19e   : > { %v1342_v51 = vpop.f32.mrf.mxu3  ;;  %v1110_v25 = vadd.f32 %v1032_v4, %v759_v60 }
 0x19f   : > { %v1655_v30 = vpop.f32.mrf.mxu0 }
 0x1a0   : > { %v1420_v12 = vadd.f32 %v1342_v51, %v1110_v25  ;;  %v1965_v39 = vpop.f32.mrf.mxu1 }
 0x1a2   : > { %v1730_v9 = vadd.f32 %v1652_v63, %v1420_v12  ;;  %6189 = vmatmul.msk.f32.gmra.mxu2 %vm347_vm1, %v1161_v21  ;;  %6265 = vmatmul.msk.f32.gmra.mxu0 %vm347_vm1, %v1473_v41  ;;  %v6572_v63 = vld [vmem:[%s8797_s3 + $0x10] sm:$0xf] }
 0x1a3   : > { %6227 = vmatmul.msk.f32.gmra.mxu3 %vm347_vm1, %v1163_v29  ;;  %6303 = vmatmul.msk.f32.gmra.mxu1 %vm347_vm1, %v1783_v44 }
 0x1a4   : > { %v7454_v54 = vadd.f32 %v1962_v52, %v1730_v9  ;;  %v1165_v52 = vld [vmem:[%s6866_s14 + $0x122] sm:$0xff]  ;;  %6573 = vmatpush.msk.msrb.mxu1 %vm456_vm0, %v6572_v63  ;;  %v1476_v9 = vld [vmem:[%s6866_s14 + $0x12b] sm:$0xff] }
 0x1a5   : > { %v1035_v5 = vpop.f32.mrf.mxu2  ;;  %v2682_v63 = vld [vmem:[%s6866_s14 + $0x2e] sm:$0xff] }
 0x1a6   : > { %v1345_v21 = vpop.f32.mrf.mxu3  ;;  %v1111_v6 = vadd.f32 %v1035_v5, %v762_v37 }
 0x1a7   : > { %v1658_v7 = vpop.f32.mrf.mxu0 }
 0x1a8   : > { %v1421_v42 = vadd.f32 %v1345_v21, %v1111_v6  ;;  %v1968_v26 = vpop.f32.mrf.mxu1  ;;  %v2371_v21 = vld [vmem:[%s6866_s14 + $0x25] sm:$0xff] }
 0x1aa   : > { %v1731_v14 = vadd.f32 %v1655_v30, %v1421_v42  ;;  %6190 = vmatmul.msk.f32.gmra.mxu2 %vm347_vm1, %v1162_v47  ;;  %6266 = vmatmul.msk.f32.gmra.mxu0 %vm347_vm1, %v1474_v28  ;;  %v1166_v30 = vld [vmem:[%s6866_s14 + $0x12a] sm:$0xff] }
 0x1ab   : > { %6228 = vmatmul.msk.f32.gmra.mxu3 %vm347_vm1, %v1164_v20  ;;  %6304 = vmatmul.msk.f32.gmra.mxu1 %vm347_vm1, %v1784_v3 }
 0x1ac   : > { %v7470_v34 = vadd.f32 %v1965_v39, %v1731_v14 }
 0x1ad   : > { %v1038_v15 = vpop.f32.mrf.mxu2 }
 0x1ae   : > { %v1348_v38 = vpop.f32.mrf.mxu3  ;;  %v1112_v47 = vadd.f32 %v1038_v15, %v765_v33 }
 0x1af   : > { %v1661_v1 = vpop.f32.mrf.mxu0 }
 0x1b0   : > { %v1422_v49 = vadd.f32 %v1348_v38, %v1112_v47  ;;  %v1971_v46 = vpop.f32.mrf.mxu1 }
 0x1b2   : > { %v1732_v60 = vadd.f32 %v1658_v7, %v1422_v49  ;;  %6191 = vmatmul.msk.f32.gmra.mxu2 %vm347_vm1, %v1163_v29  ;;  %6267 = vmatmul.msk.f32.gmra.mxu0 %vm347_vm1, %v1475_v57  ;;  %v1786_v29 = vld [vmem:[%s6866_s14 + $0x12c] sm:$0xff]  ;;  %v2373_v57 = vld [vmem:[%s6866_s14 + $0x35] sm:$0xff] }
 0x1b3   : > { %6229 = vmatmul.msk.f32.gmra.mxu3 %vm347_vm1, %v1165_v52  ;;  %6305 = vmatmul.msk.f32.gmra.mxu1 %vm347_vm1, %v1785_v16  ;;  %v2681_v7 = vld [vmem:[%s6866_s14 + $0x26] sm:$0xff] }
 0x1b4   : > { %v7487_v4 = vadd.f32 %v1968_v26, %v1732_v60  ;;  %v2991_v26 = vld [vmem:[%s7504_s12] sm:$0xff] }
 0x1b5   : > { %v1041_v51 = vpop.f32.mrf.mxu2 }
 0x1b6   : > { %v1351_v25 = vpop.f32.mrf.mxu3  ;;  %v1113_v12 = vadd.f32 %v1041_v51, %v7024_v18 }
 0x1b7   : > { %v1664_v41 = vpop.f32.mrf.mxu0 }
 0x1b8   : > { %v1423_v39 = vadd.f32 %v1351_v25, %v1113_v12  ;;  %v1974_v44 = vpop.f32.mrf.mxu1  ;;  %v2683_v25 = vld [vmem:[%s6866_s14 + $0x36] sm:$0xff] }
 0x1ba   : > { %v1733_v24 = vadd.f32 %v1661_v1, %v1423_v39  ;;  %6192 = vmatmul.msk.f32.gmra.mxu2 %vm347_vm1, %v1164_v20  ;;  %6268 = vmatmul.msk.f32.gmra.mxu0 %vm347_vm1, %v1476_v9 }
 0x1bb   : > { %6230 = vmatmul.msk.f32.gmra.mxu3 %vm347_vm1, %v1166_v30  ;;  %6306 = vmatmul.msk.f32.gmra.mxu1 %vm347_vm1, %v1786_v29 }
 0x1bc   : > { %v7497_v37 = vadd.f32 %v1971_v46, %v1733_v24 }
 0x1bd   : > { %v1044_v18 = vpop.f32.mrf.mxu2 }
 0x1be   : > { %v1354_v55 = vpop.f32.mrf.mxu3  ;;  %v1114_v5 = vadd.f32 %v1044_v18, %v7038_v27  ;;  %v2684_v18 = vld [vmem:[%s6866_s14 + $0x3e] sm:$0xff] }
 0x1bf   : > { %v1667_v20 = vpop.f32.mrf.mxu0 }
 0x1c0   : > { %v1424_v6 = vadd.f32 %v1354_v55, %v1114_v5  ;;  %v1977_v42 = vpop.f32.mrf.mxu1 }
 0x1c2   : > { %v1734_v28 = vadd.f32 %v1664_v41, %v1424_v6  ;;  %6309 = vmatmul.msk.f32.vlgmr.msra.gmra.mxu2 %vm347_vm1, %v7075_v50  ;;  %6385 = vmatmul.msk.f32.vlgmr.msra.gmra.mxu0 %vm347_vm1, %v2681_v7  ;;  %v2992_v50 = vld [vmem:[%s7504_s12 + $0x8] sm:$0xff] }
 0x1c3   : > { %6347 = vmatmul.msk.f32.vlgmr.msra.gmra.mxu3 %vm347_vm1, %v2371_v21  ;;  %6422 = vmatmul.msk.f32.vlgmr.msra.gmra.mxu1 %vm347_vm1, %v2991_v26 }
 0x1c4   : > { %v7515_v27 = vadd.f32 %v1974_v44, %v1734_v28  ;;  %v2374_v44 = vld [vmem:[%s6866_s14 + $0x3d] sm:$0xff]  ;;  %v2685_v28 = vld [vmem:[%s6866_s14 + $0x46] sm:$0xff] }
 0x1c5   : > { %v1047_v3 = vpop.f32.mrf.mxu2 }
 0x1c6   : > { %v1357_v14 = vpop.f32.mrf.mxu3  ;;  %v1115_v33 = vadd.f32 %v1047_v3, %v7052_v36 }
 0x1c7   : > { %v1670_v38 = vpop.f32.mrf.mxu0 }
 0x1c8   : > { %v1425_v15 = vadd.f32 %v1357_v14, %v1115_v33  ;;  %v1980_v47 = vpop.f32.mrf.mxu1 }
 0x1ca   : > { %v1735_v52 = vadd.f32 %v1667_v20, %v1425_v15  ;;  %6310 = vmatmul.msk.f32.gmra.mxu2 %vm347_vm1, %v7091_v58  ;;  %6386 = vmatmul.msk.f32.gmra.mxu0 %vm347_vm1, %v2682_v63  ;;  %v2993_v58 = vld [vmem:[%s7504_s12 + $0x10] sm:$0xff]  ;;  %v2375_v20 = vld [vmem:[%s6866_s14 + $0x45] sm:$0xff] }
 0x1cb   : > { %6348 = vmatmul.msk.f32.gmra.mxu3 %vm347_vm1, %v2372_v17  ;;  %6423 = vmatmul.msk.f32.gmra.mxu1 %vm347_vm1, %v2992_v50  ;;  %v8815_v17 = vld [vmem:[#allocation2_spill] sm:$0xff] }
 0x1cc   : > { %v7526_v36 = vadd.f32 %v1977_v42, %v1735_v52  ;;  %v2686_v52 = vld [vmem:[%s6866_s14 + $0x4e] sm:$0xff] }
 0x1cd   : > { %v1050_v49 = vpop.f32.mrf.mxu2 }
 0x1ce   : > { %v1360_v1 = vpop.f32.mrf.mxu3  ;;  %v1116_v46 = vadd.f32 %v1050_v49, %v7066_v45 }
 0x1cf   : > { %v1673_v60 = vpop.f32.mrf.mxu0 }
 0x1d0   : > { %v1426_v16 = vadd.f32 %v1360_v1, %v1116_v46  ;;  %v1983_v51 = vpop.f32.mrf.mxu1  ;;  %v8816_v1 = vld [vmem:[#allocation5_spill] sm:$0xff] }
 0x1d2   : > { %v1736_v12 = vadd.f32 %v1670_v38, %v1426_v16  ;;  %6311 = vmatmul.msk.f32.gmra.mxu2 %vm347_vm1, %v7107_v2  ;;  %6387 = vmatmul.msk.f32.gmra.mxu0 %vm347_vm1, %v2683_v25  ;;  %v2994_v2 = vld [vmem:[%s7504_s12 + $0x18] sm:$0xff]  ;;  %v2376_v38 = vld [vmem:[%s6866_s14 + $0x4d] sm:$0xff] }
 0x1d3   : > { %6349 = vmatmul.msk.f32.gmra.mxu3 %vm347_vm1, %v2373_v57  ;;  %6424 = vmatmul.msk.f32.gmra.mxu1 %vm347_vm1, %v2993_v58  ;;  %v2377_v25 = vld [vmem:[%s6866_s14 + $0x55] sm:$0xff] }
 0x1d4   : > { %v7537_v45 = vadd.f32 %v1980_v47, %v1736_v12 }
 0x1d5   : > { %v1053_v30 = vpop.f32.mrf.mxu2 }
 0x1d6   : > { %v1363_v39 = vpop.f32.mrf.mxu3  ;;  %v1117_v41 = vadd.f32 %v1053_v30, %v7082_v53 }
 0x1d7   : > { %v1676_v29 = vpop.f32.mrf.mxu0 }
 0x1d8   : > { %v1427_v9 = vadd.f32 %v1363_v39, %v1117_v41  ;;  %v1986_v24 = vpop.f32.mrf.mxu1  ;;  %v2687_v39 = vld [vmem:[%s6866_s14 + $0x56] sm:$0xff] }
 0x1d9   : > { %v2997_v41 = vld [vmem:[%s7504_s12 + $0x30] sm:$0xff] }
 0x1da   : > { %v1737_v55 = vadd.f32 %v1673_v60, %v1427_v9  ;;  %6312 = vmatmul.msk.f32.gmra.mxu2 %vm347_vm1, %v7123_v10  ;;  %6388 = vmatmul.msk.f32.gmra.mxu0 %vm347_vm1, %v2684_v18  ;;  %v2995_v10 = vld [vmem:[%s7504_s12 + $0x20] sm:$0xff]  ;;  %v8817_v60 = vld [vmem:[#allocation3_spill] sm:$0xff]  ;;  %v6778_v9 = vld [vmem:[%s6866_s14 + $0x54] sm:$0xff] }
 0x1db   : > { %6350 = vmatmul.msk.f32.gmra.mxu3 %vm347_vm1, %v2374_v44  ;;  %6425 = vmatmul.msk.f32.gmra.mxu1 %vm347_vm1, %v2994_v2  ;;  %v8818_v2 = vld [vmem:[#allocation4_spill] sm:$0xff] }
 0x1dc   : > { %v7548_v53 = vadd.f32 %v1983_v51, %v1737_v55 }
 0x1dd   : > { %v1056_v5 = vpop.f32.mrf.mxu2 }
 0x1de   : > { %v1366_v21 = vpop.f32.mrf.mxu3  ;;  %v1118_v6 = vadd.f32 %v1056_v5, %v7098_v61  ;;  %v2068_v5 = vld [vmem:[%s6866_s14 + $0x5c] sm:$0xff] }
 0x1df   : > { %v1679_v7 = vpop.f32.mrf.mxu0 }
 0x1e0   : > { %v1428_v42 = vadd.f32 %v1366_v21, %v1118_v6  ;;  %v1989_v26 = vpop.f32.mrf.mxu1  ;;  %v2378_v21 = vld [vmem:[%s6866_s14 + $0x5d] sm:$0xff] }
 0x1e2   : > { %v1738_v3 = vadd.f32 %v1676_v29, %v1428_v42  ;;  %6313 = vmatmul.msk.f32.gmra.mxu2 %vm347_vm1, %v7139_v23  ;;  %6389 = vmatmul.msk.f32.gmra.mxu0 %vm347_vm1, %v2685_v28  ;;  %v2996_v23 = vld [vmem:[%s7504_s12 + $0x28] sm:$0xff] }
 0x1e3   : > { %6351 = vmatmul.msk.f32.gmra.mxu3 %vm347_vm1, %v2375_v20  ;;  %6426 = vmatmul.msk.f32.gmra.mxu1 %vm347_vm1, %v2995_v10 }
 0x1e4   : > { %v7559_v61 = vadd.f32 %v1986_v24, %v1738_v3 }
 0x1e5   : > { %v1059_v14 = vpop.f32.mrf.mxu2 }
 0x1e6   : > { %v1369_v33 = vpop.f32.mrf.mxu3  ;;  %v1119_v15 = vadd.f32 %v1059_v14, %v8815_v17 }
 0x1e7   : > { %v1682_v63 = vpop.f32.mrf.mxu0 }
 0x1e8   : > { %v1429_v47 = vadd.f32 %v1369_v33, %v1119_v15  ;;  %v1992_v50 = vpop.f32.mrf.mxu1  ;;  %v8819_v33 = vld [vmem:[#allocation6_spill] sm:$0xff] }
 0x1e9   : > { %v2069_v15 = vld [vmem:[%s6866_s14 + $0x64] sm:$0xff] }
 0x1ea   : > { %v1739_v49 = vadd.f32 %v1679_v7, %v1429_v47  ;;  %6314 = vmatmul.msk.f32.gmra.mxu2 %vm347_vm1, %v8816_v1  ;;  %6390 = vmatmul.msk.f32.gmra.mxu0 %vm347_vm1, %v2686_v52  ;;  %v2688_v7 = vld [vmem:[%s6866_s14 + $0x5e] sm:$0xff]  ;;  %v2689_v52 = vld [vmem:[%s6866_s14 + $0x66] sm:$0xff] }
 0x1eb   : > { %6352 = vmatmul.msk.f32.gmra.mxu3 %vm347_vm1, %v2376_v38  ;;  %6427 = vmatmul.msk.f32.gmra.mxu1 %vm347_vm1, %v2996_v23  ;;  %v2379_v38 = vld [vmem:[%s6866_s14 + $0x65] sm:$0xff] }
 0x1ec   : > { %v7570_v46 = vadd.f32 %v1989_v26, %v1739_v49  ;;  %v2998_v26 = vld [vmem:[%s7504_s12 + $0x38] sm:$0xff]  ;;  %v2999_v23 = vld [vmem:[%s7504_s12 + $0x40] sm:$0xff] }
 0x1ed   : > { %v1062_v57 = vpop.f32.mrf.mxu2 }
 0x1ee   : > { %v1372_v16 = vpop.f32.mrf.mxu3  ;;  %v1120_v51 = vadd.f32 %v1062_v57, %v8817_v60  ;;  %v8820_v60 = vld [vmem:[#allocation7_spill] sm:$0xff] }
 0x1ef   : > { %v1685_v12 = vpop.f32.mrf.mxu0 }
 0x1f0   : > { %v1430_v58 = vadd.f32 %v1372_v16, %v1120_v51  ;;  %v1995_v30 = vpop.f32.mrf.mxu1 }
 0x1f2   : > { %v1740_v44 = vadd.f32 %v1682_v63, %v1430_v58  ;;  %6315 = vmatmul.msk.f32.gmra.mxu2 %vm347_vm1, %v6778_v9  ;;  %6391 = vmatmul.msk.f32.gmra.mxu0 %vm347_vm1, %v2687_v39  ;;  %v2380_v58 = vld [vmem:[%s6866_s14 + $0x6d] sm:$0xff] }
 0x1f3   : > { %6353 = vmatmul.msk.f32.gmra.mxu3 %vm347_vm1, %v2377_v25  ;;  %6428 = vmatmul.msk.f32.gmra.mxu1 %vm347_vm1, %v2997_v41  ;;  %v2070_v25 = vld [vmem:[%s6866_s14 + $0x6c] sm:$0xff] }
 0x1f4   : > { %v7581_v29 = vadd.f32 %v1992_v50, %v1740_v44  ;;  %v2690_v41 = vld [vmem:[%s6866_s14 + $0x6e] sm:$0xff] }
 0x1f5   : > { %v1065_v24 = vpop.f32.mrf.mxu2  ;;  %v3000_v44 = vld [vmem:[%s7504_s12 + $0x48] sm:$0xff] }
 0x1f6   : > { %v1375_v18 = vpop.f32.mrf.mxu3  ;;  %v1121_v55 = vadd.f32 %v1065_v24, %v8818_v2 }
 0x1f7   : > { %v1688_v20 = vpop.f32.mrf.mxu0 }
 0x1f8   : > { %v1431_v6 = vadd.f32 %v1375_v18, %v1121_v55  ;;  %v1998_v42 = vpop.f32.mrf.mxu1  ;;  %v8821_v55 = vld [vmem:[#allocation8_spill] sm:$0xff] }
 0x1fa   : > { %v1741_v28 = vadd.f32 %v1685_v12, %v1431_v6  ;;  %6316 = vmatmul.msk.f32.gmra.mxu2 %vm347_vm1, %v2068_v5  ;;  %6392 = vmatmul.msk.f32.gmra.mxu0 %vm347_vm1, %v2688_v7  ;;  %v2381_v6 = vld [vmem:[%s6866_s14 + $0x75] sm:$0xff] }
 0x1fb   : > { %6354 = vmatmul.msk.f32.gmra.mxu3 %vm347_vm1, %v2378_v21  ;;  %6429 = vmatmul.msk.f32.gmra.mxu1 %vm347_vm1, %v2998_v26  ;;  %v2071_v21 = vld [vmem:[%s6866_s14 + $0x74] sm:$0xff] }
 0x1fc   : > { %v7592_v10 = vadd.f32 %v1995_v30, %v1741_v28  ;;  %v2691_v26 = vld [vmem:[%s6866_s14 + $0x76] sm:$0xff] }
 0x1fd   : > { %v1068_v3 = vpop.f32.mrf.mxu2  ;;  %v3001_v28 = vld [vmem:[%s7504_s12 + $0x50] sm:$0xff] }
 0x1fe   : > { %v1378_v14 = vpop.f32.mrf.mxu3  ;;  %v1122_v17 = vadd.f32 %v1068_v3, %v8819_v33 }
 0x1ff   : > { %v1691_v63 = vpop.f32.mrf.mxu0 }
 0x200   : > { %v1432_v47 = vadd.f32 %v1378_v14, %v1122_v17  ;;  %v2001_v50 = vpop.f32.mrf.mxu1 }
 0x202   : > { %v1742_v49 = vadd.f32 %v1688_v20, %v1432_v47  ;;  %6317 = vmatmul.msk.f32.gmra.mxu2 %vm347_vm1, %v2069_v15  ;;  %6393 = vmatmul.msk.f32.gmra.mxu0 %vm347_vm1, %v2689_v52  ;;  %v8822_v15 = vld [vmem:[#allocation9_spill] sm:$0xff] }
 0x203   : > { %6355 = vmatmul.msk.f32.gmra.mxu3 %vm347_vm1, %v2379_v38  ;;  %6430 = vmatmul.msk.f32.gmra.mxu1 %vm347_vm1, %v2999_v23  ;;  %v2072_v47 = vld [vmem:[%s6866_s14 + $0x7c] sm:$0xff] }
 0x204   : > { %v7603_v1 = vadd.f32 %v1998_v42, %v1742_v49  ;;  %v2692_v49 = vld [vmem:[%s6866_s14 + $0x7e] sm:$0xff] }
 0x205   : > { %v1071_v57 = vpop.f32.mrf.mxu2 }
 0x206   : > { %v1381_v16 = vpop.f32.mrf.mxu3  ;;  %v1123_v51 = vadd.f32 %v1071_v57, %v8820_v60  ;;  %v3002_v57 = vld [vmem:[%s7504_s12 + $0x58] sm:$0xff] }
 0x207   : > { %v1694_v30 = vpop.f32.mrf.mxu0 }
 0x208   : > { %v1433_v12 = vadd.f32 %v1381_v16, %v1123_v51  ;;  %v2004_v39 = vpop.f32.mrf.mxu1 }
 0x20a   : > { %v1743_v9 = vadd.f32 %v1691_v63, %v1433_v12  ;;  %6318 = vmatmul.msk.f32.gmra.mxu2 %vm347_vm1, %v2070_v25  ;;  %6394 = vmatmul.msk.f32.gmra.mxu0 %vm347_vm1, %v2690_v41  ;;  %v2382_v63 = vld [vmem:[%s6866_s14 + $0x7d] sm:$0xff] }
 0x20b   : > { %6356 = vmatmul.msk.f32.gmra.mxu3 %vm347_vm1, %v2380_v58  ;;  %6431 = vmatmul.msk.f32.gmra.mxu1 %vm347_vm1, %v3000_v44  ;;  %v8823_v58 = vld [vmem:[#allocation10_spill] sm:$0xff] }
 0x20c   : > { %v7614_v24 = vadd.f32 %v2001_v50, %v1743_v9 }
 0x20d   : > { %v1074_v18 = vpop.f32.mrf.mxu2 }
 0x20e   : > { %v1384_v2 = vpop.f32.mrf.mxu3  ;;  %v1124_v5 = vadd.f32 %v1074_v18, %v8821_v55  ;;  %v2693_v18 = vld [vmem:[%s6866_s14 + $0x86] sm:$0xff] }
 0x20f   : > { %v1697_v42 = vpop.f32.mrf.mxu0 }
 0x210   : > { %v1434_v20 = vadd.f32 %v1384_v2, %v1124_v5  ;;  %v2007_v7 = vpop.f32.mrf.mxu1  ;;  %v3003_v2 = vld [vmem:[%s7504_s12 + $0x60] sm:$0xff] }
 0x212   : > { %v1744_v3 = vadd.f32 %v1694_v30, %v1434_v20  ;;  %6319 = vmatmul.msk.f32.gmra.mxu2 %vm347_vm1, %v2071_v21  ;;  %6395 = vmatmul.msk.f32.gmra.mxu0 %vm347_vm1, %v2691_v26  ;;  %v2073_v30 = vld [vmem:[%s6866_s14 + $0x84] sm:$0xff]  ;;  %v2384_v26 = vld [vmem:[%s6866_s14 + $0x8d] sm:$0xff] }
 0x213   : > { %6357 = vmatmul.msk.f32.gmra.mxu3 %vm347_vm1, %v2381_v6  ;;  %6432 = vmatmul.msk.f32.gmra.mxu1 %vm347_vm1, %v3001_v28  ;;  %v8824_v20 = vld [vmem:[#allocation11_spill] sm:$0xff] }
 0x214   : > { %v7625_v14 = vadd.f32 %v2004_v39, %v1744_v3  ;;  %v2383_v39 = vld [vmem:[%s6866_s14 + $0x85] sm:$0xff] }
 0x215   : > { %v1077_v33 = vpop.f32.mrf.mxu2 }
 0x216   : > { %v1387_v17 = vpop.f32.mrf.mxu3  ;;  %v1125_v38 = vadd.f32 %v1077_v33, %v8822_v15  ;;  %v3004_v15 = vld [vmem:[%s7504_s12 + $0x68] sm:$0xff] }
 0x217   : > { %v1700_v52 = vpop.f32.mrf.mxu0 }
 0x218   : > { %v1435_v50 = vadd.f32 %v1387_v17, %v1125_v38  ;;  %v2010_v23 = vpop.f32.mrf.mxu1  ;;  %v2694_v17 = vld [vmem:[%s6866_s14 + $0x8e] sm:$0xff] }
 0x21a   : > { %v1745_v16 = vadd.f32 %v1697_v42, %v1435_v50  ;;  %6320 = vmatmul.msk.f32.gmra.mxu2 %vm347_vm1, %v2072_v47  ;;  %6396 = vmatmul.msk.f32.gmra.mxu0 %vm347_vm1, %v2692_v49  ;;  %v2075_v49 = vld [vmem:[%s6866_s14 + $0x94] sm:$0xff] }
 0x21b   : > { %6358 = vmatmul.msk.f32.gmra.mxu3 %vm347_vm1, %v2382_v63  ;;  %6433 = vmatmul.msk.f32.gmra.mxu1 %vm347_vm1, %v3002_v57  ;;  %v2385_v57 = vld [vmem:[%s6866_s14 + $0x95] sm:$0xff] }
 0x21c   : > { %v7636_v60 = vadd.f32 %v2007_v7, %v1745_v16  ;;  %v2074_v7 = vld [vmem:[%s6866_s14 + $0x8c] sm:$0xff] }
 0x21d   : > { %v1080_v51 = vpop.f32.mrf.mxu2 }
 0x21e   : > { %v1390_v25 = vpop.f32.mrf.mxu3  ;;  %v1126_v12 = vadd.f32 %v1080_v51, %v8823_v58  ;;  %v2695_v58 = vld [vmem:[%s6866_s14 + $0x96] sm:$0xff] }
 0x21f   : > { %v1703_v44 = vpop.f32.mrf.mxu0 }
 0x220   : > { %v1436_v41 = vadd.f32 %v1390_v25, %v1126_v12  ;;  %v2013_v9 = vpop.f32.mrf.mxu1  ;;  %v3005_v12 = vld [vmem:[%s7504_s12 + $0x70] sm:$0xff] }
 0x222   : > { %v1746_v55 = vadd.f32 %v1700_v52, %v1436_v41  ;;  %6321 = vmatmul.msk.f32.gmra.mxu2 %vm347_vm1, %v2073_v30  ;;  %6397 = vmatmul.msk.f32.gmra.mxu0 %vm347_vm1, %v2693_v18  ;;  %v8825_v52 = vld [vmem:[#allocation12_spill] sm:$0xff] }
 0x223   : > { %6359 = vmatmul.msk.f32.gmra.mxu3 %vm347_vm1, %v2383_v39  ;;  %6434 = vmatmul.msk.f32.gmra.mxu1 %vm347_vm1, %v3003_v2  ;;  %v2076_v2 = vld [vmem:[%s6866_s14 + $0x9c] sm:$0xff] }
 0x224   : > { %v7647_v5 = vadd.f32 %v2010_v23, %v1746_v55  ;;  %v2386_v55 = vld [vmem:[%s6866_s14 + $0x9d] sm:$0xff] }
 0x225   : > { %v1083_v21 = vpop.f32.mrf.mxu2 }
 0x226   : > { %v1393_v6 = vpop.f32.mrf.mxu3  ;;  %v1127_v42 = vadd.f32 %v1083_v21, %v8824_v20 }
 0x227   : > { %v1706_v3 = vpop.f32.mrf.mxu0 }
 0x228   : > { %v1437_v28 = vadd.f32 %v1393_v6, %v1127_v42  ;;  %v2016_v33 = vpop.f32.mrf.mxu1  ;;  %v2696_v42 = vld [vmem:[%s6866_s14 + $0x9e] sm:$0xff] }
 0x22a   : > { %v1747_v38 = vadd.f32 %v1703_v44, %v1437_v28  ;;  %6322 = vmatmul.msk.f32.gmra.mxu2 %vm347_vm1, %v2074_v7  ;;  %6398 = vmatmul.msk.f32.gmra.mxu0 %vm347_vm1, %v2694_v17  ;;  %v3006_v7 = vld [vmem:[%s7504_s12 + $0x78] sm:$0xff]  ;;  %v8827_v17 = vld [vmem:[#allocation14_spill] sm:$0xff] }
 0x22b   : > { %6360 = vmatmul.msk.f32.gmra.mxu3 %vm347_vm1, %v2384_v26  ;;  %6435 = vmatmul.msk.f32.gmra.mxu1 %vm347_vm1, %v3004_v15 }
 0x22c   : > { %v7658_v47 = vadd.f32 %v2013_v9, %v1747_v38  ;;  %v8826_v9 = vld [vmem:[#allocation13_spill] sm:$0xff]  ;;  %v2077_v38 = vld [vmem:[%s6866_s14 + $0xa4] sm:$0xff] }
 0x22d   : > { %v1086_v63 = vpop.f32.mrf.mxu2 }
 0x22e   : > { %v1396_v50 = vpop.f32.mrf.mxu3  ;;  %v1128_v23 = vadd.f32 %v1086_v63, %v8825_v52  ;;  %v2387_v63 = vld [vmem:[%s6866_s14 + $0xa5] sm:$0xff] }
 0x22f   : > { %v1709_v51 = vpop.f32.mrf.mxu0 }
 0x230   : > { %v1438_v16 = vadd.f32 %v1396_v50, %v1128_v23  ;;  %v2019_v25 = vpop.f32.mrf.mxu1 }
 0x232   : > { %v1748_v30 = vadd.f32 %v1706_v3, %v1438_v16  ;;  %6323 = vmatmul.msk.f32.gmra.mxu2 %vm347_vm1, %v2075_v49  ;;  %6399 = vmatmul.msk.f32.gmra.mxu0 %vm347_vm1, %v2695_v58  ;;  %v2697_v49 = vld [vmem:[%s6866_s14 + $0xa6] sm:$0xff] }
 0x233   : > { %6361 = vmatmul.msk.f32.gmra.mxu3 %vm347_vm1, %v2385_v57  ;;  %6436 = vmatmul.msk.f32.gmra.mxu1 %vm347_vm1, %v3005_v12  ;;  %v3007_v57 = vld [vmem:[%s7504_s12 + $0x80] sm:$0xff] }
 0x234   : > { %v7669_v39 = vadd.f32 %v2016_v33, %v1748_v30  ;;  %v2078_v30 = vld [vmem:[%s6866_s14 + $0xac] sm:$0xff] }
 0x235   : > { %v1089_v41 = vpop.f32.mrf.mxu2 }
 0x236   : > { %v1399_v44 = vpop.f32.mrf.mxu3  ;;  %v1129_v18 = vadd.f32 %v1089_v41, %v8826_v9  ;;  %v2388_v41 = vld [vmem:[%s6866_s14 + $0xad] sm:$0xff] }
 0x237   : > { %v1712_v6 = vpop.f32.mrf.mxu0 }
 0x238   : > { %v1439_v21 = vadd.f32 %v1399_v44, %v1129_v18  ;;  %v2022_v20 = vpop.f32.mrf.mxu1 }
 0x23a   : > { %v1749_v26 = vadd.f32 %v1709_v51, %v1439_v21  ;;  %6324 = vmatmul.msk.f32.gmra.mxu2 %vm347_vm1, %v2076_v2  ;;  %6400 = vmatmul.msk.f32.gmra.mxu0 %vm347_vm1, %v2696_v42  ;;  %v2698_v2 = vld [vmem:[%s6866_s14 + $0xae] sm:$0xff] }
 0x23b   : > { %6362 = vmatmul.msk.f32.gmra.mxu3 %vm347_vm1, %v2386_v55  ;;  %6437 = vmatmul.msk.f32.gmra.mxu1 %vm347_vm1, %v3006_v7  ;;  %v3008_v55 = vld [vmem:[%s7504_s12 + $0x88] sm:$0xff]  ;;  %v2079_v7 = vld [vmem:[%s6866_s14 + $0xb4] sm:$0xff] }
 0x23c   : > { %v7680_v28 = vadd.f32 %v2019_v25, %v1749_v26  ;;  %v2389_v26 = vld [vmem:[%s6866_s14 + $0xb5] sm:$0xff] }
 0x23d   : > { %v1092_v3 = vpop.f32.mrf.mxu2 }
 0x23e   : > { %v1402_v33 = vpop.f32.mrf.mxu3  ;;  %v1130_v15 = vadd.f32 %v1092_v3, %v8827_v17 }
 0x23f   : > { %v2847_v52 = vpop.f32.mrf.mxu0 }
 0x240   : > { %v1440_v50 = vadd.f32 %v1402_v33, %v1130_v15  ;;  %v3156_v23 = vpop.f32.mrf.mxu1  ;;  %v2699_v15 = vld [vmem:[%s6866_s14 + $0xb6] sm:$0xff] }
 0x242   : > { %v1750_v16 = vadd.f32 %v1712_v6, %v1440_v50  ;;  %6325 = vmatmul.msk.f32.gmra.mxu2 %vm347_vm1, %v2077_v38  ;;  %6401 = vmatmul.msk.f32.gmra.mxu0 %vm347_vm1, %v2697_v49  ;;  %v3009_v38 = vld [vmem:[%s7504_s12 + $0x90] sm:$0xff]  ;;  %v2080_v49 = vld [vmem:[%s6866_s14 + $0xbc] sm:$0xff] }
 0x243   : > { %6363 = vmatmul.msk.f32.gmra.mxu3 %vm347_vm1, %v2387_v63  ;;  %6438 = vmatmul.msk.f32.gmra.mxu1 %vm347_vm1, %v3007_v57  ;;  %v2390_v57 = vld [vmem:[%s6866_s14 + $0xbd] sm:$0xff] }
 0x244   : > { %v7691_v51 = vadd.f32 %v2022_v20, %v1750_v16 }
 0x245   : > { %v2227_v25 = vpop.f32.mrf.mxu2 }
 0x246   : > { %v2537_v58 = vpop.f32.mrf.mxu3  ;;  %v2335_v12 = vadd.f32 %v2227_v25, %v7286_v13 }
 0x247   : > { %v2850_v9 = vpop.f32.mrf.mxu0 }
 0x248   : > { %v2645_v44 = vadd.f32 %v2537_v58, %v2335_v12  ;;  %v3159_v18 = vpop.f32.mrf.mxu1  ;;  %v2700_v12 = vld [vmem:[%s6866_s14 + $0xbe] sm:$0xff] }
 0x24a   : > { %v2955_v21 = vadd.f32 %v2847_v52, %v2645_v44  ;;  %6326 = vmatmul.msk.f32.gmra.mxu2 %vm347_vm1, %v2078_v30  ;;  %6402 = vmatmul.msk.f32.gmra.mxu0 %vm347_vm1, %v2698_v2  ;;  %v3010_v30 = vld [vmem:[%s7504_s12 + $0x98] sm:$0xff]  ;;  %v2081_v2 = vld [vmem:[%s6866_s14 + $0xc4] sm:$0xff] }
 0x24b   : > { %6364 = vmatmul.msk.f32.gmra.mxu3 %vm347_vm1, %v2388_v41  ;;  %6439 = vmatmul.msk.f32.gmra.mxu1 %vm347_vm1, %v3008_v55  ;;  %v2391_v55 = vld [vmem:[%s6866_s14 + $0xc5] sm:$0xff] }
 0x24c   : > { %v7702_v13 = vadd.f32 %v3156_v23, %v2955_v21 }
 0x24d   : > { %v2230_v6 = vpop.f32.mrf.mxu2 }
 0x24e   : > { %v2540_v20 = vpop.f32.mrf.mxu3  ;;  %v2336_v42 = vadd.f32 %v2230_v6, %v7297_v22 }
 0x24f   : > { %v2853_v33 = vpop.f32.mrf.mxu0 }
 0x250   : > { %v2646_v3 = vadd.f32 %v2540_v20, %v2336_v42  ;;  %v3162_v17 = vpop.f32.mrf.mxu1  ;;  %v2701_v42 = vld [vmem:[%s6866_s14 + $0xc6] sm:$0xff] }
 0x252   : > { %v2956_v63 = vadd.f32 %v2850_v9, %v2646_v3  ;;  %6327 = vmatmul.msk.f32.gmra.mxu2 %vm347_vm1, %v2079_v7  ;;  %6403 = vmatmul.msk.f32.gmra.mxu0 %vm347_vm1, %v2699_v15  ;;  %v3011_v7 = vld [vmem:[%s7504_s12 + $0xa0] sm:$0xff]  ;;  %v2082_v15 = vld [vmem:[%s6866_s14 + $0xcc] sm:$0xff] }
 0x253   : > { %6365 = vmatmul.msk.f32.gmra.mxu3 %vm347_vm1, %v2389_v26  ;;  %6440 = vmatmul.msk.f32.gmra.mxu1 %vm347_vm1, %v3009_v38  ;;  %v2392_v38 = vld [vmem:[%s6866_s14 + $0xcd] sm:$0xff] }
 0x254   : > { %v7713_v22 = vadd.f32 %v3159_v18, %v2956_v63 }
 0x255   : > { %v2233_v50 = vpop.f32.mrf.mxu2 }
 0x256   : > { %v2543_v52 = vpop.f32.mrf.mxu3  ;;  %v2337_v23 = vadd.f32 %v2233_v50, %v7308_v31 }
 0x257   : > { %v2856_v25 = vpop.f32.mrf.mxu0 }
 0x258   : > { %v2647_v16 = vadd.f32 %v2543_v52, %v2337_v23  ;;  %v3165_v58 = vpop.f32.mrf.mxu1  ;;  %v2702_v23 = vld [vmem:[%s6866_s14 + $0xce] sm:$0xff] }
 0x25a   : > { %v2957_v41 = vadd.f32 %v2853_v33, %v2647_v16  ;;  %6328 = vmatmul.msk.f32.gmra.mxu2 %vm347_vm1, %v2080_v49  ;;  %6404 = vmatmul.msk.f32.gmra.mxu0 %vm347_vm1, %v2700_v12  ;;  %v3012_v49 = vld [vmem:[%s7504_s12 + $0xa8] sm:$0xff]  ;;  %v2083_v12 = vld [vmem:[%s6866_s14 + $0xd4] sm:$0xff] }
 0x25b   : > { %6366 = vmatmul.msk.f32.gmra.mxu3 %vm347_vm1, %v2390_v57  ;;  %6441 = vmatmul.msk.f32.gmra.mxu1 %vm347_vm1, %v3010_v30  ;;  %v2393_v30 = vld [vmem:[%s6866_s14 + $0xd5] sm:$0xff] }
 0x25c   : > { %v7724_v31 = vadd.f32 %v3162_v17, %v2957_v41 }
 0x25d   : > { %v2236_v44 = vpop.f32.mrf.mxu2 }
 0x25e   : > { %v2546_v9 = vpop.f32.mrf.mxu3  ;;  %v2338_v18 = vadd.f32 %v2236_v44, %v7319_v40 }
 0x25f   : > { %v2859_v6 = vpop.f32.mrf.mxu0 }
 0x260   : > { %v2648_v21 = vadd.f32 %v2546_v9, %v2338_v18  ;;  %v3168_v20 = vpop.f32.mrf.mxu1  ;;  %v2703_v18 = vld [vmem:[%s6866_s14 + $0xd6] sm:$0xff] }
 0x262   : > { %v2958_v26 = vadd.f32 %v2856_v25, %v2648_v21  ;;  %6329 = vmatmul.msk.f32.gmra.mxu2 %vm347_vm1, %v2081_v2  ;;  %6405 = vmatmul.msk.f32.gmra.mxu0 %vm347_vm1, %v2701_v42  ;;  %v3013_v2 = vld [vmem:[%s7504_s12 + $0xb0] sm:$0xff]  ;;  %v2084_v42 = vld [vmem:[%s6866_s14 + $0xdc] sm:$0xff] }
 0x263   : > { %6367 = vmatmul.msk.f32.gmra.mxu3 %vm347_vm1, %v2391_v55  ;;  %6442 = vmatmul.msk.f32.gmra.mxu1 %vm347_vm1, %v3011_v7  ;;  %v2394_v7 = vld [vmem:[%s6866_s14 + $0xdd] sm:$0xff] }
 0x264   : > { %v7735_v40 = vadd.f32 %v3165_v58, %v2958_v26 }
 0x265   : > { %v2239_v3 = vpop.f32.mrf.mxu2 }
 0x266   : > { %v2549_v33 = vpop.f32.mrf.mxu3  ;;  %v2339_v17 = vadd.f32 %v2239_v3, %v7330_v48 }
 0x267   : > { %v2862_v50 = vpop.f32.mrf.mxu0 }
 0x268   : > { %v2649_v63 = vadd.f32 %v2549_v33, %v2339_v17  ;;  %v3171_v52 = vpop.f32.mrf.mxu1  ;;  %v2704_v17 = vld [vmem:[%s6866_s14 + $0xde] sm:$0xff] }
 0x26a   : > { %v2959_v57 = vadd.f32 %v2859_v6, %v2649_v63  ;;  %6330 = vmatmul.msk.f32.gmra.mxu2 %vm347_vm1, %v2082_v15  ;;  %6406 = vmatmul.msk.f32.gmra.mxu0 %vm347_vm1, %v2702_v23  ;;  %v3014_v15 = vld [vmem:[%s7504_s12 + $0xb8] sm:$0xff]  ;;  %v2085_v23 = vld [vmem:[%s6866_s14 + $0xe4] sm:$0xff] }
 0x26b   : > { %6368 = vmatmul.msk.f32.gmra.mxu3 %vm347_vm1, %v2392_v38  ;;  %6443 = vmatmul.msk.f32.gmra.mxu1 %vm347_vm1, %v3012_v49  ;;  %v2395_v49 = vld [vmem:[%s6866_s14 + $0xe5] sm:$0xff] }
 0x26c   : > { %v7746_v48 = vadd.f32 %v3168_v20, %v2959_v57 }
 0x26d   : > { %v2242_v16 = vpop.f32.mrf.mxu2 }
 0x26e   : > { %v2552_v25 = vpop.f32.mrf.mxu3  ;;  %v2340_v58 = vadd.f32 %v2242_v16, %v7341_v56 }
 0x26f   : > { %v2865_v44 = vpop.f32.mrf.mxu0 }
 0x270   : > { %v2650_v41 = vadd.f32 %v2552_v25, %v2340_v58  ;;  %v3174_v9 = vpop.f32.mrf.mxu1  ;;  %v2705_v58 = vld [vmem:[%s6866_s14 + $0xe6] sm:$0xff] }
 0x272   : > { %v2960_v55 = vadd.f32 %v2862_v50, %v2650_v41  ;;  %6331 = vmatmul.msk.f32.gmra.mxu2 %vm347_vm1, %v2083_v12  ;;  %6407 = vmatmul.msk.f32.gmra.mxu0 %vm347_vm1, %v2703_v18  ;;  %v3015_v12 = vld [vmem:[%s7504_s12 + $0xc0] sm:$0xff]  ;;  %v2086_v18 = vld [vmem:[%s6866_s14 + $0xec] sm:$0xff] }
 0x273   : > { %6369 = vmatmul.msk.f32.gmra.mxu3 %vm347_vm1, %v2393_v30  ;;  %6444 = vmatmul.msk.f32.gmra.mxu1 %vm347_vm1, %v3013_v2  ;;  %v2396_v2 = vld [vmem:[%s6866_s14 + $0xed] sm:$0xff] }
 0x274   : > { %v7757_v56 = vadd.f32 %v3171_v52, %v2960_v55 }
 0x275   : > { %v2245_v21 = vpop.f32.mrf.mxu2 }
 0x276   : > { %v2555_v6 = vpop.f32.mrf.mxu3  ;;  %v2341_v20 = vadd.f32 %v2245_v21, %v7352_v0 }
 0x277   : > { %v2868_v3 = vpop.f32.mrf.mxu0 }
 0x278   : > { %v2651_v26 = vadd.f32 %v2555_v6, %v2341_v20  ;;  %v3177_v33 = vpop.f32.mrf.mxu1  ;;  %v2706_v20 = vld [vmem:[%s6866_s14 + $0xee] sm:$0xff] }
 0x27a   : > { %v2961_v38 = vadd.f32 %v2865_v44, %v2651_v26  ;;  %6332 = vmatmul.msk.f32.gmra.mxu2 %vm347_vm1, %v2084_v42  ;;  %6408 = vmatmul.msk.f32.gmra.mxu0 %vm347_vm1, %v2704_v17  ;;  %v3016_v42 = vld [vmem:[%s7504_s12 + $0xc8] sm:$0xff]  ;;  %v2087_v17 = vld [vmem:[%s6866_s14 + $0xf4] sm:$0xff] }
 0x27b   : > { %6370 = vmatmul.msk.f32.gmra.mxu3 %vm347_vm1, %v2394_v7  ;;  %6445 = vmatmul.msk.f32.gmra.mxu1 %vm347_vm1, %v3014_v15  ;;  %v2397_v15 = vld [vmem:[%s6866_s14 + $0xf5] sm:$0xff] }
 0x27c   : > { %v7768_v0 = vadd.f32 %v3174_v9, %v2961_v38 }
 0x27d   : > { %v2248_v63 = vpop.f32.mrf.mxu2 }
 0x27e   : > { %v2558_v50 = vpop.f32.mrf.mxu3  ;;  %v2342_v52 = vadd.f32 %v2248_v63, %v7363_v8 }
 0x27f   : > { %v2871_v16 = vpop.f32.mrf.mxu0 }
 0x280   : > { %v2652_v57 = vadd.f32 %v2558_v50, %v2342_v52  ;;  %v3180_v25 = vpop.f32.mrf.mxu1  ;;  %v2707_v52 = vld [vmem:[%s6866_s14 + $0xf6] sm:$0xff] }
 0x282   : > { %v2962_v30 = vadd.f32 %v2868_v3, %v2652_v57  ;;  %6333 = vmatmul.msk.f32.gmra.mxu2 %vm347_vm1, %v2085_v23  ;;  %6409 = vmatmul.msk.f32.gmra.mxu0 %vm347_vm1, %v2705_v58  ;;  %v3017_v23 = vld [vmem:[%s7504_s12 + $0xd0] sm:$0xff]  ;;  %v2088_v58 = vld [vmem:[%s6866_s14 + $0xfc] sm:$0xff] }
 0x283   : > { %6371 = vmatmul.msk.f32.gmra.mxu3 %vm347_vm1, %v2395_v49  ;;  %6446 = vmatmul.msk.f32.gmra.mxu1 %vm347_vm1, %v3015_v12  ;;  %v2398_v12 = vld [vmem:[%s6866_s14 + $0xfd] sm:$0xff] }
 0x284   : > { %v7779_v8 = vadd.f32 %v3177_v33, %v2962_v30 }
 0x285   : > { %v2251_v41 = vpop.f32.mrf.mxu2 }
 0x286   : > { %v2561_v44 = vpop.f32.mrf.mxu3  ;;  %v2343_v9 = vadd.f32 %v2251_v41, %v7374_v19 }
 0x287   : > { %v2874_v21 = vpop.f32.mrf.mxu0 }
 0x288   : > { %v2653_v55 = vadd.f32 %v2561_v44, %v2343_v9  ;;  %v3183_v6 = vpop.f32.mrf.mxu1  ;;  %v2708_v9 = vld [vmem:[%s6866_s14 + $0xfe] sm:$0xff] }
 0x28a   : > { %v2963_v7 = vadd.f32 %v2871_v16, %v2653_v55  ;;  %6334 = vmatmul.msk.f32.gmra.mxu2 %vm347_vm1, %v2086_v18  ;;  %6410 = vmatmul.msk.f32.gmra.mxu0 %vm347_vm1, %v2706_v20  ;;  %v3018_v18 = vld [vmem:[%s7504_s12 + $0xd8] sm:$0xff]  ;;  %v2089_v20 = vld [vmem:[%s6866_s14 + $0x104] sm:$0xff] }
 0x28b   : > { %6372 = vmatmul.msk.f32.gmra.mxu3 %vm347_vm1, %v2396_v2  ;;  %6447 = vmatmul.msk.f32.gmra.mxu1 %vm347_vm1, %v3016_v42  ;;  %v2399_v42 = vld [vmem:[%s6866_s14 + $0x105] sm:$0xff] }
 0x28c   : > { %v7790_v19 = vadd.f32 %v3180_v25, %v2963_v7 }
 0x28d   : > { %v2254_v26 = vpop.f32.mrf.mxu2 }
 0x28e   : > { %v2564_v3 = vpop.f32.mrf.mxu3  ;;  %v2344_v33 = vadd.f32 %v2254_v26, %v7385_v32 }
 0x28f   : > { %v2877_v63 = vpop.f32.mrf.mxu0 }
 0x290   : > { %v2654_v38 = vadd.f32 %v2564_v3, %v2344_v33  ;;  %v3186_v50 = vpop.f32.mrf.mxu1  ;;  %v2709_v33 = vld [vmem:[%s6866_s14 + $0x106] sm:$0xff] }
 0x292   : > { %v2964_v49 = vadd.f32 %v2874_v21, %v2654_v38  ;;  %6335 = vmatmul.msk.f32.gmra.mxu2 %vm347_vm1, %v2087_v17  ;;  %6411 = vmatmul.msk.f32.gmra.mxu0 %vm347_vm1, %v2707_v52  ;;  %v3019_v17 = vld [vmem:[%s7504_s12 + $0xe0] sm:$0xff]  ;;  %v2090_v52 = vld [vmem:[%s6866_s14 + $0x10c] sm:$0xff] }
 0x293   : > { %6373 = vmatmul.msk.f32.gmra.mxu3 %vm347_vm1, %v2397_v15  ;;  %6448 = vmatmul.msk.f32.gmra.mxu1 %vm347_vm1, %v3017_v23  ;;  %v2400_v23 = vld [vmem:[%s6866_s14 + $0x10d] sm:$0xff] }
 0x294   : > { %v7801_v32 = vadd.f32 %v3183_v6, %v2964_v49 }
 0x295   : > { %v2257_v57 = vpop.f32.mrf.mxu2 }
 0x296   : > { %v2567_v16 = vpop.f32.mrf.mxu3  ;;  %v2345_v25 = vadd.f32 %v2257_v57, %v7396_v43 }
 0x297   : > { %v2880_v41 = vpop.f32.mrf.mxu0 }
 0x298   : > { %v2655_v30 = vadd.f32 %v2567_v16, %v2345_v25  ;;  %v3189_v44 = vpop.f32.mrf.mxu1  ;;  %v2710_v25 = vld [vmem:[%s6866_s14 + $0x10e] sm:$0xff] }
 0x29a   : > { %v2965_v2 = vadd.f32 %v2877_v63, %v2655_v30  ;;  %6336 = vmatmul.msk.f32.gmra.mxu2 %vm347_vm1, %v2088_v58  ;;  %6412 = vmatmul.msk.f32.gmra.mxu0 %vm347_vm1, %v2708_v9  ;;  %v3020_v58 = vld [vmem:[%s7504_s12 + $0xe8] sm:$0xff]  ;;  %v2091_v9 = vld [vmem:[%s6866_s14 + $0x114] sm:$0xff] }
 0x29b   : > { %6374 = vmatmul.msk.f32.gmra.mxu3 %vm347_vm1, %v2398_v12  ;;  %6449 = vmatmul.msk.f32.gmra.mxu1 %vm347_vm1, %v3018_v18  ;;  %v2401_v18 = vld [vmem:[%s6866_s14 + $0x115] sm:$0xff] }
 0x29c   : > { %v7812_v43 = vadd.f32 %v3186_v50, %v2965_v2 }
 0x29d   : > { %v2260_v55 = vpop.f32.mrf.mxu2 }
 0x29e   : > { %v2570_v21 = vpop.f32.mrf.mxu3  ;;  %v2346_v6 = vadd.f32 %v2260_v55, %v7407_v59 }
 0x29f   : > { %v2883_v26 = vpop.f32.mrf.mxu0 }
 0x2a0   : > { %v2656_v7 = vadd.f32 %v2570_v21, %v2346_v6  ;;  %v3192_v3 = vpop.f32.mrf.mxu1  ;;  %v2711_v6 = vld [vmem:[%s6866_s14 + $0x116] sm:$0xff] }
 0x2a2   : > { %v2966_v15 = vadd.f32 %v2880_v41, %v2656_v7  ;;  %6337 = vmatmul.msk.f32.gmra.mxu2 %vm347_vm1, %v2089_v20  ;;  %6413 = vmatmul.msk.f32.gmra.mxu0 %vm347_vm1, %v2709_v33  ;;  %v3021_v20 = vld [vmem:[%s7504_s12 + $0xf0] sm:$0xff]  ;;  %v2092_v33 = vld [vmem:[%s6866_s14 + $0x11c] sm:$0xff] }
 0x2a3   : > { %6375 = vmatmul.msk.f32.gmra.mxu3 %vm347_vm1, %v2399_v42  ;;  %6450 = vmatmul.msk.f32.gmra.mxu1 %vm347_vm1, %v3019_v17  ;;  %v2402_v17 = vld [vmem:[%s6866_s14 + $0x11d] sm:$0xff] }
 0x2a4   : > { %v7823_v59 = vadd.f32 %v3189_v44, %v2966_v15 }
 0x2a5   : > { %v2263_v38 = vpop.f32.mrf.mxu2 }
 0x2a6   : > { %v2573_v63 = vpop.f32.mrf.mxu3  ;;  %v2347_v50 = vadd.f32 %v2263_v38, %v7418_v11 }
 0x2a7   : > { %v2886_v57 = vpop.f32.mrf.mxu0 }
 0x2a8   : > { %v2657_v49 = vadd.f32 %v2573_v63, %v2347_v50  ;;  %v3195_v16 = vpop.f32.mrf.mxu1  ;;  %v2712_v50 = vld [vmem:[%s6866_s14 + $0x11e] sm:$0xff] }
 0x2aa   : > { %v2967_v12 = vadd.f32 %v2883_v26, %v2657_v49  ;;  %6338 = vmatmul.msk.f32.gmra.mxu2 %vm347_vm1, %v2090_v52  ;;  %6414 = vmatmul.msk.f32.gmra.mxu0 %vm347_vm1, %v2710_v25  ;;  %v3022_v52 = vld [vmem:[%s7504_s12 + $0xf8] sm:$0xff]  ;;  %v2093_v25 = vld [vmem:[%s6866_s14 + $0x124] sm:$0xff] }
 0x2ab   : > { %6376 = vmatmul.msk.f32.gmra.mxu3 %vm347_vm1, %v2400_v23  ;;  %6451 = vmatmul.msk.f32.gmra.mxu1 %vm347_vm1, %v3020_v58  ;;  %v2403_v58 = vld [vmem:[%s6866_s14 + $0x125] sm:$0xff] }
 0x2ac   : > { %v7834_v11 = vadd.f32 %v3192_v3, %v2967_v12 }
 0x2ad   : > { %v2266_v30 = vpop.f32.mrf.mxu2 }
 0x2ae   : > { %v2576_v41 = vpop.f32.mrf.mxu3  ;;  %v2348_v44 = vadd.f32 %v2266_v30, %v7429_v35 }
 0x2af   : > { %v2889_v55 = vpop.f32.mrf.mxu0 }
 0x2b0   : > { %v2658_v2 = vadd.f32 %v2576_v41, %v2348_v44  ;;  %v3198_v21 = vpop.f32.mrf.mxu1  ;;  %v2713_v44 = vld [vmem:[%s6866_s14 + $0x126] sm:$0xff] }
 0x2b2   : > { %v2968_v42 = vadd.f32 %v2886_v57, %v2658_v2  ;;  %6339 = vmatmul.msk.f32.gmra.mxu2 %vm347_vm1, %v2091_v9  ;;  %6415 = vmatmul.msk.f32.gmra.mxu0 %vm347_vm1, %v2711_v6  ;;  %v3023_v9 = vld [vmem:[%s7504_s12 + $0x100] sm:$0xff]  ;;  %v6610_v2 = vld [vmem:[%s8797_s3 + $0x14] sm:$0xf] }
 0x2b3   : > { %6377 = vmatmul.msk.f32.gmra.mxu3 %vm347_vm1, %v2401_v18  ;;  %6452 = vmatmul.msk.f32.gmra.mxu1 %vm347_vm1, %v3021_v20 }
 0x2b4   : > { %v7845_v35 = vadd.f32 %v3195_v16, %v2968_v42  ;;  %6611 = vmatpush.msk.msra.mxu2 %vm456_vm0, %v6610_v2  ;;  %v2094_v42 = vld [vmem:[%s6866_s14 + $0x12c] sm:$0xff] }
 0x2b5   : > { %v2269_v7 = vpop.f32.mrf.mxu2 }
 0x2b6   : > { %v2579_v26 = vpop.f32.mrf.mxu3  ;;  %v2349_v3 = vadd.f32 %v2269_v7, %v7440_v62  ;;  %v2404_v7 = vld [vmem:[%s6866_s14 + $0x12d] sm:$0xff] }
 0x2b7   : > { %v2892_v38 = vpop.f32.mrf.mxu0 }
 0x2b8   : > { %v2659_v15 = vadd.f32 %v2579_v26, %v2349_v3  ;;  %v3201_v63 = vpop.f32.mrf.mxu1 }
 0x2ba   : > { %v2969_v23 = vadd.f32 %v2889_v55, %v2659_v15  ;;  %6340 = vmatmul.msk.f32.gmra.mxu2 %vm347_vm1, %v2092_v33  ;;  %6416 = vmatmul.msk.f32.gmra.mxu0 %vm347_vm1, %v2712_v50  ;;  %v6648_v55 = vld [vmem:[%s8797_s3 + $0x18] sm:$0xf]  ;;  %v3024_v15 = vld [vmem:[%s7504_s12 + $0x108] sm:$0xff] }
 0x2bb   : > { %6378 = vmatmul.msk.f32.gmra.mxu3 %vm347_vm1, %v2402_v17  ;;  %6453 = vmatmul.msk.f32.gmra.mxu1 %vm347_vm1, %v3022_v52  ;;  %v2714_v17 = vld [vmem:[%s6866_s14 + $0x12e] sm:$0xff] }
 0x2bc   : > { %v7856_v62 = vadd.f32 %v3198_v21, %v2969_v23  ;;  %6649 = vmatpush.msk.msra.mxu3 %vm456_vm0, %v6648_v55  ;;  %v2096_v55 = vld [vmem:[%s6866_s14 + $0x13c] sm:$0xff] }
 0x2bd   : > { %v2272_v49 = vpop.f32.mrf.mxu2 }
 0x2be   : > { %v2582_v57 = vpop.f32.mrf.mxu3  ;;  %v2350_v16 = vadd.f32 %v2272_v49, %v7454_v54  ;;  %v6724_v49 = vld [vmem:[%s8797_s3 + $0x20] sm:$0xf] }
 0x2bf   : > { %v2895_v30 = vpop.f32.mrf.mxu0  ;;  %6725 = vmatpush.msk.msra.mxu1 %vm456_vm0, %v6724_v49  ;;  %v3920_v49 = vld [vmem:[%s7504_s12 + $0x12] sm:$0xff] }
 0x2c0   : > { %v2660_v12 = vadd.f32 %v2582_v57, %v2350_v16  ;;  %v3204_v41 = vpop.f32.mrf.mxu1  ;;  %v2095_v57 = vld [vmem:[%s6866_s14 + $0x134] sm:$0xff] }
 0x2c1   : > { %v2405_v16 = vld [vmem:[%s6866_s14 + $0x135] sm:$0xff] }
 0x2c2   : > { %v2970_v18 = vadd.f32 %v2892_v38, %v2660_v12  ;;  %6341 = vmatmul.msk.f32.gmra.mxu2 %vm347_vm1, %v2093_v25  ;;  %6417 = vmatmul.msk.f32.gmra.mxu0 %vm347_vm1, %v2713_v44 }
 0x2c3   : > { %6379 = vmatmul.msk.f32.gmra.mxu3 %vm347_vm1, %v2403_v58  ;;  %6454 = vmatmul.msk.f32.gmra.mxu1 %vm347_vm1, %v3023_v9 }
 0x2c4   : > { %v7870_v54 = vadd.f32 %v3201_v63, %v2970_v18  ;;  %v6686_v63 = vld [vmem:[%s8797_s3 + $0x1c] sm:$0xf] }
 0x2c5   : > { %v2275_v21 = vpop.f32.mrf.mxu2  ;;  %6687 = vmatpush.msk.msra.mxu0 %vm456_vm0, %v6686_v63  ;;  %v3610_v63 = vld [vmem:[%s7504_s12 + $0x2] sm:$0xff] }
 0x2c6   : > { %v2585_v6 = vpop.f32.mrf.mxu3  ;;  %v2351_v20 = vadd.f32 %v2275_v21, %v7470_v34  ;;  %v2406_v21 = vld [vmem:[%s6866_s14 + $0x13d] sm:$0xff] }
 0x2c7   : > { %v2898_v3 = vpop.f32.mrf.mxu0 }
 0x2c8   : > { %v2661_v26 = vadd.f32 %v2585_v6, %v2351_v20  ;;  %v3207_v33 = vpop.f32.mrf.mxu1 }
 0x2ca   : > { %v2971_v38 = vadd.f32 %v2895_v30, %v2661_v26  ;;  %6342 = vmatmul.msk.f32.gmra.mxu2 %vm347_vm1, %v2094_v42  ;;  %6418 = vmatmul.msk.f32.gmra.mxu0 %vm347_vm1, %v2714_v17  ;;  %v2715_v30 = vld [vmem:[%s6866_s14 + $0x136] sm:$0xff] }
 0x2cb   : > { %6380 = vmatmul.msk.f32.gmra.mxu3 %vm347_vm1, %v2404_v7  ;;  %6455 = vmatmul.msk.f32.gmra.mxu1 %vm347_vm1, %v3024_v15  ;;  %v2716_v7 = vld [vmem:[%s6866_s14 + $0x13e] sm:$0xff] }
 0x2cc   : > { %v7886_v34 = vadd.f32 %v3204_v41, %v2971_v38  ;;  %v3025_v41 = vld [vmem:[%s7504_s12 + $0x110] sm:$0xff]  ;;  %v3026_v26 = vld [vmem:[%s7504_s12 + $0x118] sm:$0xff]  ;;  %v3300_v38 = vld [vmem:[%s7504_s12 + $0x1] sm:$0xff] }
 0x2cd   : > { %v2278_v50 = vpop.f32.mrf.mxu2 }
 0x2ce   : > { %v2588_v52 = vpop.f32.mrf.mxu3  ;;  %v2352_v23 = vadd.f32 %v2278_v50, %v7487_v4 }
 0x2cf   : > { %v2901_v58 = vpop.f32.mrf.mxu0 }
 0x2d0   : > { %v2662_v25 = vadd.f32 %v2588_v52, %v2352_v23  ;;  %v3210_v12 = vpop.f32.mrf.mxu1 }
 0x2d2   : > { %v2972_v44 = vadd.f32 %v2898_v3, %v2662_v25  ;;  %6343 = vmatmul.msk.f32.gmra.mxu2 %vm347_vm1, %v2095_v57  ;;  %6419 = vmatmul.msk.f32.gmra.mxu0 %vm347_vm1, %v2715_v30  ;;  %v4230_v57 = vld [vmem:[%s7504_s12 + $0x13] sm:$0xff]  ;;  %v3301_v30 = vld [vmem:[%s7504_s12 + $0x9] sm:$0xff] }
 0x2d3   : > { %6381 = vmatmul.msk.f32.gmra.mxu3 %vm347_vm1, %v2405_v16  ;;  %6456 = vmatmul.msk.f32.gmra.mxu1 %vm347_vm1, %v3025_v41  ;;  %v3611_v41 = vld [vmem:[%s7504_s12 + $0xa] sm:$0xff] }
 0x2d4   : > { %v7905_v4 = vadd.f32 %v3207_v33, %v2972_v44 }
 0x2d5   : > { %v2281_v9 = vpop.f32.mrf.mxu2 }
 0x2d6   : > { %v2591_v18 = vpop.f32.mrf.mxu3  ;;  %v2353_v2 = vadd.f32 %v2281_v9, %v7497_v37 }
 0x2d7   : > { %v2904_v20 = vpop.f32.mrf.mxu0 }
 0x2d8   : > { %v2663_v6 = vadd.f32 %v2591_v18, %v2353_v2  ;;  %v3213_v42 = vpop.f32.mrf.mxu1  ;;  %v3921_v2 = vld [vmem:[%s7504_s12 + $0x1a] sm:$0xff] }
 0x2da   : > { %v2973_v3 = vadd.f32 %v2901_v58, %v2663_v6  ;;  %6344 = vmatmul.msk.f32.gmra.mxu2 %vm347_vm1, %v2096_v55  ;;  %6420 = vmatmul.msk.f32.gmra.mxu0 %vm347_vm1, %v2716_v7  ;;  %v4231_v55 = vld [vmem:[%s7504_s12 + $0x1b] sm:$0xff]  ;;  %v3302_v7 = vld [vmem:[%s7504_s12 + $0x11] sm:$0xff] }
 0x2db   : > { %6382 = vmatmul.msk.f32.gmra.mxu3 %vm347_vm1, %v2406_v21  ;;  %6457 = vmatmul.msk.f32.gmra.mxu1 %vm347_vm1, %v3026_v26 }
 0x2dc   : > { %v7916_v37 = vadd.f32 %v3210_v12, %v2973_v3 }
 0x2dd   : > { %v2284_v33 = vpop.f32.mrf.mxu2 }
 0x2de   : > { %v2594_v17 = vpop.f32.mrf.mxu3  ;;  %v2354_v15 = vadd.f32 %v2284_v33, %v7515_v27 }
 0x2df   : > { %v2907_v52 = vpop.f32.mrf.mxu0 }
 0x2e0   : > { %v2664_v50 = vadd.f32 %v2594_v17, %v2354_v15  ;;  %v3216_v23 = vpop.f32.mrf.mxu1  ;;  %v3922_v17 = vld [vmem:[%s7504_s12 + $0x22] sm:$0xff] }
 0x2e1   : > { %v4232_v15 = vld [vmem:[%s7504_s12 + $0x23] sm:$0xff] }
 0x2e2   : > { %v2974_v16 = vadd.f32 %v2904_v20, %v2664_v50  ;;  %6460 = vmatmul.msk.f32.vlgmr.msrb.gmra.mxu2 %vm347_vm1, %v3300_v38  ;;  %6536 = vmatmul.msk.f32.vlgmr.msrb.gmra.mxu0 %vm347_vm1, %v3920_v49 }
 0x2e3   : > { %6498 = vmatmul.msk.f32.vlgmr.msrb.gmra.mxu3 %vm347_vm1, %v3610_v63  ;;  %6574 = vmatmul.msk.f32.vlgmr.msrb.gmra.mxu1 %vm347_vm1, %v4230_v57 }
 0x2e4   : > { %v7927_v27 = vadd.f32 %v3213_v42, %v2974_v16 }
 0x2e5   : > { %v2287_v25 = vpop.f32.mrf.mxu2 }
 0x2e6   : > { %v2597_v58 = vpop.f32.mrf.mxu3  ;;  %v2355_v12 = vadd.f32 %v2287_v25, %v7526_v36 }
 0x2e7   : > { %v2910_v9 = vpop.f32.mrf.mxu0 }
 0x2e8   : > { %v2665_v44 = vadd.f32 %v2597_v58, %v2355_v12  ;;  %v3219_v18 = vpop.f32.mrf.mxu1  ;;  %v3923_v58 = vld [vmem:[%s7504_s12 + $0x2a] sm:$0xff] }
 0x2e9   : > { %v4233_v12 = vld [vmem:[%s7504_s12 + $0x2b] sm:$0xff] }
 0x2ea   : > { %v2975_v21 = vadd.f32 %v2907_v52, %v2665_v44  ;;  %6461 = vmatmul.msk.f32.gmra.mxu2 %vm347_vm1, %v3301_v30  ;;  %6537 = vmatmul.msk.f32.gmra.mxu0 %vm347_vm1, %v3921_v2 }
 0x2eb   : > { %6499 = vmatmul.msk.f32.gmra.mxu3 %vm347_vm1, %v3611_v41  ;;  %6575 = vmatmul.msk.f32.gmra.mxu1 %vm347_vm1, %v4231_v55 }
 0x2ec   : > { %v7938_v36 = vadd.f32 %v3216_v23, %v2975_v21  ;;  %v3303_v23 = vld [vmem:[%s7504_s12 + $0x19] sm:$0xff] }
 0x2ed   : > { %v2290_v6 = vpop.f32.mrf.mxu2 }
 0x2ee   : > { %v2600_v20 = vpop.f32.mrf.mxu3  ;;  %v2356_v42 = vadd.f32 %v2290_v6, %v7537_v45  ;;  %v3924_v6 = vld [vmem:[%s7504_s12 + $0x32] sm:$0xff] }
 0x2ef   : > { %v2913_v3 = vpop.f32.mrf.mxu0 }
 0x2f0   : > { %v2666_v26 = vadd.f32 %v2600_v20, %v2356_v42  ;;  %v3222_v33 = vpop.f32.mrf.mxu1  ;;  %v4234_v20 = vld [vmem:[%s7504_s12 + $0x33] sm:$0xff] }
 0x2f2   : > { %v2976_v38 = vadd.f32 %v2910_v9, %v2666_v26  ;;  %6462 = vmatmul.msk.f32.gmra.mxu2 %vm347_vm1, %v3302_v7  ;;  %6538 = vmatmul.msk.f32.gmra.mxu0 %vm347_vm1, %v3922_v17  ;;  %v3304_v9 = vld [vmem:[%s7504_s12 + $0x21] sm:$0xff] }
 0x2f3   : > { %6500 = vmatmul.msk.f32.gmra.mxu3 %vm347_vm1, %v3920_v49  ;;  %6576 = vmatmul.msk.f32.gmra.mxu1 %vm347_vm1, %v4232_v15 }
 0x2f4   : > { %v7948_v63 = vadd.f32 %v3219_v18, %v2976_v38 }
 0x2f5   : > { %v2293_v45 = vpop.f32.mrf.mxu2 }
 0x2f6   : > { %v2603_v50 = vpop.f32.mrf.mxu3  ;;  %v2357_v52 = vadd.f32 %v2293_v45, %v7548_v53  ;;  %v3925_v45 = vld [vmem:[%s7504_s12 + $0x3a] sm:$0xff] }
 0x2f7   : > { %v2916_v16 = vpop.f32.mrf.mxu0 }
 0x2f8   : > { %v2667_v57 = vadd.f32 %v2603_v50, %v2357_v52  ;;  %v3225_v25 = vpop.f32.mrf.mxu1  ;;  %v4235_v50 = vld [vmem:[%s7504_s12 + $0x3b] sm:$0xff] }
 0x2fa   : > { %v2977_v49 = vadd.f32 %v2913_v3, %v2667_v57  ;;  %6463 = vmatmul.msk.f32.gmra.mxu2 %vm347_vm1, %v3303_v23  ;;  %6539 = vmatmul.msk.f32.gmra.mxu0 %vm347_vm1, %v3923_v58  ;;  %v3305_v3 = vld [vmem:[%s7504_s12 + $0x29] sm:$0xff] }
 0x2fb   : > { %6501 = vmatmul.msk.f32.gmra.mxu3 %vm347_vm1, %v3921_v2  ;;  %6577 = vmatmul.msk.f32.gmra.mxu1 %vm347_vm1, %v4233_v12 }
 0x2fc   : > { %v7958_v30 = vadd.f32 %v3222_v33, %v2977_v49 }
 0x2fd   : > { %v2296_v53 = vpop.f32.mrf.mxu2 }
 0x2fe   : > { %v2606_v41 = vpop.f32.mrf.mxu3  ;;  %v2358_v44 = vadd.f32 %v2296_v53, %v7559_v61  ;;  %v3926_v53 = vld [vmem:[%s7504_s12 + $0x42] sm:$0xff] }
 0x2ff   : > { %v2919_v55 = vpop.f32.mrf.mxu0 }
 0x300   : > { %v2668_v18 = vadd.f32 %v2606_v41, %v2358_v44  ;;  %v3228_v21 = vpop.f32.mrf.mxu1  ;;  %v4236_v41 = vld [vmem:[%s7504_s12 + $0x43] sm:$0xff] }
 0x302   : > { %v2978_v2 = vadd.f32 %v2916_v16, %v2668_v18  ;;  %6464 = vmatmul.msk.f32.gmra.mxu2 %vm347_vm1, %v3304_v9  ;;  %6540 = vmatmul.msk.f32.gmra.mxu0 %vm347_vm1, %v3924_v6  ;;  %v3306_v16 = vld [vmem:[%s7504_s12 + $0x31] sm:$0xff] }
 0x303   : > { %6502 = vmatmul.msk.f32.gmra.mxu3 %vm347_vm1, %v3922_v17  ;;  %6578 = vmatmul.msk.f32.gmra.mxu1 %vm347_vm1, %v4234_v20 }
 0x304   : > { %v7968_v42 = vadd.f32 %v3225_v25, %v2978_v2 }
 0x305   : > { %v2299_v61 = vpop.f32.mrf.mxu2 }
 0x306   : > { %v2609_v7 = vpop.f32.mrf.mxu3  ;;  %v2359_v26 = vadd.f32 %v2299_v61, %v7570_v46  ;;  %v3927_v61 = vld [vmem:[%s7504_s12 + $0x4a] sm:$0xff] }
 0x307   : > { %v2922_v15 = vpop.f32.mrf.mxu0 }
 0x308   : > { %v2669_v33 = vadd.f32 %v2609_v7, %v2359_v26  ;;  %v3231_v38 = vpop.f32.mrf.mxu1  ;;  %v4237_v7 = vld [vmem:[%s7504_s12 + $0x4b] sm:$0xff] }
 0x30a   : > { %v2979_v17 = vadd.f32 %v2919_v55, %v2669_v33  ;;  %6465 = vmatmul.msk.f32.gmra.mxu2 %vm347_vm1, %v3305_v3  ;;  %6541 = vmatmul.msk.f32.gmra.mxu0 %vm347_vm1, %v3925_v45  ;;  %v3307_v55 = vld [vmem:[%s7504_s12 + $0x39] sm:$0xff] }
 0x30b   : > { %6503 = vmatmul.msk.f32.gmra.mxu3 %vm347_vm1, %v3923_v58  ;;  %6579 = vmatmul.msk.f32.gmra.mxu1 %vm347_vm1, %v4235_v50 }
 0x30c   : > { %v7978_v52 = vadd.f32 %v3228_v21, %v2979_v17 }
 0x30d   : > { %v2302_v46 = vpop.f32.mrf.mxu2 }
 0x30e   : > { %v2612_v23 = vpop.f32.mrf.mxu3  ;;  %v2360_v57 = vadd.f32 %v2302_v46, %v7581_v29  ;;  %v3928_v46 = vld [vmem:[%s7504_s12 + $0x52] sm:$0xff] }
 0x30f   : > { %v2925_v12 = vpop.f32.mrf.mxu0 }
 0x310   : > { %v2670_v25 = vadd.f32 %v2612_v23, %v2360_v57  ;;  %v3234_v49 = vpop.f32.mrf.mxu1  ;;  %v4238_v23 = vld [vmem:[%s7504_s12 + $0x53] sm:$0xff] }
 0x312   : > { %v2980_v58 = vadd.f32 %v2922_v15, %v2670_v25  ;;  %6466 = vmatmul.msk.f32.gmra.mxu2 %vm347_vm1, %v3306_v16  ;;  %6542 = vmatmul.msk.f32.gmra.mxu0 %vm347_vm1, %v3926_v53  ;;  %v3308_v15 = vld [vmem:[%s7504_s12 + $0x41] sm:$0xff] }
 0x313   : > { %6504 = vmatmul.msk.f32.gmra.mxu3 %vm347_vm1, %v3924_v6  ;;  %6580 = vmatmul.msk.f32.gmra.mxu1 %vm347_vm1, %v4236_v41 }
 0x314   : > { %v7988_v44 = vadd.f32 %v3231_v38, %v2980_v58 }
 0x315   : > { %v2305_v29 = vpop.f32.mrf.mxu2 }
 0x316   : > { %v2615_v9 = vpop.f32.mrf.mxu3  ;;  %v2361_v18 = vadd.f32 %v2305_v29, %v7592_v10  ;;  %v3929_v29 = vld [vmem:[%s7504_s12 + $0x5a] sm:$0xff] }
 0x317   : > { %v2928_v20 = vpop.f32.mrf.mxu0 }
 0x318   : > { %v2671_v21 = vadd.f32 %v2615_v9, %v2361_v18  ;;  %v3237_v2 = vpop.f32.mrf.mxu1  ;;  %v4239_v9 = vld [vmem:[%s7504_s12 + $0x5b] sm:$0xff] }
 0x31a   : > { %v2981_v6 = vadd.f32 %v2925_v12, %v2671_v21  ;;  %6467 = vmatmul.msk.f32.gmra.mxu2 %vm347_vm1, %v3307_v55  ;;  %6543 = vmatmul.msk.f32.gmra.mxu0 %vm347_vm1, %v3927_v61  ;;  %v3309_v12 = vld [vmem:[%s7504_s12 + $0x49] sm:$0xff] }
 0x31b   : > { %6505 = vmatmul.msk.f32.gmra.mxu3 %vm347_vm1, %v3925_v45  ;;  %6581 = vmatmul.msk.f32.gmra.mxu1 %vm347_vm1, %v4237_v7 }
 0x31c   : > { %v7998_v26 = vadd.f32 %v3234_v49, %v2981_v6 }
 0x31d   : > { %v2308_v10 = vpop.f32.mrf.mxu2 }
 0x31e   : > { %v2618_v3 = vpop.f32.mrf.mxu3  ;;  %v2362_v33 = vadd.f32 %v2308_v10, %v7603_v1  ;;  %v3930_v10 = vld [vmem:[%s7504_s12 + $0x62] sm:$0xff] }
 0x31f   : > { %v2931_v50 = vpop.f32.mrf.mxu0 }
 0x320   : > { %v2672_v38 = vadd.f32 %v2618_v3, %v2362_v33  ;;  %v3240_v17 = vpop.f32.mrf.mxu1  ;;  %v4240_v3 = vld [vmem:[%s7504_s12 + $0x63] sm:$0xff] }
 0x322   : > { %v2982_v45 = vadd.f32 %v2928_v20, %v2672_v38  ;;  %6468 = vmatmul.msk.f32.gmra.mxu2 %vm347_vm1, %v3308_v15  ;;  %6544 = vmatmul.msk.f32.gmra.mxu0 %vm347_vm1, %v3928_v46  ;;  %v3310_v20 = vld [vmem:[%s7504_s12 + $0x51] sm:$0xff] }
 0x323   : > { %6506 = vmatmul.msk.f32.gmra.mxu3 %vm347_vm1, %v3926_v53  ;;  %6582 = vmatmul.msk.f32.gmra.mxu1 %vm347_vm1, %v4238_v23 }
 0x324   : > { %v8008_v57 = vadd.f32 %v3237_v2, %v2982_v45 }
 0x325   : > { %v2311_v1 = vpop.f32.mrf.mxu2 }
 0x326   : > { %v2621_v16 = vpop.f32.mrf.mxu3  ;;  %v2363_v25 = vadd.f32 %v2311_v1, %v7614_v24  ;;  %v3931_v1 = vld [vmem:[%s7504_s12 + $0x6a] sm:$0xff] }
 0x327   : > { %v2934_v41 = vpop.f32.mrf.mxu0 }
 0x328   : > { %v2673_v49 = vadd.f32 %v2621_v16, %v2363_v25  ;;  %v3243_v58 = vpop.f32.mrf.mxu1  ;;  %v4241_v16 = vld [vmem:[%s7504_s12 + $0x6b] sm:$0xff] }
 0x32a   : > { %v2983_v53 = vadd.f32 %v2931_v50, %v2673_v49  ;;  %6469 = vmatmul.msk.f32.gmra.mxu2 %vm347_vm1, %v3309_v12  ;;  %6545 = vmatmul.msk.f32.gmra.mxu0 %vm347_vm1, %v3929_v29  ;;  %v3311_v50 = vld [vmem:[%s7504_s12 + $0x59] sm:$0xff] }
 0x32b   : > { %6507 = vmatmul.msk.f32.gmra.mxu3 %vm347_vm1, %v3927_v61  ;;  %6583 = vmatmul.msk.f32.gmra.mxu1 %vm347_vm1, %v4239_v9 }
 0x32c   : > { %v8018_v18 = vadd.f32 %v3240_v17, %v2983_v53 }
 0x32d   : > { %v2314_v24 = vpop.f32.mrf.mxu2 }
 0x32e   : > { %v2624_v55 = vpop.f32.mrf.mxu3  ;;  %v2364_v21 = vadd.f32 %v2314_v24, %v7625_v14  ;;  %v3932_v24 = vld [vmem:[%s7504_s12 + $0x72] sm:$0xff] }
 0x32f   : > { %v2937_v7 = vpop.f32.mrf.mxu0 }
 0x330   : > { %v2674_v2 = vadd.f32 %v2624_v55, %v2364_v21  ;;  %v3246_v6 = vpop.f32.mrf.mxu1  ;;  %v4242_v55 = vld [vmem:[%s7504_s12 + $0x73] sm:$0xff] }
 0x332   : > { %v2984_v61 = vadd.f32 %v2934_v41, %v2674_v2  ;;  %6470 = vmatmul.msk.f32.gmra.mxu2 %vm347_vm1, %v3310_v20  ;;  %6546 = vmatmul.msk.f32.gmra.mxu0 %vm347_vm1, %v3930_v10  ;;  %v3312_v41 = vld [vmem:[%s7504_s12 + $0x61] sm:$0xff] }
 0x333   : > { %6508 = vmatmul.msk.f32.gmra.mxu3 %vm347_vm1, %v3928_v46  ;;  %6584 = vmatmul.msk.f32.gmra.mxu1 %vm347_vm1, %v4240_v3 }
 0x334   : > { %v8028_v33 = vadd.f32 %v3243_v58, %v2984_v61 }
 0x335   : > { %v2317_v14 = vpop.f32.mrf.mxu2 }
 0x336   : > { %v2627_v15 = vpop.f32.mrf.mxu3  ;;  %v2365_v38 = vadd.f32 %v2317_v14, %v7636_v60  ;;  %v3933_v14 = vld [vmem:[%s7504_s12 + $0x7a] sm:$0xff] }
 0x337   : > { %v2940_v23 = vpop.f32.mrf.mxu0 }
 0x338   : > { %v2675_v17 = vadd.f32 %v2627_v15, %v2365_v38  ;;  %v3249_v45 = vpop.f32.mrf.mxu1  ;;  %v4243_v15 = vld [vmem:[%s7504_s12 + $0x7b] sm:$0xff] }
 0x33a   : > { %v2985_v46 = vadd.f32 %v2937_v7, %v2675_v17  ;;  %6471 = vmatmul.msk.f32.gmra.mxu2 %vm347_vm1, %v3311_v50  ;;  %6547 = vmatmul.msk.f32.gmra.mxu0 %vm347_vm1, %v3931_v1  ;;  %v3313_v7 = vld [vmem:[%s7504_s12 + $0x69] sm:$0xff] }
 0x33b   : > { %6509 = vmatmul.msk.f32.gmra.mxu3 %vm347_vm1, %v3929_v29  ;;  %6585 = vmatmul.msk.f32.gmra.mxu1 %vm347_vm1, %v4241_v16 }
 0x33c   : > { %v8038_v25 = vadd.f32 %v3246_v6, %v2985_v46 }
 0x33d   : > { %v2320_v60 = vpop.f32.mrf.mxu2 }
 0x33e   : > { %v2630_v12 = vpop.f32.mrf.mxu3  ;;  %v2366_v49 = vadd.f32 %v2320_v60, %v7647_v5  ;;  %v3934_v60 = vld [vmem:[%s7504_s12 + $0x82] sm:$0xff] }
 0x33f   : > { %v2943_v9 = vpop.f32.mrf.mxu0 }
 0x340   : > { %v2676_v58 = vadd.f32 %v2630_v12, %v2366_v49  ;;  %v3252_v53 = vpop.f32.mrf.mxu1  ;;  %v4244_v12 = vld [vmem:[%s7504_s12 + $0x83] sm:$0xff] }
 0x342   : > { %v2986_v29 = vadd.f32 %v2940_v23, %v2676_v58  ;;  %6472 = vmatmul.msk.f32.gmra.mxu2 %vm347_vm1, %v3312_v41  ;;  %6548 = vmatmul.msk.f32.gmra.mxu0 %vm347_vm1, %v3932_v24  ;;  %v3314_v23 = vld [vmem:[%s7504_s12 + $0x71] sm:$0xff] }
 0x343   : > { %6510 = vmatmul.msk.f32.gmra.mxu3 %vm347_vm1, %v3930_v10  ;;  %6586 = vmatmul.msk.f32.gmra.mxu1 %vm347_vm1, %v4242_v55 }
 0x344   : > { %v8048_v21 = vadd.f32 %v3249_v45, %v2986_v29 }
 0x345   : > { %v2323_v5 = vpop.f32.mrf.mxu2 }
 0x346   : > { %v2633_v20 = vpop.f32.mrf.mxu3  ;;  %v2367_v2 = vadd.f32 %v2323_v5, %v7658_v47  ;;  %v3935_v5 = vld [vmem:[%s7504_s12 + $0x8a] sm:$0xff] }
 0x347   : > { %v2946_v3 = vpop.f32.mrf.mxu0 }
 0x348   : > { %v2677_v6 = vadd.f32 %v2633_v20, %v2367_v2  ;;  %v3255_v61 = vpop.f32.mrf.mxu1  ;;  %v4245_v20 = vld [vmem:[%s7504_s12 + $0x8b] sm:$0xff] }
 0x34a   : > { %v2987_v10 = vadd.f32 %v2943_v9, %v2677_v6  ;;  %6473 = vmatmul.msk.f32.gmra.mxu2 %vm347_vm1, %v3313_v7  ;;  %6549 = vmatmul.msk.f32.gmra.mxu0 %vm347_vm1, %v3933_v14  ;;  %v3315_v9 = vld [vmem:[%s7504_s12 + $0x79] sm:$0xff] }
 0x34b   : > { %6511 = vmatmul.msk.f32.gmra.mxu3 %vm347_vm1, %v3931_v1  ;;  %6587 = vmatmul.msk.f32.gmra.mxu1 %vm347_vm1, %v4243_v15 }
 0x34c   : > { %v8058_v38 = vadd.f32 %v3252_v53, %v2987_v10 }
 0x34d   : > { %v2326_v47 = vpop.f32.mrf.mxu2 }
 0x34e   : > { %v2636_v50 = vpop.f32.mrf.mxu3  ;;  %v2368_v17 = vadd.f32 %v2326_v47, %v7669_v39  ;;  %v3936_v47 = vld [vmem:[%s7504_s12 + $0x92] sm:$0xff] }
 0x34f   : > { %v2949_v16 = vpop.f32.mrf.mxu0 }
 0x350   : > { %v2678_v45 = vadd.f32 %v2636_v50, %v2368_v17  ;;  %v3258_v46 = vpop.f32.mrf.mxu1  ;;  %v4246_v50 = vld [vmem:[%s7504_s12 + $0x93] sm:$0xff] }
 0x352   : > { %v2988_v1 = vadd.f32 %v2946_v3, %v2678_v45  ;;  %6474 = vmatmul.msk.f32.gmra.mxu2 %vm347_vm1, %v3314_v23  ;;  %6550 = vmatmul.msk.f32.gmra.mxu0 %vm347_vm1, %v3934_v60  ;;  %v3316_v3 = vld [vmem:[%s7504_s12 + $0x81] sm:$0xff] }
 0x353   : > { %6512 = vmatmul.msk.f32.gmra.mxu3 %vm347_vm1, %v3932_v24  ;;  %6588 = vmatmul.msk.f32.gmra.mxu1 %vm347_vm1, %v4244_v12 }
 0x354   : > { %v8068_v49 = vadd.f32 %v3255_v61, %v2988_v1 }
 0x355   : > { %v2329_v39 = vpop.f32.mrf.mxu2 }
 0x356   : > { %v2639_v41 = vpop.f32.mrf.mxu3  ;;  %v2369_v58 = vadd.f32 %v2329_v39, %v7680_v28  ;;  %v3937_v39 = vld [vmem:[%s7504_s12 + $0x9a] sm:$0xff] }
 0x357   : > { %v2952_v55 = vpop.f32.mrf.mxu0 }
 0x358   : > { %v2679_v53 = vadd.f32 %v2639_v41, %v2369_v58  ;;  %v3261_v29 = vpop.f32.mrf.mxu1  ;;  %v4247_v41 = vld [vmem:[%s7504_s12 + $0x9b] sm:$0xff] }
 0x35a   : > { %v2989_v24 = vadd.f32 %v2949_v16, %v2679_v53  ;;  %6475 = vmatmul.msk.f32.gmra.mxu2 %vm347_vm1, %v3315_v9  ;;  %6551 = vmatmul.msk.f32.gmra.mxu0 %vm347_vm1, %v3935_v5  ;;  %v3317_v16 = vld [vmem:[%s7504_s12 + $0x89] sm:$0xff] }
 0x35b   : > { %6513 = vmatmul.msk.f32.gmra.mxu3 %vm347_vm1, %v3933_v14  ;;  %6589 = vmatmul.msk.f32.gmra.mxu1 %vm347_vm1, %v4245_v20 }
 0x35c   : > { %v8078_v2 = vadd.f32 %v3258_v46, %v2989_v24 }
 0x35d   : > { %v2332_v28 = vpop.f32.mrf.mxu2 }
 0x35e   : > { %v2642_v7 = vpop.f32.mrf.mxu3  ;;  %v2370_v6 = vadd.f32 %v2332_v28, %v7691_v51  ;;  %v3938_v28 = vld [vmem:[%s7504_s12 + $0xa2] sm:$0xff] }
 0x35f   : > { %v4086_v15 = vpop.f32.mrf.mxu0 }
 0x360   : > { %v2680_v61 = vadd.f32 %v2642_v7, %v2370_v6  ;;  %v4396_v10 = vpop.f32.mrf.mxu1  ;;  %v4248_v7 = vld [vmem:[%s7504_s12 + $0xa3] sm:$0xff] }
 0x362   : > { %v2990_v14 = vadd.f32 %v2952_v55, %v2680_v61  ;;  %6476 = vmatmul.msk.f32.gmra.mxu2 %vm347_vm1, %v3316_v3  ;;  %6552 = vmatmul.msk.f32.gmra.mxu0 %vm347_vm1, %v3936_v47  ;;  %v3318_v55 = vld [vmem:[%s7504_s12 + $0x91] sm:$0xff] }
 0x363   : > { %6514 = vmatmul.msk.f32.gmra.mxu3 %vm347_vm1, %v3934_v60  ;;  %6590 = vmatmul.msk.f32.gmra.mxu1 %vm347_vm1, %v4246_v50 }
 0x364   : > { %v8088_v17 = vadd.f32 %v3261_v29, %v2990_v14 }
 0x365   : > { %v3466_v51 = vpop.f32.mrf.mxu2 }
 0x366   : > { %v3776_v23 = vpop.f32.mrf.mxu3  ;;  %v3574_v45 = vadd.f32 %v3466_v51, %v7702_v13  ;;  %v3939_v51 = vld [vmem:[%s7504_s12 + $0xaa] sm:$0xff] }
 0x367   : > { %v4089_v12 = vpop.f32.mrf.mxu0 }
 0x368   : > { %v3884_v46 = vadd.f32 %v3776_v23, %v3574_v45  ;;  %v4399_v1 = vpop.f32.mrf.mxu1  ;;  %v4249_v23 = vld [vmem:[%s7504_s12 + $0xab] sm:$0xff] }
 0x36a   : > { %v4194_v60 = vadd.f32 %v4086_v15, %v3884_v46  ;;  %6477 = vmatmul.msk.f32.gmra.mxu2 %vm347_vm1, %v3317_v16  ;;  %6553 = vmatmul.msk.f32.gmra.mxu0 %vm347_vm1, %v3937_v39  ;;  %v3319_v15 = vld [vmem:[%s7504_s12 + $0x99] sm:$0xff] }
 0x36b   : > { %6515 = vmatmul.msk.f32.gmra.mxu3 %vm347_vm1, %v3935_v5  ;;  %6591 = vmatmul.msk.f32.gmra.mxu1 %vm347_vm1, %v4247_v41 }
 0x36c   : > { %v8098_v58 = vadd.f32 %v4396_v10, %v4194_v60 }
 0x36d   : > { %v3469_v13 = vpop.f32.mrf.mxu2 }
 0x36e   : > { %v3779_v9 = vpop.f32.mrf.mxu3  ;;  %v3575_v53 = vadd.f32 %v3469_v13, %v7713_v22  ;;  %v3940_v13 = vld [vmem:[%s7504_s12 + $0xb2] sm:$0xff] }
 0x36f   : > { %v4092_v20 = vpop.f32.mrf.mxu0 }
 0x370   : > { %v3885_v29 = vadd.f32 %v3779_v9, %v3575_v53  ;;  %v4402_v24 = vpop.f32.mrf.mxu1  ;;  %v4250_v9 = vld [vmem:[%s7504_s12 + $0xb3] sm:$0xff] }
 0x372   : > { %v4195_v5 = vadd.f32 %v4089_v12, %v3885_v29  ;;  %6478 = vmatmul.msk.f32.gmra.mxu2 %vm347_vm1, %v3318_v55  ;;  %6554 = vmatmul.msk.f32.gmra.mxu0 %vm347_vm1, %v3938_v28  ;;  %v3320_v12 = vld [vmem:[%s7504_s12 + $0xa1] sm:$0xff] }
 0x373   : > { %6516 = vmatmul.msk.f32.gmra.mxu3 %vm347_vm1, %v3936_v47  ;;  %6592 = vmatmul.msk.f32.gmra.mxu1 %vm347_vm1, %v4248_v7 }
 0x374   : > { %v8108_v6 = vadd.f32 %v4399_v1, %v4195_v5 }
 0x375   : > { %v3472_v22 = vpop.f32.mrf.mxu2 }
 0x376   : > { %v3782_v3 = vpop.f32.mrf.mxu3  ;;  %v3576_v61 = vadd.f32 %v3472_v22, %v7724_v31  ;;  %v3941_v22 = vld [vmem:[%s7504_s12 + $0xba] sm:$0xff] }
 0x377   : > { %v4095_v50 = vpop.f32.mrf.mxu0 }
 0x378   : > { %v3886_v10 = vadd.f32 %v3782_v3, %v3576_v61  ;;  %v4405_v14 = vpop.f32.mrf.mxu1  ;;  %v4251_v3 = vld [vmem:[%s7504_s12 + $0xbb] sm:$0xff] }
 0x37a   : > { %v4196_v47 = vadd.f32 %v4092_v20, %v3886_v10  ;;  %6479 = vmatmul.msk.f32.gmra.mxu2 %vm347_vm1, %v3319_v15  ;;  %6555 = vmatmul.msk.f32.gmra.mxu0 %vm347_vm1, %v3939_v51  ;;  %v3321_v20 = vld [vmem:[%s7504_s12 + $0xa9] sm:$0xff] }
 0x37b   : > { %6517 = vmatmul.msk.f32.gmra.mxu3 %vm347_vm1, %v3937_v39  ;;  %6593 = vmatmul.msk.f32.gmra.mxu1 %vm347_vm1, %v4249_v23 }
 0x37c   : > { %v8118_v45 = vadd.f32 %v4402_v24, %v4196_v47 }
 0x37d   : > { %v3475_v31 = vpop.f32.mrf.mxu2 }
 0x37e   : > { %v3785_v16 = vpop.f32.mrf.mxu3  ;;  %v3577_v46 = vadd.f32 %v3475_v31, %v7735_v40  ;;  %v3942_v31 = vld [vmem:[%s7504_s12 + $0xc2] sm:$0xff] }
 0x37f   : > { %v4098_v41 = vpop.f32.mrf.mxu0 }
 0x380   : > { %v3887_v1 = vadd.f32 %v3785_v16, %v3577_v46  ;;  %v4408_v60 = vpop.f32.mrf.mxu1  ;;  %v4252_v16 = vld [vmem:[%s7504_s12 + $0xc3] sm:$0xff] }
 0x382   : > { %v4197_v39 = vadd.f32 %v4095_v50, %v3887_v1  ;;  %6480 = vmatmul.msk.f32.gmra.mxu2 %vm347_vm1, %v3320_v12  ;;  %6556 = vmatmul.msk.f32.gmra.mxu0 %vm347_vm1, %v3940_v13  ;;  %v3322_v50 = vld [vmem:[%s7504_s12 + $0xb1] sm:$0xff] }
 0x383   : > { %6518 = vmatmul.msk.f32.gmra.mxu3 %vm347_vm1, %v3938_v28  ;;  %6594 = vmatmul.msk.f32.gmra.mxu1 %vm347_vm1, %v4250_v9 }
 0x384   : > { %v8128_v53 = vadd.f32 %v4405_v14, %v4197_v39 }
 0x385   : > { %v3478_v40 = vpop.f32.mrf.mxu2 }
 0x386   : > { %v3788_v55 = vpop.f32.mrf.mxu3  ;;  %v3578_v29 = vadd.f32 %v3478_v40, %v7746_v48  ;;  %v3943_v40 = vld [vmem:[%s7504_s12 + $0xca] sm:$0xff] }
 0x387   : > { %v4101_v7 = vpop.f32.mrf.mxu0 }
 0x388   : > { %v3888_v24 = vadd.f32 %v3788_v55, %v3578_v29  ;;  %v4411_v5 = vpop.f32.mrf.mxu1  ;;  %v4253_v55 = vld [vmem:[%s7504_s12 + $0xcb] sm:$0xff] }
 0x38a   : > { %v4198_v28 = vadd.f32 %v4098_v41, %v3888_v24  ;;  %6481 = vmatmul.msk.f32.gmra.mxu2 %vm347_vm1, %v3321_v20  ;;  %6557 = vmatmul.msk.f32.gmra.mxu0 %vm347_vm1, %v3941_v22  ;;  %v3323_v41 = vld [vmem:[%s7504_s12 + $0xb9] sm:$0xff] }
 0x38b   : > { %6519 = vmatmul.msk.f32.gmra.mxu3 %vm347_vm1, %v3939_v51  ;;  %6595 = vmatmul.msk.f32.gmra.mxu1 %vm347_vm1, %v4251_v3 }
 0x38c   : > { %v8138_v61 = vadd.f32 %v4408_v60, %v4198_v28 }
 0x38d   : > { %v3481_v48 = vpop.f32.mrf.mxu2 }
 0x38e   : > { %v3791_v15 = vpop.f32.mrf.mxu3  ;;  %v3579_v10 = vadd.f32 %v3481_v48, %v7757_v56  ;;  %v3944_v48 = vld [vmem:[%s7504_s12 + $0xd2] sm:$0xff] }
 0x38f   : > { %v4104_v23 = vpop.f32.mrf.mxu0 }
 0x390   : > { %v3889_v14 = vadd.f32 %v3791_v15, %v3579_v10  ;;  %v4414_v47 = vpop.f32.mrf.mxu1  ;;  %v4254_v15 = vld [vmem:[%s7504_s12 + $0xd3] sm:$0xff] }
 0x392   : > { %v4199_v51 = vadd.f32 %v4101_v7, %v3889_v14  ;;  %6482 = vmatmul.msk.f32.gmra.mxu2 %vm347_vm1, %v3322_v50  ;;  %6558 = vmatmul.msk.f32.gmra.mxu0 %vm347_vm1, %v3942_v31  ;;  %v3324_v7 = vld [vmem:[%s7504_s12 + $0xc1] sm:$0xff] }
 0x393   : > { %6520 = vmatmul.msk.f32.gmra.mxu3 %vm347_vm1, %v3940_v13  ;;  %6596 = vmatmul.msk.f32.gmra.mxu1 %vm347_vm1, %v4252_v16 }
 0x394   : > { %v8148_v46 = vadd.f32 %v4411_v5, %v4199_v51 }
 0x395   : > { %v3484_v56 = vpop.f32.mrf.mxu2 }
 0x396   : > { %v3794_v12 = vpop.f32.mrf.mxu3  ;;  %v3580_v1 = vadd.f32 %v3484_v56, %v7768_v0  ;;  %v3945_v56 = vld [vmem:[%s7504_s12 + $0xda] sm:$0xff] }
 0x397   : > { %v4107_v9 = vpop.f32.mrf.mxu0 }
 0x398   : > { %v3890_v60 = vadd.f32 %v3794_v12, %v3580_v1  ;;  %v4417_v39 = vpop.f32.mrf.mxu1  ;;  %v4255_v12 = vld [vmem:[%s7504_s12 + $0xdb] sm:$0xff] }
 0x39a   : > { %v4200_v13 = vadd.f32 %v4104_v23, %v3890_v60  ;;  %6483 = vmatmul.msk.f32.gmra.mxu2 %vm347_vm1, %v3323_v41  ;;  %6559 = vmatmul.msk.f32.gmra.mxu0 %vm347_vm1, %v3943_v40  ;;  %v3325_v23 = vld [vmem:[%s7504_s12 + $0xc9] sm:$0xff] }
 0x39b   : > { %6521 = vmatmul.msk.f32.gmra.mxu3 %vm347_vm1, %v3941_v22  ;;  %6597 = vmatmul.msk.f32.gmra.mxu1 %vm347_vm1, %v4253_v55 }
 0x39c   : > { %v8158_v29 = vadd.f32 %v4414_v47, %v4200_v13 }
 0x39d   : > { %v3487_v0 = vpop.f32.mrf.mxu2 }
 0x39e   : > { %v3797_v20 = vpop.f32.mrf.mxu3  ;;  %v3581_v24 = vadd.f32 %v3487_v0, %v7779_v8  ;;  %v3946_v0 = vld [vmem:[%s7504_s12 + $0xe2] sm:$0xff] }
 0x39f   : > { %v4110_v3 = vpop.f32.mrf.mxu0 }
 0x3a0   : > { %v3891_v5 = vadd.f32 %v3797_v20, %v3581_v24  ;;  %v4420_v28 = vpop.f32.mrf.mxu1  ;;  %v4256_v20 = vld [vmem:[%s7504_s12 + $0xe3] sm:$0xff] }
 0x3a2   : > { %v4201_v22 = vadd.f32 %v4107_v9, %v3891_v5  ;;  %6484 = vmatmul.msk.f32.gmra.mxu2 %vm347_vm1, %v3324_v7  ;;  %6560 = vmatmul.msk.f32.gmra.mxu0 %vm347_vm1, %v3944_v48  ;;  %v3326_v9 = vld [vmem:[%s7504_s12 + $0xd1] sm:$0xff] }
 0x3a3   : > { %6522 = vmatmul.msk.f32.gmra.mxu3 %vm347_vm1, %v3942_v31  ;;  %6598 = vmatmul.msk.f32.gmra.mxu1 %vm347_vm1, %v4254_v15 }
 0x3a4   : > { %v8168_v10 = vadd.f32 %v4417_v39, %v4201_v22 }
 0x3a5   : > { %v3490_v8 = vpop.f32.mrf.mxu2 }
 0x3a6   : > { %v3800_v50 = vpop.f32.mrf.mxu3  ;;  %v3582_v14 = vadd.f32 %v3490_v8, %v7790_v19  ;;  %v3947_v8 = vld [vmem:[%s7504_s12 + $0xea] sm:$0xff] }
 0x3a7   : > { %v4113_v16 = vpop.f32.mrf.mxu0 }
 0x3a8   : > { %v3892_v47 = vadd.f32 %v3800_v50, %v3582_v14  ;;  %v4423_v51 = vpop.f32.mrf.mxu1  ;;  %v4257_v50 = vld [vmem:[%s7504_s12 + $0xeb] sm:$0xff] }
 0x3aa   : > { %v4202_v31 = vadd.f32 %v4110_v3, %v3892_v47  ;;  %6485 = vmatmul.msk.f32.gmra.mxu2 %vm347_vm1, %v3325_v23  ;;  %6561 = vmatmul.msk.f32.gmra.mxu0 %vm347_vm1, %v3945_v56  ;;  %v3327_v3 = vld [vmem:[%s7504_s12 + $0xd9] sm:$0xff] }
 0x3ab   : > { %6523 = vmatmul.msk.f32.gmra.mxu3 %vm347_vm1, %v3943_v40  ;;  %6599 = vmatmul.msk.f32.gmra.mxu1 %vm347_vm1, %v4255_v12 }
 0x3ac   : > { %v8178_v1 = vadd.f32 %v4420_v28, %v4202_v31 }
 0x3ad   : > { %v3493_v19 = vpop.f32.mrf.mxu2 }
 0x3ae   : > { %v3803_v41 = vpop.f32.mrf.mxu3  ;;  %v3583_v60 = vadd.f32 %v3493_v19, %v7801_v32  ;;  %v3948_v19 = vld [vmem:[%s7504_s12 + $0xf2] sm:$0xff] }
 0x3af   : > { %v4116_v55 = vpop.f32.mrf.mxu0 }
 0x3b0   : > { %v3893_v39 = vadd.f32 %v3803_v41, %v3583_v60  ;;  %v4426_v13 = vpop.f32.mrf.mxu1  ;;  %v4258_v41 = vld [vmem:[%s7504_s12 + $0xf3] sm:$0xff] }
 0x3b2   : > { %v4203_v40 = vadd.f32 %v4113_v16, %v3893_v39  ;;  %6486 = vmatmul.msk.f32.gmra.mxu2 %vm347_vm1, %v3326_v9  ;;  %6562 = vmatmul.msk.f32.gmra.mxu0 %vm347_vm1, %v3946_v0  ;;  %v3328_v16 = vld [vmem:[%s7504_s12 + $0xe1] sm:$0xff] }
 0x3b3   : > { %6524 = vmatmul.msk.f32.gmra.mxu3 %vm347_vm1, %v3944_v48  ;;  %6600 = vmatmul.msk.f32.gmra.mxu1 %vm347_vm1, %v4256_v20 }
 0x3b4   : > { %v8188_v24 = vadd.f32 %v4423_v51, %v4203_v40 }
 0x3b5   : > { %v3496_v32 = vpop.f32.mrf.mxu2 }
 0x3b6   : > { %v3806_v7 = vpop.f32.mrf.mxu3  ;;  %v3584_v5 = vadd.f32 %v3496_v32, %v7812_v43  ;;  %v3949_v32 = vld [vmem:[%s7504_s12 + $0xfa] sm:$0xff] }
 0x3b7   : > { %v4119_v15 = vpop.f32.mrf.mxu0 }
 0x3b8   : > { %v3894_v28 = vadd.f32 %v3806_v7, %v3584_v5  ;;  %v4429_v22 = vpop.f32.mrf.mxu1  ;;  %v4259_v7 = vld [vmem:[%s7504_s12 + $0xfb] sm:$0xff] }
 0x3ba   : > { %v4204_v48 = vadd.f32 %v4116_v55, %v3894_v28  ;;  %6487 = vmatmul.msk.f32.gmra.mxu2 %vm347_vm1, %v3327_v3  ;;  %6563 = vmatmul.msk.f32.gmra.mxu0 %vm347_vm1, %v3947_v8  ;;  %v3329_v55 = vld [vmem:[%s7504_s12 + $0xe9] sm:$0xff] }
 0x3bb   : > { %6525 = vmatmul.msk.f32.gmra.mxu3 %vm347_vm1, %v3945_v56  ;;  %6601 = vmatmul.msk.f32.gmra.mxu1 %vm347_vm1, %v4257_v50 }
 0x3bc   : > { %v8198_v14 = vadd.f32 %v4426_v13, %v4204_v48 }
 0x3bd   : > { %v3499_v43 = vpop.f32.mrf.mxu2 }
 0x3be   : > { %v3809_v23 = vpop.f32.mrf.mxu3  ;;  %v3585_v47 = vadd.f32 %v3499_v43, %v7823_v59  ;;  %v3950_v43 = vld [vmem:[%s7504_s12 + $0x102] sm:$0xff] }
 0x3bf   : > { %v4122_v12 = vpop.f32.mrf.mxu0 }
 0x3c0   : > { %v3895_v51 = vadd.f32 %v3809_v23, %v3585_v47  ;;  %v4432_v31 = vpop.f32.mrf.mxu1  ;;  %v4260_v23 = vld [vmem:[%s7504_s12 + $0x103] sm:$0xff] }
 0x3c2   : > { %v4205_v56 = vadd.f32 %v4119_v15, %v3895_v51  ;;  %6488 = vmatmul.msk.f32.gmra.mxu2 %vm347_vm1, %v3328_v16  ;;  %6564 = vmatmul.msk.f32.gmra.mxu0 %vm347_vm1, %v3948_v19  ;;  %v3330_v15 = vld [vmem:[%s7504_s12 + $0xf1] sm:$0xff] }
 0x3c3   : > { %6526 = vmatmul.msk.f32.gmra.mxu3 %vm347_vm1, %v3946_v0  ;;  %6602 = vmatmul.msk.f32.gmra.mxu1 %vm347_vm1, %v4258_v41 }
 0x3c4   : > { %v8208_v60 = vadd.f32 %v4429_v22, %v4205_v56 }
 0x3c5   : > { %v3502_v59 = vpop.f32.mrf.mxu2 }
 0x3c6   : > { %v3812_v9 = vpop.f32.mrf.mxu3  ;;  %v3586_v39 = vadd.f32 %v3502_v59, %v7834_v11  ;;  %v3951_v59 = vld [vmem:[%s7504_s12 + $0x10a] sm:$0xff] }
 0x3c7   : > { %v4125_v20 = vpop.f32.mrf.mxu0 }
 0x3c8   : > { %v3896_v13 = vadd.f32 %v3812_v9, %v3586_v39  ;;  %v4435_v40 = vpop.f32.mrf.mxu1  ;;  %v4261_v9 = vld [vmem:[%s7504_s12 + $0x10b] sm:$0xff] }
 0x3ca   : > { %v4206_v0 = vadd.f32 %v4122_v12, %v3896_v13  ;;  %6489 = vmatmul.msk.f32.gmra.mxu2 %vm347_vm1, %v3329_v55  ;;  %6565 = vmatmul.msk.f32.gmra.mxu0 %vm347_vm1, %v3949_v32  ;;  %v3331_v12 = vld [vmem:[%s7504_s12 + $0xf9] sm:$0xff] }
 0x3cb   : > { %6527 = vmatmul.msk.f32.gmra.mxu3 %vm347_vm1, %v3947_v8  ;;  %6603 = vmatmul.msk.f32.gmra.mxu1 %vm347_vm1, %v4259_v7 }
 0x3cc   : > { %v8218_v5 = vadd.f32 %v4432_v31, %v4206_v0 }
 0x3cd   : > { %v3505_v11 = vpop.f32.mrf.mxu2 }
 0x3ce   : > { %v3815_v3 = vpop.f32.mrf.mxu3  ;;  %v3587_v28 = vadd.f32 %v3505_v11, %v7845_v35  ;;  %v3952_v11 = vld [vmem:[%s7504_s12 + $0x112] sm:$0xff] }
 0x3cf   : > { %v4128_v50 = vpop.f32.mrf.mxu0 }
 0x3d0   : > { %v3897_v22 = vadd.f32 %v3815_v3, %v3587_v28  ;;  %v4438_v48 = vpop.f32.mrf.mxu1  ;;  %v4262_v3 = vld [vmem:[%s7504_s12 + $0x113] sm:$0xff] }
 0x3d2   : > { %v4207_v8 = vadd.f32 %v4125_v20, %v3897_v22  ;;  %6490 = vmatmul.msk.f32.gmra.mxu2 %vm347_vm1, %v3330_v15  ;;  %6566 = vmatmul.msk.f32.gmra.mxu0 %vm347_vm1, %v3950_v43  ;;  %v3332_v20 = vld [vmem:[%s7504_s12 + $0x101] sm:$0xff] }
 0x3d3   : > { %6528 = vmatmul.msk.f32.gmra.mxu3 %vm347_vm1, %v3948_v19  ;;  %6604 = vmatmul.msk.f32.gmra.mxu1 %vm347_vm1, %v4260_v23 }
 0x3d4   : > { %v8228_v47 = vadd.f32 %v4435_v40, %v4207_v8 }
 0x3d5   : > { %v3508_v35 = vpop.f32.mrf.mxu2 }
 0x3d6   : > { %v3818_v16 = vpop.f32.mrf.mxu3  ;;  %v3588_v51 = vadd.f32 %v3508_v35, %v7856_v62  ;;  %v3953_v35 = vld [vmem:[%s7504_s12 + $0x11a] sm:$0xff] }
 0x3d7   : > { %v4131_v41 = vpop.f32.mrf.mxu0 }
 0x3d8   : > { %v3898_v31 = vadd.f32 %v3818_v16, %v3588_v51  ;;  %v4441_v56 = vpop.f32.mrf.mxu1  ;;  %v4263_v16 = vld [vmem:[%s7504_s12 + $0x11b] sm:$0xff] }
 0x3da   : > { %v4208_v19 = vadd.f32 %v4128_v50, %v3898_v31  ;;  %6491 = vmatmul.msk.f32.gmra.mxu2 %vm347_vm1, %v3331_v12  ;;  %6567 = vmatmul.msk.f32.gmra.mxu0 %vm347_vm1, %v3951_v59  ;;  %v3333_v50 = vld [vmem:[%s7504_s12 + $0x109] sm:$0xff] }
 0x3db   : > { %6529 = vmatmul.msk.f32.gmra.mxu3 %vm347_vm1, %v3949_v32  ;;  %6605 = vmatmul.msk.f32.gmra.mxu1 %vm347_vm1, %v4261_v9 }
 0x3dc   : > { %v8238_v39 = vadd.f32 %v4438_v48, %v4208_v19 }
 0x3dd   : > { %v3511_v62 = vpop.f32.mrf.mxu2 }
 0x3de   : > { %v3821_v55 = vpop.f32.mrf.mxu3  ;;  %v3589_v13 = vadd.f32 %v3511_v62, %v7870_v54  ;;  %v3954_v62 = vld [vmem:[%s7504_s12 + $0x122] sm:$0xff] }
 0x3df   : > { %v4134_v7 = vpop.f32.mrf.mxu0 }
 0x3e0   : > { %v3899_v40 = vadd.f32 %v3821_v55, %v3589_v13  ;;  %v4444_v0 = vpop.f32.mrf.mxu1  ;;  %v4264_v55 = vld [vmem:[%s7504_s12 + $0x123] sm:$0xff] }
 0x3e2   : > { %v4209_v32 = vadd.f32 %v4131_v41, %v3899_v40  ;;  %6492 = vmatmul.msk.f32.gmra.mxu2 %vm347_vm1, %v3332_v20  ;;  %6568 = vmatmul.msk.f32.gmra.mxu0 %vm347_vm1, %v3952_v11  ;;  %v3334_v41 = vld [vmem:[%s7504_s12 + $0x111] sm:$0xff] }
 0x3e3   : > { %6530 = vmatmul.msk.f32.gmra.mxu3 %vm347_vm1, %v3950_v43  ;;  %6606 = vmatmul.msk.f32.gmra.mxu1 %vm347_vm1, %v4262_v3 }
 0x3e4   : > { %v8248_v28 = vadd.f32 %v4441_v56, %v4209_v32 }
 0x3e5   : > { %v3514_v54 = vpop.f32.mrf.mxu2 }
 0x3e6   : > { %v3824_v15 = vpop.f32.mrf.mxu3  ;;  %v3590_v22 = vadd.f32 %v3514_v54, %v7886_v34  ;;  %v3955_v54 = vld [vmem:[%s7504_s12 + $0x12a] sm:$0xff] }
 0x3e7   : > { %v4137_v23 = vpop.f32.mrf.mxu0 }
 0x3e8   : > { %v3900_v48 = vadd.f32 %v3824_v15, %v3590_v22  ;;  %v4447_v8 = vpop.f32.mrf.mxu1  ;;  %v4265_v15 = vld [vmem:[%s7504_s12 + $0x12b] sm:$0xff] }
 0x3ea   : > { %v4210_v43 = vadd.f32 %v4134_v7, %v3900_v48  ;;  %6493 = vmatmul.msk.f32.gmra.mxu2 %vm347_vm1, %v3333_v50  ;;  %6569 = vmatmul.msk.f32.gmra.mxu0 %vm347_vm1, %v3953_v35  ;;  %v3335_v7 = vld [vmem:[%s7504_s12 + $0x119] sm:$0xff] }
 0x3eb   : > { %6531 = vmatmul.msk.f32.gmra.mxu3 %vm347_vm1, %v3951_v59  ;;  %6607 = vmatmul.msk.f32.gmra.mxu1 %vm347_vm1, %v4263_v16 }
 0x3ec   : > { %v8258_v51 = vadd.f32 %v4444_v0, %v4210_v43 }
 0x3ed   : > { %v3517_v34 = vpop.f32.mrf.mxu2 }
 0x3ee   : > { %v3827_v12 = vpop.f32.mrf.mxu3  ;;  %v3591_v31 = vadd.f32 %v3517_v34, %v7905_v4 }
 0x3ef   : > { %v4140_v9 = vpop.f32.mrf.mxu0 }
 0x3f0   : > { %v3901_v56 = vadd.f32 %v3827_v12, %v3591_v31  ;;  %v4450_v19 = vpop.f32.mrf.mxu1  ;;  %v5160_v12 = vld [vmem:[%s7504_s12 + $0x25] sm:$0xff] }
 0x3f2   : > { %v4211_v59 = vadd.f32 %v4137_v23, %v3901_v56  ;;  %6494 = vmatmul.msk.f32.gmra.mxu2 %vm347_vm1, %v3334_v41  ;;  %6570 = vmatmul.msk.f32.gmra.mxu0 %vm347_vm1, %v3954_v62  ;;  %v4540_v23 = vld [vmem:[%s7504_s12 + $0x14] sm:$0xff]  ;;  %v4851_v62 = vld [vmem:[%s7504_s12 + $0x2c] sm:$0xff] }
 0x3f3   : > { %6532 = vmatmul.msk.f32.gmra.mxu3 %vm347_vm1, %v3952_v11  ;;  %6608 = vmatmul.msk.f32.gmra.mxu1 %vm347_vm1, %v4264_v55 }
 0x3f4   : > { %v8268_v13 = vadd.f32 %v4447_v8, %v4211_v59  ;;  %v4850_v8 = vld [vmem:[%s7504_s12 + $0x24] sm:$0xff] }
 0x3f5   : > { %v3520_v4 = vpop.f32.mrf.mxu2 }
 0x3f6   : > { %v3830_v20 = vpop.f32.mrf.mxu3  ;;  %v3592_v40 = vadd.f32 %v3520_v4, %v7916_v37 }
 0x3f7   : > { %v4143_v3 = vpop.f32.mrf.mxu0 }
 0x3f8   : > { %v3902_v0 = vadd.f32 %v3830_v20, %v3592_v40  ;;  %v4453_v32 = vpop.f32.mrf.mxu1  ;;  %v5161_v20 = vld [vmem:[%s7504_s12 + $0x2d] sm:$0xff] }
 0x3f9   : > { %v5471_v40 = vld [vmem:[%s7504_s12 + $0x2e] sm:$0xff] }
 0x3fa   : > { %v4212_v11 = vadd.f32 %v4140_v9, %v3902_v0  ;;  %6495 = vmatmul.msk.f32.gmra.mxu2 %vm347_vm1, %v3335_v7  ;;  %6571 = vmatmul.msk.f32.gmra.mxu0 %vm347_vm1, %v3955_v54  ;;  %v4852_v54 = vld [vmem:[%s7504_s12 + $0x34] sm:$0xff] }
 0x3fb   : > { %6533 = vmatmul.msk.f32.gmra.mxu3 %vm347_vm1, %v3953_v35  ;;  %6609 = vmatmul.msk.f32.gmra.mxu1 %vm347_vm1, %v4265_v15  ;;  %v5470_v35 = vld [vmem:[%s7504_s12 + $0x26] sm:$0xff] }
 0x3fc   : > { %v8278_v37 = vadd.f32 %v4450_v19, %v4212_v11  ;;  %v4541_v19 = vld [vmem:[%s7504_s12 + $0x1c] sm:$0xff] }
 0x3fd   : > { %v3523_v22 = vpop.f32.mrf.mxu2 }
 0x3fe   : > { %v3833_v50 = vpop.f32.mrf.mxu3  ;;  %v3593_v48 = vadd.f32 %v3523_v22, %v7927_v27 }
 0x3ff   : > { %v4146_v43 = vpop.f32.mrf.mxu0 }
 0x400   : > { %v3903_v16 = vadd.f32 %v3833_v50, %v3593_v48  ;;  %v4456_v34 = vpop.f32.mrf.mxu1  ;;  %v5162_v50 = vld [vmem:[%s7504_s12 + $0x35] sm:$0xff] }
 0x401   : > { %v5472_v48 = vld [vmem:[%s7504_s12 + $0x36] sm:$0xff] }
 0x402   : > { %v4213_v31 = vadd.f32 %v4143_v3, %v3903_v16  ;;  %6612 = vmatmul.msk.f32.vlgmr.msra.gmra.mxu2 %vm347_vm1, %v4540_v23  ;;  %6688 = vmatmul.msk.f32.vlgmr.msra.gmra.mxu0 %vm347_vm1, %v5160_v12  ;;  %v4853_v12 = vld [vmem:[%s7504_s12 + $0x3c] sm:$0xff] }
 0x403   : > { %6650 = vmatmul.msk.f32.vlgmr.msra.gmra.mxu3 %vm347_vm1, %v4850_v8  ;;  %6726 = vmatmul.msk.f32.vlgmr.msra.gmra.mxu1 %vm347_vm1, %v5470_v35 }
 0x404   : > { %v8289_v27 = vadd.f32 %v4453_v32, %v4213_v31 }
 0x405   : > { %v3526_v41 = vpop.f32.mrf.mxu2 }
 0x406   : > { %v3836_v56 = vpop.f32.mrf.mxu3  ;;  %v3594_v9 = vadd.f32 %v3526_v41, %v7938_v36 }
 0x407   : > { %v4149_v59 = vpop.f32.mrf.mxu0 }
 0x408   : > { %v3904_v55 = vadd.f32 %v3836_v56, %v3594_v9  ;;  %v4459_v4 = vpop.f32.mrf.mxu1  ;;  %v5163_v56 = vld [vmem:[%s7504_s12 + $0x3d] sm:$0xff] }
 0x40a   : > { %v4214_v7 = vadd.f32 %v4146_v43, %v3904_v55  ;;  %6613 = vmatmul.msk.f32.gmra.mxu2 %vm347_vm1, %v4541_v19  ;;  %6689 = vmatmul.msk.f32.gmra.mxu0 %vm347_vm1, %v5161_v20 }
 0x40b   : > { %6651 = vmatmul.msk.f32.gmra.mxu3 %vm347_vm1, %v4851_v62  ;;  %6727 = vmatmul.msk.f32.gmra.mxu1 %vm347_vm1, %v5471_v40 }
 0x40c   : > { %v8300_v36 = vadd.f32 %v4456_v34, %v4214_v7 }
 0x40d   : > { %v3529_v0 = vpop.f32.mrf.mxu2 }
 0x40e   : > { %v3839_v3 = vpop.f32.mrf.mxu3  ;;  %v3595_v32 = vadd.f32 %v3529_v0, %v7948_v63  ;;  %v5164_v0 = vld [vmem:[%s7504_s12 + $0x45] sm:$0xff] }
 0x40f   : > { %v4152_v11 = vpop.f32.mrf.mxu0 }
 0x410   : > { %v3905_v15 = vadd.f32 %v3839_v3, %v3595_v32  ;;  %v4462_v22 = vpop.f32.mrf.mxu1 }
 0x412   : > { %v4215_v23 = vadd.f32 %v4149_v59, %v3905_v15  ;;  %6614 = vmatmul.msk.f32.gmra.mxu2 %vm347_vm1, %v4850_v8  ;;  %6690 = vmatmul.msk.f32.gmra.mxu0 %vm347_vm1, %v5162_v50  ;;  %v5473_v8 = vld [vmem:[%s7504_s12 + $0x3e] sm:$0xff] }
 0x413   : > { %6652 = vmatmul.msk.f32.gmra.mxu3 %vm347_vm1, %v4852_v54  ;;  %6728 = vmatmul.msk.f32.gmra.mxu1 %vm347_vm1, %v5472_v48 }
 0x414   : > { %v8310_v16 = vadd.f32 %v4459_v4, %v4215_v23  ;;  %v4854_v4 = vld [vmem:[%s7504_s12 + $0x44] sm:$0xff] }
 0x415   : > { %v3532_v63 = vpop.f32.mrf.mxu2 }
 0x416   : > { %v3842_v43 = vpop.f32.mrf.mxu3  ;;  %v3596_v34 = vadd.f32 %v3532_v63, %v7958_v30  ;;  %v5165_v63 = vld [vmem:[%s7504_s12 + $0x4d] sm:$0xff] }
 0x417   : > { %v4155_v31 = vpop.f32.mrf.mxu0 }
 0x418   : > { %v3906_v35 = vadd.f32 %v3842_v43, %v3596_v34  ;;  %v4465_v41 = vpop.f32.mrf.mxu1 }
 0x41a   : > { %v4216_v9 = vadd.f32 %v4152_v11, %v3906_v35  ;;  %6615 = vmatmul.msk.f32.gmra.mxu2 %vm347_vm1, %v4851_v62  ;;  %6691 = vmatmul.msk.f32.gmra.mxu0 %vm347_vm1, %v5163_v56  ;;  %v5474_v62 = vld [vmem:[%s7504_s12 + $0x46] sm:$0xff] }
 0x41b   : > { %6653 = vmatmul.msk.f32.gmra.mxu3 %vm347_vm1, %v4853_v12  ;;  %6729 = vmatmul.msk.f32.gmra.mxu1 %vm347_vm1, %v5473_v8 }
 0x41c   : > { %v8320_v19 = vadd.f32 %v4462_v22, %v4216_v9  ;;  %v4855_v22 = vld [vmem:[%s7504_s12 + $0x4c] sm:$0xff] }
 0x41d   : > { %v3535_v30 = vpop.f32.mrf.mxu2 }
 0x41e   : > { %v3845_v55 = vpop.f32.mrf.mxu3  ;;  %v3597_v59 = vadd.f32 %v3535_v30, %v7968_v42  ;;  %v5166_v30 = vld [vmem:[%s7504_s12 + $0x55] sm:$0xff] }
 0x41f   : > { %v4158_v40 = vpop.f32.mrf.mxu0 }
 0x420   : > { %v3907_v20 = vadd.f32 %v3845_v55, %v3597_v59  ;;  %v4468_v7 = vpop.f32.mrf.mxu1 }
 0x422   : > { %v4217_v3 = vadd.f32 %v4155_v31, %v3907_v20  ;;  %6616 = vmatmul.msk.f32.gmra.mxu2 %vm347_vm1, %v4852_v54  ;;  %6692 = vmatmul.msk.f32.gmra.mxu0 %vm347_vm1, %v5164_v0  ;;  %v5475_v54 = vld [vmem:[%s7504_s12 + $0x4e] sm:$0xff] }
 0x423   : > { %6654 = vmatmul.msk.f32.gmra.mxu3 %vm347_vm1, %v4854_v4  ;;  %6730 = vmatmul.msk.f32.gmra.mxu1 %vm347_vm1, %v5474_v62 }
 0x424   : > { %v8330_v32 = vadd.f32 %v4465_v41, %v4217_v3  ;;  %v4856_v41 = vld [vmem:[%s7504_s12 + $0x54] sm:$0xff] }
 0x425   : > { %v3538_v42 = vpop.f32.mrf.mxu2 }
 0x426   : > { %v3848_v15 = vpop.f32.mrf.mxu3  ;;  %v3598_v11 = vadd.f32 %v3538_v42, %v7978_v52  ;;  %v5167_v42 = vld [vmem:[%s7504_s12 + $0x5d] sm:$0xff] }
 0x427   : > { %v4161_v48 = vpop.f32.mrf.mxu0 }
 0x428   : > { %v3908_v50 = vadd.f32 %v3848_v15, %v3598_v11  ;;  %v4471_v23 = vpop.f32.mrf.mxu1 }
 0x42a   : > { %v4218_v43 = vadd.f32 %v4158_v40, %v3908_v50  ;;  %6617 = vmatmul.msk.f32.gmra.mxu2 %vm347_vm1, %v4853_v12  ;;  %6693 = vmatmul.msk.f32.gmra.mxu0 %vm347_vm1, %v5165_v63  ;;  %v5476_v12 = vld [vmem:[%s7504_s12 + $0x56] sm:$0xff] }
 0x42b   : > { %6655 = vmatmul.msk.f32.gmra.mxu3 %vm347_vm1, %v4855_v22  ;;  %6731 = vmatmul.msk.f32.gmra.mxu1 %vm347_vm1, %v5475_v54 }
 0x42c   : > { %v8340_v34 = vadd.f32 %v4468_v7, %v4218_v43  ;;  %v4857_v7 = vld [vmem:[%s7504_s12 + $0x5c] sm:$0xff] }
 0x42d   : > { %v3541_v52 = vpop.f32.mrf.mxu2 }
 0x42e   : > { %v3851_v35 = vpop.f32.mrf.mxu3  ;;  %v3599_v31 = vadd.f32 %v3541_v52, %v7988_v44  ;;  %v5168_v52 = vld [vmem:[%s7504_s12 + $0x65] sm:$0xff] }
 0x42f   : > { %v4164_v8 = vpop.f32.mrf.mxu0 }
 0x430   : > { %v3909_v56 = vadd.f32 %v3851_v35, %v3599_v31  ;;  %v4474_v9 = vpop.f32.mrf.mxu1 }
 0x432   : > { %v4219_v55 = vadd.f32 %v4161_v48, %v3909_v56  ;;  %6618 = vmatmul.msk.f32.gmra.mxu2 %vm347_vm1, %v4854_v4  ;;  %6694 = vmatmul.msk.f32.gmra.mxu0 %vm347_vm1, %v5166_v30  ;;  %v5477_v4 = vld [vmem:[%s7504_s12 + $0x5e] sm:$0xff] }
 0x433   : > { %6656 = vmatmul.msk.f32.gmra.mxu3 %vm347_vm1, %v4856_v41  ;;  %6732 = vmatmul.msk.f32.gmra.mxu1 %vm347_vm1, %v5476_v12 }
 0x434   : > { %v8350_v59 = vadd.f32 %v4471_v23, %v4219_v55  ;;  %v4858_v23 = vld [vmem:[%s7504_s12 + $0x64] sm:$0xff] }
 0x435   : > { %v3544_v44 = vpop.f32.mrf.mxu2 }
 0x436   : > { %v3854_v20 = vpop.f32.mrf.mxu3  ;;  %v3600_v40 = vadd.f32 %v3544_v44, %v7998_v26  ;;  %v5169_v44 = vld [vmem:[%s7504_s12 + $0x6d] sm:$0xff] }
 0x437   : > { %v4167_v62 = vpop.f32.mrf.mxu0 }
 0x438   : > { %v3910_v0 = vadd.f32 %v3854_v20, %v3600_v40  ;;  %v4477_v3 = vpop.f32.mrf.mxu1 }
 0x43a   : > { %v4220_v15 = vadd.f32 %v4164_v8, %v3910_v0  ;;  %6619 = vmatmul.msk.f32.gmra.mxu2 %vm347_vm1, %v4855_v22  ;;  %6695 = vmatmul.msk.f32.gmra.mxu0 %vm347_vm1, %v5167_v42  ;;  %v5478_v22 = vld [vmem:[%s7504_s12 + $0x66] sm:$0xff] }
 0x43b   : > { %6657 = vmatmul.msk.f32.gmra.mxu3 %vm347_vm1, %v4857_v7  ;;  %6733 = vmatmul.msk.f32.gmra.mxu1 %vm347_vm1, %v5477_v4 }
 0x43c   : > { %v8360_v11 = vadd.f32 %v4474_v9, %v4220_v15  ;;  %v4859_v9 = vld [vmem:[%s7504_s12 + $0x6c] sm:$0xff] }
 0x43d   : > { %v3547_v26 = vpop.f32.mrf.mxu2 }
 0x43e   : > { %v3857_v50 = vpop.f32.mrf.mxu3  ;;  %v3601_v48 = vadd.f32 %v3547_v26, %v8008_v57  ;;  %v5170_v26 = vld [vmem:[%s7504_s12 + $0x75] sm:$0xff] }
 0x43f   : > { %v4170_v54 = vpop.f32.mrf.mxu0 }
 0x440   : > { %v3911_v63 = vadd.f32 %v3857_v50, %v3601_v48  ;;  %v4480_v43 = vpop.f32.mrf.mxu1 }
 0x442   : > { %v4221_v35 = vadd.f32 %v4167_v62, %v3911_v63  ;;  %6620 = vmatmul.msk.f32.gmra.mxu2 %vm347_vm1, %v4856_v41  ;;  %6696 = vmatmul.msk.f32.gmra.mxu0 %vm347_vm1, %v5168_v52  ;;  %v5479_v41 = vld [vmem:[%s7504_s12 + $0x6e] sm:$0xff] }
 0x443   : > { %6658 = vmatmul.msk.f32.gmra.mxu3 %vm347_vm1, %v4858_v23  ;;  %6734 = vmatmul.msk.f32.gmra.mxu1 %vm347_vm1, %v5478_v22 }
 0x444   : > { %v8370_v31 = vadd.f32 %v4477_v3, %v4221_v35  ;;  %v4860_v3 = vld [vmem:[%s7504_s12 + $0x74] sm:$0xff] }
 0x445   : > { %v3550_v57 = vpop.f32.mrf.mxu2 }
 0x446   : > { %v3860_v56 = vpop.f32.mrf.mxu3  ;;  %v3602_v8 = vadd.f32 %v3550_v57, %v8018_v18  ;;  %v5171_v57 = vld [vmem:[%s7504_s12 + $0x7d] sm:$0xff] }
 0x447   : > { %v4173_v12 = vpop.f32.mrf.mxu0 }
 0x448   : > { %v3912_v30 = vadd.f32 %v3860_v56, %v3602_v8  ;;  %v4483_v55 = vpop.f32.mrf.mxu1 }
 0x44a   : > { %v4222_v20 = vadd.f32 %v4170_v54, %v3912_v30  ;;  %6621 = vmatmul.msk.f32.gmra.mxu2 %vm347_vm1, %v4857_v7  ;;  %6697 = vmatmul.msk.f32.gmra.mxu0 %vm347_vm1, %v5169_v44  ;;  %v5480_v7 = vld [vmem:[%s7504_s12 + $0x76] sm:$0xff] }
 0x44b   : > { %6659 = vmatmul.msk.f32.gmra.mxu3 %vm347_vm1, %v4859_v9  ;;  %6735 = vmatmul.msk.f32.gmra.mxu1 %vm347_vm1, %v5479_v41 }
 0x44c   : > { %v8380_v40 = vadd.f32 %v4480_v43, %v4222_v20  ;;  %v4861_v43 = vld [vmem:[%s7504_s12 + $0x7c] sm:$0xff] }
 0x44d   : > { %v3553_v18 = vpop.f32.mrf.mxu2 }
 0x44e   : > { %v3863_v0 = vpop.f32.mrf.mxu3  ;;  %v3603_v62 = vadd.f32 %v3553_v18, %v8028_v33  ;;  %v5172_v18 = vld [vmem:[%s7504_s12 + $0x85] sm:$0xff] }
 0x44f   : > { %v4176_v4 = vpop.f32.mrf.mxu0 }
 0x450   : > { %v3913_v42 = vadd.f32 %v3863_v0, %v3603_v62  ;;  %v4486_v15 = vpop.f32.mrf.mxu1 }
 0x452   : > { %v4223_v50 = vadd.f32 %v4173_v12, %v3913_v42  ;;  %6622 = vmatmul.msk.f32.gmra.mxu2 %vm347_vm1, %v4858_v23  ;;  %6698 = vmatmul.msk.f32.gmra.mxu0 %vm347_vm1, %v5170_v26  ;;  %v5481_v23 = vld [vmem:[%s7504_s12 + $0x7e] sm:$0xff] }
 0x453   : > { %6660 = vmatmul.msk.f32.gmra.mxu3 %vm347_vm1, %v4860_v3  ;;  %6736 = vmatmul.msk.f32.gmra.mxu1 %vm347_vm1, %v5480_v7 }
 0x454   : > { %v8390_v48 = vadd.f32 %v4483_v55, %v4223_v50  ;;  %v4862_v55 = vld [vmem:[%s7504_s12 + $0x84] sm:$0xff] }
 0x455   : > { %v3556_v33 = vpop.f32.mrf.mxu2 }
 0x456   : > { %v3866_v63 = vpop.f32.mrf.mxu3  ;;  %v3604_v54 = vadd.f32 %v3556_v33, %v8038_v25  ;;  %v5173_v33 = vld [vmem:[%s7504_s12 + $0x8d] sm:$0xff] }
 0x457   : > { %v4179_v22 = vpop.f32.mrf.mxu0 }
 0x458   : > { %v3914_v52 = vadd.f32 %v3866_v63, %v3604_v54  ;;  %v4489_v35 = vpop.f32.mrf.mxu1 }
 0x45a   : > { %v4224_v56 = vadd.f32 %v4176_v4, %v3914_v52  ;;  %6623 = vmatmul.msk.f32.gmra.mxu2 %vm347_vm1, %v4859_v9  ;;  %6699 = vmatmul.msk.f32.gmra.mxu0 %vm347_vm1, %v5171_v57  ;;  %v5482_v9 = vld [vmem:[%s7504_s12 + $0x86] sm:$0xff] }
 0x45b   : > { %6661 = vmatmul.msk.f32.gmra.mxu3 %vm347_vm1, %v4861_v43  ;;  %6737 = vmatmul.msk.f32.gmra.mxu1 %vm347_vm1, %v5481_v23 }
 0x45c   : > { %v8400_v8 = vadd.f32 %v4486_v15, %v4224_v56  ;;  %v4863_v15 = vld [vmem:[%s7504_s12 + $0x8c] sm:$0xff] }
 0x45d   : > { %v3559_v25 = vpop.f32.mrf.mxu2 }
 0x45e   : > { %v3869_v30 = vpop.f32.mrf.mxu3  ;;  %v3605_v12 = vadd.f32 %v3559_v25, %v8048_v21  ;;  %v5174_v25 = vld [vmem:[%s7504_s12 + $0x95] sm:$0xff] }
 0x45f   : > { %v4182_v41 = vpop.f32.mrf.mxu0 }
 0x460   : > { %v3915_v44 = vadd.f32 %v3869_v30, %v3605_v12  ;;  %v4492_v20 = vpop.f32.mrf.mxu1 }
 0x462   : > { %v4225_v0 = vadd.f32 %v4179_v22, %v3915_v44  ;;  %6624 = vmatmul.msk.f32.gmra.mxu2 %vm347_vm1, %v4860_v3  ;;  %6700 = vmatmul.msk.f32.gmra.mxu0 %vm347_vm1, %v5172_v18  ;;  %v5483_v3 = vld [vmem:[%s7504_s12 + $0x8e] sm:$0xff] }
 0x463   : > { %6662 = vmatmul.msk.f32.gmra.mxu3 %vm347_vm1, %v4862_v55  ;;  %6738 = vmatmul.msk.f32.gmra.mxu1 %vm347_vm1, %v5482_v9 }
 0x464   : > { %v8410_v62 = vadd.f32 %v4489_v35, %v4225_v0  ;;  %v4864_v35 = vld [vmem:[%s7504_s12 + $0x94] sm:$0xff] }
 0x465   : > { %v3562_v21 = vpop.f32.mrf.mxu2 }
 0x466   : > { %v3872_v42 = vpop.f32.mrf.mxu3  ;;  %v3606_v4 = vadd.f32 %v3562_v21, %v8058_v38  ;;  %v5175_v21 = vld [vmem:[%s7504_s12 + $0x9d] sm:$0xff] }
 0x467   : > { %v4185_v7 = vpop.f32.mrf.mxu0 }
 0x468   : > { %v3916_v26 = vadd.f32 %v3872_v42, %v3606_v4  ;;  %v4495_v50 = vpop.f32.mrf.mxu1 }
 0x46a   : > { %v4226_v63 = vadd.f32 %v4182_v41, %v3916_v26  ;;  %6625 = vmatmul.msk.f32.gmra.mxu2 %vm347_vm1, %v4861_v43  ;;  %6701 = vmatmul.msk.f32.gmra.mxu0 %vm347_vm1, %v5173_v33  ;;  %v5484_v43 = vld [vmem:[%s7504_s12 + $0x96] sm:$0xff] }
 0x46b   : > { %6663 = vmatmul.msk.f32.gmra.mxu3 %vm347_vm1, %v4863_v15  ;;  %6739 = vmatmul.msk.f32.gmra.mxu1 %vm347_vm1, %v5483_v3 }
 0x46c   : > { %v8420_v54 = vadd.f32 %v4492_v20, %v4226_v63  ;;  %v4865_v20 = vld [vmem:[%s7504_s12 + $0x9c] sm:$0xff] }
 0x46d   : > { %v3565_v38 = vpop.f32.mrf.mxu2 }
 0x46e   : > { %v3875_v52 = vpop.f32.mrf.mxu3  ;;  %v3607_v22 = vadd.f32 %v3565_v38, %v8068_v49  ;;  %v5176_v38 = vld [vmem:[%s7504_s12 + $0xa5] sm:$0xff] }
 0x46f   : > { %v4188_v23 = vpop.f32.mrf.mxu0 }
 0x470   : > { %v3917_v57 = vadd.f32 %v3875_v52, %v3607_v22  ;;  %v4498_v56 = vpop.f32.mrf.mxu1 }
 0x472   : > { %v4227_v30 = vadd.f32 %v4185_v7, %v3917_v57  ;;  %6626 = vmatmul.msk.f32.gmra.mxu2 %vm347_vm1, %v4862_v55  ;;  %6702 = vmatmul.msk.f32.gmra.mxu0 %vm347_vm1, %v5174_v25  ;;  %v5485_v55 = vld [vmem:[%s7504_s12 + $0x9e] sm:$0xff] }
 0x473   : > { %6664 = vmatmul.msk.f32.gmra.mxu3 %vm347_vm1, %v4864_v35  ;;  %6740 = vmatmul.msk.f32.gmra.mxu1 %vm347_vm1, %v5484_v43 }
 0x474   : > { %v8430_v12 = vadd.f32 %v4495_v50, %v4227_v30  ;;  %v4866_v50 = vld [vmem:[%s7504_s12 + $0xa4] sm:$0xff] }
 0x475   : > { %v3568_v49 = vpop.f32.mrf.mxu2 }
 0x476   : > { %v3878_v44 = vpop.f32.mrf.mxu3  ;;  %v3608_v41 = vadd.f32 %v3568_v49, %v8078_v2  ;;  %v5177_v49 = vld [vmem:[%s7504_s12 + $0xad] sm:$0xff] }
 0x477   : > { %v4191_v9 = vpop.f32.mrf.mxu0 }
 0x478   : > { %v3918_v18 = vadd.f32 %v3878_v44, %v3608_v41  ;;  %v4501_v0 = vpop.f32.mrf.mxu1  ;;  %v8460_v41 = vld [vmem:[%s8798_s4] ss:$0 sm:$0xff] }
 0x47a   : > { %v4228_v42 = vadd.f32 %v4188_v23, %v3918_v18  ;;  %6627 = vmatmul.msk.f32.gmra.mxu2 %vm347_vm1, %v4863_v15  ;;  %6703 = vmatmul.msk.f32.gmra.mxu0 %vm347_vm1, %v5175_v21  ;;  %v5486_v15 = vld [vmem:[%s7504_s12 + $0xa6] sm:$0xff]  ;;  %v8468_v18 = vld [vmem:[%s8799_s5] ss:$0 sm:$0xff] }
 0x47b   : > { %6665 = vmatmul.msk.f32.gmra.mxu3 %vm347_vm1, %v4865_v20  ;;  %6741 = vmatmul.msk.f32.gmra.mxu1 %vm347_vm1, %v5485_v55  ;;  %v4868_v55 = vld [vmem:[%s7504_s12 + $0xb4] sm:$0xff] }
 0x47c   : > { %v8440_v4 = vadd.f32 %v4498_v56, %v4228_v42  ;;  %v4867_v56 = vld [vmem:[%s7504_s12 + $0xac] sm:$0xff] }
 0x47d   : > { %v3571_v2 = vpop.f32.mrf.mxu2 }
 0x47e   : > { %v3881_v26 = vpop.f32.mrf.mxu3  ;;  %v3609_v7 = vadd.f32 %v3571_v2, %v8088_v17 }
 0x47f   : > { %v5326_v3 = vpop.f32.mrf.mxu0 }
 0x480   : > { %v3919_v33 = vadd.f32 %v3881_v26, %v3609_v7  ;;  %v5636_v63 = vpop.f32.mrf.mxu1 }
 0x482   : > { %v4229_v52 = vadd.f32 %v4191_v9, %v3919_v33  ;;  %6628 = vmatmul.msk.f32.gmra.mxu2 %vm347_vm1, %v4864_v35  ;;  %6704 = vmatmul.msk.f32.gmra.mxu0 %vm347_vm1, %v5176_v38  ;;  %v5487_v35 = vld [vmem:[%s7504_s12 + $0xae] sm:$0xff] }
 0x483   : > { %6666 = vmatmul.msk.f32.gmra.mxu3 %vm347_vm1, %v4866_v50  ;;  %6742 = vmatmul.msk.f32.gmra.mxu1 %vm347_vm1, %v5486_v15  ;;  %v5178_v33 = vld [vmem:[%s7504_s12 + $0xb5] sm:$0xff] }
 0x484   : > { %v8450_v22 = vadd.f32 %v4501_v0, %v4229_v52 }
 0x485   : > { %v4706_v17 = vpop.f32.mrf.mxu2 }
 0x486   : > { %v5016_v57 = vpop.f32.mrf.mxu3  ;;  %v4814_v23 = vadd.f32 %v4706_v17, %v8098_v58 }
 0x487   : > { %v5329_v43 = vpop.f32.mrf.mxu0 }
 0x488   : > { %v5124_v25 = vadd.f32 %v5016_v57, %v4814_v23  ;;  %v5639_v30 = vpop.f32.mrf.mxu1 }
 0x48a   : > { %v5434_v44 = vadd.f32 %v5326_v3, %v5124_v25  ;;  %6629 = vmatmul.msk.f32.gmra.mxu2 %vm347_vm1, %v4865_v20  ;;  %6705 = vmatmul.msk.f32.gmra.mxu0 %vm347_vm1, %v5177_v49  ;;  %v5488_v3 = vld [vmem:[%s7504_s12 + $0xb6] sm:$0xff] }
 0x48b   : > { %6667 = vmatmul.msk.f32.gmra.mxu3 %vm347_vm1, %v4867_v56  ;;  %6743 = vmatmul.msk.f32.gmra.mxu1 %vm347_vm1, %v5487_v35  ;;  %v4869_v25 = vld [vmem:[%s7504_s12 + $0xbc] sm:$0xff] }
 0x48c   : > { %v5744_v58 = vadd.f32 %v5636_v63, %v5434_v44  ;;  %v5179_v44 = vld [vmem:[%s7504_s12 + $0xbd] sm:$0xff] }
 0x48d   : > { %v4709_v20 = vpop.f32.mrf.mxu2 }
 0x48e   : > { %v5019_v9 = vpop.f32.mrf.mxu3  ;;  %v5784_v0 = vmul.f32 %v8460_v41, %v5744_v58  ;;  %v4815_v21 = vadd.f32 %v4709_v20, %v8108_v6  ;;  %v5489_v58 = vld [vmem:[%s7504_s12 + $0xbe] sm:$0xff] }
 0x48f   : > { %v5332_v26 = vpop.f32.mrf.mxu0 }
 0x490   : > { %v5824_v42 = vadd.f32 %v8468_v18, %v5784_v0  ;;  %v5125_v2 = vadd.f32 %v5019_v9, %v4815_v21  ;;  %v5642_v7 = vpop.f32.mrf.mxu1 }
 0x492   : > { %vm5860_vm2 = vcmp.gt.f32.partialorder %v5824_v42, 0.0  ;;  %v5896_v63 = vmul.f32 0.01, %v5824_v42  ;;  %v5435_v38 = vadd.f32 %v5329_v43, %v5125_v2  ;;  %6630 = vmatmul.msk.f32.gmra.mxu2 %vm347_vm1, %v4866_v50  ;;  %6706 = vmatmul.msk.f32.gmra.mxu0 %vm347_vm1, %v5178_v33 }
 0x493   : > { %6668 = vmatmul.msk.f32.gmra.mxu3 %vm347_vm1, %v4868_v55  ;;  %6744 = vmatmul.msk.f32.gmra.mxu1 %vm347_vm1, %v5488_v3 }
 0x494   : > { %v5932_v6 = vsel %vm5860_vm2, %v5824_v42, %v5896_v63  ;;  %v5745_v15 = vadd.f32 %v5639_v30, %v5435_v38  ;;  %v5180_v38 = vld [vmem:[%s7504_s12 + $0xc5] sm:$0xff] }
 0x495   : > { %5969 = vst.msk [vmem:[%s8480_s29] sm:$0xff] %vm5968_vm3, %v5932_v6  ;;  %v4712_v52 = vpop.f32.mrf.mxu2  ;;  %v5490_v6 = vld [vmem:[%s7504_s12 + $0xc6] sm:$0xff] }
 0x496   : > { %v5022_v17 = vpop.f32.mrf.mxu3  ;;  %v5785_v57 = vmul.f32 %v8460_v41, %v5745_v15  ;;  %v4816_v23 = vadd.f32 %v4712_v52, %v8118_v45 }
 0x497   : > { %v5335_v49 = vpop.f32.mrf.mxu0 }
 0x498   : > { %v5825_v50 = vadd.f32 %v8468_v18, %v5785_v57  ;;  %v5126_v43 = vadd.f32 %v5022_v17, %v4816_v23  ;;  %v5645_v35 = vpop.f32.mrf.mxu1 }
 0x49a   : > { %vm5861_vm4 = vcmp.gt.f32.partialorder %v5825_v50, 0.0  ;;  %v5897_v30 = vmul.f32 0.01, %v5825_v50  ;;  %v5436_v20 = vadd.f32 %v5332_v26, %v5126_v43  ;;  %6631 = vmatmul.msk.f32.gmra.mxu2 %vm347_vm1, %v4867_v56  ;;  %6707 = vmatmul.msk.f32.gmra.mxu0 %vm347_vm1, %v5179_v44  ;;  %v4870_v26 = vld [vmem:[%s7504_s12 + $0xc4] sm:$0xff]  ;;  %v4871_v43 = vld [vmem:[%s7504_s12 + $0xcc] sm:$0xff] }
 0x49b   : > { %6669 = vmatmul.msk.f32.gmra.mxu3 %vm347_vm1, %v4869_v25  ;;  %6745 = vmatmul.msk.f32.gmra.mxu1 %vm347_vm1, %v5489_v58 }
 0x49c   : > { %v5933_v45 = vsel %vm5861_vm4, %v5825_v50, %v5897_v30  ;;  %v5746_v9 = vadd.f32 %v5642_v7, %v5436_v20  ;;  %v5181_v30 = vld [vmem:[%s7504_s12 + $0xcd] sm:$0xff] }
 0x49d   : > { %5970 = vst.msk [vmem:[%s8480_s29 + $0x8] sm:$0xff] %vm5968_vm3, %v5933_v45  ;;  %v4715_v0 = vpop.f32.mrf.mxu2  ;;  %v5491_v20 = vld [vmem:[%s7504_s12 + $0xce] sm:$0xff] }
 0x49e   : > { %v5025_v21 = vpop.f32.mrf.mxu3  ;;  %v5786_v42 = vmul.f32 %v8460_v41, %v5746_v9  ;;  %v4817_v2 = vadd.f32 %v4715_v0, %v8128_v53 }
 0x49f   : > { %v5338_v3 = vpop.f32.mrf.mxu0 }
 0x4a0   : > { %v5826_v56 = vadd.f32 %v8468_v18, %v5786_v42  ;;  %v5127_v33 = vadd.f32 %v5025_v21, %v4817_v2  ;;  %v5648_v63 = vpop.f32.mrf.mxu1 }
 0x4a2   : > { %vm5862_vm5 = vcmp.gt.f32.partialorder %v5826_v56, 0.0  ;;  %v5898_v7 = vmul.f32 0.01, %v5826_v56  ;;  %v5437_v15 = vadd.f32 %v5335_v49, %v5127_v33  ;;  %6632 = vmatmul.msk.f32.gmra.mxu2 %vm347_vm1, %v4868_v55  ;;  %6708 = vmatmul.msk.f32.gmra.mxu0 %vm347_vm1, %v5180_v38 }
 0x4a3   : > { %6670 = vmatmul.msk.f32.gmra.mxu3 %vm347_vm1, %v4870_v26  ;;  %6746 = vmatmul.msk.f32.gmra.mxu1 %vm347_vm1, %v5490_v6  ;;  %v5182_v6 = vld [vmem:[%s7504_s12 + $0xd5] sm:$0xff] }
 0x4a4   : > { %v5934_v53 = vsel %vm5862_vm5, %v5826_v56, %v5898_v7  ;;  %v5747_v52 = vadd.f32 %v5645_v35, %v5437_v15  ;;  %v4872_v56 = vld [vmem:[%s7504_s12 + $0xd4] sm:$0xff] }
 0x4a5   : > { %5971 = vst.msk [vmem:[%s8480_s29 + $0x10] sm:$0xff] %vm5968_vm3, %v5934_v53  ;;  %v4718_v17 = vpop.f32.mrf.mxu2  ;;  %v5492_v7 = vld [vmem:[%s7504_s12 + $0xd6] sm:$0xff] }
 0x4a6   : > { %v5028_v57 = vpop.f32.mrf.mxu3  ;;  %v5787_v23 = vmul.f32 %v8460_v41, %v5747_v52  ;;  %v4818_v50 = vadd.f32 %v4718_v17, %v8138_v61 }
 0x4a7   : > { %v5341_v44 = vpop.f32.mrf.mxu0 }
 0x4a8   : > { %v5827_v55 = vadd.f32 %v8468_v18, %v5787_v23  ;;  %v5128_v49 = vadd.f32 %v5028_v57, %v4818_v50  ;;  %v5651_v58 = vpop.f32.mrf.mxu1  ;;  %v4873_v50 = vld [vmem:[%s7504_s12 + $0xdc] sm:$0xff] }
 0x4aa   : > { %vm5863_vm6 = vcmp.gt.f32.partialorder %v5827_v55, 0.0  ;;  %v5899_v35 = vmul.f32 0.01, %v5827_v55  ;;  %v5438_v45 = vadd.f32 %v5338_v3, %v5128_v49  ;;  %6633 = vmatmul.msk.f32.gmra.mxu2 %vm347_vm1, %v4869_v25  ;;  %6709 = vmatmul.msk.f32.gmra.mxu0 %vm347_vm1, %v5181_v30  ;;  %v5183_v30 = vld [vmem:[%s7504_s12 + $0xdd] sm:$0xff] }
 0x4ab   : > { %6671 = vmatmul.msk.f32.gmra.mxu3 %vm347_vm1, %v4871_v43  ;;  %6747 = vmatmul.msk.f32.gmra.mxu1 %vm347_vm1, %v5491_v20  ;;  %v5493_v20 = vld [vmem:[%s7504_s12 + $0xde] sm:$0xff] }
 0x4ac   : > { %v5935_v61 = vsel %vm5863_vm6, %v5827_v55, %v5899_v35  ;;  %v5748_v9 = vadd.f32 %v5648_v63, %v5438_v45 }
 0x4ad   : > { %5972 = vst.msk [vmem:[%s8480_s29 + $0x18] sm:$0xff] %vm5968_vm3, %v5935_v61  ;;  %v4721_v0 = vpop.f32.mrf.mxu2 }
 0x4ae   : > { %v5031_v21 = vpop.f32.mrf.mxu3  ;;  %v5788_v42 = vmul.f32 %v8460_v41, %v5748_v9  ;;  %v4819_v2 = vadd.f32 %v4721_v0, %v8148_v46 }
 0x4af   : > { %v5344_v3 = vpop.f32.mrf.mxu0 }
 0x4b0   : > { %v5828_v25 = vadd.f32 %v8468_v18, %v5788_v42  ;;  %v5129_v33 = vadd.f32 %v5031_v21, %v4819_v2  ;;  %v5654_v38 = vpop.f32.mrf.mxu1  ;;  %v4874_v42 = vld [vmem:[%s7504_s12 + $0xe4] sm:$0xff] }
 0x4b2   : > { %vm5864_vm7 = vcmp.gt.f32.partialorder %v5828_v25, 0.0  ;;  %v5900_v63 = vmul.f32 0.01, %v5828_v25  ;;  %v5439_v15 = vadd.f32 %v5341_v44, %v5129_v33  ;;  %6634 = vmatmul.msk.f32.gmra.mxu2 %vm347_vm1, %v4870_v26  ;;  %6710 = vmatmul.msk.f32.gmra.mxu0 %vm347_vm1, %v5182_v6  ;;  %v5494_v6 = vld [vmem:[%s7504_s12 + $0xe6] sm:$0xff] }
 0x4b3   : > { %6672 = vmatmul.msk.f32.gmra.mxu3 %vm347_vm1, %v4872_v56  ;;  %6748 = vmatmul.msk.f32.gmra.mxu1 %vm347_vm1, %v5492_v7 }
 0x4b4   : > { %v5936_v46 = vsel %vm5864_vm7, %v5828_v25, %v5900_v63  ;;  %v5749_v53 = vadd.f32 %v5651_v58, %v5439_v15 }
 0x4b5   : > { %5973 = vst.msk [vmem:[%s8480_s29 + $0x20] sm:$0xff] %vm5968_vm3, %v5936_v46  ;;  %v4724_v52 = vpop.f32.mrf.mxu2 }
 0x4b6   : > { %v5034_v17 = vpop.f32.mrf.mxu3  ;;  %v5789_v57 = vmul.f32 %v8460_v41, %v5749_v53  ;;  %v4820_v23 = vadd.f32 %v4724_v52, %v8158_v29 }
 0x4b7   : > { %v5347_v49 = vpop.f32.mrf.mxu0 }
 0x4b8   : > { %v5829_v26 = vadd.f32 %v8468_v18, %v5789_v57  ;;  %v5130_v55 = vadd.f32 %v5034_v17, %v4820_v23  ;;  %v5657_v44 = vpop.f32.mrf.mxu1  ;;  %v4875_v17 = vld [vmem:[%s7504_s12 + $0xec] sm:$0xff] }
 0x4ba   : > { %vm5865_vm8 = vcmp.gt.f32.partialorder %v5829_v26, 0.0  ;;  %v5901_v58 = vmul.f32 0.01, %v5829_v26  ;;  %v5440_v35 = vadd.f32 %v5344_v3, %v5130_v55  ;;  %6635 = vmatmul.msk.f32.gmra.mxu2 %vm347_vm1, %v4871_v43  ;;  %6711 = vmatmul.msk.f32.gmra.mxu0 %vm347_vm1, %v5183_v30  ;;  %v5184_v3 = vld [vmem:[%s7504_s12 + $0xe5] sm:$0xff]  ;;  %v5185_v55 = vld [vmem:[%s7504_s12 + $0xed] sm:$0xff] }
 0x4bb   : > { %6673 = vmatmul.msk.f32.gmra.mxu3 %vm347_vm1, %v4873_v50  ;;  %6749 = vmatmul.msk.f32.gmra.mxu1 %vm347_vm1, %v5493_v20 }
 0x4bc   : > { %v5937_v29 = vsel %vm5865_vm8, %v5829_v26, %v5901_v58  ;;  %v5750_v45 = vadd.f32 %v5654_v38, %v5440_v35 }
 0x4bd   : > { %5974 = vst.msk [vmem:[%s8480_s29 + $0x28] sm:$0xff] %vm5968_vm3, %v5937_v29  ;;  %v4727_v61 = vpop.f32.mrf.mxu2 }
 0x4be   : > { %v5037_v9 = vpop.f32.mrf.mxu3  ;;  %v5790_v0 = vmul.f32 %v8460_v41, %v5750_v45  ;;  %v4821_v21 = vadd.f32 %v4727_v61, %v8168_v10  ;;  %v4876_v61 = vld [vmem:[%s7504_s12 + $0xf4] sm:$0xff] }
 0x4bf   : > { %v5350_v25 = vpop.f32.mrf.mxu0 }
 0x4c0   : > { %v5830_v43 = vadd.f32 %v8468_v18, %v5790_v0  ;;  %v5131_v2 = vadd.f32 %v5037_v9, %v4821_v21  ;;  %v5660_v33 = vpop.f32.mrf.mxu1 }
 0x4c2   : > { %vm5866_vm9 = vcmp.gt.f32.partialorder %v5830_v43, 0.0  ;;  %v5902_v38 = vmul.f32 0.01, %v5830_v43  ;;  %v5441_v7 = vadd.f32 %v5347_v49, %v5131_v2  ;;  %6636 = vmatmul.msk.f32.gmra.mxu2 %vm347_vm1, %v4872_v56  ;;  %6712 = vmatmul.msk.f32.gmra.mxu0 %vm347_vm1, %v5184_v3  ;;  %v5495_v49 = vld [vmem:[%s7504_s12 + $0xee] sm:$0xff]  ;;  %v5496_v2 = vld [vmem:[%s7504_s12 + $0xf6] sm:$0xff] }
 0x4c3   : > { %6674 = vmatmul.msk.f32.gmra.mxu3 %vm347_vm1, %v4874_v42  ;;  %6750 = vmatmul.msk.f32.gmra.mxu1 %vm347_vm1, %v5494_v6 }
 0x4c4   : > { %v5938_v10 = vsel %vm5866_vm9, %v5830_v43, %v5902_v38  ;;  %v5751_v63 = vadd.f32 %v5657_v44, %v5441_v7  ;;  %v5186_v43 = vld [vmem:[%s7504_s12 + $0xf5] sm:$0xff] }
 0x4c5   : > { %5975 = vst.msk [vmem:[%s8480_s29 + $0x30] sm:$0xff] %vm5968_vm3, %v5938_v10  ;;  %v4730_v15 = vpop.f32.mrf.mxu2 }
 0x4c6   : > { %v5040_v46 = vpop.f32.mrf.mxu3  ;;  %v5791_v53 = vmul.f32 %v8460_v41, %v5751_v63  ;;  %v4822_v52 = vadd.f32 %v4730_v15, %v8178_v1  ;;  %v4877_v63 = vld [vmem:[%s7504_s12 + $0xfc] sm:$0xff] }
 0x4c7   : > { %v5353_v23 = vpop.f32.mrf.mxu0 }
 0x4c8   : > { %v5831_v56 = vadd.f32 %v8468_v18, %v5791_v53  ;;  %v5132_v57 = vadd.f32 %v5040_v46, %v4822_v52  ;;  %v5663_v26 = vpop.f32.mrf.mxu1  ;;  %v5187_v52 = vld [vmem:[%s7504_s12 + $0xfd] sm:$0xff] }
 0x4ca   : > { %vm5867_vm10 = vcmp.gt.f32.partialorder %v5831_v56, 0.0  ;;  %v5903_v44 = vmul.f32 0.01, %v5831_v56  ;;  %v5442_v30 = vadd.f32 %v5350_v25, %v5132_v57  ;;  %6637 = vmatmul.msk.f32.gmra.mxu2 %vm347_vm1, %v4873_v50  ;;  %6713 = vmatmul.msk.f32.gmra.mxu0 %vm347_vm1, %v5185_v55 }
 0x4cb   : > { %6675 = vmatmul.msk.f32.gmra.mxu3 %vm347_vm1, %v4875_v17  ;;  %6751 = vmatmul.msk.f32.gmra.mxu1 %vm347_vm1, %v5495_v49 }
 0x4cc   : > { %v5939_v1 = vsel %vm5867_vm10, %v5831_v56, %v5903_v44  ;;  %v5752_v20 = vadd.f32 %v5660_v33, %v5442_v30  ;;  %v5497_v56 = vld [vmem:[%s7504_s12 + $0xfe] sm:$0xff] }
 0x4cd   : > { %5976 = vst.msk [vmem:[%s8480_s29 + $0x38] sm:$0xff] %vm5968_vm3, %v5939_v1  ;;  %v4733_v58 = vpop.f32.mrf.mxu2  ;;  %v4878_v1 = vld [vmem:[%s7504_s12 + $0x104] sm:$0xff] }
 0x4ce   : > { %v5043_v35 = vpop.f32.mrf.mxu3  ;;  %v5792_v29 = vmul.f32 %v8460_v41, %v5752_v20  ;;  %v4823_v45 = vadd.f32 %v4733_v58, %v8188_v24 }
 0x4cf   : > { %v5356_v0 = vpop.f32.mrf.mxu0 }
 0x4d0   : > { %v5832_v50 = vadd.f32 %v8468_v18, %v5792_v29  ;;  %v5133_v9 = vadd.f32 %v5043_v35, %v4823_v45  ;;  %v5666_v21 = vpop.f32.mrf.mxu1  ;;  %v5188_v29 = vld [vmem:[%s7504_s12 + $0x105] sm:$0xff] }
 0x4d1   : > { %v5498_v45 = vld [vmem:[%s7504_s12 + $0x106] sm:$0xff] }
 0x4d2   : > { %vm5868_vm11 = vcmp.gt.f32.partialorder %v5832_v50, 0.0  ;;  %v5904_v25 = vmul.f32 0.01, %v5832_v50  ;;  %v5443_v33 = vadd.f32 %v5353_v23, %v5133_v9  ;;  %6638 = vmatmul.msk.f32.gmra.mxu2 %vm347_vm1, %v4874_v42  ;;  %6714 = vmatmul.msk.f32.gmra.mxu0 %vm347_vm1, %v5186_v43 }
 0x4d3   : > { %6676 = vmatmul.msk.f32.gmra.mxu3 %vm347_vm1, %v4876_v61  ;;  %6752 = vmatmul.msk.f32.gmra.mxu1 %vm347_vm1, %v5496_v2 }
 0x4d4   : > { %v5940_v24 = vsel %vm5868_vm11, %v5832_v50, %v5904_v25  ;;  %v5753_v3 = vadd.f32 %v5663_v26, %v5443_v33  ;;  %v4879_v33 = vld [vmem:[%s7504_s12 + $0x10c] sm:$0xff] }
 0x4d5   : > { %5977 = vst.msk [vmem:[%s8480_s29 + $0x40] sm:$0xff] %vm5968_vm3, %v5940_v24  ;;  %v4736_v6 = vpop.f32.mrf.mxu2 }
 0x4d6   : > { %v5046_v38 = vpop.f32.mrf.mxu3  ;;  %v5793_v7 = vmul.f32 %v8460_v41, %v5753_v3  ;;  %v4824_v10 = vadd.f32 %v4736_v6, %v8198_v14 }
 0x4d7   : > { %v5359_v46 = vpop.f32.mrf.mxu0 }
 0x4d8   : > { %v5833_v42 = vadd.f32 %v8468_v18, %v5793_v7  ;;  %v5134_v15 = vadd.f32 %v5046_v38, %v4824_v10  ;;  %v5669_v53 = vpop.f32.mrf.mxu1  ;;  %v5189_v38 = vld [vmem:[%s7504_s12 + $0x10d] sm:$0xff] }
 0x4d9   : > { %v5499_v7 = vld [vmem:[%s7504_s12 + $0x10e] sm:$0xff] }
 0x4da   : > { %vm5869_vm12 = vcmp.gt.f32.partialorder %v5833_v42, 0.0  ;;  %v5905_v57 = vmul.f32 0.01, %v5833_v42  ;;  %v5444_v23 = vadd.f32 %v5356_v0, %v5134_v15  ;;  %6639 = vmatmul.msk.f32.gmra.mxu2 %vm347_vm1, %v4875_v17  ;;  %6715 = vmatmul.msk.f32.gmra.mxu0 %vm347_vm1, %v5187_v52 }
 0x4db   : > { %6677 = vmatmul.msk.f32.gmra.mxu3 %vm347_vm1, %v4877_v63  ;;  %6753 = vmatmul.msk.f32.gmra.mxu1 %vm347_vm1, %v5497_v56 }
 0x4dc   : > { %v5941_v14 = vsel %vm5869_vm12, %v5833_v42, %v5905_v57  ;;  %v5754_v26 = vadd.f32 %v5666_v21, %v5444_v23  ;;  %v4880_v57 = vld [vmem:[%s7504_s12 + $0x114] sm:$0xff] }
 0x4dd   : > { %5978 = vst.msk [vmem:[%s8480_s29 + $0x48] sm:$0xff] %vm5968_vm3, %v5941_v14  ;;  %v4739_v55 = vpop.f32.mrf.mxu2 }
 0x4de   : > { %v5049_v49 = vpop.f32.mrf.mxu3  ;;  %v5794_v44 = vmul.f32 %v8460_v41, %v5754_v26  ;;  %v4825_v30 = vadd.f32 %v4739_v55, %v8208_v60  ;;  %v5190_v55 = vld [vmem:[%s7504_s12 + $0x115] sm:$0xff] }
 0x4df   : > { %v5362_v58 = vpop.f32.mrf.mxu0 }
 0x4e0   : > { %v5834_v17 = vadd.f32 %v8468_v18, %v5794_v44  ;;  %v5135_v20 = vadd.f32 %v5049_v49, %v4825_v30  ;;  %v5672_v35 = vpop.f32.mrf.mxu1  ;;  %v5500_v49 = vld [vmem:[%s7504_s12 + $0x116] sm:$0xff] }
 0x4e2   : > { %vm5870_vm13 = vcmp.gt.f32.partialorder %v5834_v17, 0.0  ;;  %v5906_v50 = vmul.f32 0.01, %v5834_v17  ;;  %v5445_v9 = vadd.f32 %v5359_v46, %v5135_v20  ;;  %6640 = vmatmul.msk.f32.gmra.mxu2 %vm347_vm1, %v4876_v61  ;;  %6716 = vmatmul.msk.f32.gmra.mxu0 %vm347_vm1, %v5188_v29 }
 0x4e3   : > { %6678 = vmatmul.msk.f32.gmra.mxu3 %vm347_vm1, %v4878_v1  ;;  %6754 = vmatmul.msk.f32.gmra.mxu1 %vm347_vm1, %v5498_v45  ;;  %v4881_v45 = vld [vmem:[%s7504_s12 + $0x11c] sm:$0xff] }
 0x4e4   : > { %v5942_v60 = vsel %vm5870_vm13, %v5834_v17, %v5906_v50  ;;  %v5755_v0 = vadd.f32 %v5669_v53, %v5445_v9 }
 0x4e5   : > { %5979 = vst.msk [vmem:[%s8480_s29 + $0x50] sm:$0xff] %vm5968_vm3, %v5942_v60  ;;  %v4742_v21 = vpop.f32.mrf.mxu2 }
 0x4e6   : > { %v5052_v43 = vpop.f32.mrf.mxu3  ;;  %v5795_v2 = vmul.f32 %v8460_v41, %v5755_v0  ;;  %v4826_v25 = vadd.f32 %v4742_v21, %v8218_v5  ;;  %v5191_v0 = vld [vmem:[%s7504_s12 + $0x11d] sm:$0xff] }
 0x4e7   : > { %v5365_v3 = vpop.f32.mrf.mxu0  ;;  %v5501_v21 = vld [vmem:[%s7504_s12 + $0x11e] sm:$0xff] }
 0x4e8   : > { %v5835_v61 = vadd.f32 %v8468_v18, %v5795_v2  ;;  %v5136_v24 = vadd.f32 %v5052_v43, %v4826_v25  ;;  %v5675_v6 = vpop.f32.mrf.mxu1 }
 0x4ea   : > { %vm5871_vm14 = vcmp.gt.f32.partialorder %v5835_v61, 0.0  ;;  %v5907_v10 = vmul.f32 0.01, %v5835_v61  ;;  %v5446_v42 = vadd.f32 %v5362_v58, %v5136_v24  ;;  %6641 = vmatmul.msk.f32.gmra.mxu2 %vm347_vm1, %v4877_v63  ;;  %6717 = vmatmul.msk.f32.gmra.mxu0 %vm347_vm1, %v5189_v38  ;;  %v4882_v38 = vld [vmem:[%s7504_s12 + $0x124] sm:$0xff] }
 0x4eb   : > { %6679 = vmatmul.msk.f32.gmra.mxu3 %vm347_vm1, %v4879_v33  ;;  %6755 = vmatmul.msk.f32.gmra.mxu1 %vm347_vm1, %v5499_v7 }
 0x4ec   : > { %v5943_v5 = vsel %vm5871_vm14, %v5835_v61, %v5907_v10  ;;  %v5756_v15 = vadd.f32 %v5672_v35, %v5446_v42 }
 0x4ed   : > { %5980 = vst.msk [vmem:[%s8480_s29 + $0x58] sm:$0xff] %vm5968_vm3, %v5943_v5  ;;  %v4745_v46 = vpop.f32.mrf.mxu2  ;;  %v5192_v5 = vld [vmem:[%s7504_s12 + $0x125] sm:$0xff] }
 0x4ee   : > { %v5055_v53 = vpop.f32.mrf.mxu3  ;;  %v5796_v52 = vmul.f32 %v8460_v41, %v5756_v15  ;;  %v4827_v56 = vadd.f32 %v4745_v46, %v8228_v47  ;;  %v5502_v15 = vld [vmem:[%s7504_s12 + $0x126] sm:$0xff] }
 0x4ef   : > { %v5368_v14 = vpop.f32.mrf.mxu0 }
 0x4f0   : > { %v5836_v63 = vadd.f32 %v8468_v18, %v5796_v52  ;;  %v5137_v23 = vadd.f32 %v5055_v53, %v4827_v56  ;;  %v5678_v26 = vpop.f32.mrf.mxu1 }
 0x4f2   : > { %vm5872_vm15 = vcmp.gt.f32.partialorder %v5836_v63, 0.0  ;;  %v5908_v44 = vmul.f32 0.01, %v5836_v63  ;;  %v5447_v30 = vadd.f32 %v5365_v3, %v5137_v23  ;;  %6642 = vmatmul.msk.f32.gmra.mxu2 %vm347_vm1, %v4878_v1  ;;  %6718 = vmatmul.msk.f32.gmra.mxu0 %vm347_vm1, %v5190_v55 }
 0x4f3   : > { %6680 = vmatmul.msk.f32.gmra.mxu3 %vm347_vm1, %v4880_v57  ;;  %6756 = vmatmul.msk.f32.gmra.mxu1 %vm347_vm1, %v5500_v49 }
 0x4f4   : > { %v5944_v47 = vsel %vm5872_vm15, %v5836_v63, %v5908_v44  ;;  %v5757_v17 = vadd.f32 %v5675_v6, %v5447_v30  ;;  %v5193_v30 = vld [vmem:[%s7504_s12 + $0x12d] sm:$0xff] }
 0x4f5   : > { %5981 = vst.msk [vmem:[%s8480_s29 + $0x60] sm:$0xff] %vm5968_vm3, %v5944_v47  ;;  %v4748_v20 = vpop.f32.mrf.mxu2  ;;  %v5503_v47 = vld [vmem:[%s7504_s12 + $0x12e] sm:$0xff] }
 0x4f6   : > { %v5058_v58 = vpop.f32.mrf.mxu3  ;;  %v5797_v35 = vmul.f32 %v8460_v41, %v5757_v17  ;;  %v4828_v29 = vadd.f32 %v4748_v20, %v8238_v39 }
 0x4f7   : > { %v5371_v9 = vpop.f32.mrf.mxu0 }
 0x4f8   : > { %v5837_v1 = vadd.f32 %v8468_v18, %v5797_v35  ;;  %v5138_v50 = vadd.f32 %v5058_v58, %v4828_v29  ;;  %v5681_v60 = vpop.f32.mrf.mxu1 }
 0x4fa   : > { %vm5873_vm0 = vcmp.gt.f32.partialorder %v5837_v1, 0.0  ;;  %v5909_v43 = vmul.f32 0.01, %v5837_v1  ;;  %v5448_v2 = vadd.f32 %v5368_v14, %v5138_v50  ;;  %6643 = vmatmul.msk.f32.gmra.mxu2 %vm347_vm1, %v4879_v33  ;;  %6719 = vmatmul.msk.f32.gmra.mxu0 %vm347_vm1, %v5191_v0 }
 0x4fb   : > { %6681 = vmatmul.msk.f32.gmra.mxu3 %vm347_vm1, %v4881_v45  ;;  %6757 = vmatmul.msk.f32.gmra.mxu1 %vm347_vm1, %v5501_v21 }
 0x4fc   : > { %v5945_v39 = vsel %vm5873_vm0, %v5837_v1, %v5909_v43  ;;  %v5758_v25 = vadd.f32 %v5678_v26, %v5448_v2  ;;  %v4883_v26 = vld [vmem:[%s7504_s12 + $0x12c] sm:$0xff]  ;;  %v5194_v43 = vld [vmem:[%s7504_s12 + $0x135] sm:$0xff] }
 0x4fd   : > { %5982 = vst.msk [vmem:[%s8480_s29 + $0x68] sm:$0xff] %vm5968_vm3, %v5945_v39  ;;  %v4751_v61 = vpop.f32.mrf.mxu2  ;;  %v5504_v2 = vld [vmem:[%s7504_s12 + $0x136] sm:$0xff] }
 0x4fe   : > { %v5061_v24 = vpop.f32.mrf.mxu3  ;;  %v5798_v3 = vmul.f32 %v8460_v41, %v5758_v25  ;;  %v4829_v6 = vadd.f32 %v4751_v61, %v8248_v28 }
 0x4ff   : > { %v5374_v10 = vpop.f32.mrf.mxu0 }
 0x500   : > { %v5838_v33 = vadd.f32 %v8468_v18, %v5798_v3  ;;  %v5139_v7 = vadd.f32 %v5061_v24, %v4829_v6  ;;  %v5684_v42 = vpop.f32.mrf.mxu1 }
 0x502   : > { %vm5874_vm2 = vcmp.gt.f32.partialorder %v5838_v33, 0.0  ;;  %v5910_v46 = vmul.f32 0.01, %v5838_v33  ;;  %v5449_v53 = vadd.f32 %v5371_v9, %v5139_v7  ;;  %6644 = vmatmul.msk.f32.gmra.mxu2 %vm347_vm1, %v4880_v57  ;;  %6720 = vmatmul.msk.f32.gmra.mxu0 %vm347_vm1, %v5192_v5  ;;  %v4884_v9 = vld [vmem:[%s7504_s12 + $0x134] sm:$0xff]  ;;  %v4885_v7 = vld [vmem:[%s7504_s12 + $0x13c] sm:$0xff] }
 0x503   : > { %6682 = vmatmul.msk.f32.gmra.mxu3 %vm347_vm1, %v4882_v38  ;;  %6758 = vmatmul.msk.f32.gmra.mxu1 %vm347_vm1, %v5502_v15  ;;  %v5195_v15 = vld [vmem:[%s7504_s12 + $0x13d] sm:$0xff] }
 0x504   : > { %v5946_v28 = vsel %vm5874_vm2, %v5838_v33, %v5910_v46  ;;  %v5759_v52 = vadd.f32 %v5681_v60, %v5449_v53  ;;  %v5505_v46 = vld [vmem:[%s7504_s12 + $0x13e] sm:$0xff] }
 0x505   : > { %5983 = vst.msk [vmem:[%s8480_s29 + $0x70] sm:$0xff] %vm5968_vm3, %v5946_v28  ;;  %v4754_v56 = vpop.f32.mrf.mxu2 }
 0x506   : > { %v5064_v63 = vpop.f32.mrf.mxu3  ;;  %v5799_v23 = vmul.f32 %v8460_v41, %v5759_v52  ;;  %v4830_v14 = vadd.f32 %v4754_v56, %v8258_v51 }
 0x507   : > { %v5377_v49 = vpop.f32.mrf.mxu0 }
 0x508   : > { %v5839_v57 = vadd.f32 %v8468_v18, %v5799_v23  ;;  %v5140_v55 = vadd.f32 %v5064_v63, %v4830_v14  ;;  %v5687_v44 = vpop.f32.mrf.mxu1 }
 0x50a   : > { %vm5875_vm4 = vcmp.gt.f32.partialorder %v5839_v57, 0.0  ;;  %v5911_v17 = vmul.f32 0.01, %v5839_v57  ;;  %v5450_v20 = vadd.f32 %v5374_v10, %v5140_v55  ;;  %6645 = vmatmul.msk.f32.gmra.mxu2 %vm347_vm1, %v4881_v45  ;;  %6721 = vmatmul.msk.f32.gmra.mxu0 %vm347_vm1, %v5193_v30 }
 0x50b   : > { %6683 = vmatmul.msk.f32.gmra.mxu3 %vm347_vm1, %v4883_v26  ;;  %6759 = vmatmul.msk.f32.gmra.mxu1 %vm347_vm1, %v5503_v47 }
 0x50c   : > { %v5947_v51 = vsel %vm5875_vm4, %v5839_v57, %v5911_v17  ;;  %v5760_v58 = vadd.f32 %v5684_v42, %v5450_v20 }
 0x50d   : > { %5984 = vst.msk [vmem:[%s8480_s29 + $0x78] sm:$0xff] %vm5968_vm3, %v5947_v51  ;;  %v4757_v35 = vpop.f32.mrf.mxu2 }
 0x50e   : > { %v5067_v29 = vpop.f32.mrf.mxu3  ;;  %v5800_v1 = vmul.f32 %v8460_v41, %v5760_v58  ;;  %v4831_v50 = vadd.f32 %v4757_v35, %v8268_v13 }
 0x50f   : > { %v5380_v0 = vpop.f32.mrf.mxu0 }
 0x510   : > { %v5840_v45 = vadd.f32 %v8468_v18, %v5800_v1  ;;  %v5141_v60 = vadd.f32 %v5067_v29, %v4831_v50  ;;  %v5690_v21 = vpop.f32.mrf.mxu1 }
 0x512   : > { %vm5876_vm5 = vcmp.gt.f32.partialorder %v5840_v45, 0.0  ;;  %v5912_v39 = vmul.f32 0.01, %v5840_v45  ;;  %v5451_v25 = vadd.f32 %v5377_v49, %v5141_v60  ;;  %6646 = vmatmul.msk.f32.gmra.mxu2 %vm347_vm1, %v4882_v38  ;;  %6722 = vmatmul.msk.f32.gmra.mxu0 %vm347_vm1, %v5194_v43 }
 0x513   : > { %6684 = vmatmul.msk.f32.gmra.mxu3 %vm347_vm1, %v4884_v9  ;;  %6760 = vmatmul.msk.f32.gmra.mxu1 %vm347_vm1, %v5504_v2 }
 0x514   : > { %v5948_v13 = vsel %vm5876_vm5, %v5840_v45, %v5912_v39  ;;  %v5761_v61 = vadd.f32 %v5687_v44, %v5451_v25 }
 0x515   : > { %5985 = vst.msk [vmem:[%s8480_s29 + $0x80] sm:$0xff] %vm5968_vm3, %v5948_v13  ;;  %v4760_v24 = vpop.f32.mrf.mxu2 }
 0x516   : > { %v5070_v3 = vpop.f32.mrf.mxu3  ;;  %v5801_v6 = vmul.f32 %v8460_v41, %v5761_v61  ;;  %v4832_v33 = vadd.f32 %v4760_v24, %v8278_v37 }
 0x517   : > { %v5383_v42 = vpop.f32.mrf.mxu0 }
 0x518   : > { %v5841_v38 = vadd.f32 %v8468_v18, %v5801_v6  ;;  %v5142_v10 = vadd.f32 %v5070_v3, %v4832_v33  ;;  %v5693_v5 = vpop.f32.mrf.mxu1 }
 0x51a   : > { %vm5877_vm6 = vcmp.gt.f32.partialorder %v5841_v38, 0.0  ;;  %v5913_v53 = vmul.f32 0.01, %v5841_v38  ;;  %v5452_v28 = vadd.f32 %v5380_v0, %v5142_v10  ;;  %6647 = vmatmul.msk.f32.gmra.mxu2 %vm347_vm1, %v4883_v26  ;;  %6723 = vmatmul.msk.f32.gmra.mxu0 %vm347_vm1, %v5195_v15 }
 0x51b   : > { %6685 = vmatmul.msk.f32.gmra.mxu3 %vm347_vm1, %v4885_v7  ;;  %6761 = vmatmul.msk.f32.gmra.mxu1 %vm347_vm1, %v5505_v46 }
 0x51c   : > { %v5949_v37 = vsel %vm5877_vm6, %v5841_v38, %v5913_v53  ;;  %v5762_v52 = vadd.f32 %v5690_v21, %v5452_v28 }
 0x51d   : > { %5986 = vst.msk [vmem:[%s8480_s29 + $0x88] sm:$0xff] %vm5968_vm3, %v5949_v37  ;;  %v4763_v56 = vpop.f32.mrf.mxu2 }
 0x51e   : > { %v5073_v63 = vpop.f32.mrf.mxu3  ;;  %v5802_v23 = vmul.f32 %v8460_v41, %v5762_v52  ;;  %v4833_v14 = vadd.f32 %v4763_v56, %v8289_v27 }
 0x51f   : > { %v5386_v55 = vpop.f32.mrf.mxu0 }
 0x520   : > { %v5842_v57 = vadd.f32 %v8468_v18, %v5802_v23  ;;  %v5143_v26 = vadd.f32 %v5073_v63, %v4833_v14  ;;  %v5696_v49 = vpop.f32.mrf.mxu1 }
 0x522   : > { %vm5878_vm7 = vcmp.gt.f32.partialorder %v5842_v57, 0.0  ;;  %v5914_v44 = vmul.f32 0.01, %v5842_v57  ;;  %v5453_v30 = vadd.f32 %v5383_v42, %v5143_v26 }
 0x524   : > { %v5950_v47 = vsel %vm5878_vm7, %v5842_v57, %v5914_v44  ;;  %v5763_v17 = vadd.f32 %v5693_v5, %v5453_v30 }
 0x525   : > { %5987 = vst.msk [vmem:[%s8480_s29 + $0x90] sm:$0xff] %vm5968_vm3, %v5950_v47  ;;  %v4766_v20 = vpop.f32.mrf.mxu2 }
 0x526   : > { %v5076_v51 = vpop.f32.mrf.mxu3  ;;  %v5803_v58 = vmul.f32 %v8460_v41, %v5763_v17  ;;  %v4834_v35 = vadd.f32 %v4766_v20, %v8300_v36 }
 0x527   : > { %v5389_v1 = vpop.f32.mrf.mxu0 }
 0x528   : > { %v5843_v27 = vadd.f32 %v8468_v18, %v5803_v58  ;;  %v5144_v29 = vadd.f32 %v5076_v51, %v4834_v35  ;;  %v5699_v50 = vpop.f32.mrf.mxu1 }
 0x52a   : > { %vm5879_vm1 = vcmp.gt.f32.partialorder %v5843_v27, 0.0  ;;  %v5915_v9 = vmul.f32 0.01, %v5843_v27  ;;  %v5454_v45 = vadd.f32 %v5386_v55, %v5144_v29 }
 0x52c   : > { %v5951_v60 = vsel %vm5879_vm1, %v5843_v27, %v5915_v9  ;;  %v5764_v0 = vadd.f32 %v5696_v49, %v5454_v45 }
 0x52d   : > { %5988 = vst.msk [vmem:[%s8480_s29 + $0x98] sm:$0xff] %vm5968_vm3, %v5951_v60  ;;  %v4769_v21 = vpop.f32.mrf.mxu2 }
 0x52e   : > { %v5079_v43 = vpop.f32.mrf.mxu3  ;;  %v5804_v2 = vmul.f32 %v8460_v41, %v5764_v0  ;;  %v4835_v39 = vadd.f32 %v4769_v21, %v8310_v16 }
 0x52f   : > { %v5392_v13 = vpop.f32.mrf.mxu0 }
 0x530   : > { %v5844_v36 = vadd.f32 %v8468_v18, %v5804_v2  ;;  %v5145_v25 = vadd.f32 %v5079_v43, %v4835_v39  ;;  %v5702_v61 = vpop.f32.mrf.mxu1 }
 0x532   : > { %vm5880_vm8 = vcmp.gt.f32.partialorder %v5844_v36, 0.0  ;;  %v5916_v24 = vmul.f32 0.01, %v5844_v36  ;;  %v5455_v3 = vadd.f32 %v5389_v1, %v5145_v25 }
 0x534   : > { %v5952_v6 = vsel %vm5880_vm8, %v5844_v36, %v5916_v24  ;;  %v5765_v33 = vadd.f32 %v5699_v50, %v5455_v3 }
 0x535   : > { %5989 = vst.msk [vmem:[%s8480_s29 + $0xa0] sm:$0xff] %vm5968_vm3, %v5952_v6  ;;  %v4772_v7 = vpop.f32.mrf.mxu2 }
 0x536   : > { %v5082_v38 = vpop.f32.mrf.mxu3  ;;  %v5805_v10 = vmul.f32 %v8460_v41, %v5765_v33  ;;  %v4836_v42 = vadd.f32 %v4772_v7, %v8320_v19 }
 0x537   : > { %v5395_v15 = vpop.f32.mrf.mxu0 }
 0x538   : > { %v5845_v16 = vadd.f32 %v8468_v18, %v5805_v10  ;;  %v5146_v5 = vadd.f32 %v5082_v38, %v4836_v42  ;;  %v5705_v46 = vpop.f32.mrf.mxu1 }
 0x53a   : > { %vm5881_vm9 = vcmp.gt.f32.partialorder %v5845_v16, 0.0  ;;  %v5917_v53 = vmul.f32 0.01, %v5845_v16  ;;  %v5456_v28 = vadd.f32 %v5392_v13, %v5146_v5 }
 0x53c   : > { %v5953_v37 = vsel %vm5881_vm9, %v5845_v16, %v5917_v53  ;;  %v5766_v52 = vadd.f32 %v5702_v61, %v5456_v28 }
 0x53d   : > { %5990 = vst.msk [vmem:[%s8480_s29 + $0xa8] sm:$0xff] %vm5968_vm3, %v5953_v37  ;;  %v4775_v56 = vpop.f32.mrf.mxu2 }
 0x53e   : > { %v5085_v63 = vpop.f32.mrf.mxu3  ;;  %v5806_v23 = vmul.f32 %v8460_v41, %v5766_v52  ;;  %v4837_v14 = vadd.f32 %v4775_v56, %v8330_v32 }
 0x53f   : > { %v5398_v26 = vpop.f32.mrf.mxu0 }
 0x540   : > { %v5846_v19 = vadd.f32 %v8468_v18, %v5806_v23  ;;  %v5147_v57 = vadd.f32 %v5085_v63, %v4837_v14  ;;  %v5708_v55 = vpop.f32.mrf.mxu1 }
 0x542   : > { %vm5882_vm10 = vcmp.gt.f32.partialorder %v5846_v19, 0.0  ;;  %v5918_v49 = vmul.f32 0.01, %v5846_v19  ;;  %v5457_v44 = vadd.f32 %v5395_v15, %v5147_v57 }
 0x544   : > { %v5954_v30 = vsel %vm5882_vm10, %v5846_v19, %v5918_v49  ;;  %v5767_v47 = vadd.f32 %v5705_v46, %v5457_v44  ;;  %v8747_v44 = vld [vmem:[%s8799_s5] ss:$0 sm:$0xff] }
 0x545   : > { %5991 = vst.msk [vmem:[%s8480_s29 + $0xb0] sm:$0xff] %vm5968_vm3, %v5954_v30  ;;  %v4778_v17 = vpop.f32.mrf.mxu2 }
 0x546   : > { %v5088_v20 = vpop.f32.mrf.mxu3  ;;  %v5807_v51 = vmul.f32 %v8460_v41, %v5767_v47  ;;  %v4838_v58 = vadd.f32 %v4778_v17, %v8340_v34 }
 0x547   : > { %v5401_v27 = vpop.f32.mrf.mxu0 }
 0x548   : > { %v5847_v32 = vadd.f32 %v8468_v18, %v5807_v51  ;;  %v5148_v35 = vadd.f32 %v5088_v20, %v4838_v58  ;;  %v5711_v29 = vpop.f32.mrf.mxu1 }
 0x54a   : > { %vm5883_vm11 = vcmp.gt.f32.partialorder %v5847_v32, 0.0  ;;  %v5919_v1 = vmul.f32 0.01, %v5847_v32  ;;  %v5458_v50 = vadd.f32 %v5398_v26, %v5148_v35 }
 0x54c   : > { %v5955_v9 = vsel %vm5883_vm11, %v5847_v32, %v5919_v1  ;;  %v5768_v45 = vadd.f32 %v5708_v55, %v5458_v50 }
 0x54d   : > { %5992 = vst.msk [vmem:[%s8480_s29 + $0xb8] sm:$0xff] %vm5968_vm3, %v5955_v9  ;;  %v4781_v60 = vpop.f32.mrf.mxu2 }
 0x54e   : > { %v5091_v0 = vpop.f32.mrf.mxu3  ;;  %v5808_v21 = vmul.f32 %v8460_v41, %v5768_v45  ;;  %v4839_v43 = vadd.f32 %v4781_v60, %v8350_v59 }
 0x54f   : > { %v5404_v39 = vpop.f32.mrf.mxu0 }
 0x550   : > { %v5848_v34 = vadd.f32 %v8468_v18, %v5808_v21  ;;  %v5149_v2 = vadd.f32 %v5091_v0, %v4839_v43  ;;  %v5714_v36 = vpop.f32.mrf.mxu1 }
 0x552   : > { %vm5884_vm12 = vcmp.gt.f32.partialorder %v5848_v34, 0.0  ;;  %v5920_v25 = vmul.f32 0.01, %v5848_v34  ;;  %v5459_v13 = vadd.f32 %v5401_v27, %v5149_v2 }
 0x554   : > { %v5956_v61 = vsel %vm5884_vm12, %v5848_v34, %v5920_v25  ;;  %v5769_v24 = vadd.f32 %v5711_v29, %v5459_v13 }
 0x555   : > { %5993 = vst.msk [vmem:[%s8480_s29 + $0xc0] sm:$0xff] %vm5968_vm3, %v5956_v61  ;;  %v4784_v3 = vpop.f32.mrf.mxu2 }
 0x556   : > { %v5094_v6 = vpop.f32.mrf.mxu3  ;;  %v5809_v33 = vmul.f32 %v8460_v41, %v5769_v24  ;;  %v4840_v7 = vadd.f32 %v4784_v3, %v8360_v11 }
 0x557   : > { %v5407_v10 = vpop.f32.mrf.mxu0 }
 0x558   : > { %v5849_v59 = vadd.f32 %v8468_v18, %v5809_v33  ;;  %v5150_v38 = vadd.f32 %v5094_v6, %v4840_v7  ;;  %v5717_v42 = vpop.f32.mrf.mxu1 }
 0x55a   : > { %vm5885_vm13 = vcmp.gt.f32.partialorder %v5849_v59, 0.0  ;;  %v5921_v16 = vmul.f32 0.01, %v5849_v59  ;;  %v5460_v5 = vadd.f32 %v5404_v39, %v5150_v38 }
 0x55c   : > { %v5957_v15 = vsel %vm5885_vm13, %v5849_v59, %v5921_v16  ;;  %v5770_v46 = vadd.f32 %v5714_v36, %v5460_v5 }
 0x55d   : > { %5994 = vst.msk [vmem:[%s8480_s29 + $0xc8] sm:$0xff] %vm5968_vm3, %v5957_v15  ;;  %v4787_v53 = vpop.f32.mrf.mxu2 }
 0x55e   : > { %v5097_v28 = vpop.f32.mrf.mxu3  ;;  %v5810_v37 = vmul.f32 %v8460_v41, %v5770_v46  ;;  %v4841_v52 = vadd.f32 %v4787_v53, %v8370_v31  ;;  %v8740_v41 = vld [vmem:[%s8798_s4] ss:$0 sm:$0xff] }
 0x55f   : > { %v5410_v63 = vpop.f32.mrf.mxu0 }
 0x560   : > { %v5850_v11 = vadd.f32 %v8468_v18, %v5810_v37  ;;  %v5151_v56 = vadd.f32 %v5097_v28, %v4841_v52  ;;  %v5720_v23 = vpop.f32.mrf.mxu1 }
 0x562   : > { %vm5886_vm14 = vcmp.gt.f32.partialorder %v5850_v11, 0.0  ;;  %v5922_v14 = vmul.f32 0.01, %v5850_v11  ;;  %v5461_v19 = vadd.f32 %v5407_v10, %v5151_v56 }
 0x564   : > { %v5958_v57 = vsel %vm5886_vm14, %v5850_v11, %v5922_v14  ;;  %v5771_v26 = vadd.f32 %v5717_v42, %v5461_v19 }
 0x565   : > { %5995 = vst.msk [vmem:[%s8480_s29 + $0xd0] sm:$0xff] %vm5968_vm3, %v5958_v57  ;;  %v4790_v55 = vpop.f32.mrf.mxu2 }
 0x566   : > { %v5100_v49 = vpop.f32.mrf.mxu3  ;;  %v5811_v31 = vmul.f32 %v8740_v41, %v5771_v26  ;;  %v4842_v18 = vadd.f32 %v4790_v55, %v8380_v40 }
 0x567   : > { %v5413_v17 = vpop.f32.mrf.mxu0 }
 0x568   : > { %v5851_v30 = vadd.f32 %v8747_v44, %v5811_v31  ;;  %v5152_v47 = vadd.f32 %v5100_v49, %v4842_v18  ;;  %v5723_v20 = vpop.f32.mrf.mxu1 }
 0x56a   : > { %vm5887_vm15 = vcmp.gt.f32.partialorder %v5851_v30, 0.0  ;;  %v5923_v51 = vmul.f32 0.01, %v5851_v30  ;;  %v5462_v58 = vadd.f32 %v5410_v63, %v5152_v47 }
 0x56c   : > { %v5959_v32 = vsel %vm5887_vm15, %v5851_v30, %v5923_v51  ;;  %v5772_v35 = vadd.f32 %v5720_v23, %v5462_v58 }
 0x56d   : > { %5996 = vst.msk [vmem:[%s8480_s29 + $0xd8] sm:$0xff] %vm5968_vm3, %v5959_v32  ;;  %v4793_v27 = vpop.f32.mrf.mxu2 }
 0x56e   : > { %v5103_v40 = vpop.f32.mrf.mxu3  ;;  %v5812_v29 = vmul.f32 %v8740_v41, %v5772_v35  ;;  %v4843_v1 = vadd.f32 %v4793_v27, %v8390_v48 }
 0x56f   : > { %v5416_v45 = vpop.f32.mrf.mxu0 }
 0x570   : > { %v5852_v50 = vadd.f32 %v8747_v44, %v5812_v29  ;;  %v5153_v9 = vadd.f32 %v5103_v40, %v4843_v1  ;;  %v5726_v60 = vpop.f32.mrf.mxu1 }
 0x572   : > { %vm5888_vm0 = vcmp.gt.f32.partialorder %v5852_v50, 0.0  ;;  %v5924_v0 = vmul.f32 0.01, %v5852_v50  ;;  %v5463_v21 = vadd.f32 %v5413_v17, %v5153_v9 }
 0x574   : > { %v5960_v43 = vsel %vm5888_vm0, %v5852_v50, %v5924_v0  ;;  %v5773_v34 = vadd.f32 %v5723_v20, %v5463_v21 }
 0x575   : > { %5997 = vst.msk [vmem:[%s8480_s29 + $0xe0] sm:$0xff] %vm5968_vm3, %v5960_v43  ;;  %v4796_v2 = vpop.f32.mrf.mxu2 }
 0x576   : > { %v5106_v39 = vpop.f32.mrf.mxu3  ;;  %v5813_v36 = vmul.f32 %v8740_v41, %v5773_v34  ;;  %v4844_v25 = vadd.f32 %v4796_v2, %v8400_v8 }
 0x577   : > { %v5419_v61 = vpop.f32.mrf.mxu0 }
 0x578   : > { %v5853_v48 = vadd.f32 %v8747_v44, %v5813_v36  ;;  %v5154_v13 = vadd.f32 %v5106_v39, %v4844_v25  ;;  %v5729_v24 = vpop.f32.mrf.mxu1 }
 0x57a   : > { %vm5889_vm2 = vcmp.gt.f32.partialorder %v5853_v48, 0.0  ;;  %v5925_v3 = vmul.f32 0.01, %v5853_v48  ;;  %v5464_v6 = vadd.f32 %v5416_v45, %v5154_v13 }
 0x57c   : > { %v5961_v33 = vsel %vm5889_vm2, %v5853_v48, %v5925_v3  ;;  %v5774_v7 = vadd.f32 %v5726_v60, %v5464_v6 }
 0x57d   : > { %5998 = vst.msk [vmem:[%s8480_s29 + $0xe8] sm:$0xff] %vm5968_vm3, %v5961_v33  ;;  %v4799_v59 = vpop.f32.mrf.mxu2 }
 0x57e   : > { %v5109_v38 = vpop.f32.mrf.mxu3  ;;  %v5814_v10 = vmul.f32 %v8740_v41, %v5774_v7  ;;  %v4845_v42 = vadd.f32 %v4799_v59, %v8410_v62 }
 0x57f   : > { %v5422_v5 = vpop.f32.mrf.mxu0 }
 0x580   : > { %v5854_v8 = vadd.f32 %v8747_v44, %v5814_v10  ;;  %v5155_v16 = vadd.f32 %v5109_v38, %v4845_v42  ;;  %v5732_v53 = vpop.f32.mrf.mxu1 }
 0x582   : > { %vm5890_vm4 = vcmp.gt.f32.partialorder %v5854_v8, 0.0  ;;  %v5926_v15 = vmul.f32 0.01, %v5854_v8  ;;  %v5465_v46 = vadd.f32 %v5419_v61, %v5155_v16 }
 0x584   : > { %v5962_v28 = vsel %vm5890_vm4, %v5854_v8, %v5926_v15  ;;  %v5775_v37 = vadd.f32 %v5729_v24, %v5465_v46 }
 0x585   : > { %5999 = vst.msk [vmem:[%s8480_s29 + $0xf0] sm:$0xff] %vm5968_vm3, %v5962_v28  ;;  %v4802_v52 = vpop.f32.mrf.mxu2 }
 0x586   : > { %v5112_v11 = vpop.f32.mrf.mxu3  ;;  %v5815_v56 = vmul.f32 %v8740_v41, %v5775_v37  ;;  %v4846_v63 = vadd.f32 %v4802_v52, %v8420_v54 }
 0x587   : > { %v5425_v57 = vpop.f32.mrf.mxu0 }
 0x588   : > { %v5855_v62 = vadd.f32 %v8747_v44, %v5815_v56  ;;  %v5156_v23 = vadd.f32 %v5112_v11, %v4846_v63  ;;  %v5735_v49 = vpop.f32.mrf.mxu1 }
 0x58a   : > { %vm5891_vm5 = vcmp.gt.f32.partialorder %v5855_v62, 0.0  ;;  %v5927_v14 = vmul.f32 0.01, %v5855_v62  ;;  %v5466_v19 = vadd.f32 %v5422_v5, %v5156_v23 }
 0x58c   : > { %v5963_v26 = vsel %vm5891_vm5, %v5855_v62, %v5927_v14  ;;  %v5776_v55 = vadd.f32 %v5732_v53, %v5466_v19 }
 0x58d   : > { %6000 = vst.msk [vmem:[%s8480_s29 + $0xf8] sm:$0xff] %vm5968_vm3, %v5963_v26  ;;  %v4805_v31 = vpop.f32.mrf.mxu2 }
 0x58e   : > { %v5115_v18 = vpop.f32.mrf.mxu3  ;;  %v5816_v30 = vmul.f32 %v8740_v41, %v5776_v55  ;;  %v4847_v47 = vadd.f32 %v4805_v31, %v8430_v12 }
 0x58f   : > { %v5428_v35 = vpop.f32.mrf.mxu0 }
 0x590   : > { %v5856_v54 = vadd.f32 %v8747_v44, %v5816_v30  ;;  %v5157_v17 = vadd.f32 %v5115_v18, %v4847_v47  ;;  %v5738_v50 = vpop.f32.mrf.mxu1 }
 0x592   : > { %vm5892_vm6 = vcmp.gt.f32.partialorder %v5856_v54, 0.0  ;;  %v5928_v20 = vmul.f32 0.01, %v5856_v54  ;;  %v5467_v51 = vadd.f32 %v5425_v57, %v5157_v17 }
 0x594   : > { %v5964_v58 = vsel %vm5892_vm6, %v5856_v54, %v5928_v20  ;;  %v5777_v32 = vadd.f32 %v5735_v49, %v5467_v51 }
 0x595   : > { %6001 = vst.msk [vmem:[%s8480_s29 + $0x100] sm:$0xff] %vm5968_vm3, %v5964_v58  ;;  %v4808_v27 = vpop.f32.mrf.mxu2 }
 0x596   : > { %v5118_v40 = vpop.f32.mrf.mxu3  ;;  %v5817_v29 = vmul.f32 %v8740_v41, %v5777_v32  ;;  %v4848_v1 = vadd.f32 %v4808_v27, %v8440_v4 }
 0x597   : > { %v5431_v4 = vpop.f32.mrf.mxu0 }
 0x598   : > { %v5857_v12 = vadd.f32 %v8747_v44, %v5817_v29  ;;  %v5158_v9 = vadd.f32 %v5118_v40, %v4848_v1  ;;  %v5741_v48 = vpop.f32.mrf.mxu1 }
 0x59a   : > { %vm5893_vm7 = vcmp.gt.f32.partialorder %v5857_v12, 0.0  ;;  %v5929_v45 = vmul.f32 0.01, %v5857_v12  ;;  %v5468_v60 = vadd.f32 %v5428_v35, %v5158_v9 }
 0x59c   : > { %v5965_v0 = vsel %vm5893_vm7, %v5857_v12, %v5929_v45  ;;  %v5778_v21 = vadd.f32 %v5738_v50, %v5468_v60 }
 0x59d   : > { %6002 = vst.msk [vmem:[%s8480_s29 + $0x108] sm:$0xff] %vm5968_vm3, %v5965_v0  ;;  %v4811_v43 = vpop.f32.mrf.mxu2 }
 0x59e   : > { %v5121_v34 = vpop.f32.mrf.mxu3  ;;  %v5818_v2 = vmul.f32 %v8740_v41, %v5778_v21  ;;  %v4849_v39 = vadd.f32 %v4811_v43, %v8450_v22 }
 0x5a0   : > { %v5858_v36 = vadd.f32 %v8747_v44, %v5818_v2  ;;  %v5159_v25 = vadd.f32 %v5121_v34, %v4849_v39 }
 0x5a2   : > { %vm5894_vm1 = vcmp.gt.f32.partialorder %v5858_v36, 0.0  ;;  %v5930_v13 = vmul.f32 0.01, %v5858_v36  ;;  %v5469_v61 = vadd.f32 %v5431_v4, %v5159_v25 }
 0x5a4   : > { %v5966_v24 = vsel %vm5894_vm1, %v5858_v36, %v5930_v13  ;;  %v5779_v3 = vadd.f32 %v5741_v48, %v5469_v61 }
 0x5a5   : > { %6003 = vst.msk [vmem:[%s8480_s29 + $0x110] sm:$0xff] %vm5968_vm3, %v5966_v24 }
 0x5a6   : > { %v5819_v6 = vmul.f32 %v8740_v41, %v5779_v3 }
 0x5a8   : > { %v5859_v33 = vadd.f32 %v8747_v44, %v5819_v6 }
 0x5aa   : > { %vm5895_vm8 = vcmp.gt.f32.partialorder %v5859_v33, 0.0  ;;  %v5931_v7 = vmul.f32 0.01, %v5859_v33 }
 0x5ac   : > { %v5967_v22 = vsel %vm5895_vm8, %v5859_v33, %v5931_v7 }
 0x5ad   : > { %6004 = vst.msk [vmem:[%s8480_s29 + $0x118] sm:$0xff] %vm5968_vm3, %v5967_v22 }
 0x5ae PF: > { %s16_s21 = sadd.s32 1, %s6787_s21  }
 0x5af   : > { %p13_p4 = scmp.ge.s32.totalorder %s16_s21, 4  }
 0x5b1   :  { %15 = sbr.rel (!%p13_p4) target bundleno = 1 (0x1), region = 93 }

</bundles_post_ra>
